<compile_context>
chip_gen: v5e
topology: v5e:2x2
jax: 0.10.0
libtpu: 0.0.40
codegen_flags: <defaults>
</compile_context>

<pallas_src>
import math
import functools

import jax
import jax.numpy as jnp
import numpy as np
from jax.experimental import pallas as pl
from jax.experimental.pallas import tpu as pltpu

CLASS_NUM = 7  # typical emotion classes


# ---------------------------------------------------------------------------
# small helpers
# ---------------------------------------------------------------------------
def _cdiv(a, b):
    return -(-a // b)


def _round_up(x, m):
    return _cdiv(x, m) * m


def _tile_rows(rows, target=1024):
    """Pick a row tile (multiple of 16, for bf16 sublane packing) and the
    zero-padded total row count for a 1-D row grid."""
    rows_up = _round_up(rows, 16)
    n_steps = _cdiv(rows_up, target)
    tile = _round_up(_cdiv(rows_up, n_steps), 16)
    return tile, tile * n_steps, n_steps


# ---------------------------------------------------------------------------
# Pallas kernels
# ---------------------------------------------------------------------------
def conv_relu_pool_kernel(p_ref, w_ref, b_ref, o_ref):
    """Fused 3x3 conv (single merged im2col matmul over the 4 pool slots)
    + 2x2/stride-2 max-pool + bias + ReLU.

    p_ref: (4, TR, K) bf16   4 = 2x2 pool-window slots, K = 9*Cin
    w_ref: (K, Cout)  bf16
    b_ref: (1, Cout)  f32
    o_ref: (TR, Cout) bf16   rows ordered (n, h_out, w_out) of the pooled map
    """
    four, tr, k = p_ref.shape
    cout = w_ref.shape[-1]
    # One MXU call for all 4 pool slots.  The leading-dim merge is layout-free
    # because TR is a multiple of the sublane tile.
    y = jnp.dot(p_ref[...].reshape(four * tr, k), w_ref[...],
                preferred_element_type=jnp.float32)           # (4*TR, Cout) f32
    y = y.reshape(four, tr, cout)
    # Max-pool across the 4 window positions, then bias + ReLU applied once.
    # Equivalent to max_s(relu(y_s + b)) since b is identical across the
    # window and ReLU is monotonic.
    y = jnp.max(y, axis=0)                                    # (TR, Cout)
    y = jnp.maximum(y + b_ref[...], 0.0)
    o_ref[...] = y.astype(o_ref.dtype)


def mlp_softmax_kernel(x_ref, w1_ref, b1_ref, w2_ref, b2_ref, o_ref):
    """fc1 + ReLU + (dropout = identity at inference) + fc2 + softmax(dim=1)."""
    h = jnp.dot(x_ref[...], w1_ref[...], preferred_element_type=jnp.float32)
    h = jnp.maximum(h + b1_ref[...], 0.0)
    # TODO(synk): nn.Dropout(p) is identity in eval mode; training-mode random
    # masking is not implemented here.
    logits = jnp.dot(h.astype(w2_ref.dtype), w2_ref[...],
                     preferred_element_type=jnp.float32) + b2_ref[...]
    m = jnp.max(logits, axis=-1, keepdims=True)
    e = jnp.exp(logits - m)
    o_ref[...] = (e / jnp.sum(e, axis=-1, keepdims=True)).astype(o_ref.dtype)


# ---------------------------------------------------------------------------
# Wrappers (im2col / pool-slot grouping in XLA + pallas_call plumbing)
# ---------------------------------------------------------------------------
def conv_relu_pool(x_nhwc, w_hwio, b):
    """One conv3x3(pad=1) + ReLU + maxpool2x2 block. Returns NHWC bf16."""
    n, h, w, cin = x_nhwc.shape
    cout = w_hwio.shape[-1]
    k = 9 * cin
    h2, w2 = h // 2, w // 2
    rows = n * h2 * w2

    # im2col patches grouped by 2x2 pool slot: (4, rows, 9*Cin).
    xp = jnp.pad(x_nhwc, ((0, 0), (1, 1), (1, 1), (0, 0)))
    cols = [xp[:, kh:kh + h, kw:kw + w, :] for kh in range(3) for kw in range(3)]
    p = jnp.concatenate(cols, axis=-1)                         # (N, H, W, 9*Cin)
    p = p.reshape(n, h2, 2, w2, 2, k).transpose(2, 4, 0, 1, 3, 5)
    p = p.reshape(4, rows, k).astype(jnp.bfloat16)

    tr, rows_p, n_steps = _tile_rows(rows)
    if rows_p != rows:
        p = jnp.pad(p, ((0, 0), (0, rows_p - rows), (0, 0)))

    w2d = w_hwio.reshape(k, cout).astype(jnp.bfloat16)
    b2d = b.reshape(1, cout).astype(jnp.float32)

    out = pl.pallas_call(
        conv_relu_pool_kernel,
        out_shape=jax.ShapeDtypeStruct((rows_p, cout), jnp.bfloat16),
        grid=(n_steps,),
        in_specs=[
            pl.BlockSpec((4, tr, k), lambda i: (0, i, 0)),
            pl.BlockSpec((k, cout), lambda i: (0, 0)),
            pl.BlockSpec((1, cout), lambda i: (0, 0)),
        ],
        out_specs=pl.BlockSpec((tr, cout), lambda i: (i, 0)),
        compiler_params=pltpu.CompilerParams(dimension_semantics=("parallel",)),
    )(p, w2d, b2d)
    return out[:rows].reshape(n, h2, w2, cout)


def mlp_softmax(x, w1, b1, w2, b2):
    n, d = x.shape
    hdim = w1.shape[1]
    c = w2.shape[1]
    tb, n_p, n_steps = _tile_rows(n, target=256)
    if n_p != n:
        x = jnp.pad(x, ((0, n_p - n), (0, 0)))
    out = pl.pallas_call(
        mlp_softmax_kernel,
        out_shape=jax.ShapeDtypeStruct((n_p, c), jnp.float32),
        grid=(n_steps,),
        in_specs=[
            pl.BlockSpec((tb, d), lambda i: (i, 0)),
            pl.BlockSpec((d, hdim), lambda i: (0, 0)),
            pl.BlockSpec((1, hdim), lambda i: (0, 0)),
            pl.BlockSpec((hdim, c), lambda i: (0, 0)),
            pl.BlockSpec((1, c), lambda i: (0, 0)),
        ],
        out_specs=pl.BlockSpec((tb, c), lambda i: (i, 0)),
        compiler_params=pltpu.CompilerParams(dimension_semantics=("parallel",)),
    )(x.astype(jnp.bfloat16),
      w1.astype(jnp.bfloat16), b1.reshape(1, hdim).astype(jnp.float32),
      w2.astype(jnp.bfloat16), b2.reshape(1, c).astype(jnp.float32))
    return out[:n]


@jax.jit
def cnn_forward(x_nchw, params):
    """Forward pass equivalent to the PyTorch `cnn.forward` (eval mode)."""
    x = jnp.transpose(x_nchw, (0, 2, 3, 1)).astype(jnp.bfloat16)  # NCHW -> NHWC
    x = conv_relu_pool(x, params["conv1_w"], params["conv1_b"])   # (N, 24, 24, 16)
    x = conv_relu_pool(x, params["conv2_w"], params["conv2_b"])   # (N, 12, 12, 32)
    x = conv_relu_pool(x, params["conv3_w"], params["conv3_b"])   # (N,  6,  6, 64)
    n = x.shape[0]
    # PyTorch flattens in (C, H, W) order; we flatten NHWC and compensate by
    # permuting fc1's weight rows once (exact, weight-side only).
    x = x.reshape(n, 6 * 6 * 64)
    w1_hwc = params["fc1_w"].reshape(64, 6, 6, 256).transpose(1, 2, 0, 3)
    w1_hwc = w1_hwc.reshape(6 * 6 * 64, 256)
    return mlp_softmax(x, w1_hwc, params["fc1_b"],
                       params["fc2_w"], params["fc2_b"])


# ---------------------------------------------------------------------------
# Deterministic parameter init (xavier_uniform_ weights, zero biases)
# ---------------------------------------------------------------------------
def _xavier(key, shape, fan_in, fan_out):
    bound = math.sqrt(6.0 / (fan_in + fan_out))
    return jax.random.uniform(key, shape, jnp.float32, -bound, bound)


def init_params(key, class_num=CLASS_NUM):
    keys = jax.random.split(key, 5)
    params = {}
    # conv weights stored as (kh, kw, Cin, Cout) = HWIO
    params["conv1_w"] = _xavier(keys[0], (3, 3, 3, 16), 3 * 9, 16 * 9)
    params["conv1_b"] = jnp.zeros((16,), jnp.float32)
    params["conv2_w"] = _xavier(keys[1], (3, 3, 16, 32), 16 * 9, 32 * 9)
    params["conv2_b"] = jnp.zeros((32,), jnp.float32)
    params["conv3_w"] = _xavier(keys[2], (3, 3, 32, 64), 32 * 9, 64 * 9)
    params["conv3_b"] = jnp.zeros((64,), jnp.float32)
    # fc weights stored as (in, out); fc1 rows follow PyTorch's (C,H,W) flatten
    params["fc1_w"] = _xavier(keys[3], (64 * 6 * 6, 256), 64 * 6 * 6, 256)
    params["fc1_b"] = jnp.zeros((256,), jnp.float32)
    params["fc2_w"] = _xavier(keys[4], (256, class_num), 256, class_num)
    params["fc2_b"] = jnp.zeros((class_num,), jnp.float32)
    return params


# ---------------------------------------------------------------------------
# Pure-JAX f32 reference (for correctness check)
# ---------------------------------------------------------------------------
def reference_forward(x_nchw, params):
    x = jnp.transpose(x_nchw, (0, 2, 3, 1)).astype(jnp.float32)
    for i in (1, 2, 3):
        w = params[f"conv{i}_w"]
        b = params[f"conv{i}_b"]
        x = jax.lax.conv_general_dilated(
            x, w, window_strides=(1, 1), padding="SAME",
            dimension_numbers=("NHWC", "HWIO", "NHWC"))
        x = jnp.maximum(x + b, 0.0)
        n, h, wdt, c = x.shape
        x = x.reshape(n, h // 2, 2, wdt // 2, 2, c).max(axis=(2, 4))
    n = x.shape[0]
    x = jnp.transpose(x, (0, 3, 1, 2)).reshape(n, 64 * 6 * 6)
    h = jnp.maximum(x @ params["fc1_w"] + params["fc1_b"], 0.0)
    logits = h @ params["fc2_w"] + params["fc2_b"]
    return jax.nn.softmax(logits, axis=1)


# ---------------------------------------------------------------------------
if __name__ == "__main__":
    key = jax.random.PRNGKey(0)
    k_x, k_p = jax.random.split(key)

    # PyTorch-style NCHW input; spatial 48x48 is forced by fc1 = Linear(64*6*6, 256)
    x = jax.random.normal(k_x, (2, 3, 48, 48), jnp.float32)
    params = init_params(k_p, class_num=CLASS_NUM)

    out = jax.block_until_ready(cnn_forward(x, params))
    ref = jax.block_until_ready(reference_forward(x, params))

    assert out.shape == (2, CLASS_NUM)
    assert bool(jnp.all(jnp.isfinite(out)))
    # bf16 matmul path vs f32 reference -> relaxed but meaningful tolerances
    np.testing.assert_allclose(np.asarray(out), np.asarray(ref),
                               rtol=5e-2, atol=2e-2)
    np.testing.assert_allclose(np.asarray(out).sum(axis=1),
                               np.ones(2, np.float32), atol=1e-3)

    print("KERNEL_OK")
</pallas_src>

<mosaic_0001>
module attributes {stable_mosaic.version = 11 : i64} {
  func.func @conv_relu_pool_kernel(%arg0: i32, %arg1: memref<4x576x27xbf16, #tpu.memory_space<vmem>>, %arg2: memref<27x16xbf16, #tpu.memory_space<vmem>>, %arg3: memref<1x16xf32, #tpu.memory_space<vmem>>, %arg4: memref<576x16xbf16, #tpu.memory_space<vmem>>) attributes {dimension_semantics = [#tpu.dimension_semantics<parallel>], iteration_bounds = array<i64: 2>, scalar_prefetch = 0 : i64, scratch_operands = 0 : i64, tpu.core_type = #tpu.core_type<tc>, window_params = [{transform_indices = @transform_0, window_bounds = array<i64: 4, 576, 27>}, {pipeline_mode = #tpu.pipeline_mode<synchronous>, transform_indices = @transform_1, window_bounds = array<i64: 27, 16>}, {pipeline_mode = #tpu.pipeline_mode<synchronous>, transform_indices = @transform_2, window_bounds = array<i64: 1, 16>}, {transform_indices = @transform_3, window_bounds = array<i64: 576, 16>}]} {
    %c0 = arith.constant 0 : index
    %c0_0 = arith.constant 0 : index
    %c0_1 = arith.constant 0 : index
    %0 = vector.load %arg1[%c0, %c0_0, %c0_1] : memref<4x576x27xbf16, #tpu.memory_space<vmem>>, vector<4x576x27xbf16>
    %1 = vector.shape_cast %0 : vector<4x576x27xbf16> to vector<2304x27xbf16>
    %c0_2 = arith.constant 0 : index
    %c0_3 = arith.constant 0 : index
    %2 = vector.load %arg2[%c0_2, %c0_3] : memref<27x16xbf16, #tpu.memory_space<vmem>>, vector<27x16xbf16>
    %cst = arith.constant dense<0.000000e+00> : vector<2304x16xf32>
    %3 = tpu.matmul %1, %2, %cst {dimension_numbers = #tpu.dot_dimension_numbers<[1], [0], [0], [1], [0, 0, 1, 1], [], []>} : vector<2304x27xbf16>, vector<27x16xbf16>, vector<2304x16xf32> -> vector<2304x16xf32>
    %4 = vector.shape_cast %3 : vector<2304x16xf32> to vector<4x576x16xf32>
    %cst_4 = arith.constant dense<0xFF800000> : vector<576x16xf32>
    %5 = vector.multi_reduction <maximumf>, %4, %cst_4 [0] : vector<4x576x16xf32> to vector<576x16xf32>
    %c0_5 = arith.constant 0 : index
    %c0_6 = arith.constant 0 : index
    %6 = vector.load %arg3[%c0_5, %c0_6] : memref<1x16xf32, #tpu.memory_space<vmem>>, vector<1x16xf32>
    %7 = vector.broadcast %6 : vector<1x16xf32> to vector<576x16xf32>
    %8 = arith.addf %5, %7 : vector<576x16xf32>
    %cst_7 = arith.constant 0.000000e+00 : f32
    %9 = vector.broadcast %cst_7 : f32 to vector<576x16xf32>
    %10 = arith.maximumf %8, %9 : vector<576x16xf32>
    %11 = arith.truncf %10 : vector<576x16xf32> to vector<576x16xbf16>
    %c0_8 = arith.constant 0 : index
    %c0_9 = arith.constant 0 : index
    %12 = vector.load %arg4[%c0_8, %c0_9] : memref<576x16xbf16, #tpu.memory_space<vmem>>, vector<576x16xbf16>
    tpu.vector_store %arg4[%c0_8, %c0_9], %11 {strides = array<i32>} : memref<576x16xbf16, #tpu.memory_space<vmem>>, vector<576x16xbf16>,
    return
  }
  func.func @transform_0(%arg0: i32) -> (i32, i32, i32) {
    %c0_i32 = arith.constant 0 : i32
    %c0_i32_0 = arith.constant 0 : i32
    %c0_i32_1 = arith.constant 0 : i32
    return %c0_i32, %arg0, %c0_i32_0 : i32, i32, i32
  }
  func.func @transform_1(%arg0: i32) -> (i32, i32) {
    %c0_i32 = arith.constant 0 : i32
    %c0_i32_0 = arith.constant 0 : i32
    %c0_i32_1 = arith.constant 0 : i32
    return %c0_i32, %c0_i32_0 : i32, i32
  }
  func.func @transform_2(%arg0: i32) -> (i32, i32) {
    %c0_i32 = arith.constant 0 : i32
    %c0_i32_0 = arith.constant 0 : i32
    %c0_i32_1 = arith.constant 0 : i32
    return %c0_i32, %c0_i32_0 : i32, i32
  }
  func.func @transform_3(%arg0: i32) -> (i32, i32) {
    %c0_i32 = arith.constant 0 : i32
    %c0_i32_0 = arith.constant 0 : i32
    return %arg0, %c0_i32 : i32, i32
  }
}

module attributes {stable_mosaic.version = 11 : i64} {
  func.func @conv_relu_pool_kernel(%arg0: i32, %arg1: memref<4x288x144xbf16, #tpu.memory_space<vmem>>, %arg2: memref<144x32xbf16, #tpu.memory_space<vmem>>, %arg3: memref<1x32xf32, #tpu.memory_space<vmem>>, %arg4: memref<288x32xbf16, #tpu.memory_space<vmem>>) attributes {dimension_semantics = [#tpu.dimension_semantics<parallel>], iteration_bounds = array<i64: 1>, scalar_prefetch = 0 : i64, scratch_operands = 0 : i64, tpu.core_type = #tpu.core_type<tc>, window_params = [{transform_indices = @transform_0, window_bounds = array<i64: 4, 288, 144>}, {pipeline_mode = #tpu.pipeline_mode<synchronous>, transform_indices = @transform_1, window_bounds = array<i64: 144, 32>}, {pipeline_mode = #tpu.pipeline_mode<synchronous>, transform_indices = @transform_2, window_bounds = array<i64: 1, 32>}, {transform_indices = @transform_3, window_bounds = array<i64: 288, 32>}]} {
    %c0 = arith.constant 0 : index
    %c0_0 = arith.constant 0 : index
    %c0_1 = arith.constant 0 : index
    %0 = vector.load %arg1[%c0, %c0_0, %c0_1] : memref<4x288x144xbf16, #tpu.memory_space<vmem>>, vector<4x288x144xbf16>
    %1 = vector.shape_cast %0 : vector<4x288x144xbf16> to vector<1152x144xbf16>
    %c0_2 = arith.constant 0 : index
    %c0_3 = arith.constant 0 : index
    %2 = vector.load %arg2[%c0_2, %c0_3] : memref<144x32xbf16, #tpu.memory_space<vmem>>, vector<144x32xbf16>
    %cst = arith.constant dense<0.000000e+00> : vector<1152x32xf32>
    %3 = tpu.matmul %1, %2, %cst {dimension_numbers = #tpu.dot_dimension_numbers<[1], [0], [0], [1], [0, 0, 1, 1], [], []>} : vector<1152x144xbf16>, vector<144x32xbf16>, vector<1152x32xf32> -> vector<1152x32xf32>
    %4 = vector.shape_cast %3 : vector<1152x32xf32> to vector<4x288x32xf32>
    %cst_4 = arith.constant dense<0xFF800000> : vector<288x32xf32>
    %5 = vector.multi_reduction <maximumf>, %4, %cst_4 [0] : vector<4x288x32xf32> to vector<288x32xf32>
    %c0_5 = arith.constant 0 : index
    %c0_6 = arith.constant 0 : index
    %6 = vector.load %arg3[%c0_5, %c0_6] : memref<1x32xf32, #tpu.memory_space<vmem>>, vector<1x32xf32>
    %7 = vector.broadcast %6 : vector<1x32xf32> to vector<288x32xf32>
    %8 = arith.addf %5, %7 : vector<288x32xf32>
    %cst_7 = arith.constant 0.000000e+00 : f32
    %9 = vector.broadcast %cst_7 : f32 to vector<288x32xf32>
    %10 = arith.maximumf %8, %9 : vector<288x32xf32>
    %11 = arith.truncf %10 : vector<288x32xf32> to vector<288x32xbf16>
    %c0_8 = arith.constant 0 : index
    %c0_9 = arith.constant 0 : index
    %12 = vector.load %arg4[%c0_8, %c0_9] : memref<288x32xbf16, #tpu.memory_space<vmem>>, vector<288x32xbf16>
    tpu.vector_store %arg4[%c0_8, %c0_9], %11 {strides = array<i32>} : memref<288x32xbf16, #tpu.memory_space<vmem>>, vector<288x32xbf16>,
    return
  }
  func.func @transform_0(%arg0: i32) -> (i32, i32, i32) {
    %c0_i32 = arith.constant 0 : i32
    %c0_i32_0 = arith.constant 0 : i32
    %c0_i32_1 = arith.constant 0 : i32
    return %c0_i32, %arg0, %c0_i32_0 : i32, i32, i32
  }
  func.func @transform_1(%arg0: i32) -> (i32, i32) {
    %c0_i32 = arith.constant 0 : i32
    %c0_i32_0 = arith.constant 0 : i32
    %c0_i32_1 = arith.constant 0 : i32
    return %c0_i32, %c0_i32_0 : i32, i32
  }
  func.func @transform_2(%arg0: i32) -> (i32, i32) {
    %c0_i32 = arith.constant 0 : i32
    %c0_i32_0 = arith.constant 0 : i32
    %c0_i32_1 = arith.constant 0 : i32
    return %c0_i32, %c0_i32_0 : i32, i32
  }
  func.func @transform_3(%arg0: i32) -> (i32, i32) {
    %c0_i32 = arith.constant 0 : i32
    %c0_i32_0 = arith.constant 0 : i32
    return %arg0, %c0_i32 : i32, i32
  }
}

module attributes {stable_mosaic.version = 11 : i64} {
  func.func @conv_relu_pool_kernel(%arg0: i32, %arg1: memref<4x80x288xbf16, #tpu.memory_space<vmem>>, %arg2: memref<288x64xbf16, #tpu.memory_space<vmem>>, %arg3: memref<1x64xf32, #tpu.memory_space<vmem>>, %arg4: memref<80x64xbf16, #tpu.memory_space<vmem>>) attributes {dimension_semantics = [#tpu.dimension_semantics<parallel>], iteration_bounds = array<i64: 1>, scalar_prefetch = 0 : i64, scratch_operands = 0 : i64, tpu.core_type = #tpu.core_type<tc>, window_params = [{transform_indices = @transform_0, window_bounds = array<i64: 4, 80, 288>}, {pipeline_mode = #tpu.pipeline_mode<synchronous>, transform_indices = @transform_1, window_bounds = array<i64: 288, 64>}, {pipeline_mode = #tpu.pipeline_mode<synchronous>, transform_indices = @transform_2, window_bounds = array<i64: 1, 64>}, {transform_indices = @transform_3, window_bounds = array<i64: 80, 64>}]} {
    %c0 = arith.constant 0 : index
    %c0_0 = arith.constant 0 : index
    %c0_1 = arith.constant 0 : index
    %0 = vector.load %arg1[%c0, %c0_0, %c0_1] : memref<4x80x288xbf16, #tpu.memory_space<vmem>>, vector<4x80x288xbf16>
    %1 = vector.shape_cast %0 : vector<4x80x288xbf16> to vector<320x288xbf16>
    %c0_2 = arith.constant 0 : index
    %c0_3 = arith.constant 0 : index
    %2 = vector.load %arg2[%c0_2, %c0_3] : memref<288x64xbf16, #tpu.memory_space<vmem>>, vector<288x64xbf16>
    %cst = arith.constant dense<0.000000e+00> : vector<320x64xf32>
    %3 = tpu.matmul %1, %2, %cst {dimension_numbers = #tpu.dot_dimension_numbers<[1], [0], [0], [1], [0, 0, 1, 1], [], []>} : vector<320x288xbf16>, vector<288x64xbf16>, vector<320x64xf32> -> vector<320x64xf32>
    %4 = vector.shape_cast %3 : vector<320x64xf32> to vector<4x80x64xf32>
    %cst_4 = arith.constant dense<0xFF800000> : vector<80x64xf32>
    %5 = vector.multi_reduction <maximumf>, %4, %cst_4 [0] : vector<4x80x64xf32> to vector<80x64xf32>
    %c0_5 = arith.constant 0 : index
    %c0_6 = arith.constant 0 : index
    %6 = vector.load %arg3[%c0_5, %c0_6] : memref<1x64xf32, #tpu.memory_space<vmem>>, vector<1x64xf32>
    %7 = vector.broadcast %6 : vector<1x64xf32> to vector<80x64xf32>
    %8 = arith.addf %5, %7 : vector<80x64xf32>
    %cst_7 = arith.constant 0.000000e+00 : f32
    %9 = vector.broadcast %cst_7 : f32 to vector<80x64xf32>
    %10 = arith.maximumf %8, %9 : vector<80x64xf32>
    %11 = arith.truncf %10 : vector<80x64xf32> to vector<80x64xbf16>
    %c0_8 = arith.constant 0 : index
    %c0_9 = arith.constant 0 : index
    %12 = vector.load %arg4[%c0_8, %c0_9] : memref<80x64xbf16, #tpu.memory_space<vmem>>, vector<80x64xbf16>
    tpu.vector_store %arg4[%c0_8, %c0_9], %11 {strides = array<i32>} : memref<80x64xbf16, #tpu.memory_space<vmem>>, vector<80x64xbf16>,
    return
  }
  func.func @transform_0(%arg0: i32) -> (i32, i32, i32) {
    %c0_i32 = arith.constant 0 : i32
    %c0_i32_0 = arith.constant 0 : i32
    %c0_i32_1 = arith.constant 0 : i32
    return %c0_i32, %arg0, %c0_i32_0 : i32, i32, i32
  }
  func.func @transform_1(%arg0: i32) -> (i32, i32) {
    %c0_i32 = arith.constant 0 : i32
    %c0_i32_0 = arith.constant 0 : i32
    %c0_i32_1 = arith.constant 0 : i32
    return %c0_i32, %c0_i32_0 : i32, i32
  }
  func.func @transform_2(%arg0: i32) -> (i32, i32) {
    %c0_i32 = arith.constant 0 : i32
    %c0_i32_0 = arith.constant 0 : i32
    %c0_i32_1 = arith.constant 0 : i32
    return %c0_i32, %c0_i32_0 : i32, i32
  }
  func.func @transform_3(%arg0: i32) -> (i32, i32) {
    %c0_i32 = arith.constant 0 : i32
    %c0_i32_0 = arith.constant 0 : i32
    return %arg0, %c0_i32 : i32, i32
  }
}

module attributes {stable_mosaic.version = 11 : i64} {
  func.func @mlp_softmax_kernel(%arg0: i32, %arg1: memref<16x2304xbf16, #tpu.memory_space<vmem>>, %arg2: memref<2304x256xbf16, #tpu.memory_space<vmem>>, %arg3: memref<1x256xf32, #tpu.memory_space<vmem>>, %arg4: memref<256x7xbf16, #tpu.memory_space<vmem>>, %arg5: memref<1x7xf32, #tpu.memory_space<vmem>>, %arg6: memref<16x7xf32, #tpu.memory_space<vmem>>) attributes {dimension_semantics = [#tpu.dimension_semantics<parallel>], iteration_bounds = array<i64: 1>, scalar_prefetch = 0 : i64, scratch_operands = 0 : i64, tpu.core_type = #tpu.core_type<tc>, window_params = [{transform_indices = @transform_0, window_bounds = array<i64: 16, 2304>}, {pipeline_mode = #tpu.pipeline_mode<synchronous>, transform_indices = @transform_1, window_bounds = array<i64: 2304, 256>}, {pipeline_mode = #tpu.pipeline_mode<synchronous>, transform_indices = @transform_2, window_bounds = array<i64: 1, 256>}, {pipeline_mode = #tpu.pipeline_mode<synchronous>, transform_indices = @transform_3, window_bounds = array<i64: 256, 7>}, {pipeline_mode = #tpu.pipeline_mode<synchronous>, transform_indices = @transform_4, window_bounds = array<i64: 1, 7>}, {transform_indices = @transform_5, window_bounds = array<i64: 16, 7>}]} {
    %c0 = arith.constant 0 : index
    %c0_0 = arith.constant 0 : index
    %0 = vector.load %arg1[%c0, %c0_0] : memref<16x2304xbf16, #tpu.memory_space<vmem>>, vector<16x2304xbf16>
    %c0_1 = arith.constant 0 : index
    %c0_2 = arith.constant 0 : index
    %1 = vector.load %arg2[%c0_1, %c0_2] : memref<2304x256xbf16, #tpu.memory_space<vmem>>, vector<2304x256xbf16>
    %cst = arith.constant dense<0.000000e+00> : vector<16x256xf32>
    %2 = tpu.matmul %0, %1, %cst {dimension_numbers = #tpu.dot_dimension_numbers<[1], [0], [0], [1], [0, 0, 1, 1], [], []>} : vector<16x2304xbf16>, vector<2304x256xbf16>, vector<16x256xf32> -> vector<16x256xf32>
    %c0_3 = arith.constant 0 : index
    %c0_4 = arith.constant 0 : index
    %3 = vector.load %arg3[%c0_3, %c0_4] : memref<1x256xf32, #tpu.memory_space<vmem>>, vector<1x256xf32>
    %4 = vector.broadcast %3 : vector<1x256xf32> to vector<16x256xf32>
    %5 = arith.addf %2, %4 : vector<16x256xf32>
    %cst_5 = arith.constant 0.000000e+00 : f32
    %6 = vector.broadcast %cst_5 : f32 to vector<16x256xf32>
    %7 = arith.maximumf %5, %6 : vector<16x256xf32>
    %8 = arith.truncf %7 : vector<16x256xf32> to vector<16x256xbf16>
    %c0_6 = arith.constant 0 : index
    %c0_7 = arith.constant 0 : index
    %9 = vector.load %arg4[%c0_6, %c0_7] : memref<256x7xbf16, #tpu.memory_space<vmem>>, vector<256x7xbf16>
    %cst_8 = arith.constant dense<0.000000e+00> : vector<16x7xf32>
    %10 = tpu.matmul %8, %9, %cst_8 {dimension_numbers = #tpu.dot_dimension_numbers<[1], [0], [0], [1], [0, 0, 1, 1], [], []>} : vector<16x256xbf16>, vector<256x7xbf16>, vector<16x7xf32> -> vector<16x7xf32>
    %c0_9 = arith.constant 0 : index
    %c0_10 = arith.constant 0 : index
    %11 = vector.load %arg5[%c0_9, %c0_10] : memref<1x7xf32, #tpu.memory_space<vmem>>, vector<1x7xf32>
    %12 = vector.broadcast %11 : vector<1x7xf32> to vector<16x7xf32>
    %13 = arith.addf %10, %12 : vector<16x7xf32>
    %cst_11 = arith.constant dense<0xFF800000> : vector<16xf32>
    %14 = vector.multi_reduction <maximumf>, %13, %cst_11 [1] : vector<16x7xf32> to vector<16xf32>
    %15 = vector.shape_cast %14 : vector<16xf32> to vector<16x1xf32>
    %16 = vector.broadcast %15 : vector<16x1xf32> to vector<16x7xf32>
    %17 = arith.subf %13, %16 : vector<16x7xf32>
    %18 = math.exp %17 : vector<16x7xf32>
    %cst_12 = arith.constant dense<0.000000e+00> : vector<16xf32>
    %19 = vector.multi_reduction <add>, %18, %cst_12 [1] : vector<16x7xf32> to vector<16xf32>
    %20 = vector.shape_cast %19 : vector<16xf32> to vector<16x1xf32>
    %21 = vector.broadcast %20 : vector<16x1xf32> to vector<16x7xf32>
    %22 = arith.divf %18, %21 : vector<16x7xf32>
    %c0_13 = arith.constant 0 : index
    %c0_14 = arith.constant 0 : index
    %23 = vector.load %arg6[%c0_13, %c0_14] : memref<16x7xf32, #tpu.memory_space<vmem>>, vector<16x7xf32>
    tpu.vector_store %arg6[%c0_13, %c0_14], %22 {strides = array<i32>} : memref<16x7xf32, #tpu.memory_space<vmem>>, vector<16x7xf32>,
    return
  }
  func.func @transform_0(%arg0: i32) -> (i32, i32) {
    %c0_i32 = arith.constant 0 : i32
    %c0_i32_0 = arith.constant 0 : i32
    return %arg0, %c0_i32 : i32, i32
  }
  func.func @transform_1(%arg0: i32) -> (i32, i32) {
    %c0_i32 = arith.constant 0 : i32
    %c0_i32_0 = arith.constant 0 : i32
    %c0_i32_1 = arith.constant 0 : i32
    return %c0_i32, %c0_i32_0 : i32, i32
  }
  func.func @transform_2(%arg0: i32) -> (i32, i32) {
    %c0_i32 = arith.constant 0 : i32
    %c0_i32_0 = arith.constant 0 : i32
    %c0_i32_1 = arith.constant 0 : i32
    return %c0_i32, %c0_i32_0 : i32, i32
  }
  func.func @transform_3(%arg0: i32) -> (i32, i32) {
    %c0_i32 = arith.constant 0 : i32
    %c0_i32_0 = arith.constant 0 : i32
    %c0_i32_1 = arith.constant 0 : i32
    return %c0_i32, %c0_i32_0 : i32, i32
  }
  func.func @transform_4(%arg0: i32) -> (i32, i32) {
    %c0_i32 = arith.constant 0 : i32
    %c0_i32_0 = arith.constant 0 : i32
    %c0_i32_1 = arith.constant 0 : i32
    return %c0_i32, %c0_i32_0 : i32, i32
  }
  func.func @transform_5(%arg0: i32) -> (i32, i32) {
    %c0_i32 = arith.constant 0 : i32
    %c0_i32_0 = arith.constant 0 : i32
    return %arg0, %c0_i32 : i32, i32
  }
}

</mosaic_0001>

<bundles_post_ra>
// kernel: cnn_forward.4
= control target key start
LH: loop header
LB: loop body
LE: loop exit
PB: predicated region body
PF: predicated region fallthrough
CT: control target
= control target key end

     0   :  { %s6569_s12 = smov 0   ;;  %s6571_s13 = smov 0   ;;  %s7733_s0 = inlined_call_operand.vmem [shape: bf16[4,1152,27], index: 0, kind: input, shape index: {}]   ;;  %s7734_s1 = inlined_call_operand.vmem [shape: bf16[27,16], index: 1, kind: input, shape index: {}]   ;;  %s7735_s2 = inlined_call_operand.vmem [shape: f32[1,16], index: 2, kind: input, shape index: {}]   ;;  %s7736_s3 = inlined_call_operand.vmem [shape: bf16[1152,16], index: 3, kind: output, shape index: {}]  }
   0x1   :  { %s6573_s14 = smov 0  }
   0x2 LB: > { %s5604_s15 = sadd.s32 4294967295, %s6546_s14   ;;  %s6586_s16 = sadd.s32 1, %s6546_s14   ;;  %s6546_s14 = sphi %s6573_s14, %s7739_s14   ;;  %s6542_s13 = sphi %s6571_s13, %s7738_s13   ;;  %s6538_s12 = sphi %s6569_s12, %s7737_s12  }
   0x3   : > { %s17_s17 = ssub.s32 %s6546_s14, %s6586_s16  ;;  %s20_s18 = sadd.s32 1, %s6542_s13 }
   0x4   : > { %p18_p0 = scmp.eq.s32.totalorder %s17_s17, 0  ;;  %p27_p1 = scmp.ne.s32.totalorder %s6542_s13, %s6538_s12 }
   0x5   : > { %p28_p2 = scmp.eq.s32.totalorder %s6546_s14, 0  ;;  %p5607_p4 = scmp.ge.s32.totalorder %s6546_s14, 2 }
   0x6   : > { %s6595_s19 = scalar_select %p18_p0, %s6542_s13, %s20_s18  }
   0x7   : > { %p29_p3 = por %p28_p2, %p27_p1  ;;  %127 = sbr.rel (%p5607_p4) target bundleno = 161 (0xa1), region = 24 }
   0xc   : > { %130 = sbr.rel (!%p29_p3) target bundleno = 161 (0xa1), region = 28  ;;  %s132_s20 = sand.u32 (%p29_p3), 1, %s6542_s13  }
   0xd   : > { %s6341_s21 = smul.u32 (%p29_p3), 288, %s6546_s14 }
   0xe   : > { %s6494_s22 = smul.u32 (%p29_p3), 1152, %s132_s20 }
   0xf   : > { %s6603_s25 = scalar_lea.vmem (%p29_p3), %s7733_s0, %s6341_s21 }
  0x10   : > { %v154_v0 = vld [vmem:[%s6603_s25] sm:$0xff] (%p29_p3)   ;;  %v158_v1 = vld [vmem:[%s6603_s25 + $0x8] sm:$0xff] (%p29_p3)   ;;  %v162_v2 = vld [vmem:[%s6603_s25 + $0x10] sm:$0xff] (%p29_p3)   ;;  %s6608_s26 = scalar_lea.vmem (%p29_p3), [#allocation2], %s6494_s22 }
  0x11   : > { %155 = vst [vmem:[%s6608_s26] sm:$0xff] %v154_v0   ;;  %v166_v3 = vld [vmem:[%s6603_s25 + $0x18] sm:$0xff]   ;;  %v170_v4 = vld [vmem:[%s6603_s25 + $0x20] sm:$0xff]   ;;  %v174_v5 = vld [vmem:[%s6603_s25 + $0x28] sm:$0xff]  }
  0x12   : > { %159 = vst [vmem:[%s6608_s26 + $0x8] sm:$0xff] %v158_v1   ;;  %v178_v6 = vld [vmem:[%s6603_s25 + $0x30] sm:$0xff]   ;;  %v182_v7 = vld [vmem:[%s6603_s25 + $0x38] sm:$0xff]   ;;  %v186_v8 = vld [vmem:[%s6603_s25 + $0x40] sm:$0xff]  }
  0x13   : > { %163 = vst [vmem:[%s6608_s26 + $0x10] sm:$0xff] %v162_v2   ;;  %v190_v9 = vld [vmem:[%s6603_s25 + $0x48] sm:$0xff]   ;;  %v194_v10 = vld [vmem:[%s6603_s25 + $0x50] sm:$0xff]   ;;  %v198_v11 = vld [vmem:[%s6603_s25 + $0x58] sm:$0xff]  }
  0x14   : > { %167 = vst [vmem:[%s6608_s26 + $0x18] sm:$0xff] %v166_v3   ;;  %v202_v12 = vld [vmem:[%s6603_s25 + $0x60] sm:$0xff]   ;;  %v206_v13 = vld [vmem:[%s6603_s25 + $0x68] sm:$0xff]   ;;  %v210_v14 = vld [vmem:[%s6603_s25 + $0x70] sm:$0xff]  }
  0x15   : > { %171 = vst [vmem:[%s6608_s26 + $0x20] sm:$0xff] %v170_v4   ;;  %v214_v15 = vld [vmem:[%s6603_s25 + $0x78] sm:$0xff]   ;;  %v218_v16 = vld [vmem:[%s6603_s25 + $0x80] sm:$0xff]   ;;  %v222_v17 = vld [vmem:[%s6603_s25 + $0x88] sm:$0xff]  }
  0x16   : > { %175 = vst [vmem:[%s6608_s26 + $0x28] sm:$0xff] %v174_v5   ;;  %v226_v18 = vld [vmem:[%s6603_s25 + $0x90] sm:$0xff]   ;;  %v230_v19 = vld [vmem:[%s6603_s25 + $0x98] sm:$0xff]   ;;  %v234_v20 = vld [vmem:[%s6603_s25 + $0xa0] sm:$0xff]  }
  0x17   : > { %179 = vst [vmem:[%s6608_s26 + $0x30] sm:$0xff] %v178_v6   ;;  %v238_v21 = vld [vmem:[%s6603_s25 + $0xa8] sm:$0xff]   ;;  %v242_v22 = vld [vmem:[%s6603_s25 + $0xb0] sm:$0xff]   ;;  %v246_v23 = vld [vmem:[%s6603_s25 + $0xb8] sm:$0xff]  }
  0x18   : > { %183 = vst [vmem:[%s6608_s26 + $0x38] sm:$0xff] %v182_v7   ;;  %v250_v24 = vld [vmem:[%s6603_s25 + $0xc0] sm:$0xff]   ;;  %v254_v25 = vld [vmem:[%s6603_s25 + $0xc8] sm:$0xff]   ;;  %v258_v26 = vld [vmem:[%s6603_s25 + $0xd0] sm:$0xff]  }
  0x19   : > { %187 = vst [vmem:[%s6608_s26 + $0x40] sm:$0xff] %v186_v8   ;;  %v262_v27 = vld [vmem:[%s6603_s25 + $0xd8] sm:$0xff]   ;;  %v266_v28 = vld [vmem:[%s6603_s25 + $0xe0] sm:$0xff]   ;;  %v270_v29 = vld [vmem:[%s6603_s25 + $0xe8] sm:$0xff]  }
  0x1a   : > { %191 = vst [vmem:[%s6608_s26 + $0x48] sm:$0xff] %v190_v9   ;;  %v274_v30 = vld [vmem:[%s6603_s25 + $0xf0] sm:$0xff]   ;;  %v278_v31 = vld [vmem:[%s6603_s25 + $0xf8] sm:$0xff]   ;;  %v282_v32 = vld [vmem:[%s6603_s25 + $0x100] sm:$0xff]  }
  0x1b   : > { %195 = vst [vmem:[%s6608_s26 + $0x50] sm:$0xff] %v194_v10   ;;  %v286_v33 = vld [vmem:[%s6603_s25 + $0x108] sm:$0xff]   ;;  %v290_v34 = vld [vmem:[%s6603_s25 + $0x110] sm:$0xff]   ;;  %v294_v35 = vld [vmem:[%s6603_s25 + $0x118] sm:$0xff]  }
  0x1c   : > { %199 = vst [vmem:[%s6608_s26 + $0x58] sm:$0xff] %v198_v11   ;;  %v298_v36 = vld [vmem:[%s6603_s25 + $0x240] sm:$0xff]   ;;  %v302_v37 = vld [vmem:[%s6603_s25 + $0x248] sm:$0xff]   ;;  %v306_v38 = vld [vmem:[%s6603_s25 + $0x250] sm:$0xff]  }
  0x1d   : > { %203 = vst [vmem:[%s6608_s26 + $0x60] sm:$0xff] %v202_v12   ;;  %v310_v39 = vld [vmem:[%s6603_s25 + $0x258] sm:$0xff]   ;;  %v314_v40 = vld [vmem:[%s6603_s25 + $0x260] sm:$0xff]   ;;  %v318_v41 = vld [vmem:[%s6603_s25 + $0x268] sm:$0xff]  }
  0x1e   : > { %207 = vst [vmem:[%s6608_s26 + $0x68] sm:$0xff] %v206_v13   ;;  %v322_v42 = vld [vmem:[%s6603_s25 + $0x270] sm:$0xff]   ;;  %v326_v43 = vld [vmem:[%s6603_s25 + $0x278] sm:$0xff]   ;;  %v330_v44 = vld [vmem:[%s6603_s25 + $0x280] sm:$0xff]  }
  0x1f   : > { %211 = vst [vmem:[%s6608_s26 + $0x70] sm:$0xff] %v210_v14   ;;  %v334_v45 = vld [vmem:[%s6603_s25 + $0x288] sm:$0xff]   ;;  %v338_v46 = vld [vmem:[%s6603_s25 + $0x290] sm:$0xff]   ;;  %v342_v47 = vld [vmem:[%s6603_s25 + $0x298] sm:$0xff]  }
  0x20   : > { %215 = vst [vmem:[%s6608_s26 + $0x78] sm:$0xff] %v214_v15   ;;  %v346_v48 = vld [vmem:[%s6603_s25 + $0x2a0] sm:$0xff]   ;;  %v350_v49 = vld [vmem:[%s6603_s25 + $0x2a8] sm:$0xff]   ;;  %v354_v50 = vld [vmem:[%s6603_s25 + $0x2b0] sm:$0xff]  }
  0x21   : > { %219 = vst [vmem:[%s6608_s26 + $0x80] sm:$0xff] %v218_v16   ;;  %v358_v51 = vld [vmem:[%s6603_s25 + $0x2b8] sm:$0xff]   ;;  %v362_v52 = vld [vmem:[%s6603_s25 + $0x2c0] sm:$0xff]   ;;  %v366_v53 = vld [vmem:[%s6603_s25 + $0x2c8] sm:$0xff]  }
  0x22   : > { %223 = vst [vmem:[%s6608_s26 + $0x88] sm:$0xff] %v222_v17   ;;  %v370_v54 = vld [vmem:[%s6603_s25 + $0x2d0] sm:$0xff]   ;;  %v374_v55 = vld [vmem:[%s6603_s25 + $0x2d8] sm:$0xff]   ;;  %v378_v56 = vld [vmem:[%s6603_s25 + $0x2e0] sm:$0xff]  }
  0x23   : > { %227 = vst [vmem:[%s6608_s26 + $0x90] sm:$0xff] %v226_v18   ;;  %v382_v57 = vld [vmem:[%s6603_s25 + $0x2e8] sm:$0xff]   ;;  %v386_v58 = vld [vmem:[%s6603_s25 + $0x2f0] sm:$0xff]   ;;  %v390_v59 = vld [vmem:[%s6603_s25 + $0x2f8] sm:$0xff]  }
  0x24   : > { %231 = vst [vmem:[%s6608_s26 + $0x98] sm:$0xff] %v230_v19   ;;  %v394_v60 = vld [vmem:[%s6603_s25 + $0x300] sm:$0xff]   ;;  %v398_v61 = vld [vmem:[%s6603_s25 + $0x308] sm:$0xff]   ;;  %v402_v62 = vld [vmem:[%s6603_s25 + $0x310] sm:$0xff]  }
  0x25   : > { %235 = vst [vmem:[%s6608_s26 + $0xa0] sm:$0xff] %v234_v20   ;;  %v406_v63 = vld [vmem:[%s6603_s25 + $0x318] sm:$0xff]   ;;  %v410_v0 = vld [vmem:[%s6603_s25 + $0x320] sm:$0xff]   ;;  %v414_v1 = vld [vmem:[%s6603_s25 + $0x328] sm:$0xff]  }
  0x26   : > { %239 = vst [vmem:[%s6608_s26 + $0xa8] sm:$0xff] %v238_v21   ;;  %v418_v2 = vld [vmem:[%s6603_s25 + $0x330] sm:$0xff]   ;;  %v422_v3 = vld [vmem:[%s6603_s25 + $0x338] sm:$0xff]   ;;  %v426_v4 = vld [vmem:[%s6603_s25 + $0x340] sm:$0xff]  }
  0x27   : > { %243 = vst [vmem:[%s6608_s26 + $0xb0] sm:$0xff] %v242_v22   ;;  %v430_v5 = vld [vmem:[%s6603_s25 + $0x348] sm:$0xff]   ;;  %v434_v6 = vld [vmem:[%s6603_s25 + $0x350] sm:$0xff]   ;;  %v438_v7 = vld [vmem:[%s6603_s25 + $0x358] sm:$0xff]  }
  0x28   : > { %247 = vst [vmem:[%s6608_s26 + $0xb8] sm:$0xff] %v246_v23   ;;  %v442_v8 = vld [vmem:[%s6603_s25 + $0x480] sm:$0xff]   ;;  %v446_v9 = vld [vmem:[%s6603_s25 + $0x488] sm:$0xff]   ;;  %v450_v10 = vld [vmem:[%s6603_s25 + $0x490] sm:$0xff]  }
  0x29   : > { %251 = vst [vmem:[%s6608_s26 + $0xc0] sm:$0xff] %v250_v24   ;;  %v454_v11 = vld [vmem:[%s6603_s25 + $0x498] sm:$0xff]   ;;  %v458_v12 = vld [vmem:[%s6603_s25 + $0x4a0] sm:$0xff]   ;;  %v462_v13 = vld [vmem:[%s6603_s25 + $0x4a8] sm:$0xff]  }
  0x2a   : > { %255 = vst [vmem:[%s6608_s26 + $0xc8] sm:$0xff] %v254_v25   ;;  %v466_v14 = vld [vmem:[%s6603_s25 + $0x4b0] sm:$0xff]   ;;  %v470_v15 = vld [vmem:[%s6603_s25 + $0x4b8] sm:$0xff]   ;;  %v474_v16 = vld [vmem:[%s6603_s25 + $0x4c0] sm:$0xff]  }
  0x2b   : > { %259 = vst [vmem:[%s6608_s26 + $0xd0] sm:$0xff] %v258_v26   ;;  %v478_v17 = vld [vmem:[%s6603_s25 + $0x4c8] sm:$0xff]   ;;  %v482_v18 = vld [vmem:[%s6603_s25 + $0x4d0] sm:$0xff]   ;;  %v486_v19 = vld [vmem:[%s6603_s25 + $0x4d8] sm:$0xff]  }
  0x2c   : > { %263 = vst [vmem:[%s6608_s26 + $0xd8] sm:$0xff] %v262_v27   ;;  %v490_v20 = vld [vmem:[%s6603_s25 + $0x4e0] sm:$0xff]   ;;  %v494_v21 = vld [vmem:[%s6603_s25 + $0x4e8] sm:$0xff]   ;;  %v498_v22 = vld [vmem:[%s6603_s25 + $0x4f0] sm:$0xff]  }
  0x2d   : > { %267 = vst [vmem:[%s6608_s26 + $0xe0] sm:$0xff] %v266_v28   ;;  %v502_v23 = vld [vmem:[%s6603_s25 + $0x4f8] sm:$0xff]   ;;  %v506_v24 = vld [vmem:[%s6603_s25 + $0x500] sm:$0xff]   ;;  %v510_v25 = vld [vmem:[%s6603_s25 + $0x508] sm:$0xff]  }
  0x2e   : > { %271 = vst [vmem:[%s6608_s26 + $0xe8] sm:$0xff] %v270_v29   ;;  %v514_v26 = vld [vmem:[%s6603_s25 + $0x510] sm:$0xff]   ;;  %v518_v27 = vld [vmem:[%s6603_s25 + $0x518] sm:$0xff]   ;;  %v522_v28 = vld [vmem:[%s6603_s25 + $0x520] sm:$0xff]  }
  0x2f   : > { %275 = vst [vmem:[%s6608_s26 + $0xf0] sm:$0xff] %v274_v30   ;;  %v526_v29 = vld [vmem:[%s6603_s25 + $0x528] sm:$0xff]   ;;  %v530_v30 = vld [vmem:[%s6603_s25 + $0x530] sm:$0xff]  }
  0x30   : > { %279 = vst [vmem:[%s6608_s26 + $0xf8] sm:$0xff] %v278_v31   ;;  %v534_v31 = vld [vmem:[%s6603_s25 + $0x538] sm:$0xff]  }
  0x31   : > { %283 = vst [vmem:[%s6608_s26 + $0x100] sm:$0xff] %v282_v32   ;;  %v538_v32 = vld [vmem:[%s6603_s25 + $0x540] sm:$0xff]  }
  0x32   : > { %287 = vst [vmem:[%s6608_s26 + $0x108] sm:$0xff] %v286_v33   ;;  %v542_v33 = vld [vmem:[%s6603_s25 + $0x548] sm:$0xff]  }
  0x33   : > { %291 = vst [vmem:[%s6608_s26 + $0x110] sm:$0xff] %v290_v34   ;;  %v546_v34 = vld [vmem:[%s6603_s25 + $0x550] sm:$0xff]  }
  0x34   : > { %295 = vst [vmem:[%s6608_s26 + $0x118] sm:$0xff] %v294_v35   ;;  %v550_v35 = vld [vmem:[%s6603_s25 + $0x558] sm:$0xff]  }
  0x35   : > { %299 = vst [vmem:[%s6608_s26 + $0x120] sm:$0xff] %v298_v36   ;;  %v554_v36 = vld [vmem:[%s6603_s25 + $0x560] sm:$0xff]  }
  0x36   : > { %303 = vst [vmem:[%s6608_s26 + $0x128] sm:$0xff] %v302_v37   ;;  %v558_v37 = vld [vmem:[%s6603_s25 + $0x568] sm:$0xff]  }
  0x37   : > { %307 = vst [vmem:[%s6608_s26 + $0x130] sm:$0xff] %v306_v38   ;;  %v562_v38 = vld [vmem:[%s6603_s25 + $0x570] sm:$0xff]  }
  0x38   : > { %311 = vst [vmem:[%s6608_s26 + $0x138] sm:$0xff] %v310_v39   ;;  %v566_v39 = vld [vmem:[%s6603_s25 + $0x578] sm:$0xff]  }
  0x39   : > { %315 = vst [vmem:[%s6608_s26 + $0x140] sm:$0xff] %v314_v40   ;;  %v570_v40 = vld [vmem:[%s6603_s25 + $0x580] sm:$0xff]  }
  0x3a   : > { %319 = vst [vmem:[%s6608_s26 + $0x148] sm:$0xff] %v318_v41   ;;  %v574_v41 = vld [vmem:[%s6603_s25 + $0x588] sm:$0xff]  }
  0x3b   : > { %323 = vst [vmem:[%s6608_s26 + $0x150] sm:$0xff] %v322_v42   ;;  %v578_v42 = vld [vmem:[%s6603_s25 + $0x590] sm:$0xff]  }
  0x3c   : > { %327 = vst [vmem:[%s6608_s26 + $0x158] sm:$0xff] %v326_v43   ;;  %v582_v43 = vld [vmem:[%s6603_s25 + $0x598] sm:$0xff]  }
  0x3d   : > { %331 = vst [vmem:[%s6608_s26 + $0x160] sm:$0xff] %v330_v44   ;;  %v586_v44 = vld [vmem:[%s6603_s25 + $0x6c0] sm:$0xff]  }
  0x3e   : > { %335 = vst [vmem:[%s6608_s26 + $0x168] sm:$0xff] %v334_v45   ;;  %v590_v45 = vld [vmem:[%s6603_s25 + $0x6c8] sm:$0xff]  }
  0x3f   : > { %339 = vst [vmem:[%s6608_s26 + $0x170] sm:$0xff] %v338_v46   ;;  %v594_v46 = vld [vmem:[%s6603_s25 + $0x6d0] sm:$0xff]  }
  0x40   : > { %343 = vst [vmem:[%s6608_s26 + $0x178] sm:$0xff] %v342_v47   ;;  %v598_v47 = vld [vmem:[%s6603_s25 + $0x6d8] sm:$0xff]  }
  0x41   : > { %347 = vst [vmem:[%s6608_s26 + $0x180] sm:$0xff] %v346_v48   ;;  %v602_v48 = vld [vmem:[%s6603_s25 + $0x6e0] sm:$0xff]  }
  0x42   : > { %351 = vst [vmem:[%s6608_s26 + $0x188] sm:$0xff] %v350_v49   ;;  %v606_v49 = vld [vmem:[%s6603_s25 + $0x6e8] sm:$0xff]  }
  0x43   : > { %355 = vst [vmem:[%s6608_s26 + $0x190] sm:$0xff] %v354_v50   ;;  %v610_v50 = vld [vmem:[%s6603_s25 + $0x6f0] sm:$0xff]  }
  0x44   : > { %359 = vst [vmem:[%s6608_s26 + $0x198] sm:$0xff] %v358_v51   ;;  %v614_v51 = vld [vmem:[%s6603_s25 + $0x6f8] sm:$0xff]  }
  0x45   : > { %363 = vst [vmem:[%s6608_s26 + $0x1a0] sm:$0xff] %v362_v52   ;;  %v618_v52 = vld [vmem:[%s6603_s25 + $0x700] sm:$0xff]  }
  0x46   : > { %367 = vst [vmem:[%s6608_s26 + $0x1a8] sm:$0xff] %v366_v53   ;;  %v622_v53 = vld [vmem:[%s6603_s25 + $0x708] sm:$0xff]  }
  0x47   : > { %371 = vst [vmem:[%s6608_s26 + $0x1b0] sm:$0xff] %v370_v54   ;;  %v626_v54 = vld [vmem:[%s6603_s25 + $0x710] sm:$0xff]  }
  0x48   : > { %375 = vst [vmem:[%s6608_s26 + $0x1b8] sm:$0xff] %v374_v55   ;;  %v630_v55 = vld [vmem:[%s6603_s25 + $0x718] sm:$0xff]  }
  0x49   : > { %379 = vst [vmem:[%s6608_s26 + $0x1c0] sm:$0xff] %v378_v56   ;;  %v634_v56 = vld [vmem:[%s6603_s25 + $0x720] sm:$0xff]  }
  0x4a   : > { %383 = vst [vmem:[%s6608_s26 + $0x1c8] sm:$0xff] %v382_v57   ;;  %v638_v57 = vld [vmem:[%s6603_s25 + $0x728] sm:$0xff]  }
  0x4b   : > { %387 = vst [vmem:[%s6608_s26 + $0x1d0] sm:$0xff] %v386_v58   ;;  %v642_v58 = vld [vmem:[%s6603_s25 + $0x730] sm:$0xff]  }
  0x4c   : > { %391 = vst [vmem:[%s6608_s26 + $0x1d8] sm:$0xff] %v390_v59   ;;  %v646_v59 = vld [vmem:[%s6603_s25 + $0x738] sm:$0xff]  }
  0x4d   : > { %395 = vst [vmem:[%s6608_s26 + $0x1e0] sm:$0xff] %v394_v60   ;;  %v650_v60 = vld [vmem:[%s6603_s25 + $0x740] sm:$0xff]  }
  0x4e   : > { %399 = vst [vmem:[%s6608_s26 + $0x1e8] sm:$0xff] %v398_v61   ;;  %v654_v61 = vld [vmem:[%s6603_s25 + $0x748] sm:$0xff]  }
  0x4f   : > { %403 = vst [vmem:[%s6608_s26 + $0x1f0] sm:$0xff] %v402_v62   ;;  %v658_v62 = vld [vmem:[%s6603_s25 + $0x750] sm:$0xff]  }
  0x50   : > { %407 = vst [vmem:[%s6608_s26 + $0x1f8] sm:$0xff] %v406_v63   ;;  %v662_v63 = vld [vmem:[%s6603_s25 + $0x758] sm:$0xff]  }
  0x51   : > { %411 = vst [vmem:[%s6608_s26 + $0x200] sm:$0xff] %v410_v0   ;;  %v666_v0 = vld [vmem:[%s6603_s25 + $0x760] sm:$0xff]  }
  0x52   : > { %415 = vst [vmem:[%s6608_s26 + $0x208] sm:$0xff] %v414_v1   ;;  %v670_v1 = vld [vmem:[%s6603_s25 + $0x768] sm:$0xff]  }
  0x53   : > { %419 = vst [vmem:[%s6608_s26 + $0x210] sm:$0xff] %v418_v2   ;;  %v674_v2 = vld [vmem:[%s6603_s25 + $0x770] sm:$0xff]  }
  0x54   : > { %423 = vst [vmem:[%s6608_s26 + $0x218] sm:$0xff] %v422_v3   ;;  %v678_v3 = vld [vmem:[%s6603_s25 + $0x778] sm:$0xff]  }
  0x55   : > { %427 = vst [vmem:[%s6608_s26 + $0x220] sm:$0xff] %v426_v4   ;;  %v682_v4 = vld [vmem:[%s6603_s25 + $0x780] sm:$0xff]  }
  0x56   : > { %431 = vst [vmem:[%s6608_s26 + $0x228] sm:$0xff] %v430_v5   ;;  %v686_v5 = vld [vmem:[%s6603_s25 + $0x788] sm:$0xff]  }
  0x57   : > { %435 = vst [vmem:[%s6608_s26 + $0x230] sm:$0xff] %v434_v6   ;;  %v690_v6 = vld [vmem:[%s6603_s25 + $0x790] sm:$0xff]  }
  0x58   : > { %439 = vst [vmem:[%s6608_s26 + $0x238] sm:$0xff] %v438_v7   ;;  %v694_v7 = vld [vmem:[%s6603_s25 + $0x798] sm:$0xff]  }
  0x59   : > { %443 = vst [vmem:[%s6608_s26 + $0x240] sm:$0xff] %v442_v8   ;;  %v698_v8 = vld [vmem:[%s6603_s25 + $0x7a0] sm:$0xff]  }
  0x5a   : > { %447 = vst [vmem:[%s6608_s26 + $0x248] sm:$0xff] %v446_v9   ;;  %v702_v9 = vld [vmem:[%s6603_s25 + $0x7a8] sm:$0xff]  }
  0x5b   : > { %451 = vst [vmem:[%s6608_s26 + $0x250] sm:$0xff] %v450_v10   ;;  %v706_v10 = vld [vmem:[%s6603_s25 + $0x7b0] sm:$0xff]  }
  0x5c   : > { %455 = vst [vmem:[%s6608_s26 + $0x258] sm:$0xff] %v454_v11   ;;  %v710_v11 = vld [vmem:[%s6603_s25 + $0x7b8] sm:$0xff]  }
  0x5d   : > { %459 = vst [vmem:[%s6608_s26 + $0x260] sm:$0xff] %v458_v12   ;;  %v714_v12 = vld [vmem:[%s6603_s25 + $0x7c0] sm:$0xff]  }
  0x5e   : > { %463 = vst [vmem:[%s6608_s26 + $0x268] sm:$0xff] %v462_v13   ;;  %v718_v13 = vld [vmem:[%s6603_s25 + $0x7c8] sm:$0xff]  }
  0x5f   : > { %467 = vst [vmem:[%s6608_s26 + $0x270] sm:$0xff] %v466_v14   ;;  %v722_v14 = vld [vmem:[%s6603_s25 + $0x7d0] sm:$0xff]  }
  0x60   : > { %471 = vst [vmem:[%s6608_s26 + $0x278] sm:$0xff] %v470_v15   ;;  %v726_v15 = vld [vmem:[%s6603_s25 + $0x7d8] sm:$0xff]  }
  0x61   : > { %475 = vst [vmem:[%s6608_s26 + $0x280] sm:$0xff] %v474_v16  }
  0x62   : > { %479 = vst [vmem:[%s6608_s26 + $0x288] sm:$0xff] %v478_v17  }
  0x63   : > { %483 = vst [vmem:[%s6608_s26 + $0x290] sm:$0xff] %v482_v18  }
  0x64   : > { %487 = vst [vmem:[%s6608_s26 + $0x298] sm:$0xff] %v486_v19  }
  0x65   : > { %491 = vst [vmem:[%s6608_s26 + $0x2a0] sm:$0xff] %v490_v20  }
  0x66   : > { %495 = vst [vmem:[%s6608_s26 + $0x2a8] sm:$0xff] %v494_v21  }
  0x67   : > { %499 = vst [vmem:[%s6608_s26 + $0x2b0] sm:$0xff] %v498_v22  }
  0x68   : > { %503 = vst [vmem:[%s6608_s26 + $0x2b8] sm:$0xff] %v502_v23  }
  0x69   : > { %507 = vst [vmem:[%s6608_s26 + $0x2c0] sm:$0xff] %v506_v24  }
  0x6a   : > { %511 = vst [vmem:[%s6608_s26 + $0x2c8] sm:$0xff] %v510_v25  }
  0x6b   : > { %515 = vst [vmem:[%s6608_s26 + $0x2d0] sm:$0xff] %v514_v26  }
  0x6c   : > { %519 = vst [vmem:[%s6608_s26 + $0x2d8] sm:$0xff] %v518_v27  }
  0x6d   : > { %523 = vst [vmem:[%s6608_s26 + $0x2e0] sm:$0xff] %v522_v28  }
  0x6e   : > { %527 = vst [vmem:[%s6608_s26 + $0x2e8] sm:$0xff] %v526_v29  }
  0x6f   : > { %531 = vst [vmem:[%s6608_s26 + $0x2f0] sm:$0xff] %v530_v30  }
  0x70   : > { %535 = vst [vmem:[%s6608_s26 + $0x2f8] sm:$0xff] %v534_v31  }
  0x71   : > { %539 = vst [vmem:[%s6608_s26 + $0x300] sm:$0xff] %v538_v32  }
  0x72   : > { %543 = vst [vmem:[%s6608_s26 + $0x308] sm:$0xff] %v542_v33  }
  0x73   : > { %547 = vst [vmem:[%s6608_s26 + $0x310] sm:$0xff] %v546_v34  }
  0x74   : > { %551 = vst [vmem:[%s6608_s26 + $0x318] sm:$0xff] %v550_v35  }
  0x75   : > { %555 = vst [vmem:[%s6608_s26 + $0x320] sm:$0xff] %v554_v36  }
  0x76   : > { %559 = vst [vmem:[%s6608_s26 + $0x328] sm:$0xff] %v558_v37  }
  0x77   : > { %563 = vst [vmem:[%s6608_s26 + $0x330] sm:$0xff] %v562_v38  }
  0x78   : > { %567 = vst [vmem:[%s6608_s26 + $0x338] sm:$0xff] %v566_v39  }
  0x79   : > { %571 = vst [vmem:[%s6608_s26 + $0x340] sm:$0xff] %v570_v40  }
  0x7a   : > { %575 = vst [vmem:[%s6608_s26 + $0x348] sm:$0xff] %v574_v41  }
  0x7b   : > { %579 = vst [vmem:[%s6608_s26 + $0x350] sm:$0xff] %v578_v42  }
  0x7c   : > { %583 = vst [vmem:[%s6608_s26 + $0x358] sm:$0xff] %v582_v43  }
  0x7d   : > { %587 = vst [vmem:[%s6608_s26 + $0x360] sm:$0xff] %v586_v44  }
  0x7e   : > { %591 = vst [vmem:[%s6608_s26 + $0x368] sm:$0xff] %v590_v45  }
  0x7f   : > { %595 = vst [vmem:[%s6608_s26 + $0x370] sm:$0xff] %v594_v46  }
  0x80   : > { %599 = vst [vmem:[%s6608_s26 + $0x378] sm:$0xff] %v598_v47  }
  0x81   : > { %603 = vst [vmem:[%s6608_s26 + $0x380] sm:$0xff] %v602_v48  }
  0x82   : > { %607 = vst [vmem:[%s6608_s26 + $0x388] sm:$0xff] %v606_v49  }
  0x83   : > { %611 = vst [vmem:[%s6608_s26 + $0x390] sm:$0xff] %v610_v50  }
  0x84   : > { %615 = vst [vmem:[%s6608_s26 + $0x398] sm:$0xff] %v614_v51  }
  0x85   : > { %619 = vst [vmem:[%s6608_s26 + $0x3a0] sm:$0xff] %v618_v52  }
  0x86   : > { %623 = vst [vmem:[%s6608_s26 + $0x3a8] sm:$0xff] %v622_v53  }
  0x87   : > { %627 = vst [vmem:[%s6608_s26 + $0x3b0] sm:$0xff] %v626_v54  }
  0x88   : > { %631 = vst [vmem:[%s6608_s26 + $0x3b8] sm:$0xff] %v630_v55  }
  0x89   : > { %635 = vst [vmem:[%s6608_s26 + $0x3c0] sm:$0xff] %v634_v56  }
  0x8a   : > { %639 = vst [vmem:[%s6608_s26 + $0x3c8] sm:$0xff] %v638_v57  }
  0x8b   : > { %643 = vst [vmem:[%s6608_s26 + $0x3d0] sm:$0xff] %v642_v58  }
  0x8c   : > { %647 = vst [vmem:[%s6608_s26 + $0x3d8] sm:$0xff] %v646_v59  }
  0x8d   : > { %651 = vst [vmem:[%s6608_s26 + $0x3e0] sm:$0xff] %v650_v60  }
  0x8e   : > { %655 = vst [vmem:[%s6608_s26 + $0x3e8] sm:$0xff] %v654_v61  }
  0x8f   : > { %659 = vst [vmem:[%s6608_s26 + $0x3f0] sm:$0xff] %v658_v62  }
  0x90   : > { %663 = vst [vmem:[%s6608_s26 + $0x3f8] sm:$0xff] %v662_v63  }
  0x91   : > { %667 = vst [vmem:[%s6608_s26 + $0x400] sm:$0xff] %v666_v0  }
  0x92   : > { %671 = vst [vmem:[%s6608_s26 + $0x408] sm:$0xff] %v670_v1  }
  0x93   : > { %675 = vst [vmem:[%s6608_s26 + $0x410] sm:$0xff] %v674_v2  }
  0x94   : > { %679 = vst [vmem:[%s6608_s26 + $0x418] sm:$0xff] %v678_v3  }
  0x95   : > { %683 = vst [vmem:[%s6608_s26 + $0x420] sm:$0xff] %v682_v4  }
  0x96   : > { %687 = vst [vmem:[%s6608_s26 + $0x428] sm:$0xff] %v686_v5  }
  0x97   : > { %691 = vst [vmem:[%s6608_s26 + $0x430] sm:$0xff] %v690_v6  }
  0x98   : > { %695 = vst [vmem:[%s6608_s26 + $0x438] sm:$0xff] %v694_v7  }
  0x99   : > { %699 = vst [vmem:[%s6608_s26 + $0x440] sm:$0xff] %v698_v8  }
  0x9a   : > { %703 = vst [vmem:[%s6608_s26 + $0x448] sm:$0xff] %v702_v9  }
  0x9b   : > { %707 = vst [vmem:[%s6608_s26 + $0x450] sm:$0xff] %v706_v10  }
  0x9c   : > { %711 = vst [vmem:[%s6608_s26 + $0x458] sm:$0xff] %v710_v11  }
  0x9d   : > { %715 = vst [vmem:[%s6608_s26 + $0x460] sm:$0xff] %v714_v12  }
  0x9e   : > { %719 = vst [vmem:[%s6608_s26 + $0x468] sm:$0xff] %v718_v13  }
  0x9f   : > { %723 = vst [vmem:[%s6608_s26 + $0x470] sm:$0xff] %v722_v14  }
  0xa0   : > { %727 = vst [vmem:[%s6608_s26 + $0x478] sm:$0xff] %v726_v15  }
  0xa1 PF: > { %p5609_p5 = scmp.ge.s32.totalorder %s6546_s14, 1  ;;  %p2506_p6 = scmp.lt.s32.totalorder %s6546_s14, 3 }
  0xa3   : > { %p2507_p7 = pnand %p5609_p5, %p2506_p6 }
  0xa4   : > { %s2513_s4 = sand.u32 (!%p2507_p7), 1, %s6538_s12   ;;  %s2537_s9 = smul.u32 (!%p2507_p7), 72, %s5604_s15 }
  0xa5   : > { %2510 = sbr.rel (%p2507_p7) target bundleno = 896 (0x380), region = 80 }
  0xa6   : > { %s6495_s5 = smul.u32 (!%p2507_p7), 1152, %s2513_s4  ;;  %p2538_p8 = scmp.lt.s32.totalorder (!%p2507_p7), %s2537_s9, 143 }
  0xa8   : > { %s6907_s8 = scalar_lea.vmem (!%p2507_p7), [#allocation2], %s6495_s5 }
  0xaa   : > { %v6193_v16 = vld [vmem:[%s7734_s1 + $0x8] sm:$0xf]  ;;  %v6487_v17 = vld [vmem:[%s7734_s1 + $0x8] sm:$0x30]  ;;  %vm4000_vm0 = vcmask 1044480   ;;  %vm4001_vm1 = vcmask 1045504  }
  0xab   : > { %v6194_v18 = vor.u32 %v6487_v17, %v6193_v16  ;;  %v6548_v19 = vmov 65535   ;;  %v6486_v23 = vld [vmem:[%s7734_s1] sm:$0xff]  ;;  %vm3567_vm2 = vcmask 220160   ;;  %v6343_v28 = vld [vmem:[%s6907_s8 + $0x8] sm:$0xff]  ;;  %v6344_v32 = vld [vmem:[%s6907_s8 + $0x10] sm:$0xff]  ;;  %vm4736_vm3 = vcmask 130048  }
  0xac   : > { %v4002_v20 = vsel %vm4000_vm0, 4294967295, %v6548_v19  ;;  %v6342_v24 = vld [vmem:[%s6907_s8] sm:$0xff]  ;;  %v6379_v29 = vld [vmem:[%s6907_s8 + $0x128] sm:$0xff]  ;;  %v6380_v33 = vld [vmem:[%s6907_s8 + $0x130] sm:$0xff]  ;;  %s7741_s9 = smov (!%p2538_p8, %s2537_s9), 143  ;;  %vm5461_vm4 = vcmask 125952  }
  0xad   : > { %v4003_v21 = vsel %vm4001_vm1, %v4002_v20, 0  ;;  %v6378_v25 = vld [vmem:[%s6907_s8 + $0x120] sm:$0xff]  ;;  %v6415_v30 = vld [vmem:[%s6907_s8 + $0x248] sm:$0xff]  ;;  %v6416_v34 = vld [vmem:[%s6907_s8 + $0x250] sm:$0xff]  ;;  %s5610_s12 = sshll.u32 %s7741_s9, 2 }
  0xae   : > { %v4005_v22 = vand.u32 %v6194_v18, %v4003_v21  ;;  %v6414_v26 = vld [vmem:[%s6907_s8 + $0x240] sm:$0xff]  ;;  %v6451_v31 = vld [vmem:[%s6907_s8 + $0x368] sm:$0xff]  ;;  %v6452_v35 = vld [vmem:[%s6907_s8 + $0x370] sm:$0xff]  ;;  %s7000_s17 = scalar_lea.vmem %s7736_s3, %s5610_s12 }
  0xaf   : > { %v6450_v27 = vld [vmem:[%s6907_s8 + $0x360] sm:$0xff]  ;;  %v6345_v36 = vld [vmem:[%s6907_s8 + $0x18] sm:$0xff]  ;;  %v6347_v44 = vld [vmem:[%s6907_s8 + $0x28] sm:$0xff] }
  0xb0   : > { %4013 = vmatpush.bf16.msra.mxu0 %v4005_v22  ;;  %6488 = vmatpush.bf16.msra.mxu1 %v4005_v22  ;;  %v6381_v37 = vld [vmem:[%s6907_s8 + $0x138] sm:$0xff]  ;;  %v6346_v40 = vld [vmem:[%s6907_s8 + $0x20] sm:$0xff]  ;;  %v6383_v45 = vld [vmem:[%s6907_s8 + $0x148] sm:$0xff] }
  0xb1   : > { %6489 = vmatpush.bf16.msra.mxu2 %v4005_v22  ;;  %6490 = vmatpush.bf16.msra.mxu3 %v4005_v22  ;;  %v6417_v38 = vld [vmem:[%s6907_s8 + $0x258] sm:$0xff]  ;;  %v6382_v41 = vld [vmem:[%s6907_s8 + $0x140] sm:$0xff]  ;;  %v6419_v46 = vld [vmem:[%s6907_s8 + $0x268] sm:$0xff] }
  0xb2   : > { %v6453_v39 = vld [vmem:[%s6907_s8 + $0x378] sm:$0xff]  ;;  %v6418_v42 = vld [vmem:[%s6907_s8 + $0x260] sm:$0xff]  ;;  %v6455_v47 = vld [vmem:[%s6907_s8 + $0x388] sm:$0xff] }
  0xb3   : > { %v6454_v43 = vld [vmem:[%s6907_s8 + $0x380] sm:$0xff]  ;;  %v6348_v48 = vld [vmem:[%s6907_s8 + $0x30] sm:$0xff]  ;;  %v6349_v52 = vld [vmem:[%s6907_s8 + $0x38] sm:$0xff] }
  0xb4   : > { %4014 = vmatpush.bf16.msra.mxu0 %v6486_v23  ;;  %6491 = vmatpush.bf16.msra.mxu1 %v6486_v23  ;;  %v6384_v49 = vld [vmem:[%s6907_s8 + $0x150] sm:$0xff]  ;;  %v6385_v53 = vld [vmem:[%s6907_s8 + $0x158] sm:$0xff]  ;;  %v6350_v56 = vld [vmem:[%s6907_s8 + $0x40] sm:$0xff] }
  0xb5   : > { %6492 = vmatpush.bf16.msra.mxu2 %v6486_v23  ;;  %6493 = vmatpush.bf16.msra.mxu3 %v6486_v23  ;;  %v6420_v50 = vld [vmem:[%s6907_s8 + $0x270] sm:$0xff]  ;;  %v6421_v54 = vld [vmem:[%s6907_s8 + $0x278] sm:$0xff]  ;;  %v6386_v57 = vld [vmem:[%s6907_s8 + $0x160] sm:$0xff] }
  0xb6   : > { %v6456_v51 = vld [vmem:[%s6907_s8 + $0x390] sm:$0xff]  ;;  %v6457_v55 = vld [vmem:[%s6907_s8 + $0x398] sm:$0xff]  ;;  %v6422_v60 = vld [vmem:[%s6907_s8 + $0x280] sm:$0xff] }
  0xb7   : > { %6195 = vmatmul.msk.bf16.vlgmr.msra.gmra.mxu0 %vm3567_vm2, %v6342_v24  ;;  %6231 = vmatmul.msk.bf16.vlgmr.msra.gmra.mxu1 %vm3567_vm2, %v6378_v25  ;;  %v6458_v61 = vld [vmem:[%s6907_s8 + $0x3a0] sm:$0xff]  ;;  %v6351_v17 = vld [vmem:[%s6907_s8 + $0x48] sm:$0xff] }
  0xb8   : > { %6267 = vmatmul.msk.bf16.vlgmr.msra.gmra.mxu2 %vm3567_vm2, %v6414_v26  ;;  %6303 = vmatmul.msk.bf16.vlgmr.msra.gmra.mxu3 %vm3567_vm2, %v6450_v27  ;;  %v6990_v8 = vld [vmem:[%s7735_s2] ss:$0 sm:$0xff]  ;;  %v6387_v18 = vld [vmem:[%s6907_s8 + $0x168] sm:$0xff] }
  0xb9   : > { %v6423_v22 = vld [vmem:[%s6907_s8 + $0x288] sm:$0xff] }
  0xba   : > { %v6459_v23 = vld [vmem:[%s6907_s8 + $0x3a8] sm:$0xff] }
  0xc7   : > { %6196 = vmatmul.msk.bf16.gmra.mxu0 %vm3567_vm2, %v6343_v28  ;;  %6232 = vmatmul.msk.bf16.gmra.mxu1 %vm3567_vm2, %v6379_v29 }
  0xc8   : > { %6268 = vmatmul.msk.bf16.gmra.mxu2 %vm3567_vm2, %v6415_v30  ;;  %6304 = vmatmul.msk.bf16.gmra.mxu3 %vm3567_vm2, %v6451_v31 }
  0xd7   : > { %6197 = vmatmul.msk.bf16.gmra.mxu0 %vm3567_vm2, %v6344_v32  ;;  %6233 = vmatmul.msk.bf16.gmra.mxu1 %vm3567_vm2, %v6380_v33 }
  0xd8   : > { %6269 = vmatmul.msk.bf16.gmra.mxu2 %vm3567_vm2, %v6416_v34  ;;  %6305 = vmatmul.msk.bf16.gmra.mxu3 %vm3567_vm2, %v6452_v35 }
  0xe7   : > { %6198 = vmatmul.msk.bf16.gmra.mxu0 %vm3567_vm2, %v6345_v36  ;;  %6234 = vmatmul.msk.bf16.gmra.mxu1 %vm3567_vm2, %v6381_v37 }
  0xe8   : > { %6270 = vmatmul.msk.bf16.gmra.mxu2 %vm3567_vm2, %v6417_v38  ;;  %6306 = vmatmul.msk.bf16.gmra.mxu3 %vm3567_vm2, %v6453_v39 }
  0xf7   : > { %6199 = vmatmul.msk.bf16.gmra.mxu0 %vm3567_vm2, %v6346_v40  ;;  %6235 = vmatmul.msk.bf16.gmra.mxu1 %vm3567_vm2, %v6382_v41 }
  0xf8   : > { %6271 = vmatmul.msk.bf16.gmra.mxu2 %vm3567_vm2, %v6418_v42  ;;  %6307 = vmatmul.msk.bf16.gmra.mxu3 %vm3567_vm2, %v6454_v43 }
 0x107   : > { %6200 = vmatmul.msk.bf16.gmra.mxu0 %vm3567_vm2, %v6347_v44  ;;  %6236 = vmatmul.msk.bf16.gmra.mxu1 %vm3567_vm2, %v6383_v45 }
 0x108   : > { %6272 = vmatmul.msk.bf16.gmra.mxu2 %vm3567_vm2, %v6419_v46  ;;  %6308 = vmatmul.msk.bf16.gmra.mxu3 %vm3567_vm2, %v6455_v47 }
 0x117   : > { %6201 = vmatmul.msk.bf16.gmra.mxu0 %vm3567_vm2, %v6348_v48  ;;  %6237 = vmatmul.msk.bf16.gmra.mxu1 %vm3567_vm2, %v6384_v49  ;;  %v6352_v49 = vld [vmem:[%s6907_s8 + $0x50] sm:$0xff] }
 0x118   : > { %6273 = vmatmul.msk.bf16.gmra.mxu2 %vm3567_vm2, %v6420_v50  ;;  %6309 = vmatmul.msk.bf16.gmra.mxu3 %vm3567_vm2, %v6456_v51  ;;  %v6388_v50 = vld [vmem:[%s6907_s8 + $0x170] sm:$0xff] }
 0x127   : > { %6202 = vmatmul.msk.bf16.gmra.mxu0 %vm3567_vm2, %v6349_v52  ;;  %6238 = vmatmul.msk.bf16.gmra.mxu1 %vm3567_vm2, %v6385_v53 }
 0x128   : > { %6274 = vmatmul.msk.bf16.gmra.mxu2 %vm3567_vm2, %v6421_v54  ;;  %6310 = vmatmul.msk.bf16.gmra.mxu3 %vm3567_vm2, %v6457_v55  ;;  %v6424_v54 = vld [vmem:[%s6907_s8 + $0x290] sm:$0xff] }
 0x129   : > { %v6460_v55 = vld [vmem:[%s6907_s8 + $0x3b0] sm:$0xff] }
 0x134   : > { %v4016_v58 = vpop.f32.mrf.mxu0  ;;  %v4196_v59 = vpop.f32.mrf.mxu1 }
 0x135   : > { %v4737_v62 = vsel %vm4736_vm3, %v4016_v58, -inf  ;;  %v4738_v63 = vsel %vm4736_vm3, %v4196_v59, -inf }
 0x136   : > { %v4739_v0 = vmax.f32 %v4737_v62, %v4738_v63 }
 0x137   : > { %6203 = vmatmul.msk.bf16.gmra.mxu0 %vm3567_vm2, %v6350_v56  ;;  %6239 = vmatmul.msk.bf16.gmra.mxu1 %vm3567_vm2, %v6386_v57 }
 0x138   : > { %6275 = vmatmul.msk.bf16.gmra.mxu2 %vm3567_vm2, %v6422_v60  ;;  %6311 = vmatmul.msk.bf16.gmra.mxu3 %vm3567_vm2, %v6458_v61 }
 0x13b   : > { %v4376_v1 = vpop.f32.mrf.mxu2  ;;  %v4556_v2 = vpop.f32.mrf.mxu3 }
 0x13c   : > { %v4740_v3 = vsel %vm4736_vm3, %v4376_v1, -inf  ;;  %v4742_v4 = vsel %vm4736_vm3, %v4556_v2, -inf  ;;  %v4018_v5 = vpop.f32.mrf.mxu0  ;;  %v4198_v6 = vpop.f32.mrf.mxu1 }
 0x13d   : > { %v4741_v7 = vmax.f32 %v4739_v0, %v4740_v3  ;;  %v4744_v10 = vsel %vm4736_vm3, %v4018_v5, -inf  ;;  %v4745_v11 = vsel %vm4736_vm3, %v4198_v6, -inf }
 0x13e   : > { %v4746_v14 = vmax.f32 %v4744_v10, %v4745_v11 }
 0x13f   : > { %v4743_v9 = vmax.f32 %v4741_v7, %v4742_v4 }
 0x141   : > { %v5245_v12 = vadd.f32 %v6990_v8, %v4743_v9 }
 0x143   : > { %v5317_v13 = vmax.f32 %v5245_v12, 0.0  ;;  %v4378_v15 = vpop.f32.mrf.mxu2  ;;  %v4558_v16 = vpop.f32.mrf.mxu3 }
 0x144   : > { %v4747_v19 = vsel %vm4736_vm3, %v4378_v15, -inf  ;;  %v4021_v20 = vpop.f32.mrf.mxu0  ;;  %v4201_v21 = vpop.f32.mrf.mxu1  ;;  %v4749_v26 = vsel %vm4736_vm3, %v4558_v16, -inf }
 0x145   : > { %v5389_v24 = vpack.c.bf16 %v5317_v13, %v5317_v13  ;;  %v4748_v25 = vmax.f32 %v4746_v14, %v4747_v19  ;;  %v4751_v27 = vsel %vm4736_vm3, %v4021_v20, -inf  ;;  %v4752_v28 = vsel %vm4736_vm3, %v4201_v21, -inf  ;;  %v6389_v19 = vld [vmem:[%s6907_s8 + $0x178] sm:$0xff] }
 0x146   : > { %v4753_v31 = vmax.f32 %v4751_v27, %v4752_v28 }
 0x147   : > { %5462 = vst.msk [vmem:[%s7000_s17] sm:$0xf] %vm5461_vm4, %v5389_v24  ;;  %v4750_v29 = vmax.f32 %v4748_v25, %v4749_v26  ;;  %6204 = vmatmul.msk.bf16.gmra.mxu0 %vm3567_vm2, %v6351_v17  ;;  %6240 = vmatmul.msk.bf16.gmra.mxu1 %vm3567_vm2, %v6387_v18  ;;  %v6353_v18 = vld [vmem:[%s6907_s8 + $0x58] sm:$0xff] }
 0x148   : > { %6276 = vmatmul.msk.bf16.gmra.mxu2 %vm3567_vm2, %v6423_v22  ;;  %6312 = vmatmul.msk.bf16.gmra.mxu3 %vm3567_vm2, %v6459_v23  ;;  %v6425_v23 = vld [vmem:[%s6907_s8 + $0x298] sm:$0xff] }
 0x149   : > { %v5246_v30 = vadd.f32 %v6990_v8, %v4750_v29  ;;  %v6461_v24 = vld [vmem:[%s6907_s8 + $0x3b8] sm:$0xff] }
 0x14b   : > { %v5318_v32 = vmax.f32 %v5246_v30, 0.0  ;;  %v4381_v33 = vpop.f32.mrf.mxu2  ;;  %v4561_v34 = vpop.f32.mrf.mxu3 }
 0x14c   : > { %v4754_v35 = vsel %vm4736_vm3, %v4381_v33, -inf  ;;  %v4756_v36 = vsel %vm4736_vm3, %v4561_v34, -inf  ;;  %v4023_v37 = vpop.f32.mrf.mxu0  ;;  %v4203_v38 = vpop.f32.mrf.mxu1 }
 0x14d   : > { %v5390_v39 = vpack.c.bf16 %v5318_v32, %v5318_v32  ;;  %v4755_v40 = vmax.f32 %v4753_v31, %v4754_v35  ;;  %v4758_v42 = vsel %vm4736_vm3, %v4023_v37, -inf  ;;  %v4759_v43 = vsel %vm4736_vm3, %v4203_v38, -inf }
 0x14e   : > { %v4760_v46 = vmax.f32 %v4758_v42, %v4759_v43 }
 0x14f   : > { %5463 = vst.msk [vmem:[%s7000_s17 + $0x4] sm:$0xf] %vm5461_vm4, %v5390_v39  ;;  %v4757_v41 = vmax.f32 %v4755_v40, %v4756_v36 }
 0x151   : > { %v5247_v44 = vadd.f32 %v6990_v8, %v4757_v41 }
 0x153   : > { %v5319_v45 = vmax.f32 %v5247_v44, 0.0  ;;  %v4383_v47 = vpop.f32.mrf.mxu2  ;;  %v4563_v48 = vpop.f32.mrf.mxu3 }
 0x154   : > { %v4761_v51 = vsel %vm4736_vm3, %v4383_v47, -inf  ;;  %v4026_v52 = vpop.f32.mrf.mxu0  ;;  %v4206_v53 = vpop.f32.mrf.mxu1  ;;  %v4763_v58 = vsel %vm4736_vm3, %v4563_v48, -inf }
 0x155   : > { %v5391_v56 = vpack.c.bf16 %v5319_v45, %v5319_v45  ;;  %v4762_v57 = vmax.f32 %v4760_v46, %v4761_v51  ;;  %v4765_v59 = vsel %vm4736_vm3, %v4026_v52, -inf  ;;  %v4766_v60 = vsel %vm4736_vm3, %v4206_v53, -inf  ;;  %v6390_v51 = vld [vmem:[%s6907_s8 + $0x180] sm:$0xff] }
 0x156   : > { %v4767_v63 = vmax.f32 %v4765_v59, %v4766_v60 }
 0x157   : > { %5464 = vst.msk [vmem:[%s7000_s17 + $0x8] sm:$0xf] %vm5461_vm4, %v5391_v56  ;;  %v4764_v61 = vmax.f32 %v4762_v57, %v4763_v58  ;;  %6205 = vmatmul.msk.bf16.gmra.mxu0 %vm3567_vm2, %v6352_v49  ;;  %6241 = vmatmul.msk.bf16.gmra.mxu1 %vm3567_vm2, %v6388_v50  ;;  %v6354_v50 = vld [vmem:[%s6907_s8 + $0x60] sm:$0xff] }
 0x158   : > { %6277 = vmatmul.msk.bf16.gmra.mxu2 %vm3567_vm2, %v6424_v54  ;;  %6313 = vmatmul.msk.bf16.gmra.mxu3 %vm3567_vm2, %v6460_v55  ;;  %v6426_v55 = vld [vmem:[%s6907_s8 + $0x2a0] sm:$0xff] }
 0x159   : > { %v5248_v62 = vadd.f32 %v6990_v8, %v4764_v61  ;;  %v6462_v56 = vld [vmem:[%s6907_s8 + $0x3c0] sm:$0xff] }
 0x15b   : > { %v5320_v0 = vmax.f32 %v5248_v62, 0.0  ;;  %v4386_v1 = vpop.f32.mrf.mxu2  ;;  %v4566_v2 = vpop.f32.mrf.mxu3 }
 0x15c   : > { %v4768_v3 = vsel %vm4736_vm3, %v4386_v1, -inf  ;;  %v4770_v4 = vsel %vm4736_vm3, %v4566_v2, -inf  ;;  %v4028_v5 = vpop.f32.mrf.mxu0  ;;  %v4208_v6 = vpop.f32.mrf.mxu1 }
 0x15d   : > { %v5392_v7 = vpack.c.bf16 %v5320_v0, %v5320_v0  ;;  %v4769_v9 = vmax.f32 %v4767_v63, %v4768_v3  ;;  %v4772_v11 = vsel %vm4736_vm3, %v4028_v5, -inf  ;;  %v4773_v12 = vsel %vm4736_vm3, %v4208_v6, -inf }
 0x15e   : > { %v4774_v15 = vmax.f32 %v4772_v11, %v4773_v12 }
 0x15f   : > { %5465 = vst.msk [vmem:[%s7000_s17 + $0xc] sm:$0xf] %vm5461_vm4, %v5392_v7  ;;  %v4771_v10 = vmax.f32 %v4769_v9, %v4770_v4 }
 0x161   : > { %v5249_v13 = vadd.f32 %v6990_v8, %v4771_v10 }
 0x163   : > { %v5321_v14 = vmax.f32 %v5249_v13, 0.0  ;;  %v4388_v16 = vpop.f32.mrf.mxu2  ;;  %v4568_v17 = vpop.f32.mrf.mxu3 }
 0x164   : > { %v4775_v20 = vsel %vm4736_vm3, %v4388_v16, -inf  ;;  %v4031_v21 = vpop.f32.mrf.mxu0  ;;  %v4211_v22 = vpop.f32.mrf.mxu1  ;;  %v4777_v27 = vsel %vm4736_vm3, %v4568_v17, -inf }
 0x165   : > { %v5393_v25 = vpack.c.bf16 %v5321_v14, %v5321_v14  ;;  %v4776_v26 = vmax.f32 %v4774_v15, %v4775_v20  ;;  %v4779_v28 = vsel %vm4736_vm3, %v4031_v21, -inf  ;;  %v4780_v29 = vsel %vm4736_vm3, %v4211_v22, -inf  ;;  %v6391_v20 = vld [vmem:[%s6907_s8 + $0x188] sm:$0xff] }
 0x166   : > { %v4781_v32 = vmax.f32 %v4779_v28, %v4780_v29 }
 0x167   : > { %5466 = vst.msk [vmem:[%s7000_s17 + $0x10] sm:$0xf] %vm5461_vm4, %v5393_v25  ;;  %v4778_v30 = vmax.f32 %v4776_v26, %v4777_v27  ;;  %6206 = vmatmul.msk.bf16.gmra.mxu0 %vm3567_vm2, %v6353_v18  ;;  %6242 = vmatmul.msk.bf16.gmra.mxu1 %vm3567_vm2, %v6389_v19  ;;  %v6355_v19 = vld [vmem:[%s6907_s8 + $0x68] sm:$0xff] }
 0x168   : > { %6278 = vmatmul.msk.bf16.gmra.mxu2 %vm3567_vm2, %v6425_v23  ;;  %6314 = vmatmul.msk.bf16.gmra.mxu3 %vm3567_vm2, %v6461_v24  ;;  %v6427_v24 = vld [vmem:[%s6907_s8 + $0x2a8] sm:$0xff] }
 0x169   : > { %v5250_v31 = vadd.f32 %v6990_v8, %v4778_v30  ;;  %v6463_v25 = vld [vmem:[%s6907_s8 + $0x3c8] sm:$0xff] }
 0x16b   : > { %v5322_v33 = vmax.f32 %v5250_v31, 0.0  ;;  %v4391_v34 = vpop.f32.mrf.mxu2  ;;  %v4571_v35 = vpop.f32.mrf.mxu3 }
 0x16c   : > { %v4782_v36 = vsel %vm4736_vm3, %v4391_v34, -inf  ;;  %v4784_v37 = vsel %vm4736_vm3, %v4571_v35, -inf  ;;  %v4033_v38 = vpop.f32.mrf.mxu0  ;;  %v4213_v39 = vpop.f32.mrf.mxu1 }
 0x16d   : > { %v5394_v40 = vpack.c.bf16 %v5322_v33, %v5322_v33  ;;  %v4783_v41 = vmax.f32 %v4781_v32, %v4782_v36  ;;  %v4786_v43 = vsel %vm4736_vm3, %v4033_v38, -inf  ;;  %v4787_v44 = vsel %vm4736_vm3, %v4213_v39, -inf }
 0x16e   : > { %v4788_v47 = vmax.f32 %v4786_v43, %v4787_v44 }
 0x16f   : > { %5467 = vst.msk [vmem:[%s7000_s17 + $0x14] sm:$0xf] %vm5461_vm4, %v5394_v40  ;;  %v4785_v42 = vmax.f32 %v4783_v41, %v4784_v37 }
 0x171   : > { %v5251_v45 = vadd.f32 %v6990_v8, %v4785_v42 }
 0x173   : > { %v5323_v46 = vmax.f32 %v5251_v45, 0.0  ;;  %v4393_v48 = vpop.f32.mrf.mxu2  ;;  %v4573_v49 = vpop.f32.mrf.mxu3 }
 0x174   : > { %v4789_v52 = vsel %vm4736_vm3, %v4393_v48, -inf  ;;  %v4036_v53 = vpop.f32.mrf.mxu0  ;;  %v4216_v54 = vpop.f32.mrf.mxu1  ;;  %v4791_v59 = vsel %vm4736_vm3, %v4573_v49, -inf }
 0x175   : > { %v5395_v57 = vpack.c.bf16 %v5323_v46, %v5323_v46  ;;  %v4790_v58 = vmax.f32 %v4788_v47, %v4789_v52  ;;  %v4793_v60 = vsel %vm4736_vm3, %v4036_v53, -inf  ;;  %v4794_v61 = vsel %vm4736_vm3, %v4216_v54, -inf  ;;  %v6392_v52 = vld [vmem:[%s6907_s8 + $0x190] sm:$0xff] }
 0x176   : > { %v4795_v0 = vmax.f32 %v4793_v60, %v4794_v61 }
 0x177   : > { %5468 = vst.msk [vmem:[%s7000_s17 + $0x18] sm:$0xf] %vm5461_vm4, %v5395_v57  ;;  %v4792_v62 = vmax.f32 %v4790_v58, %v4791_v59  ;;  %6207 = vmatmul.msk.bf16.gmra.mxu0 %vm3567_vm2, %v6354_v50  ;;  %6243 = vmatmul.msk.bf16.gmra.mxu1 %vm3567_vm2, %v6390_v51  ;;  %v6356_v51 = vld [vmem:[%s6907_s8 + $0x70] sm:$0xff] }
 0x178   : > { %6279 = vmatmul.msk.bf16.gmra.mxu2 %vm3567_vm2, %v6426_v55  ;;  %6315 = vmatmul.msk.bf16.gmra.mxu3 %vm3567_vm2, %v6462_v56  ;;  %v6428_v56 = vld [vmem:[%s6907_s8 + $0x2b0] sm:$0xff] }
 0x179   : > { %v5252_v63 = vadd.f32 %v6990_v8, %v4792_v62  ;;  %v6464_v57 = vld [vmem:[%s6907_s8 + $0x3d0] sm:$0xff] }
 0x17b   : > { %v5324_v1 = vmax.f32 %v5252_v63, 0.0  ;;  %v4396_v2 = vpop.f32.mrf.mxu2  ;;  %v4576_v3 = vpop.f32.mrf.mxu3 }
 0x17c   : > { %v4796_v4 = vsel %vm4736_vm3, %v4396_v2, -inf  ;;  %v4798_v5 = vsel %vm4736_vm3, %v4576_v3, -inf  ;;  %v4038_v6 = vpop.f32.mrf.mxu0  ;;  %v4218_v7 = vpop.f32.mrf.mxu1 }
 0x17d   : > { %v5396_v9 = vpack.c.bf16 %v5324_v1, %v5324_v1  ;;  %v4797_v10 = vmax.f32 %v4795_v0, %v4796_v4  ;;  %v4800_v12 = vsel %vm4736_vm3, %v4038_v6, -inf  ;;  %v4801_v13 = vsel %vm4736_vm3, %v4218_v7, -inf }
 0x17e   : > { %v4802_v16 = vmax.f32 %v4800_v12, %v4801_v13 }
 0x17f   : > { %5469 = vst.msk [vmem:[%s7000_s17 + $0x1c] sm:$0xf] %vm5461_vm4, %v5396_v9  ;;  %v4799_v11 = vmax.f32 %v4797_v10, %v4798_v5 }
 0x181   : > { %v5253_v14 = vadd.f32 %v6990_v8, %v4799_v11 }
 0x183   : > { %v5325_v15 = vmax.f32 %v5253_v14, 0.0  ;;  %v4398_v17 = vpop.f32.mrf.mxu2  ;;  %v4578_v18 = vpop.f32.mrf.mxu3 }
 0x184   : > { %v4803_v21 = vsel %vm4736_vm3, %v4398_v17, -inf  ;;  %v4041_v22 = vpop.f32.mrf.mxu0  ;;  %v4221_v23 = vpop.f32.mrf.mxu1  ;;  %v4805_v28 = vsel %vm4736_vm3, %v4578_v18, -inf }
 0x185   : > { %v5397_v26 = vpack.c.bf16 %v5325_v15, %v5325_v15  ;;  %v4804_v27 = vmax.f32 %v4802_v16, %v4803_v21  ;;  %v4807_v29 = vsel %vm4736_vm3, %v4041_v22, -inf  ;;  %v4808_v30 = vsel %vm4736_vm3, %v4221_v23, -inf  ;;  %v6393_v21 = vld [vmem:[%s6907_s8 + $0x198] sm:$0xff] }
 0x186   : > { %v4809_v33 = vmax.f32 %v4807_v29, %v4808_v30 }
 0x187   : > { %5470 = vst.msk [vmem:[%s7000_s17 + $0x20] sm:$0xf] %vm5461_vm4, %v5397_v26  ;;  %v4806_v31 = vmax.f32 %v4804_v27, %v4805_v28  ;;  %6208 = vmatmul.msk.bf16.gmra.mxu0 %vm3567_vm2, %v6355_v19  ;;  %6244 = vmatmul.msk.bf16.gmra.mxu1 %vm3567_vm2, %v6391_v20  ;;  %v6357_v20 = vld [vmem:[%s6907_s8 + $0x78] sm:$0xff] }
 0x188   : > { %6280 = vmatmul.msk.bf16.gmra.mxu2 %vm3567_vm2, %v6427_v24  ;;  %6316 = vmatmul.msk.bf16.gmra.mxu3 %vm3567_vm2, %v6463_v25  ;;  %v6429_v25 = vld [vmem:[%s6907_s8 + $0x2b8] sm:$0xff] }
 0x189   : > { %v5254_v32 = vadd.f32 %v6990_v8, %v4806_v31  ;;  %v6465_v26 = vld [vmem:[%s6907_s8 + $0x3d8] sm:$0xff] }
 0x18b   : > { %v5326_v34 = vmax.f32 %v5254_v32, 0.0  ;;  %v4401_v35 = vpop.f32.mrf.mxu2  ;;  %v4581_v36 = vpop.f32.mrf.mxu3 }
 0x18c   : > { %v4810_v37 = vsel %vm4736_vm3, %v4401_v35, -inf  ;;  %v4812_v38 = vsel %vm4736_vm3, %v4581_v36, -inf  ;;  %v4043_v39 = vpop.f32.mrf.mxu0  ;;  %v4223_v40 = vpop.f32.mrf.mxu1 }
 0x18d   : > { %v5398_v41 = vpack.c.bf16 %v5326_v34, %v5326_v34  ;;  %v4811_v42 = vmax.f32 %v4809_v33, %v4810_v37  ;;  %v4814_v44 = vsel %vm4736_vm3, %v4043_v39, -inf  ;;  %v4815_v45 = vsel %vm4736_vm3, %v4223_v40, -inf }
 0x18e   : > { %v4816_v48 = vmax.f32 %v4814_v44, %v4815_v45 }
 0x18f   : > { %5471 = vst.msk [vmem:[%s7000_s17 + $0x24] sm:$0xf] %vm5461_vm4, %v5398_v41  ;;  %v4813_v43 = vmax.f32 %v4811_v42, %v4812_v38 }
 0x191   : > { %v5255_v46 = vadd.f32 %v6990_v8, %v4813_v43 }
 0x193   : > { %v5327_v47 = vmax.f32 %v5255_v46, 0.0  ;;  %v4403_v49 = vpop.f32.mrf.mxu2  ;;  %v4583_v50 = vpop.f32.mrf.mxu3 }
 0x194   : > { %v4817_v53 = vsel %vm4736_vm3, %v4403_v49, -inf  ;;  %v4046_v54 = vpop.f32.mrf.mxu0  ;;  %v4226_v55 = vpop.f32.mrf.mxu1  ;;  %v4819_v60 = vsel %vm4736_vm3, %v4583_v50, -inf }
 0x195   : > { %v5399_v58 = vpack.c.bf16 %v5327_v47, %v5327_v47  ;;  %v4818_v59 = vmax.f32 %v4816_v48, %v4817_v53  ;;  %v4821_v61 = vsel %vm4736_vm3, %v4046_v54, -inf  ;;  %v4822_v62 = vsel %vm4736_vm3, %v4226_v55, -inf  ;;  %v6394_v53 = vld [vmem:[%s6907_s8 + $0x1a0] sm:$0xff] }
 0x196   : > { %v4823_v1 = vmax.f32 %v4821_v61, %v4822_v62 }
 0x197   : > { %5472 = vst.msk [vmem:[%s7000_s17 + $0x28] sm:$0xf] %vm5461_vm4, %v5399_v58  ;;  %v4820_v63 = vmax.f32 %v4818_v59, %v4819_v60  ;;  %6209 = vmatmul.msk.bf16.gmra.mxu0 %vm3567_vm2, %v6356_v51  ;;  %6245 = vmatmul.msk.bf16.gmra.mxu1 %vm3567_vm2, %v6392_v52  ;;  %v6358_v52 = vld [vmem:[%s6907_s8 + $0x80] sm:$0xff] }
 0x198   : > { %6281 = vmatmul.msk.bf16.gmra.mxu2 %vm3567_vm2, %v6428_v56  ;;  %6317 = vmatmul.msk.bf16.gmra.mxu3 %vm3567_vm2, %v6464_v57  ;;  %v6430_v57 = vld [vmem:[%s6907_s8 + $0x2c0] sm:$0xff] }
 0x199   : > { %v5256_v0 = vadd.f32 %v6990_v8, %v4820_v63  ;;  %v6466_v58 = vld [vmem:[%s6907_s8 + $0x3e0] sm:$0xff] }
 0x19b   : > { %v5328_v2 = vmax.f32 %v5256_v0, 0.0  ;;  %v4406_v3 = vpop.f32.mrf.mxu2  ;;  %v4586_v4 = vpop.f32.mrf.mxu3 }
 0x19c   : > { %v4824_v5 = vsel %vm4736_vm3, %v4406_v3, -inf  ;;  %v4826_v6 = vsel %vm4736_vm3, %v4586_v4, -inf  ;;  %v4048_v7 = vpop.f32.mrf.mxu0  ;;  %v4228_v9 = vpop.f32.mrf.mxu1 }
 0x19d   : > { %v5400_v10 = vpack.c.bf16 %v5328_v2, %v5328_v2  ;;  %v4825_v11 = vmax.f32 %v4823_v1, %v4824_v5  ;;  %v4828_v13 = vsel %vm4736_vm3, %v4048_v7, -inf  ;;  %v4829_v14 = vsel %vm4736_vm3, %v4228_v9, -inf }
 0x19e   : > { %v4830_v17 = vmax.f32 %v4828_v13, %v4829_v14 }
 0x19f   : > { %5473 = vst.msk [vmem:[%s7000_s17 + $0x2c] sm:$0xf] %vm5461_vm4, %v5400_v10  ;;  %v4827_v12 = vmax.f32 %v4825_v11, %v4826_v6 }
 0x1a1   : > { %v5257_v15 = vadd.f32 %v6990_v8, %v4827_v12 }
 0x1a3   : > { %v5329_v16 = vmax.f32 %v5257_v15, 0.0  ;;  %v4408_v18 = vpop.f32.mrf.mxu2  ;;  %v4588_v19 = vpop.f32.mrf.mxu3 }
 0x1a4   : > { %v4831_v22 = vsel %vm4736_vm3, %v4408_v18, -inf  ;;  %v4051_v23 = vpop.f32.mrf.mxu0  ;;  %v4231_v24 = vpop.f32.mrf.mxu1  ;;  %v4833_v29 = vsel %vm4736_vm3, %v4588_v19, -inf }
 0x1a5   : > { %v5401_v27 = vpack.c.bf16 %v5329_v16, %v5329_v16  ;;  %v4832_v28 = vmax.f32 %v4830_v17, %v4831_v22  ;;  %v4835_v30 = vsel %vm4736_vm3, %v4051_v23, -inf  ;;  %v4836_v31 = vsel %vm4736_vm3, %v4231_v24, -inf  ;;  %v6395_v22 = vld [vmem:[%s6907_s8 + $0x1a8] sm:$0xff] }
 0x1a6   : > { %v4837_v34 = vmax.f32 %v4835_v30, %v4836_v31 }
 0x1a7   : > { %5474 = vst.msk [vmem:[%s7000_s17 + $0x30] sm:$0xf] %vm5461_vm4, %v5401_v27  ;;  %v4834_v32 = vmax.f32 %v4832_v28, %v4833_v29  ;;  %6210 = vmatmul.msk.bf16.gmra.mxu0 %vm3567_vm2, %v6357_v20  ;;  %6246 = vmatmul.msk.bf16.gmra.mxu1 %vm3567_vm2, %v6393_v21  ;;  %v6359_v21 = vld [vmem:[%s6907_s8 + $0x88] sm:$0xff] }
 0x1a8   : > { %6282 = vmatmul.msk.bf16.gmra.mxu2 %vm3567_vm2, %v6429_v25  ;;  %6318 = vmatmul.msk.bf16.gmra.mxu3 %vm3567_vm2, %v6465_v26  ;;  %v6431_v26 = vld [vmem:[%s6907_s8 + $0x2c8] sm:$0xff] }
 0x1a9   : > { %v5258_v33 = vadd.f32 %v6990_v8, %v4834_v32  ;;  %v6467_v27 = vld [vmem:[%s6907_s8 + $0x3e8] sm:$0xff] }
 0x1ab   : > { %v5330_v35 = vmax.f32 %v5258_v33, 0.0  ;;  %v4411_v36 = vpop.f32.mrf.mxu2  ;;  %v4591_v37 = vpop.f32.mrf.mxu3 }
 0x1ac   : > { %v4838_v38 = vsel %vm4736_vm3, %v4411_v36, -inf  ;;  %v4840_v39 = vsel %vm4736_vm3, %v4591_v37, -inf  ;;  %v4053_v40 = vpop.f32.mrf.mxu0  ;;  %v4233_v41 = vpop.f32.mrf.mxu1 }
 0x1ad   : > { %v5402_v42 = vpack.c.bf16 %v5330_v35, %v5330_v35  ;;  %v4839_v43 = vmax.f32 %v4837_v34, %v4838_v38  ;;  %v4842_v45 = vsel %vm4736_vm3, %v4053_v40, -inf  ;;  %v4843_v46 = vsel %vm4736_vm3, %v4233_v41, -inf }
 0x1ae   : > { %v4844_v49 = vmax.f32 %v4842_v45, %v4843_v46 }
 0x1af   : > { %5475 = vst.msk [vmem:[%s7000_s17 + $0x34] sm:$0xf] %vm5461_vm4, %v5402_v42  ;;  %v4841_v44 = vmax.f32 %v4839_v43, %v4840_v39 }
 0x1b1   : > { %v5259_v47 = vadd.f32 %v6990_v8, %v4841_v44 }
 0x1b3   : > { %v5331_v48 = vmax.f32 %v5259_v47, 0.0  ;;  %v4413_v50 = vpop.f32.mrf.mxu2  ;;  %v4593_v51 = vpop.f32.mrf.mxu3 }
 0x1b4   : > { %v4845_v54 = vsel %vm4736_vm3, %v4413_v50, -inf  ;;  %v4056_v55 = vpop.f32.mrf.mxu0  ;;  %v4236_v56 = vpop.f32.mrf.mxu1  ;;  %v4847_v61 = vsel %vm4736_vm3, %v4593_v51, -inf }
 0x1b5   : > { %v5403_v59 = vpack.c.bf16 %v5331_v48, %v5331_v48  ;;  %v4846_v60 = vmax.f32 %v4844_v49, %v4845_v54  ;;  %v4849_v62 = vsel %vm4736_vm3, %v4056_v55, -inf  ;;  %v4850_v63 = vsel %vm4736_vm3, %v4236_v56, -inf  ;;  %v6396_v54 = vld [vmem:[%s6907_s8 + $0x1b0] sm:$0xff] }
 0x1b6   : > { %v4851_v2 = vmax.f32 %v4849_v62, %v4850_v63 }
 0x1b7   : > { %5476 = vst.msk [vmem:[%s7000_s17 + $0x38] sm:$0xf] %vm5461_vm4, %v5403_v59  ;;  %v4848_v0 = vmax.f32 %v4846_v60, %v4847_v61  ;;  %6211 = vmatmul.msk.bf16.gmra.mxu0 %vm3567_vm2, %v6358_v52  ;;  %6247 = vmatmul.msk.bf16.gmra.mxu1 %vm3567_vm2, %v6394_v53  ;;  %v6360_v53 = vld [vmem:[%s6907_s8 + $0x90] sm:$0xff] }
 0x1b8   : > { %6283 = vmatmul.msk.bf16.gmra.mxu2 %vm3567_vm2, %v6430_v57  ;;  %6319 = vmatmul.msk.bf16.gmra.mxu3 %vm3567_vm2, %v6466_v58  ;;  %v6432_v58 = vld [vmem:[%s6907_s8 + $0x2d0] sm:$0xff] }
 0x1b9   : > { %v5260_v1 = vadd.f32 %v6990_v8, %v4848_v0  ;;  %v6468_v59 = vld [vmem:[%s6907_s8 + $0x3f0] sm:$0xff] }
 0x1bb   : > { %v5332_v3 = vmax.f32 %v5260_v1, 0.0  ;;  %v4416_v4 = vpop.f32.mrf.mxu2  ;;  %v4596_v5 = vpop.f32.mrf.mxu3 }
 0x1bc   : > { %v4852_v6 = vsel %vm4736_vm3, %v4416_v4, -inf  ;;  %v4854_v7 = vsel %vm4736_vm3, %v4596_v5, -inf  ;;  %v4058_v9 = vpop.f32.mrf.mxu0  ;;  %v4238_v10 = vpop.f32.mrf.mxu1 }
 0x1bd   : > { %v5404_v11 = vpack.c.bf16 %v5332_v3, %v5332_v3  ;;  %v4853_v12 = vmax.f32 %v4851_v2, %v4852_v6  ;;  %v4856_v14 = vsel %vm4736_vm3, %v4058_v9, -inf  ;;  %v4857_v15 = vsel %vm4736_vm3, %v4238_v10, -inf }
 0x1be   : > { %v4858_v18 = vmax.f32 %v4856_v14, %v4857_v15 }
 0x1bf   : > { %5477 = vst.msk [vmem:[%s7000_s17 + $0x3c] sm:$0xf] %vm5461_vm4, %v5404_v11  ;;  %v4855_v13 = vmax.f32 %v4853_v12, %v4854_v7 }
 0x1c1   : > { %v5261_v16 = vadd.f32 %v6990_v8, %v4855_v13 }
 0x1c3   : > { %v5333_v17 = vmax.f32 %v5261_v16, 0.0  ;;  %v4418_v19 = vpop.f32.mrf.mxu2  ;;  %v4598_v20 = vpop.f32.mrf.mxu3 }
 0x1c4   : > { %v4859_v23 = vsel %vm4736_vm3, %v4418_v19, -inf  ;;  %v4061_v24 = vpop.f32.mrf.mxu0  ;;  %v4241_v25 = vpop.f32.mrf.mxu1  ;;  %v4861_v30 = vsel %vm4736_vm3, %v4598_v20, -inf }
 0x1c5   : > { %v5405_v28 = vpack.c.bf16 %v5333_v17, %v5333_v17  ;;  %v4860_v29 = vmax.f32 %v4858_v18, %v4859_v23  ;;  %v4863_v31 = vsel %vm4736_vm3, %v4061_v24, -inf  ;;  %v4864_v32 = vsel %vm4736_vm3, %v4241_v25, -inf  ;;  %v6397_v23 = vld [vmem:[%s6907_s8 + $0x1b8] sm:$0xff] }
 0x1c6   : > { %v4865_v35 = vmax.f32 %v4863_v31, %v4864_v32 }
 0x1c7   : > { %5478 = vst.msk [vmem:[%s7000_s17 + $0x40] sm:$0xf] %vm5461_vm4, %v5405_v28  ;;  %v4862_v33 = vmax.f32 %v4860_v29, %v4861_v30  ;;  %6212 = vmatmul.msk.bf16.gmra.mxu0 %vm3567_vm2, %v6359_v21  ;;  %6248 = vmatmul.msk.bf16.gmra.mxu1 %vm3567_vm2, %v6395_v22  ;;  %v6361_v22 = vld [vmem:[%s6907_s8 + $0x98] sm:$0xff] }
 0x1c8   : > { %6284 = vmatmul.msk.bf16.gmra.mxu2 %vm3567_vm2, %v6431_v26  ;;  %6320 = vmatmul.msk.bf16.gmra.mxu3 %vm3567_vm2, %v6467_v27  ;;  %v6433_v27 = vld [vmem:[%s6907_s8 + $0x2d8] sm:$0xff] }
 0x1c9   : > { %v5262_v34 = vadd.f32 %v6990_v8, %v4862_v33  ;;  %v6469_v28 = vld [vmem:[%s6907_s8 + $0x3f8] sm:$0xff] }
 0x1cb   : > { %v5334_v36 = vmax.f32 %v5262_v34, 0.0  ;;  %v4421_v37 = vpop.f32.mrf.mxu2  ;;  %v4601_v38 = vpop.f32.mrf.mxu3 }
 0x1cc   : > { %v4866_v39 = vsel %vm4736_vm3, %v4421_v37, -inf  ;;  %v4868_v40 = vsel %vm4736_vm3, %v4601_v38, -inf  ;;  %v4063_v41 = vpop.f32.mrf.mxu0  ;;  %v4243_v42 = vpop.f32.mrf.mxu1 }
 0x1cd   : > { %v5406_v43 = vpack.c.bf16 %v5334_v36, %v5334_v36  ;;  %v4867_v44 = vmax.f32 %v4865_v35, %v4866_v39  ;;  %v4870_v46 = vsel %vm4736_vm3, %v4063_v41, -inf  ;;  %v4871_v47 = vsel %vm4736_vm3, %v4243_v42, -inf }
 0x1ce   : > { %v4872_v50 = vmax.f32 %v4870_v46, %v4871_v47 }
 0x1cf   : > { %5479 = vst.msk [vmem:[%s7000_s17 + $0x44] sm:$0xf] %vm5461_vm4, %v5406_v43  ;;  %v4869_v45 = vmax.f32 %v4867_v44, %v4868_v40 }
 0x1d1   : > { %v5263_v48 = vadd.f32 %v6990_v8, %v4869_v45 }
 0x1d3   : > { %v5335_v49 = vmax.f32 %v5263_v48, 0.0  ;;  %v4423_v51 = vpop.f32.mrf.mxu2  ;;  %v4603_v52 = vpop.f32.mrf.mxu3 }
 0x1d4   : > { %v4873_v55 = vsel %vm4736_vm3, %v4423_v51, -inf  ;;  %v4066_v56 = vpop.f32.mrf.mxu0  ;;  %v4246_v57 = vpop.f32.mrf.mxu1  ;;  %v4875_v62 = vsel %vm4736_vm3, %v4603_v52, -inf }
 0x1d5   : > { %v5407_v60 = vpack.c.bf16 %v5335_v49, %v5335_v49  ;;  %v4874_v61 = vmax.f32 %v4872_v50, %v4873_v55  ;;  %v4877_v63 = vsel %vm4736_vm3, %v4066_v56, -inf  ;;  %v4878_v0 = vsel %vm4736_vm3, %v4246_v57, -inf  ;;  %v6398_v55 = vld [vmem:[%s6907_s8 + $0x1c0] sm:$0xff] }
 0x1d6   : > { %v4879_v3 = vmax.f32 %v4877_v63, %v4878_v0 }
 0x1d7   : > { %5480 = vst.msk [vmem:[%s7000_s17 + $0x48] sm:$0xf] %vm5461_vm4, %v5407_v60  ;;  %v4876_v1 = vmax.f32 %v4874_v61, %v4875_v62  ;;  %6213 = vmatmul.msk.bf16.gmra.mxu0 %vm3567_vm2, %v6360_v53  ;;  %6249 = vmatmul.msk.bf16.gmra.mxu1 %vm3567_vm2, %v6396_v54  ;;  %v6362_v54 = vld [vmem:[%s6907_s8 + $0xa0] sm:$0xff] }
 0x1d8   : > { %6285 = vmatmul.msk.bf16.gmra.mxu2 %vm3567_vm2, %v6432_v58  ;;  %6321 = vmatmul.msk.bf16.gmra.mxu3 %vm3567_vm2, %v6468_v59  ;;  %v6434_v59 = vld [vmem:[%s6907_s8 + $0x2e0] sm:$0xff] }
 0x1d9   : > { %v5264_v2 = vadd.f32 %v6990_v8, %v4876_v1  ;;  %v6470_v60 = vld [vmem:[%s6907_s8 + $0x400] sm:$0xff] }
 0x1db   : > { %v5336_v4 = vmax.f32 %v5264_v2, 0.0  ;;  %v4426_v5 = vpop.f32.mrf.mxu2  ;;  %v4606_v6 = vpop.f32.mrf.mxu3 }
 0x1dc   : > { %v4880_v7 = vsel %vm4736_vm3, %v4426_v5, -inf  ;;  %v4882_v9 = vsel %vm4736_vm3, %v4606_v6, -inf  ;;  %v4068_v10 = vpop.f32.mrf.mxu0  ;;  %v4248_v11 = vpop.f32.mrf.mxu1 }
 0x1dd   : > { %v5408_v12 = vpack.c.bf16 %v5336_v4, %v5336_v4  ;;  %v4881_v13 = vmax.f32 %v4879_v3, %v4880_v7  ;;  %v4884_v15 = vsel %vm4736_vm3, %v4068_v10, -inf  ;;  %v4885_v16 = vsel %vm4736_vm3, %v4248_v11, -inf }
 0x1de   : > { %v4886_v19 = vmax.f32 %v4884_v15, %v4885_v16 }
 0x1df   : > { %5481 = vst.msk [vmem:[%s7000_s17 + $0x4c] sm:$0xf] %vm5461_vm4, %v5408_v12  ;;  %v4883_v14 = vmax.f32 %v4881_v13, %v4882_v9 }
 0x1e1   : > { %v5265_v17 = vadd.f32 %v6990_v8, %v4883_v14 }
 0x1e3   : > { %v5337_v18 = vmax.f32 %v5265_v17, 0.0  ;;  %v4428_v20 = vpop.f32.mrf.mxu2  ;;  %v4608_v21 = vpop.f32.mrf.mxu3 }
 0x1e4   : > { %v4887_v24 = vsel %vm4736_vm3, %v4428_v20, -inf  ;;  %v4071_v25 = vpop.f32.mrf.mxu0  ;;  %v4251_v26 = vpop.f32.mrf.mxu1  ;;  %v4889_v31 = vsel %vm4736_vm3, %v4608_v21, -inf }
 0x1e5   : > { %v5409_v29 = vpack.c.bf16 %v5337_v18, %v5337_v18  ;;  %v4888_v30 = vmax.f32 %v4886_v19, %v4887_v24  ;;  %v4891_v32 = vsel %vm4736_vm3, %v4071_v25, -inf  ;;  %v4892_v33 = vsel %vm4736_vm3, %v4251_v26, -inf  ;;  %v6399_v24 = vld [vmem:[%s6907_s8 + $0x1c8] sm:$0xff] }
 0x1e6   : > { %v4893_v36 = vmax.f32 %v4891_v32, %v4892_v33 }
 0x1e7   : > { %5482 = vst.msk [vmem:[%s7000_s17 + $0x50] sm:$0xf] %vm5461_vm4, %v5409_v29  ;;  %v4890_v34 = vmax.f32 %v4888_v30, %v4889_v31  ;;  %6214 = vmatmul.msk.bf16.gmra.mxu0 %vm3567_vm2, %v6361_v22  ;;  %6250 = vmatmul.msk.bf16.gmra.mxu1 %vm3567_vm2, %v6397_v23  ;;  %v6363_v23 = vld [vmem:[%s6907_s8 + $0xa8] sm:$0xff] }
 0x1e8   : > { %6286 = vmatmul.msk.bf16.gmra.mxu2 %vm3567_vm2, %v6433_v27  ;;  %6322 = vmatmul.msk.bf16.gmra.mxu3 %vm3567_vm2, %v6469_v28  ;;  %v6435_v28 = vld [vmem:[%s6907_s8 + $0x2e8] sm:$0xff] }
 0x1e9   : > { %v5266_v35 = vadd.f32 %v6990_v8, %v4890_v34  ;;  %v6471_v29 = vld [vmem:[%s6907_s8 + $0x408] sm:$0xff] }
 0x1eb   : > { %v5338_v37 = vmax.f32 %v5266_v35, 0.0  ;;  %v4431_v38 = vpop.f32.mrf.mxu2  ;;  %v4611_v39 = vpop.f32.mrf.mxu3 }
 0x1ec   : > { %v4894_v40 = vsel %vm4736_vm3, %v4431_v38, -inf  ;;  %v4896_v41 = vsel %vm4736_vm3, %v4611_v39, -inf  ;;  %v4073_v42 = vpop.f32.mrf.mxu0  ;;  %v4253_v43 = vpop.f32.mrf.mxu1 }
 0x1ed   : > { %v5410_v44 = vpack.c.bf16 %v5338_v37, %v5338_v37  ;;  %v4895_v45 = vmax.f32 %v4893_v36, %v4894_v40  ;;  %v4898_v47 = vsel %vm4736_vm3, %v4073_v42, -inf  ;;  %v4899_v48 = vsel %vm4736_vm3, %v4253_v43, -inf }
 0x1ee   : > { %v4900_v51 = vmax.f32 %v4898_v47, %v4899_v48 }
 0x1ef   : > { %5483 = vst.msk [vmem:[%s7000_s17 + $0x54] sm:$0xf] %vm5461_vm4, %v5410_v44  ;;  %v4897_v46 = vmax.f32 %v4895_v45, %v4896_v41 }
 0x1f1   : > { %v5267_v49 = vadd.f32 %v6990_v8, %v4897_v46 }
 0x1f3   : > { %v5339_v50 = vmax.f32 %v5267_v49, 0.0  ;;  %v4433_v52 = vpop.f32.mrf.mxu2  ;;  %v4613_v53 = vpop.f32.mrf.mxu3 }
 0x1f4   : > { %v4901_v56 = vsel %vm4736_vm3, %v4433_v52, -inf  ;;  %v4076_v57 = vpop.f32.mrf.mxu0  ;;  %v4256_v58 = vpop.f32.mrf.mxu1  ;;  %v4903_v63 = vsel %vm4736_vm3, %v4613_v53, -inf }
 0x1f5   : > { %v5411_v61 = vpack.c.bf16 %v5339_v50, %v5339_v50  ;;  %v4902_v62 = vmax.f32 %v4900_v51, %v4901_v56  ;;  %v4905_v0 = vsel %vm4736_vm3, %v4076_v57, -inf  ;;  %v4906_v1 = vsel %vm4736_vm3, %v4256_v58, -inf  ;;  %v6400_v56 = vld [vmem:[%s6907_s8 + $0x1d0] sm:$0xff] }
 0x1f6   : > { %v4907_v4 = vmax.f32 %v4905_v0, %v4906_v1 }
 0x1f7   : > { %5484 = vst.msk [vmem:[%s7000_s17 + $0x58] sm:$0xf] %vm5461_vm4, %v5411_v61  ;;  %v4904_v2 = vmax.f32 %v4902_v62, %v4903_v63  ;;  %6215 = vmatmul.msk.bf16.gmra.mxu0 %vm3567_vm2, %v6362_v54  ;;  %6251 = vmatmul.msk.bf16.gmra.mxu1 %vm3567_vm2, %v6398_v55  ;;  %v6364_v55 = vld [vmem:[%s6907_s8 + $0xb0] sm:$0xff] }
 0x1f8   : > { %6287 = vmatmul.msk.bf16.gmra.mxu2 %vm3567_vm2, %v6434_v59  ;;  %6323 = vmatmul.msk.bf16.gmra.mxu3 %vm3567_vm2, %v6470_v60  ;;  %v6436_v60 = vld [vmem:[%s6907_s8 + $0x2f0] sm:$0xff] }
 0x1f9   : > { %v5268_v3 = vadd.f32 %v6990_v8, %v4904_v2  ;;  %v6472_v61 = vld [vmem:[%s6907_s8 + $0x410] sm:$0xff] }
 0x1fb   : > { %v5340_v5 = vmax.f32 %v5268_v3, 0.0  ;;  %v4436_v6 = vpop.f32.mrf.mxu2  ;;  %v4616_v7 = vpop.f32.mrf.mxu3  ;;  %v7303_v3 = vld [vmem:[%s7735_s2] ss:$0 sm:$0xff] }
 0x1fc   : > { %v4908_v9 = vsel %vm4736_vm3, %v4436_v6, -inf  ;;  %v4910_v10 = vsel %vm4736_vm3, %v4616_v7, -inf  ;;  %v4078_v11 = vpop.f32.mrf.mxu0  ;;  %v4258_v12 = vpop.f32.mrf.mxu1 }
 0x1fd   : > { %v5412_v13 = vpack.c.bf16 %v5340_v5, %v5340_v5  ;;  %v4909_v14 = vmax.f32 %v4907_v4, %v4908_v9  ;;  %v4912_v16 = vsel %vm4736_vm3, %v4078_v11, -inf  ;;  %v4913_v17 = vsel %vm4736_vm3, %v4258_v12, -inf }
 0x1fe   : > { %v4914_v20 = vmax.f32 %v4912_v16, %v4913_v17 }
 0x1ff   : > { %5485 = vst.msk [vmem:[%s7000_s17 + $0x5c] sm:$0xf] %vm5461_vm4, %v5412_v13  ;;  %v4911_v15 = vmax.f32 %v4909_v14, %v4910_v10 }
 0x201   : > { %v5269_v18 = vadd.f32 %v6990_v8, %v4911_v15 }
 0x203   : > { %v5341_v19 = vmax.f32 %v5269_v18, 0.0  ;;  %v4438_v21 = vpop.f32.mrf.mxu2  ;;  %v4618_v22 = vpop.f32.mrf.mxu3 }
 0x204   : > { %v4915_v25 = vsel %vm4736_vm3, %v4438_v21, -inf  ;;  %v4081_v26 = vpop.f32.mrf.mxu0  ;;  %v4261_v27 = vpop.f32.mrf.mxu1  ;;  %v4917_v32 = vsel %vm4736_vm3, %v4618_v22, -inf }
 0x205   : > { %v5413_v30 = vpack.c.bf16 %v5341_v19, %v5341_v19  ;;  %v4916_v31 = vmax.f32 %v4914_v20, %v4915_v25  ;;  %v4919_v33 = vsel %vm4736_vm3, %v4081_v26, -inf  ;;  %v4920_v34 = vsel %vm4736_vm3, %v4261_v27, -inf  ;;  %v6401_v25 = vld [vmem:[%s6907_s8 + $0x1d8] sm:$0xff] }
 0x206   : > { %v4921_v37 = vmax.f32 %v4919_v33, %v4920_v34 }
 0x207   : > { %5486 = vst.msk [vmem:[%s7000_s17 + $0x60] sm:$0xf] %vm5461_vm4, %v5413_v30  ;;  %v4918_v35 = vmax.f32 %v4916_v31, %v4917_v32  ;;  %6216 = vmatmul.msk.bf16.gmra.mxu0 %vm3567_vm2, %v6363_v23  ;;  %6252 = vmatmul.msk.bf16.gmra.mxu1 %vm3567_vm2, %v6399_v24  ;;  %v6365_v24 = vld [vmem:[%s6907_s8 + $0xb8] sm:$0xff] }
 0x208   : > { %6288 = vmatmul.msk.bf16.gmra.mxu2 %vm3567_vm2, %v6435_v28  ;;  %6324 = vmatmul.msk.bf16.gmra.mxu3 %vm3567_vm2, %v6471_v29  ;;  %v6437_v29 = vld [vmem:[%s6907_s8 + $0x2f8] sm:$0xff] }
 0x209   : > { %v5270_v36 = vadd.f32 %v6990_v8, %v4918_v35  ;;  %v6473_v30 = vld [vmem:[%s6907_s8 + $0x418] sm:$0xff] }
 0x20b   : > { %v5342_v38 = vmax.f32 %v5270_v36, 0.0  ;;  %v4441_v39 = vpop.f32.mrf.mxu2  ;;  %v4621_v40 = vpop.f32.mrf.mxu3 }
 0x20c   : > { %v4922_v41 = vsel %vm4736_vm3, %v4441_v39, -inf  ;;  %v4924_v42 = vsel %vm4736_vm3, %v4621_v40, -inf  ;;  %v4083_v43 = vpop.f32.mrf.mxu0  ;;  %v4263_v44 = vpop.f32.mrf.mxu1 }
 0x20d   : > { %v5414_v45 = vpack.c.bf16 %v5342_v38, %v5342_v38  ;;  %v4923_v46 = vmax.f32 %v4921_v37, %v4922_v41  ;;  %v4926_v48 = vsel %vm4736_vm3, %v4083_v43, -inf  ;;  %v4927_v49 = vsel %vm4736_vm3, %v4263_v44, -inf }
 0x20e   : > { %v4928_v52 = vmax.f32 %v4926_v48, %v4927_v49 }
 0x20f   : > { %5487 = vst.msk [vmem:[%s7000_s17 + $0x64] sm:$0xf] %vm5461_vm4, %v5414_v45  ;;  %v4925_v47 = vmax.f32 %v4923_v46, %v4924_v42 }
 0x211   : > { %v5271_v50 = vadd.f32 %v6990_v8, %v4925_v47 }
 0x213   : > { %v5343_v51 = vmax.f32 %v5271_v50, 0.0  ;;  %v4443_v53 = vpop.f32.mrf.mxu2  ;;  %v4623_v54 = vpop.f32.mrf.mxu3 }
 0x214   : > { %v4929_v57 = vsel %vm4736_vm3, %v4443_v53, -inf  ;;  %v4086_v58 = vpop.f32.mrf.mxu0  ;;  %v4266_v59 = vpop.f32.mrf.mxu1  ;;  %v4931_v0 = vsel %vm4736_vm3, %v4623_v54, -inf }
 0x215   : > { %v5415_v62 = vpack.c.bf16 %v5343_v51, %v5343_v51  ;;  %v4930_v63 = vmax.f32 %v4928_v52, %v4929_v57  ;;  %v4933_v1 = vsel %vm4736_vm3, %v4086_v58, -inf  ;;  %v4934_v8 = vsel %vm4736_vm3, %v4266_v59, -inf  ;;  %v6402_v57 = vld [vmem:[%s6907_s8 + $0x1e0] sm:$0xff] }
 0x216   : > { %v4935_v5 = vmax.f32 %v4933_v1, %v4934_v8 }
 0x217   : > { %5488 = vst.msk [vmem:[%s7000_s17 + $0x68] sm:$0xf] %vm5461_vm4, %v5415_v62  ;;  %v4932_v2 = vmax.f32 %v4930_v63, %v4931_v0  ;;  %6217 = vmatmul.msk.bf16.gmra.mxu0 %vm3567_vm2, %v6364_v55  ;;  %6253 = vmatmul.msk.bf16.gmra.mxu1 %vm3567_vm2, %v6400_v56  ;;  %v6366_v56 = vld [vmem:[%s6907_s8 + $0xc0] sm:$0xff] }
 0x218   : > { %6289 = vmatmul.msk.bf16.gmra.mxu2 %vm3567_vm2, %v6436_v60  ;;  %6325 = vmatmul.msk.bf16.gmra.mxu3 %vm3567_vm2, %v6472_v61  ;;  %v6438_v61 = vld [vmem:[%s6907_s8 + $0x300] sm:$0xff] }
 0x219   : > { %v5272_v4 = vadd.f32 %v7303_v3, %v4932_v2  ;;  %v6474_v62 = vld [vmem:[%s6907_s8 + $0x420] sm:$0xff] }
 0x21b   : > { %v5344_v6 = vmax.f32 %v5272_v4, 0.0  ;;  %v4446_v7 = vpop.f32.mrf.mxu2  ;;  %v4626_v9 = vpop.f32.mrf.mxu3 }
 0x21c   : > { %v4936_v10 = vsel %vm4736_vm3, %v4446_v7, -inf  ;;  %v4938_v11 = vsel %vm4736_vm3, %v4626_v9, -inf  ;;  %v4088_v12 = vpop.f32.mrf.mxu0  ;;  %v4268_v13 = vpop.f32.mrf.mxu1 }
 0x21d   : > { %v5416_v14 = vpack.c.bf16 %v5344_v6, %v5344_v6  ;;  %v4937_v15 = vmax.f32 %v4935_v5, %v4936_v10  ;;  %v4940_v17 = vsel %vm4736_vm3, %v4088_v12, -inf  ;;  %v4941_v18 = vsel %vm4736_vm3, %v4268_v13, -inf }
 0x21e   : > { %v4942_v21 = vmax.f32 %v4940_v17, %v4941_v18 }
 0x21f   : > { %5489 = vst.msk [vmem:[%s7000_s17 + $0x6c] sm:$0xf] %vm5461_vm4, %v5416_v14  ;;  %v4939_v16 = vmax.f32 %v4937_v15, %v4938_v11 }
 0x221   : > { %v5273_v19 = vadd.f32 %v7303_v3, %v4939_v16 }
 0x223   : > { %v5345_v20 = vmax.f32 %v5273_v19, 0.0  ;;  %v4448_v22 = vpop.f32.mrf.mxu2  ;;  %v4628_v23 = vpop.f32.mrf.mxu3 }
 0x224   : > { %v4943_v26 = vsel %vm4736_vm3, %v4448_v22, -inf  ;;  %v4091_v27 = vpop.f32.mrf.mxu0  ;;  %v4271_v28 = vpop.f32.mrf.mxu1  ;;  %v4945_v33 = vsel %vm4736_vm3, %v4628_v23, -inf }
 0x225   : > { %v5417_v31 = vpack.c.bf16 %v5345_v20, %v5345_v20  ;;  %v4944_v32 = vmax.f32 %v4942_v21, %v4943_v26  ;;  %v4947_v34 = vsel %vm4736_vm3, %v4091_v27, -inf  ;;  %v4948_v35 = vsel %vm4736_vm3, %v4271_v28, -inf  ;;  %v6403_v26 = vld [vmem:[%s6907_s8 + $0x1e8] sm:$0xff] }
 0x226   : > { %v4949_v38 = vmax.f32 %v4947_v34, %v4948_v35 }
 0x227   : > { %5490 = vst.msk [vmem:[%s7000_s17 + $0x70] sm:$0xf] %vm5461_vm4, %v5417_v31  ;;  %v4946_v36 = vmax.f32 %v4944_v32, %v4945_v33  ;;  %6218 = vmatmul.msk.bf16.gmra.mxu0 %vm3567_vm2, %v6365_v24  ;;  %6254 = vmatmul.msk.bf16.gmra.mxu1 %vm3567_vm2, %v6401_v25  ;;  %v6367_v25 = vld [vmem:[%s6907_s8 + $0xc8] sm:$0xff] }
 0x228   : > { %6290 = vmatmul.msk.bf16.gmra.mxu2 %vm3567_vm2, %v6437_v29  ;;  %6326 = vmatmul.msk.bf16.gmra.mxu3 %vm3567_vm2, %v6473_v30  ;;  %v6439_v30 = vld [vmem:[%s6907_s8 + $0x308] sm:$0xff] }
 0x229   : > { %v5274_v37 = vadd.f32 %v7303_v3, %v4946_v36  ;;  %v6475_v31 = vld [vmem:[%s6907_s8 + $0x428] sm:$0xff] }
 0x22b   : > { %v5346_v39 = vmax.f32 %v5274_v37, 0.0  ;;  %v4451_v40 = vpop.f32.mrf.mxu2  ;;  %v4631_v41 = vpop.f32.mrf.mxu3 }
 0x22c   : > { %v4950_v42 = vsel %vm4736_vm3, %v4451_v40, -inf  ;;  %v4952_v43 = vsel %vm4736_vm3, %v4631_v41, -inf  ;;  %v4093_v44 = vpop.f32.mrf.mxu0  ;;  %v4273_v45 = vpop.f32.mrf.mxu1 }
 0x22d   : > { %v5418_v46 = vpack.c.bf16 %v5346_v39, %v5346_v39  ;;  %v4951_v47 = vmax.f32 %v4949_v38, %v4950_v42  ;;  %v4954_v49 = vsel %vm4736_vm3, %v4093_v44, -inf  ;;  %v4955_v50 = vsel %vm4736_vm3, %v4273_v45, -inf }
 0x22e   : > { %v4956_v53 = vmax.f32 %v4954_v49, %v4955_v50 }
 0x22f   : > { %5491 = vst.msk [vmem:[%s7000_s17 + $0x74] sm:$0xf] %vm5461_vm4, %v5418_v46  ;;  %v4953_v48 = vmax.f32 %v4951_v47, %v4952_v43 }
 0x231   : > { %v5275_v51 = vadd.f32 %v7303_v3, %v4953_v48 }
 0x233   : > { %v5347_v52 = vmax.f32 %v5275_v51, 0.0  ;;  %v4453_v54 = vpop.f32.mrf.mxu2  ;;  %v4633_v55 = vpop.f32.mrf.mxu3 }
 0x234   : > { %v4957_v58 = vsel %vm4736_vm3, %v4453_v54, -inf  ;;  %v4096_v59 = vpop.f32.mrf.mxu0  ;;  %v4276_v60 = vpop.f32.mrf.mxu1  ;;  %v4959_v1 = vsel %vm4736_vm3, %v4633_v55, -inf }
 0x235   : > { %v5419_v63 = vpack.c.bf16 %v5347_v52, %v5347_v52  ;;  %v4958_v0 = vmax.f32 %v4956_v53, %v4957_v58  ;;  %v4961_v8 = vsel %vm4736_vm3, %v4096_v59, -inf  ;;  %v4962_v2 = vsel %vm4736_vm3, %v4276_v60, -inf  ;;  %v6404_v58 = vld [vmem:[%s6907_s8 + $0x1f0] sm:$0xff] }
 0x236   : > { %v4963_v6 = vmax.f32 %v4961_v8, %v4962_v2 }
 0x237   : > { %5492 = vst.msk [vmem:[%s7000_s17 + $0x78] sm:$0xf] %vm5461_vm4, %v5419_v63  ;;  %v4960_v4 = vmax.f32 %v4958_v0, %v4959_v1  ;;  %6219 = vmatmul.msk.bf16.gmra.mxu0 %vm3567_vm2, %v6366_v56  ;;  %6255 = vmatmul.msk.bf16.gmra.mxu1 %vm3567_vm2, %v6402_v57  ;;  %v6368_v57 = vld [vmem:[%s6907_s8 + $0xd0] sm:$0xff] }
 0x238   : > { %6291 = vmatmul.msk.bf16.gmra.mxu2 %vm3567_vm2, %v6438_v61  ;;  %6327 = vmatmul.msk.bf16.gmra.mxu3 %vm3567_vm2, %v6474_v62  ;;  %v6440_v62 = vld [vmem:[%s6907_s8 + $0x310] sm:$0xff] }
 0x239   : > { %v5276_v5 = vadd.f32 %v7303_v3, %v4960_v4  ;;  %v6476_v63 = vld [vmem:[%s6907_s8 + $0x430] sm:$0xff] }
 0x23b   : > { %v5348_v7 = vmax.f32 %v5276_v5, 0.0  ;;  %v4456_v9 = vpop.f32.mrf.mxu2  ;;  %v4636_v10 = vpop.f32.mrf.mxu3 }
 0x23c   : > { %v4964_v11 = vsel %vm4736_vm3, %v4456_v9, -inf  ;;  %v4966_v12 = vsel %vm4736_vm3, %v4636_v10, -inf  ;;  %v4098_v13 = vpop.f32.mrf.mxu0  ;;  %v4278_v14 = vpop.f32.mrf.mxu1 }
 0x23d   : > { %v5420_v15 = vpack.c.bf16 %v5348_v7, %v5348_v7  ;;  %v4965_v16 = vmax.f32 %v4963_v6, %v4964_v11  ;;  %v4968_v18 = vsel %vm4736_vm3, %v4098_v13, -inf  ;;  %v4969_v19 = vsel %vm4736_vm3, %v4278_v14, -inf }
 0x23e   : > { %v4970_v22 = vmax.f32 %v4968_v18, %v4969_v19 }
 0x23f   : > { %5493 = vst.msk [vmem:[%s7000_s17 + $0x7c] sm:$0xf] %vm5461_vm4, %v5420_v15  ;;  %v4967_v17 = vmax.f32 %v4965_v16, %v4966_v12 }
 0x241   : > { %v5277_v20 = vadd.f32 %v7303_v3, %v4967_v17 }
 0x243   : > { %v5349_v21 = vmax.f32 %v5277_v20, 0.0  ;;  %v4458_v23 = vpop.f32.mrf.mxu2  ;;  %v4638_v24 = vpop.f32.mrf.mxu3 }
 0x244   : > { %v4971_v27 = vsel %vm4736_vm3, %v4458_v23, -inf  ;;  %v4101_v28 = vpop.f32.mrf.mxu0  ;;  %v4281_v29 = vpop.f32.mrf.mxu1  ;;  %v4973_v34 = vsel %vm4736_vm3, %v4638_v24, -inf }
 0x245   : > { %v5421_v32 = vpack.c.bf16 %v5349_v21, %v5349_v21  ;;  %v4972_v33 = vmax.f32 %v4970_v22, %v4971_v27  ;;  %v4975_v35 = vsel %vm4736_vm3, %v4101_v28, -inf  ;;  %v4976_v36 = vsel %vm4736_vm3, %v4281_v29, -inf  ;;  %v6405_v27 = vld [vmem:[%s6907_s8 + $0x1f8] sm:$0xff] }
 0x246   : > { %v4977_v39 = vmax.f32 %v4975_v35, %v4976_v36 }
 0x247   : > { %5494 = vst.msk [vmem:[%s7000_s17 + $0x80] sm:$0xf] %vm5461_vm4, %v5421_v32  ;;  %v4974_v37 = vmax.f32 %v4972_v33, %v4973_v34  ;;  %6220 = vmatmul.msk.bf16.gmra.mxu0 %vm3567_vm2, %v6367_v25  ;;  %6256 = vmatmul.msk.bf16.gmra.mxu1 %vm3567_vm2, %v6403_v26  ;;  %v6369_v26 = vld [vmem:[%s6907_s8 + $0xd8] sm:$0xff] }
 0x248   : > { %6292 = vmatmul.msk.bf16.gmra.mxu2 %vm3567_vm2, %v6439_v30  ;;  %6328 = vmatmul.msk.bf16.gmra.mxu3 %vm3567_vm2, %v6475_v31  ;;  %v6441_v31 = vld [vmem:[%s6907_s8 + $0x318] sm:$0xff] }
 0x249   : > { %v5278_v38 = vadd.f32 %v7303_v3, %v4974_v37  ;;  %v6477_v32 = vld [vmem:[%s6907_s8 + $0x438] sm:$0xff] }
 0x24b   : > { %v5350_v40 = vmax.f32 %v5278_v38, 0.0  ;;  %v4461_v41 = vpop.f32.mrf.mxu2  ;;  %v4641_v42 = vpop.f32.mrf.mxu3 }
 0x24c   : > { %v4978_v43 = vsel %vm4736_vm3, %v4461_v41, -inf  ;;  %v4980_v44 = vsel %vm4736_vm3, %v4641_v42, -inf  ;;  %v4103_v45 = vpop.f32.mrf.mxu0  ;;  %v4283_v46 = vpop.f32.mrf.mxu1 }
 0x24d   : > { %v5422_v47 = vpack.c.bf16 %v5350_v40, %v5350_v40  ;;  %v4979_v48 = vmax.f32 %v4977_v39, %v4978_v43  ;;  %v4982_v50 = vsel %vm4736_vm3, %v4103_v45, -inf  ;;  %v4983_v51 = vsel %vm4736_vm3, %v4283_v46, -inf }
 0x24e   : > { %v4984_v54 = vmax.f32 %v4982_v50, %v4983_v51 }
 0x24f   : > { %5495 = vst.msk [vmem:[%s7000_s17 + $0x84] sm:$0xf] %vm5461_vm4, %v5422_v47  ;;  %v4981_v49 = vmax.f32 %v4979_v48, %v4980_v44 }
 0x251   : > { %v5279_v52 = vadd.f32 %v7303_v3, %v4981_v49 }
 0x253   : > { %v5351_v53 = vmax.f32 %v5279_v52, 0.0  ;;  %v4463_v55 = vpop.f32.mrf.mxu2  ;;  %v4643_v56 = vpop.f32.mrf.mxu3 }
 0x254   : > { %v4985_v59 = vsel %vm4736_vm3, %v4463_v55, -inf  ;;  %v4106_v60 = vpop.f32.mrf.mxu0  ;;  %v4286_v61 = vpop.f32.mrf.mxu1  ;;  %v4987_v8 = vsel %vm4736_vm3, %v4643_v56, -inf }
 0x255   : > { %v5423_v0 = vpack.c.bf16 %v5351_v53, %v5351_v53  ;;  %v4986_v1 = vmax.f32 %v4984_v54, %v4985_v59  ;;  %v4989_v2 = vsel %vm4736_vm3, %v4106_v60, -inf  ;;  %v4990_v4 = vsel %vm4736_vm3, %v4286_v61, -inf  ;;  %v6406_v59 = vld [vmem:[%s6907_s8 + $0x200] sm:$0xff] }
 0x256   : > { %v4991_v7 = vmax.f32 %v4989_v2, %v4990_v4 }
 0x257   : > { %5496 = vst.msk [vmem:[%s7000_s17 + $0x88] sm:$0xf] %vm5461_vm4, %v5423_v0  ;;  %v4988_v5 = vmax.f32 %v4986_v1, %v4987_v8  ;;  %6221 = vmatmul.msk.bf16.gmra.mxu0 %vm3567_vm2, %v6368_v57  ;;  %6257 = vmatmul.msk.bf16.gmra.mxu1 %vm3567_vm2, %v6404_v58  ;;  %v6370_v58 = vld [vmem:[%s6907_s8 + $0xe0] sm:$0xff] }
 0x258   : > { %6293 = vmatmul.msk.bf16.gmra.mxu2 %vm3567_vm2, %v6440_v62  ;;  %6329 = vmatmul.msk.bf16.gmra.mxu3 %vm3567_vm2, %v6476_v63  ;;  %v6442_v63 = vld [vmem:[%s6907_s8 + $0x320] sm:$0xff] }
 0x259   : > { %v5280_v6 = vadd.f32 %v7303_v3, %v4988_v5  ;;  %v6478_v0 = vld [vmem:[%s6907_s8 + $0x440] sm:$0xff] }
 0x25b   : > { %v5352_v9 = vmax.f32 %v5280_v6, 0.0  ;;  %v4466_v10 = vpop.f32.mrf.mxu2  ;;  %v4646_v11 = vpop.f32.mrf.mxu3 }
 0x25c   : > { %v4992_v12 = vsel %vm4736_vm3, %v4466_v10, -inf  ;;  %v4994_v13 = vsel %vm4736_vm3, %v4646_v11, -inf  ;;  %v4108_v14 = vpop.f32.mrf.mxu0  ;;  %v4288_v15 = vpop.f32.mrf.mxu1 }
 0x25d   : > { %v5424_v16 = vpack.c.bf16 %v5352_v9, %v5352_v9  ;;  %v4993_v17 = vmax.f32 %v4991_v7, %v4992_v12  ;;  %v4996_v19 = vsel %vm4736_vm3, %v4108_v14, -inf  ;;  %v4997_v20 = vsel %vm4736_vm3, %v4288_v15, -inf }
 0x25e   : > { %v4998_v23 = vmax.f32 %v4996_v19, %v4997_v20 }
 0x25f   : > { %5497 = vst.msk [vmem:[%s7000_s17 + $0x8c] sm:$0xf] %vm5461_vm4, %v5424_v16  ;;  %v4995_v18 = vmax.f32 %v4993_v17, %v4994_v13 }
 0x261   : > { %v5281_v21 = vadd.f32 %v7303_v3, %v4995_v18 }
 0x263   : > { %v5353_v22 = vmax.f32 %v5281_v21, 0.0  ;;  %v4468_v24 = vpop.f32.mrf.mxu2  ;;  %v4648_v25 = vpop.f32.mrf.mxu3 }
 0x264   : > { %v4999_v28 = vsel %vm4736_vm3, %v4468_v24, -inf  ;;  %v4111_v29 = vpop.f32.mrf.mxu0  ;;  %v4291_v30 = vpop.f32.mrf.mxu1  ;;  %v5001_v35 = vsel %vm4736_vm3, %v4648_v25, -inf }
 0x265   : > { %v5425_v33 = vpack.c.bf16 %v5353_v22, %v5353_v22  ;;  %v5000_v34 = vmax.f32 %v4998_v23, %v4999_v28  ;;  %v5003_v36 = vsel %vm4736_vm3, %v4111_v29, -inf  ;;  %v5004_v37 = vsel %vm4736_vm3, %v4291_v30, -inf  ;;  %v6407_v28 = vld [vmem:[%s6907_s8 + $0x208] sm:$0xff] }
 0x266   : > { %v5005_v40 = vmax.f32 %v5003_v36, %v5004_v37 }
 0x267   : > { %5498 = vst.msk [vmem:[%s7000_s17 + $0x90] sm:$0xf] %vm5461_vm4, %v5425_v33  ;;  %v5002_v38 = vmax.f32 %v5000_v34, %v5001_v35  ;;  %6222 = vmatmul.msk.bf16.gmra.mxu0 %vm3567_vm2, %v6369_v26  ;;  %6258 = vmatmul.msk.bf16.gmra.mxu1 %vm3567_vm2, %v6405_v27  ;;  %v6371_v27 = vld [vmem:[%s6907_s8 + $0xe8] sm:$0xff] }
 0x268   : > { %6294 = vmatmul.msk.bf16.gmra.mxu2 %vm3567_vm2, %v6441_v31  ;;  %6330 = vmatmul.msk.bf16.gmra.mxu3 %vm3567_vm2, %v6477_v32  ;;  %v6443_v32 = vld [vmem:[%s6907_s8 + $0x328] sm:$0xff] }
 0x269   : > { %v5282_v39 = vadd.f32 %v7303_v3, %v5002_v38  ;;  %v6479_v33 = vld [vmem:[%s6907_s8 + $0x448] sm:$0xff] }
 0x26b   : > { %v5354_v41 = vmax.f32 %v5282_v39, 0.0  ;;  %v4471_v42 = vpop.f32.mrf.mxu2  ;;  %v4651_v43 = vpop.f32.mrf.mxu3 }
 0x26c   : > { %v5006_v44 = vsel %vm4736_vm3, %v4471_v42, -inf  ;;  %v5008_v45 = vsel %vm4736_vm3, %v4651_v43, -inf  ;;  %v4113_v46 = vpop.f32.mrf.mxu0  ;;  %v4293_v47 = vpop.f32.mrf.mxu1 }
 0x26d   : > { %v5426_v48 = vpack.c.bf16 %v5354_v41, %v5354_v41  ;;  %v5007_v49 = vmax.f32 %v5005_v40, %v5006_v44  ;;  %v5010_v51 = vsel %vm4736_vm3, %v4113_v46, -inf  ;;  %v5011_v52 = vsel %vm4736_vm3, %v4293_v47, -inf }
 0x26e   : > { %v5012_v55 = vmax.f32 %v5010_v51, %v5011_v52 }
 0x26f   : > { %5499 = vst.msk [vmem:[%s7000_s17 + $0x94] sm:$0xf] %vm5461_vm4, %v5426_v48  ;;  %v5009_v50 = vmax.f32 %v5007_v49, %v5008_v45 }
 0x271   : > { %v5283_v53 = vadd.f32 %v7303_v3, %v5009_v50 }
 0x273   : > { %v5355_v54 = vmax.f32 %v5283_v53, 0.0  ;;  %v4473_v56 = vpop.f32.mrf.mxu2  ;;  %v4653_v57 = vpop.f32.mrf.mxu3 }
 0x274   : > { %v5013_v60 = vsel %vm4736_vm3, %v4473_v56, -inf  ;;  %v4116_v61 = vpop.f32.mrf.mxu0  ;;  %v4296_v62 = vpop.f32.mrf.mxu1  ;;  %v5015_v2 = vsel %vm4736_vm3, %v4653_v57, -inf }
 0x275   : > { %v5427_v1 = vpack.c.bf16 %v5355_v54, %v5355_v54  ;;  %v5014_v8 = vmax.f32 %v5012_v55, %v5013_v60  ;;  %v5017_v4 = vsel %vm4736_vm3, %v4116_v61, -inf  ;;  %v5018_v5 = vsel %vm4736_vm3, %v4296_v62, -inf  ;;  %v6408_v60 = vld [vmem:[%s6907_s8 + $0x210] sm:$0xff] }
 0x276   : > { %v5019_v9 = vmax.f32 %v5017_v4, %v5018_v5 }
 0x277   : > { %5500 = vst.msk [vmem:[%s7000_s17 + $0x98] sm:$0xf] %vm5461_vm4, %v5427_v1  ;;  %v5016_v6 = vmax.f32 %v5014_v8, %v5015_v2  ;;  %6223 = vmatmul.msk.bf16.gmra.mxu0 %vm3567_vm2, %v6370_v58  ;;  %6259 = vmatmul.msk.bf16.gmra.mxu1 %vm3567_vm2, %v6406_v59  ;;  %v6372_v59 = vld [vmem:[%s6907_s8 + $0xf0] sm:$0xff] }
 0x278   : > { %6295 = vmatmul.msk.bf16.gmra.mxu2 %vm3567_vm2, %v6442_v63  ;;  %6331 = vmatmul.msk.bf16.gmra.mxu3 %vm3567_vm2, %v6478_v0  ;;  %v6444_v0 = vld [vmem:[%s6907_s8 + $0x330] sm:$0xff] }
 0x279   : > { %v5284_v7 = vadd.f32 %v7303_v3, %v5016_v6  ;;  %v6480_v1 = vld [vmem:[%s6907_s8 + $0x450] sm:$0xff] }
 0x27b   : > { %v5356_v10 = vmax.f32 %v5284_v7, 0.0  ;;  %v4476_v11 = vpop.f32.mrf.mxu2  ;;  %v4656_v12 = vpop.f32.mrf.mxu3 }
 0x27c   : > { %v5020_v13 = vsel %vm4736_vm3, %v4476_v11, -inf  ;;  %v5022_v14 = vsel %vm4736_vm3, %v4656_v12, -inf  ;;  %v4118_v15 = vpop.f32.mrf.mxu0  ;;  %v4298_v16 = vpop.f32.mrf.mxu1 }
 0x27d   : > { %v5428_v17 = vpack.c.bf16 %v5356_v10, %v5356_v10  ;;  %v5021_v18 = vmax.f32 %v5019_v9, %v5020_v13  ;;  %v5024_v20 = vsel %vm4736_vm3, %v4118_v15, -inf  ;;  %v5025_v21 = vsel %vm4736_vm3, %v4298_v16, -inf }
 0x27e   : > { %v5026_v24 = vmax.f32 %v5024_v20, %v5025_v21 }
 0x27f   : > { %5501 = vst.msk [vmem:[%s7000_s17 + $0x9c] sm:$0xf] %vm5461_vm4, %v5428_v17  ;;  %v5023_v19 = vmax.f32 %v5021_v18, %v5022_v14 }
 0x281   : > { %v5285_v22 = vadd.f32 %v7303_v3, %v5023_v19 }
 0x283   : > { %v5357_v23 = vmax.f32 %v5285_v22, 0.0  ;;  %v4478_v25 = vpop.f32.mrf.mxu2  ;;  %v4658_v26 = vpop.f32.mrf.mxu3 }
 0x284   : > { %v5027_v29 = vsel %vm4736_vm3, %v4478_v25, -inf  ;;  %v4121_v30 = vpop.f32.mrf.mxu0  ;;  %v4301_v31 = vpop.f32.mrf.mxu1  ;;  %v5029_v36 = vsel %vm4736_vm3, %v4658_v26, -inf }
 0x285   : > { %v5429_v34 = vpack.c.bf16 %v5357_v23, %v5357_v23  ;;  %v5028_v35 = vmax.f32 %v5026_v24, %v5027_v29  ;;  %v5031_v37 = vsel %vm4736_vm3, %v4121_v30, -inf  ;;  %v5032_v38 = vsel %vm4736_vm3, %v4301_v31, -inf  ;;  %v6409_v29 = vld [vmem:[%s6907_s8 + $0x218] sm:$0xff] }
 0x286   : > { %v5033_v41 = vmax.f32 %v5031_v37, %v5032_v38 }
 0x287   : > { %5502 = vst.msk [vmem:[%s7000_s17 + $0xa0] sm:$0xf] %vm5461_vm4, %v5429_v34  ;;  %v5030_v39 = vmax.f32 %v5028_v35, %v5029_v36  ;;  %6224 = vmatmul.msk.bf16.gmra.mxu0 %vm3567_vm2, %v6371_v27  ;;  %6260 = vmatmul.msk.bf16.gmra.mxu1 %vm3567_vm2, %v6407_v28  ;;  %v6373_v28 = vld [vmem:[%s6907_s8 + $0xf8] sm:$0xff] }
 0x288   : > { %6296 = vmatmul.msk.bf16.gmra.mxu2 %vm3567_vm2, %v6443_v32  ;;  %6332 = vmatmul.msk.bf16.gmra.mxu3 %vm3567_vm2, %v6479_v33  ;;  %v6445_v33 = vld [vmem:[%s6907_s8 + $0x338] sm:$0xff] }
 0x289   : > { %v5286_v40 = vadd.f32 %v7303_v3, %v5030_v39  ;;  %v6481_v34 = vld [vmem:[%s6907_s8 + $0x458] sm:$0xff] }
 0x28b   : > { %v5358_v42 = vmax.f32 %v5286_v40, 0.0  ;;  %v4481_v43 = vpop.f32.mrf.mxu2  ;;  %v4661_v44 = vpop.f32.mrf.mxu3 }
 0x28c   : > { %v5034_v45 = vsel %vm4736_vm3, %v4481_v43, -inf  ;;  %v5036_v46 = vsel %vm4736_vm3, %v4661_v44, -inf  ;;  %v4123_v47 = vpop.f32.mrf.mxu0  ;;  %v4303_v48 = vpop.f32.mrf.mxu1 }
 0x28d   : > { %v5430_v49 = vpack.c.bf16 %v5358_v42, %v5358_v42  ;;  %v5035_v50 = vmax.f32 %v5033_v41, %v5034_v45  ;;  %v5038_v52 = vsel %vm4736_vm3, %v4123_v47, -inf  ;;  %v5039_v53 = vsel %vm4736_vm3, %v4303_v48, -inf }
 0x28e   : > { %v5040_v56 = vmax.f32 %v5038_v52, %v5039_v53 }
 0x28f   : > { %5503 = vst.msk [vmem:[%s7000_s17 + $0xa4] sm:$0xf] %vm5461_vm4, %v5430_v49  ;;  %v5037_v51 = vmax.f32 %v5035_v50, %v5036_v46 }
 0x291   : > { %v5287_v54 = vadd.f32 %v7303_v3, %v5037_v51 }
 0x293   : > { %v5359_v55 = vmax.f32 %v5287_v54, 0.0  ;;  %v4483_v57 = vpop.f32.mrf.mxu2  ;;  %v4663_v58 = vpop.f32.mrf.mxu3 }
 0x294   : > { %v5041_v61 = vsel %vm4736_vm3, %v4483_v57, -inf  ;;  %v4126_v62 = vpop.f32.mrf.mxu0  ;;  %v4306_v63 = vpop.f32.mrf.mxu1  ;;  %v5043_v4 = vsel %vm4736_vm3, %v4663_v58, -inf }
 0x295   : > { %v5431_v8 = vpack.c.bf16 %v5359_v55, %v5359_v55  ;;  %v5042_v2 = vmax.f32 %v5040_v56, %v5041_v61  ;;  %v5045_v5 = vsel %vm4736_vm3, %v4126_v62, -inf  ;;  %v5046_v6 = vsel %vm4736_vm3, %v4306_v63, -inf  ;;  %v6410_v61 = vld [vmem:[%s6907_s8 + $0x220] sm:$0xff] }
 0x296   : > { %v5047_v10 = vmax.f32 %v5045_v5, %v5046_v6 }
 0x297   : > { %5504 = vst.msk [vmem:[%s7000_s17 + $0xa8] sm:$0xf] %vm5461_vm4, %v5431_v8  ;;  %v5044_v7 = vmax.f32 %v5042_v2, %v5043_v4  ;;  %6225 = vmatmul.msk.bf16.gmra.mxu0 %vm3567_vm2, %v6372_v59  ;;  %6261 = vmatmul.msk.bf16.gmra.mxu1 %vm3567_vm2, %v6408_v60  ;;  %v6374_v60 = vld [vmem:[%s6907_s8 + $0x100] sm:$0xff] }
 0x298   : > { %6297 = vmatmul.msk.bf16.gmra.mxu2 %vm3567_vm2, %v6444_v0  ;;  %6333 = vmatmul.msk.bf16.gmra.mxu3 %vm3567_vm2, %v6480_v1  ;;  %v6446_v1 = vld [vmem:[%s6907_s8 + $0x340] sm:$0xff] }
 0x299   : > { %v5288_v9 = vadd.f32 %v7303_v3, %v5044_v7  ;;  %v6482_v8 = vld [vmem:[%s6907_s8 + $0x460] sm:$0xff] }
 0x29b   : > { %v5360_v11 = vmax.f32 %v5288_v9, 0.0  ;;  %v4486_v12 = vpop.f32.mrf.mxu2  ;;  %v4666_v13 = vpop.f32.mrf.mxu3 }
 0x29c   : > { %v5048_v14 = vsel %vm4736_vm3, %v4486_v12, -inf  ;;  %v5050_v15 = vsel %vm4736_vm3, %v4666_v13, -inf  ;;  %v4128_v16 = vpop.f32.mrf.mxu0  ;;  %v4308_v17 = vpop.f32.mrf.mxu1 }
 0x29d   : > { %v5432_v18 = vpack.c.bf16 %v5360_v11, %v5360_v11  ;;  %v5049_v19 = vmax.f32 %v5047_v10, %v5048_v14  ;;  %v5052_v21 = vsel %vm4736_vm3, %v4128_v16, -inf  ;;  %v5053_v22 = vsel %vm4736_vm3, %v4308_v17, -inf }
 0x29e   : > { %v5054_v25 = vmax.f32 %v5052_v21, %v5053_v22 }
 0x29f   : > { %5505 = vst.msk [vmem:[%s7000_s17 + $0xac] sm:$0xf] %vm5461_vm4, %v5432_v18  ;;  %v5051_v20 = vmax.f32 %v5049_v19, %v5050_v15 }
 0x2a1   : > { %v5289_v23 = vadd.f32 %v7303_v3, %v5051_v20 }
 0x2a3   : > { %v5361_v24 = vmax.f32 %v5289_v23, 0.0  ;;  %v4488_v26 = vpop.f32.mrf.mxu2  ;;  %v4668_v27 = vpop.f32.mrf.mxu3 }
 0x2a4   : > { %v5055_v30 = vsel %vm4736_vm3, %v4488_v26, -inf  ;;  %v4131_v31 = vpop.f32.mrf.mxu0  ;;  %v4311_v32 = vpop.f32.mrf.mxu1  ;;  %v5057_v37 = vsel %vm4736_vm3, %v4668_v27, -inf }
 0x2a5   : > { %v5433_v35 = vpack.c.bf16 %v5361_v24, %v5361_v24  ;;  %v5056_v36 = vmax.f32 %v5054_v25, %v5055_v30  ;;  %v5059_v38 = vsel %vm4736_vm3, %v4131_v31, -inf  ;;  %v5060_v39 = vsel %vm4736_vm3, %v4311_v32, -inf  ;;  %v6411_v30 = vld [vmem:[%s6907_s8 + $0x228] sm:$0xff] }
 0x2a6   : > { %v5061_v42 = vmax.f32 %v5059_v38, %v5060_v39 }
 0x2a7   : > { %5506 = vst.msk [vmem:[%s7000_s17 + $0xb0] sm:$0xf] %vm5461_vm4, %v5433_v35  ;;  %v5058_v40 = vmax.f32 %v5056_v36, %v5057_v37  ;;  %6226 = vmatmul.msk.bf16.gmra.mxu0 %vm3567_vm2, %v6373_v28  ;;  %6262 = vmatmul.msk.bf16.gmra.mxu1 %vm3567_vm2, %v6409_v29  ;;  %v6375_v29 = vld [vmem:[%s6907_s8 + $0x108] sm:$0xff] }
 0x2a8   : > { %6298 = vmatmul.msk.bf16.gmra.mxu2 %vm3567_vm2, %v6445_v33  ;;  %6334 = vmatmul.msk.bf16.gmra.mxu3 %vm3567_vm2, %v6481_v34  ;;  %v6447_v34 = vld [vmem:[%s6907_s8 + $0x348] sm:$0xff] }
 0x2a9   : > { %v5290_v41 = vadd.f32 %v7303_v3, %v5058_v40  ;;  %v6483_v35 = vld [vmem:[%s6907_s8 + $0x468] sm:$0xff] }
 0x2ab   : > { %v5362_v43 = vmax.f32 %v5290_v41, 0.0  ;;  %v4491_v44 = vpop.f32.mrf.mxu2  ;;  %v4671_v45 = vpop.f32.mrf.mxu3 }
 0x2ac   : > { %v5062_v46 = vsel %vm4736_vm3, %v4491_v44, -inf  ;;  %v5064_v47 = vsel %vm4736_vm3, %v4671_v45, -inf  ;;  %v4133_v48 = vpop.f32.mrf.mxu0  ;;  %v4313_v49 = vpop.f32.mrf.mxu1 }
 0x2ad   : > { %v5434_v50 = vpack.c.bf16 %v5362_v43, %v5362_v43  ;;  %v5063_v51 = vmax.f32 %v5061_v42, %v5062_v46  ;;  %v5066_v53 = vsel %vm4736_vm3, %v4133_v48, -inf  ;;  %v5067_v54 = vsel %vm4736_vm3, %v4313_v49, -inf }
 0x2ae   : > { %v5068_v57 = vmax.f32 %v5066_v53, %v5067_v54 }
 0x2af   : > { %5507 = vst.msk [vmem:[%s7000_s17 + $0xb4] sm:$0xf] %vm5461_vm4, %v5434_v50  ;;  %v5065_v52 = vmax.f32 %v5063_v51, %v5064_v47 }
 0x2b1   : > { %v5291_v55 = vadd.f32 %v7303_v3, %v5065_v52 }
 0x2b3   : > { %v5363_v56 = vmax.f32 %v5291_v55, 0.0  ;;  %v4493_v58 = vpop.f32.mrf.mxu2  ;;  %v4673_v59 = vpop.f32.mrf.mxu3 }
 0x2b4   : > { %v5069_v62 = vsel %vm4736_vm3, %v4493_v58, -inf  ;;  %v4136_v63 = vpop.f32.mrf.mxu0  ;;  %v4316_v0 = vpop.f32.mrf.mxu1  ;;  %v5071_v5 = vsel %vm4736_vm3, %v4673_v59, -inf }
 0x2b5   : > { %v5435_v2 = vpack.c.bf16 %v5363_v56, %v5363_v56  ;;  %v5070_v4 = vmax.f32 %v5068_v57, %v5069_v62  ;;  %v5073_v6 = vsel %vm4736_vm3, %v4136_v63, -inf  ;;  %v5074_v7 = vsel %vm4736_vm3, %v4316_v0, -inf  ;;  %v6412_v62 = vld [vmem:[%s6907_s8 + $0x230] sm:$0xff] }
 0x2b6   : > { %v5075_v11 = vmax.f32 %v5073_v6, %v5074_v7 }
 0x2b7   : > { %5508 = vst.msk [vmem:[%s7000_s17 + $0xb8] sm:$0xf] %vm5461_vm4, %v5435_v2  ;;  %v5072_v9 = vmax.f32 %v5070_v4, %v5071_v5  ;;  %6227 = vmatmul.msk.bf16.gmra.mxu0 %vm3567_vm2, %v6374_v60  ;;  %6263 = vmatmul.msk.bf16.gmra.mxu1 %vm3567_vm2, %v6410_v61  ;;  %v6376_v61 = vld [vmem:[%s6907_s8 + $0x110] sm:$0xff] }
 0x2b8   : > { %6299 = vmatmul.msk.bf16.gmra.mxu2 %vm3567_vm2, %v6446_v1  ;;  %6335 = vmatmul.msk.bf16.gmra.mxu3 %vm3567_vm2, %v6482_v8  ;;  %v6448_v8 = vld [vmem:[%s6907_s8 + $0x350] sm:$0xff] }
 0x2b9   : > { %v5292_v10 = vadd.f32 %v7303_v3, %v5072_v9  ;;  %v6484_v2 = vld [vmem:[%s6907_s8 + $0x470] sm:$0xff] }
 0x2bb   : > { %v5364_v12 = vmax.f32 %v5292_v10, 0.0  ;;  %v4496_v13 = vpop.f32.mrf.mxu2  ;;  %v4676_v14 = vpop.f32.mrf.mxu3 }
 0x2bc   : > { %v5076_v15 = vsel %vm4736_vm3, %v4496_v13, -inf  ;;  %v5078_v16 = vsel %vm4736_vm3, %v4676_v14, -inf  ;;  %v4138_v17 = vpop.f32.mrf.mxu0  ;;  %v4318_v18 = vpop.f32.mrf.mxu1 }
 0x2bd   : > { %v5436_v19 = vpack.c.bf16 %v5364_v12, %v5364_v12  ;;  %v5077_v20 = vmax.f32 %v5075_v11, %v5076_v15  ;;  %v5080_v22 = vsel %vm4736_vm3, %v4138_v17, -inf  ;;  %v5081_v23 = vsel %vm4736_vm3, %v4318_v18, -inf }
 0x2be   : > { %v5082_v26 = vmax.f32 %v5080_v22, %v5081_v23 }
 0x2bf   : > { %5509 = vst.msk [vmem:[%s7000_s17 + $0xbc] sm:$0xf] %vm5461_vm4, %v5436_v19  ;;  %v5079_v21 = vmax.f32 %v5077_v20, %v5078_v16 }
 0x2c1   : > { %v5293_v24 = vadd.f32 %v7303_v3, %v5079_v21 }
 0x2c3   : > { %v5365_v25 = vmax.f32 %v5293_v24, 0.0  ;;  %v4498_v27 = vpop.f32.mrf.mxu2  ;;  %v4678_v28 = vpop.f32.mrf.mxu3 }
 0x2c4   : > { %v5083_v31 = vsel %vm4736_vm3, %v4498_v27, -inf  ;;  %v4141_v32 = vpop.f32.mrf.mxu0  ;;  %v4321_v33 = vpop.f32.mrf.mxu1  ;;  %v5085_v38 = vsel %vm4736_vm3, %v4678_v28, -inf }
 0x2c5   : > { %v5437_v36 = vpack.c.bf16 %v5365_v25, %v5365_v25  ;;  %v5084_v37 = vmax.f32 %v5082_v26, %v5083_v31  ;;  %v5087_v39 = vsel %vm4736_vm3, %v4141_v32, -inf  ;;  %v5088_v40 = vsel %vm4736_vm3, %v4321_v33, -inf  ;;  %v6413_v31 = vld [vmem:[%s6907_s8 + $0x238] sm:$0xff] }
 0x2c6   : > { %v5089_v43 = vmax.f32 %v5087_v39, %v5088_v40 }
 0x2c7   : > { %5510 = vst.msk [vmem:[%s7000_s17 + $0xc0] sm:$0xf] %vm5461_vm4, %v5437_v36  ;;  %v5086_v41 = vmax.f32 %v5084_v37, %v5085_v38  ;;  %6228 = vmatmul.msk.bf16.gmra.mxu0 %vm3567_vm2, %v6375_v29  ;;  %6264 = vmatmul.msk.bf16.gmra.mxu1 %vm3567_vm2, %v6411_v30  ;;  %v6377_v30 = vld [vmem:[%s6907_s8 + $0x118] sm:$0xff] }
 0x2c8   : > { %6300 = vmatmul.msk.bf16.gmra.mxu2 %vm3567_vm2, %v6447_v34  ;;  %6336 = vmatmul.msk.bf16.gmra.mxu3 %vm3567_vm2, %v6483_v35  ;;  %v6449_v35 = vld [vmem:[%s6907_s8 + $0x358] sm:$0xff] }
 0x2c9   : > { %v5294_v42 = vadd.f32 %v7303_v3, %v5086_v41  ;;  %v6485_v36 = vld [vmem:[%s6907_s8 + $0x478] sm:$0xff] }
 0x2cb   : > { %v5366_v44 = vmax.f32 %v5294_v42, 0.0  ;;  %v4501_v45 = vpop.f32.mrf.mxu2  ;;  %v4681_v46 = vpop.f32.mrf.mxu3 }
 0x2cc   : > { %v5090_v47 = vsel %vm4736_vm3, %v4501_v45, -inf  ;;  %v5092_v48 = vsel %vm4736_vm3, %v4681_v46, -inf  ;;  %v4143_v49 = vpop.f32.mrf.mxu0  ;;  %v4323_v50 = vpop.f32.mrf.mxu1 }
 0x2cd   : > { %v5438_v51 = vpack.c.bf16 %v5366_v44, %v5366_v44  ;;  %v5091_v52 = vmax.f32 %v5089_v43, %v5090_v47  ;;  %v5094_v54 = vsel %vm4736_vm3, %v4143_v49, -inf  ;;  %v5095_v55 = vsel %vm4736_vm3, %v4323_v50, -inf }
 0x2ce   : > { %v5096_v58 = vmax.f32 %v5094_v54, %v5095_v55 }
 0x2cf   : > { %5511 = vst.msk [vmem:[%s7000_s17 + $0xc4] sm:$0xf] %vm5461_vm4, %v5438_v51  ;;  %v5093_v53 = vmax.f32 %v5091_v52, %v5092_v48 }
 0x2d1   : > { %v5295_v56 = vadd.f32 %v7303_v3, %v5093_v53 }
 0x2d3   : > { %v5367_v57 = vmax.f32 %v5295_v56, 0.0  ;;  %v4503_v59 = vpop.f32.mrf.mxu2  ;;  %v4683_v60 = vpop.f32.mrf.mxu3 }
 0x2d4   : > { %v5097_v63 = vsel %vm4736_vm3, %v4503_v59, -inf  ;;  %v4146_v0 = vpop.f32.mrf.mxu0  ;;  %v4326_v1 = vpop.f32.mrf.mxu1  ;;  %v5099_v6 = vsel %vm4736_vm3, %v4683_v60, -inf }
 0x2d5   : > { %v5439_v4 = vpack.c.bf16 %v5367_v57, %v5367_v57  ;;  %v5098_v5 = vmax.f32 %v5096_v58, %v5097_v63  ;;  %v5101_v7 = vsel %vm4736_vm3, %v4146_v0, -inf  ;;  %v5102_v9 = vsel %vm4736_vm3, %v4326_v1, -inf }
 0x2d6   : > { %v5103_v12 = vmax.f32 %v5101_v7, %v5102_v9 }
 0x2d7   : > { %5512 = vst.msk [vmem:[%s7000_s17 + $0xc8] sm:$0xf] %vm5461_vm4, %v5439_v4  ;;  %v5100_v10 = vmax.f32 %v5098_v5, %v5099_v6  ;;  %6229 = vmatmul.msk.bf16.gmra.mxu0 %vm3567_vm2, %v6376_v61  ;;  %6265 = vmatmul.msk.bf16.gmra.mxu1 %vm3567_vm2, %v6412_v62  ;;  %v7608_v6 = vld [vmem:[%s7735_s2] ss:$0 sm:$0xff] }
 0x2d8   : > { %6301 = vmatmul.msk.bf16.gmra.mxu2 %vm3567_vm2, %v6448_v8  ;;  %6337 = vmatmul.msk.bf16.gmra.mxu3 %vm3567_vm2, %v6484_v2 }
 0x2d9   : > { %v5296_v11 = vadd.f32 %v7303_v3, %v5100_v10 }
 0x2db   : > { %v5368_v13 = vmax.f32 %v5296_v11, 0.0  ;;  %v4506_v14 = vpop.f32.mrf.mxu2  ;;  %v4686_v15 = vpop.f32.mrf.mxu3 }
 0x2dc   : > { %v5104_v16 = vsel %vm4736_vm3, %v4506_v14, -inf  ;;  %v5106_v17 = vsel %vm4736_vm3, %v4686_v15, -inf  ;;  %v4148_v18 = vpop.f32.mrf.mxu0  ;;  %v4328_v19 = vpop.f32.mrf.mxu1 }
 0x2dd   : > { %v5440_v20 = vpack.c.bf16 %v5368_v13, %v5368_v13  ;;  %v5105_v21 = vmax.f32 %v5103_v12, %v5104_v16  ;;  %v5108_v23 = vsel %vm4736_vm3, %v4148_v18, -inf  ;;  %v5109_v24 = vsel %vm4736_vm3, %v4328_v19, -inf }
 0x2de   : > { %v5110_v27 = vmax.f32 %v5108_v23, %v5109_v24 }
 0x2df   : > { %5513 = vst.msk [vmem:[%s7000_s17 + $0xcc] sm:$0xf] %vm5461_vm4, %v5440_v20  ;;  %v5107_v22 = vmax.f32 %v5105_v21, %v5106_v17 }
 0x2e1   : > { %v5297_v25 = vadd.f32 %v7303_v3, %v5107_v22 }
 0x2e3   : > { %v5369_v26 = vmax.f32 %v5297_v25, 0.0  ;;  %v4508_v28 = vpop.f32.mrf.mxu2  ;;  %v4688_v29 = vpop.f32.mrf.mxu3 }
 0x2e4   : > { %v5111_v32 = vsel %vm4736_vm3, %v4508_v28, -inf  ;;  %v4151_v33 = vpop.f32.mrf.mxu0  ;;  %v4331_v34 = vpop.f32.mrf.mxu1  ;;  %v5113_v39 = vsel %vm4736_vm3, %v4688_v29, -inf }
 0x2e5   : > { %v5441_v37 = vpack.c.bf16 %v5369_v26, %v5369_v26  ;;  %v5112_v38 = vmax.f32 %v5110_v27, %v5111_v32  ;;  %v5115_v40 = vsel %vm4736_vm3, %v4151_v33, -inf  ;;  %v5116_v41 = vsel %vm4736_vm3, %v4331_v34, -inf }
 0x2e6   : > { %v5117_v44 = vmax.f32 %v5115_v40, %v5116_v41 }
 0x2e7   : > { %5514 = vst.msk [vmem:[%s7000_s17 + $0xd0] sm:$0xf] %vm5461_vm4, %v5441_v37  ;;  %v5114_v42 = vmax.f32 %v5112_v38, %v5113_v39  ;;  %6230 = vmatmul.msk.bf16.gmra.mxu0 %vm3567_vm2, %v6377_v30  ;;  %6266 = vmatmul.msk.bf16.gmra.mxu1 %vm3567_vm2, %v6413_v31 }
 0x2e8   : > { %6302 = vmatmul.msk.bf16.gmra.mxu2 %vm3567_vm2, %v6449_v35  ;;  %6338 = vmatmul.msk.bf16.gmra.mxu3 %vm3567_vm2, %v6485_v36 }
 0x2e9   : > { %v5298_v43 = vadd.f32 %v7303_v3, %v5114_v42 }
 0x2eb   : > { %v5370_v45 = vmax.f32 %v5298_v43, 0.0  ;;  %v4511_v46 = vpop.f32.mrf.mxu2  ;;  %v4691_v47 = vpop.f32.mrf.mxu3 }
 0x2ec   : > { %v5118_v48 = vsel %vm4736_vm3, %v4511_v46, -inf  ;;  %v5120_v49 = vsel %vm4736_vm3, %v4691_v47, -inf  ;;  %v4153_v50 = vpop.f32.mrf.mxu0  ;;  %v4333_v51 = vpop.f32.mrf.mxu1 }
 0x2ed   : > { %v5442_v52 = vpack.c.bf16 %v5370_v45, %v5370_v45  ;;  %v5119_v53 = vmax.f32 %v5117_v44, %v5118_v48  ;;  %v5122_v55 = vsel %vm4736_vm3, %v4153_v50, -inf  ;;  %v5123_v56 = vsel %vm4736_vm3, %v4333_v51, -inf }
 0x2ee   : > { %v5124_v59 = vmax.f32 %v5122_v55, %v5123_v56 }
 0x2ef   : > { %5515 = vst.msk [vmem:[%s7000_s17 + $0xd4] sm:$0xf] %vm5461_vm4, %v5442_v52  ;;  %v5121_v54 = vmax.f32 %v5119_v53, %v5120_v49 }
 0x2f1   : > { %v5299_v57 = vadd.f32 %v7303_v3, %v5121_v54 }
 0x2f3   : > { %v5371_v58 = vmax.f32 %v5299_v57, 0.0  ;;  %v4513_v60 = vpop.f32.mrf.mxu2  ;;  %v4693_v61 = vpop.f32.mrf.mxu3 }
 0x2f4   : > { %v5125_v62 = vsel %vm4736_vm3, %v4513_v60, -inf  ;;  %v4156_v63 = vpop.f32.mrf.mxu0  ;;  %v4336_v0 = vpop.f32.mrf.mxu1  ;;  %v5127_v2 = vsel %vm4736_vm3, %v4693_v61, -inf }
 0x2f5   : > { %v5443_v1 = vpack.c.bf16 %v5371_v58, %v5371_v58  ;;  %v5126_v8 = vmax.f32 %v5124_v59, %v5125_v62  ;;  %v5129_v4 = vsel %vm4736_vm3, %v4156_v63, -inf  ;;  %v5130_v5 = vsel %vm4736_vm3, %v4336_v0, -inf }
 0x2f6   : > { %v5131_v9 = vmax.f32 %v5129_v4, %v5130_v5 }
 0x2f7   : > { %5516 = vst.msk [vmem:[%s7000_s17 + $0xd8] sm:$0xf] %vm5461_vm4, %v5443_v1  ;;  %v5128_v3 = vmax.f32 %v5126_v8, %v5127_v2 }
 0x2f9   : > { %v5300_v7 = vadd.f32 %v7608_v6, %v5128_v3 }
 0x2fb   : > { %v5372_v10 = vmax.f32 %v5300_v7, 0.0  ;;  %v4516_v11 = vpop.f32.mrf.mxu2  ;;  %v4696_v12 = vpop.f32.mrf.mxu3 }
 0x2fc   : > { %v5132_v13 = vsel %vm4736_vm3, %v4516_v11, -inf  ;;  %v5134_v14 = vsel %vm4736_vm3, %v4696_v12, -inf  ;;  %v4158_v15 = vpop.f32.mrf.mxu0  ;;  %v4338_v16 = vpop.f32.mrf.mxu1 }
 0x2fd   : > { %v5444_v17 = vpack.c.bf16 %v5372_v10, %v5372_v10  ;;  %v5133_v18 = vmax.f32 %v5131_v9, %v5132_v13  ;;  %v5136_v20 = vsel %vm4736_vm3, %v4158_v15, -inf  ;;  %v5137_v21 = vsel %vm4736_vm3, %v4338_v16, -inf }
 0x2fe   : > { %v5138_v24 = vmax.f32 %v5136_v20, %v5137_v21 }
 0x2ff   : > { %5517 = vst.msk [vmem:[%s7000_s17 + $0xdc] sm:$0xf] %vm5461_vm4, %v5444_v17  ;;  %v5135_v19 = vmax.f32 %v5133_v18, %v5134_v14 }
 0x301   : > { %v5301_v22 = vadd.f32 %v7608_v6, %v5135_v19 }
 0x303   : > { %v5373_v23 = vmax.f32 %v5301_v22, 0.0  ;;  %v4518_v25 = vpop.f32.mrf.mxu2  ;;  %v4698_v26 = vpop.f32.mrf.mxu3 }
 0x304   : > { %v5139_v27 = vsel %vm4736_vm3, %v4518_v25, -inf  ;;  %v4161_v28 = vpop.f32.mrf.mxu0  ;;  %v4341_v29 = vpop.f32.mrf.mxu1  ;;  %v5141_v32 = vsel %vm4736_vm3, %v4698_v26, -inf }
 0x305   : > { %v5445_v30 = vpack.c.bf16 %v5373_v23, %v5373_v23  ;;  %v5140_v31 = vmax.f32 %v5138_v24, %v5139_v27  ;;  %v5143_v33 = vsel %vm4736_vm3, %v4161_v28, -inf  ;;  %v5144_v34 = vsel %vm4736_vm3, %v4341_v29, -inf }
 0x306   : > { %v5145_v37 = vmax.f32 %v5143_v33, %v5144_v34 }
 0x307   : > { %5518 = vst.msk [vmem:[%s7000_s17 + $0xe0] sm:$0xf] %vm5461_vm4, %v5445_v30  ;;  %v5142_v35 = vmax.f32 %v5140_v31, %v5141_v32 }
 0x309   : > { %v5302_v36 = vadd.f32 %v7608_v6, %v5142_v35 }
 0x30b   : > { %v5374_v38 = vmax.f32 %v5302_v36, 0.0  ;;  %v4521_v39 = vpop.f32.mrf.mxu2  ;;  %v4701_v40 = vpop.f32.mrf.mxu3 }
 0x30c   : > { %v5146_v41 = vsel %vm4736_vm3, %v4521_v39, -inf  ;;  %v5148_v42 = vsel %vm4736_vm3, %v4701_v40, -inf  ;;  %v4163_v43 = vpop.f32.mrf.mxu0  ;;  %v4343_v44 = vpop.f32.mrf.mxu1 }
 0x30d   : > { %v5446_v45 = vpack.c.bf16 %v5374_v38, %v5374_v38  ;;  %v5147_v46 = vmax.f32 %v5145_v37, %v5146_v41  ;;  %v5150_v48 = vsel %vm4736_vm3, %v4163_v43, -inf  ;;  %v5151_v49 = vsel %vm4736_vm3, %v4343_v44, -inf }
 0x30e   : > { %v5152_v52 = vmax.f32 %v5150_v48, %v5151_v49 }
 0x30f   : > { %5519 = vst.msk [vmem:[%s7000_s17 + $0xe4] sm:$0xf] %vm5461_vm4, %v5446_v45  ;;  %v5149_v47 = vmax.f32 %v5147_v46, %v5148_v42 }
 0x311   : > { %v5303_v50 = vadd.f32 %v7608_v6, %v5149_v47 }
 0x313   : > { %v5375_v51 = vmax.f32 %v5303_v50, 0.0  ;;  %v4523_v53 = vpop.f32.mrf.mxu2  ;;  %v4703_v54 = vpop.f32.mrf.mxu3 }
 0x314   : > { %v5153_v55 = vsel %vm4736_vm3, %v4523_v53, -inf  ;;  %v4166_v56 = vpop.f32.mrf.mxu0  ;;  %v4346_v57 = vpop.f32.mrf.mxu1  ;;  %v5155_v60 = vsel %vm4736_vm3, %v4703_v54, -inf }
 0x315   : > { %v5447_v58 = vpack.c.bf16 %v5375_v51, %v5375_v51  ;;  %v5154_v59 = vmax.f32 %v5152_v52, %v5153_v55  ;;  %v5157_v61 = vsel %vm4736_vm3, %v4166_v56, -inf  ;;  %v5158_v62 = vsel %vm4736_vm3, %v4346_v57, -inf }
 0x316   : > { %v5159_v1 = vmax.f32 %v5157_v61, %v5158_v62 }
 0x317   : > { %5520 = vst.msk [vmem:[%s7000_s17 + $0xe8] sm:$0xf] %vm5461_vm4, %v5447_v58  ;;  %v5156_v63 = vmax.f32 %v5154_v59, %v5155_v60 }
 0x319   : > { %v5304_v0 = vadd.f32 %v7608_v6, %v5156_v63 }
 0x31b   : > { %v5376_v8 = vmax.f32 %v5304_v0, 0.0  ;;  %v4526_v2 = vpop.f32.mrf.mxu2  ;;  %v4706_v4 = vpop.f32.mrf.mxu3 }
 0x31c   : > { %v5160_v5 = vsel %vm4736_vm3, %v4526_v2, -inf  ;;  %v5162_v3 = vsel %vm4736_vm3, %v4706_v4, -inf  ;;  %v4168_v7 = vpop.f32.mrf.mxu0  ;;  %v4348_v9 = vpop.f32.mrf.mxu1 }
 0x31d   : > { %v5448_v10 = vpack.c.bf16 %v5376_v8, %v5376_v8  ;;  %v5161_v11 = vmax.f32 %v5159_v1, %v5160_v5  ;;  %v5164_v13 = vsel %vm4736_vm3, %v4168_v7, -inf  ;;  %v5165_v14 = vsel %vm4736_vm3, %v4348_v9, -inf }
 0x31e   : > { %v5166_v17 = vmax.f32 %v5164_v13, %v5165_v14 }
 0x31f   : > { %5521 = vst.msk [vmem:[%s7000_s17 + $0xec] sm:$0xf] %vm5461_vm4, %v5448_v10  ;;  %v5163_v12 = vmax.f32 %v5161_v11, %v5162_v3 }
 0x321   : > { %v5305_v15 = vadd.f32 %v7608_v6, %v5163_v12 }
 0x323   : > { %v5377_v16 = vmax.f32 %v5305_v15, 0.0  ;;  %v4528_v18 = vpop.f32.mrf.mxu2  ;;  %v4708_v19 = vpop.f32.mrf.mxu3 }
 0x324   : > { %v5167_v20 = vsel %vm4736_vm3, %v4528_v18, -inf  ;;  %v4171_v21 = vpop.f32.mrf.mxu0  ;;  %v4351_v22 = vpop.f32.mrf.mxu1  ;;  %v5169_v25 = vsel %vm4736_vm3, %v4708_v19, -inf }
 0x325   : > { %v5449_v23 = vpack.c.bf16 %v5377_v16, %v5377_v16  ;;  %v5168_v24 = vmax.f32 %v5166_v17, %v5167_v20  ;;  %v5171_v26 = vsel %vm4736_vm3, %v4171_v21, -inf  ;;  %v5172_v27 = vsel %vm4736_vm3, %v4351_v22, -inf }
 0x326   : > { %v5173_v30 = vmax.f32 %v5171_v26, %v5172_v27 }
 0x327   : > { %5522 = vst.msk [vmem:[%s7000_s17 + $0xf0] sm:$0xf] %vm5461_vm4, %v5449_v23  ;;  %v5170_v28 = vmax.f32 %v5168_v24, %v5169_v25 }
 0x329   : > { %v5306_v29 = vadd.f32 %v7608_v6, %v5170_v28 }
 0x32b   : > { %v5378_v31 = vmax.f32 %v5306_v29, 0.0  ;;  %v4531_v32 = vpop.f32.mrf.mxu2  ;;  %v4711_v33 = vpop.f32.mrf.mxu3 }
 0x32c   : > { %v5174_v34 = vsel %vm4736_vm3, %v4531_v32, -inf  ;;  %v5176_v35 = vsel %vm4736_vm3, %v4711_v33, -inf  ;;  %v4173_v36 = vpop.f32.mrf.mxu0  ;;  %v4353_v37 = vpop.f32.mrf.mxu1 }
 0x32d   : > { %v5450_v38 = vpack.c.bf16 %v5378_v31, %v5378_v31  ;;  %v5175_v39 = vmax.f32 %v5173_v30, %v5174_v34  ;;  %v5178_v41 = vsel %vm4736_vm3, %v4173_v36, -inf  ;;  %v5179_v42 = vsel %vm4736_vm3, %v4353_v37, -inf }
 0x32e   : > { %v5180_v45 = vmax.f32 %v5178_v41, %v5179_v42 }
 0x32f   : > { %5523 = vst.msk [vmem:[%s7000_s17 + $0xf4] sm:$0xf] %vm5461_vm4, %v5450_v38  ;;  %v5177_v40 = vmax.f32 %v5175_v39, %v5176_v35 }
 0x331   : > { %v5307_v43 = vadd.f32 %v7608_v6, %v5177_v40 }
 0x333   : > { %v5379_v44 = vmax.f32 %v5307_v43, 0.0  ;;  %v4533_v46 = vpop.f32.mrf.mxu2  ;;  %v4713_v47 = vpop.f32.mrf.mxu3 }
 0x334   : > { %v5181_v48 = vsel %vm4736_vm3, %v4533_v46, -inf  ;;  %v4176_v49 = vpop.f32.mrf.mxu0  ;;  %v4356_v50 = vpop.f32.mrf.mxu1  ;;  %v5183_v53 = vsel %vm4736_vm3, %v4713_v47, -inf }
 0x335   : > { %v5451_v51 = vpack.c.bf16 %v5379_v44, %v5379_v44  ;;  %v5182_v52 = vmax.f32 %v5180_v45, %v5181_v48  ;;  %v5185_v54 = vsel %vm4736_vm3, %v4176_v49, -inf  ;;  %v5186_v55 = vsel %vm4736_vm3, %v4356_v50, -inf }
 0x336   : > { %v5187_v58 = vmax.f32 %v5185_v54, %v5186_v55 }
 0x337   : > { %5524 = vst.msk [vmem:[%s7000_s17 + $0xf8] sm:$0xf] %vm5461_vm4, %v5451_v51  ;;  %v5184_v56 = vmax.f32 %v5182_v52, %v5183_v53 }
 0x339   : > { %v5308_v57 = vadd.f32 %v7608_v6, %v5184_v56 }
 0x33b   : > { %v5380_v59 = vmax.f32 %v5308_v57, 0.0  ;;  %v4536_v60 = vpop.f32.mrf.mxu2  ;;  %v4716_v61 = vpop.f32.mrf.mxu3 }
 0x33c   : > { %v5188_v62 = vsel %vm4736_vm3, %v4536_v60, -inf  ;;  %v5190_v63 = vsel %vm4736_vm3, %v4716_v61, -inf  ;;  %v4178_v0 = vpop.f32.mrf.mxu0  ;;  %v4358_v1 = vpop.f32.mrf.mxu1 }
 0x33d   : > { %v5452_v8 = vpack.c.bf16 %v5380_v59, %v5380_v59  ;;  %v5189_v2 = vmax.f32 %v5187_v58, %v5188_v62  ;;  %v5192_v5 = vsel %vm4736_vm3, %v4178_v0, -inf  ;;  %v5193_v3 = vsel %vm4736_vm3, %v4358_v1, -inf }
 0x33e   : > { %v5194_v10 = vmax.f32 %v5192_v5, %v5193_v3 }
 0x33f   : > { %5525 = vst.msk [vmem:[%s7000_s17 + $0xfc] sm:$0xf] %vm5461_vm4, %v5452_v8  ;;  %v5191_v4 = vmax.f32 %v5189_v2, %v5190_v63 }
 0x341   : > { %v5309_v7 = vadd.f32 %v7608_v6, %v5191_v4 }
 0x343   : > { %v5381_v9 = vmax.f32 %v5309_v7, 0.0  ;;  %v4538_v11 = vpop.f32.mrf.mxu2  ;;  %v4718_v12 = vpop.f32.mrf.mxu3 }
 0x344   : > { %v5195_v13 = vsel %vm4736_vm3, %v4538_v11, -inf  ;;  %v4181_v14 = vpop.f32.mrf.mxu0  ;;  %v4361_v15 = vpop.f32.mrf.mxu1  ;;  %v5197_v18 = vsel %vm4736_vm3, %v4718_v12, -inf }
 0x345   : > { %v5453_v16 = vpack.c.bf16 %v5381_v9, %v5381_v9  ;;  %v5196_v17 = vmax.f32 %v5194_v10, %v5195_v13  ;;  %v5199_v19 = vsel %vm4736_vm3, %v4181_v14, -inf  ;;  %v5200_v20 = vsel %vm4736_vm3, %v4361_v15, -inf }
 0x346   : > { %v5201_v23 = vmax.f32 %v5199_v19, %v5200_v20 }
 0x347   : > { %5526 = vst.msk [vmem:[%s7000_s17 + $0x100] sm:$0xf] %vm5461_vm4, %v5453_v16  ;;  %v5198_v21 = vmax.f32 %v5196_v17, %v5197_v18 }
 0x349   : > { %v5310_v22 = vadd.f32 %v7608_v6, %v5198_v21 }
 0x34b   : > { %v5382_v24 = vmax.f32 %v5310_v22, 0.0  ;;  %v4541_v25 = vpop.f32.mrf.mxu2  ;;  %v4721_v26 = vpop.f32.mrf.mxu3 }
 0x34c   : > { %v5202_v27 = vsel %vm4736_vm3, %v4541_v25, -inf  ;;  %v5204_v28 = vsel %vm4736_vm3, %v4721_v26, -inf  ;;  %v4183_v29 = vpop.f32.mrf.mxu0  ;;  %v4363_v30 = vpop.f32.mrf.mxu1 }
 0x34d   : > { %v5454_v31 = vpack.c.bf16 %v5382_v24, %v5382_v24  ;;  %v5203_v32 = vmax.f32 %v5201_v23, %v5202_v27  ;;  %v5206_v34 = vsel %vm4736_vm3, %v4183_v29, -inf  ;;  %v5207_v35 = vsel %vm4736_vm3, %v4363_v30, -inf }
 0x34e   : > { %v5208_v38 = vmax.f32 %v5206_v34, %v5207_v35 }
 0x34f   : > { %5527 = vst.msk [vmem:[%s7000_s17 + $0x104] sm:$0xf] %vm5461_vm4, %v5454_v31  ;;  %v5205_v33 = vmax.f32 %v5203_v32, %v5204_v28 }
 0x351   : > { %v5311_v36 = vadd.f32 %v7608_v6, %v5205_v33 }
 0x353   : > { %v5383_v37 = vmax.f32 %v5311_v36, 0.0  ;;  %v4543_v39 = vpop.f32.mrf.mxu2  ;;  %v4723_v40 = vpop.f32.mrf.mxu3 }
 0x354   : > { %v5209_v41 = vsel %vm4736_vm3, %v4543_v39, -inf  ;;  %v4186_v42 = vpop.f32.mrf.mxu0  ;;  %v4366_v43 = vpop.f32.mrf.mxu1  ;;  %v5211_v46 = vsel %vm4736_vm3, %v4723_v40, -inf }
 0x355   : > { %v5455_v44 = vpack.c.bf16 %v5383_v37, %v5383_v37  ;;  %v5210_v45 = vmax.f32 %v5208_v38, %v5209_v41  ;;  %v5213_v47 = vsel %vm4736_vm3, %v4186_v42, -inf  ;;  %v5214_v48 = vsel %vm4736_vm3, %v4366_v43, -inf }
 0x356   : > { %v5215_v51 = vmax.f32 %v5213_v47, %v5214_v48 }
 0x357   : > { %5528 = vst.msk [vmem:[%s7000_s17 + $0x108] sm:$0xf] %vm5461_vm4, %v5455_v44  ;;  %v5212_v49 = vmax.f32 %v5210_v45, %v5211_v46 }
 0x359   : > { %v5312_v50 = vadd.f32 %v7608_v6, %v5212_v49 }
 0x35b   : > { %v5384_v52 = vmax.f32 %v5312_v50, 0.0  ;;  %v4546_v53 = vpop.f32.mrf.mxu2  ;;  %v4726_v54 = vpop.f32.mrf.mxu3 }
 0x35c   : > { %v5216_v55 = vsel %vm4736_vm3, %v4546_v53, -inf  ;;  %v5218_v56 = vsel %vm4736_vm3, %v4726_v54, -inf  ;;  %v4188_v57 = vpop.f32.mrf.mxu0  ;;  %v4368_v58 = vpop.f32.mrf.mxu1 }
 0x35d   : > { %v5456_v59 = vpack.c.bf16 %v5384_v52, %v5384_v52  ;;  %v5217_v60 = vmax.f32 %v5215_v51, %v5216_v55  ;;  %v5220_v62 = vsel %vm4736_vm3, %v4188_v57, -inf  ;;  %v5221_v63 = vsel %vm4736_vm3, %v4368_v58, -inf }
 0x35e   : > { %v5222_v8 = vmax.f32 %v5220_v62, %v5221_v63 }
 0x35f   : > { %5529 = vst.msk [vmem:[%s7000_s17 + $0x10c] sm:$0xf] %vm5461_vm4, %v5456_v59  ;;  %v5219_v61 = vmax.f32 %v5217_v60, %v5218_v56 }
 0x361   : > { %v5313_v0 = vadd.f32 %v7608_v6, %v5219_v61 }
 0x363   : > { %v5385_v1 = vmax.f32 %v5313_v0, 0.0  ;;  %v4548_v2 = vpop.f32.mrf.mxu2  ;;  %v4728_v4 = vpop.f32.mrf.mxu3 }
 0x364   : > { %v5223_v5 = vsel %vm4736_vm3, %v4548_v2, -inf  ;;  %v4191_v3 = vpop.f32.mrf.mxu0  ;;  %v4371_v7 = vpop.f32.mrf.mxu1  ;;  %v5225_v11 = vsel %vm4736_vm3, %v4728_v4, -inf }
 0x365   : > { %v5457_v9 = vpack.c.bf16 %v5385_v1, %v5385_v1  ;;  %v5224_v10 = vmax.f32 %v5222_v8, %v5223_v5  ;;  %v5227_v12 = vsel %vm4736_vm3, %v4191_v3, -inf  ;;  %v5228_v13 = vsel %vm4736_vm3, %v4371_v7, -inf }
 0x366   : > { %v5229_v16 = vmax.f32 %v5227_v12, %v5228_v13 }
 0x367   : > { %5530 = vst.msk [vmem:[%s7000_s17 + $0x110] sm:$0xf] %vm5461_vm4, %v5457_v9  ;;  %v5226_v14 = vmax.f32 %v5224_v10, %v5225_v11 }
 0x369   : > { %v5314_v15 = vadd.f32 %v7608_v6, %v5226_v14 }
 0x36b   : > { %v5386_v17 = vmax.f32 %v5314_v15, 0.0  ;;  %v4551_v18 = vpop.f32.mrf.mxu2  ;;  %v4731_v19 = vpop.f32.mrf.mxu3 }
 0x36c   : > { %v5230_v20 = vsel %vm4736_vm3, %v4551_v18, -inf  ;;  %v5232_v21 = vsel %vm4736_vm3, %v4731_v19, -inf  ;;  %v4193_v24 = vpop.f32.mrf.mxu0  ;;  %v4373_v25 = vpop.f32.mrf.mxu1 }
 0x36d   : > { %v5458_v22 = vpack.c.bf16 %v5386_v17, %v5386_v17  ;;  %v5231_v23 = vmax.f32 %v5229_v16, %v5230_v20  ;;  %v5234_v27 = vsel %vm4736_vm3, %v4193_v24, -inf  ;;  %v5235_v28 = vsel %vm4736_vm3, %v4373_v25, -inf }
 0x36e   : > { %v5236_v31 = vmax.f32 %v5234_v27, %v5235_v28 }
 0x36f   : > { %5531 = vst.msk [vmem:[%s7000_s17 + $0x114] sm:$0xf] %vm5461_vm4, %v5458_v22  ;;  %v5233_v26 = vmax.f32 %v5231_v23, %v5232_v21 }
 0x371   : > { %v5315_v29 = vadd.f32 %v7608_v6, %v5233_v26 }
 0x373   : > { %v5387_v30 = vmax.f32 %v5315_v29, 0.0  ;;  %v4553_v32 = vpop.f32.mrf.mxu2  ;;  %v4733_v33 = vpop.f32.mrf.mxu3 }
 0x374   : > { %v5237_v34 = vsel %vm4736_vm3, %v4553_v32, -inf  ;;  %v5239_v37 = vsel %vm4736_vm3, %v4733_v33, -inf }
 0x375   : > { %v5459_v35 = vpack.c.bf16 %v5387_v30, %v5387_v30  ;;  %v5238_v36 = vmax.f32 %v5236_v31, %v5237_v34 }
 0x377   : > { %5532 = vst.msk [vmem:[%s7000_s17 + $0x118] sm:$0xf] %vm5461_vm4, %v5459_v35  ;;  %v5240_v38 = vmax.f32 %v5238_v36, %v5239_v37 }
 0x379   : > { %v5316_v39 = vadd.f32 %v7608_v6, %v5240_v38 }
 0x37b   : > { %v5388_v40 = vmax.f32 %v5316_v39, 0.0 }
 0x37d   : > { %v5460_v41 = vpack.c.bf16 %v5388_v40, %v5388_v40 }
 0x37f   : > { %5533 = vst.msk [vmem:[%s7000_s17 + $0x11c] sm:$0xf] %vm5461_vm4, %v5460_v41 }
 0x380 PF: > { %p10_p9 = scmp.ge.s32.totalorder %s6586_s16, 4   ;;  %s7737_s12 = smov %s6542_s13 }
 0x381   : > { %s7738_s13 = smov %s6595_s19  ;;  %s7739_s14 = smov %s6586_s16 }
 0x382   :  { %12 = sbr.rel (!%p10_p9) target bundleno = 2 (0x2), region = 123 }

// kernel: cnn_forward.5
= control target key start
LH: loop header
LB: loop body
LE: loop exit
PB: predicated region body
PF: predicated region fallthrough
CT: control target
= control target key end

     0   :  { %vm879_vm0 = vcmask 130048   ;;  %vm1834_vm1 = vcmask 261120   ;;  %vm2199_vm2 = vcmask 257024   ;;  %s4867_s1 = inlined_call_operand.vmem [shape: bf16[144,32], index: 1, kind: input, shape index: {}]   ;;  %s4868_s0 = inlined_call_operand.vmem [shape: bf16[4,288,144], index: 0, kind: input, shape index: {}]   ;;  %s4869_s2 = inlined_call_operand.vmem [shape: f32[1,32], index: 2, kind: input, shape index: {}]   ;;  %s4870_s3 = inlined_call_operand.vmem [shape: bf16[288,32], index: 3, kind: output, shape index: {}]  }
   0x1   :  { %v3075_v0 = vld [vmem:[%s4867_s1 + $0x38] sm:$0xff]  ;;  %v3076_v1 = vld [vmem:[%s4867_s1 + $0x40] sm:$0xff]  ;;  %v2244_v3 = vld [vmem:[%s4868_s0 + $0x8] sm:$0xf0] }
   0x2   :  { %v2924_v2 = vld [vmem:[%s4868_s0 + $0x4] sm:$0xf]  ;;  %1096 = vmatpush.bf16.msra.mxu0 %v3075_v0  ;;  %3077 = vmatpush.bf16.msra.mxu2 %v3075_v0  ;;  %v3074_v5 = vld [vmem:[%s4867_s1 + $0x30] sm:$0xff]  ;;  %v3073_v6 = vld [vmem:[%s4867_s1 + $0x28] sm:$0xff] }
   0x3   :  { %v2247_v4 = vor.u32 %v2924_v2, %v2244_v3  ;;  %1472 = vmatpush.bf16.msra.mxu1 %v3076_v1  ;;  %3085 = vmatpush.bf16.msra.mxu3 %v3076_v1  ;;  %v2998_v7 = vld [vmem:[%s4868_s0 + $0x254] sm:$0xf]  ;;  %v2540_v8 = vld [vmem:[%s4868_s0 + $0x258] sm:$0xf0]  ;;  %v3072_v10 = vld [vmem:[%s4867_s1 + $0x20] sm:$0xff] }
   0x4   :  { %v2543_v9 = vor.u32 %v2998_v7, %v2540_v8  ;;  %v3071_v11 = vld [vmem:[%s4867_s1 + $0x18] sm:$0xff]  ;;  %v2926_v12 = vld [vmem:[%s4868_s0 + $0x14] sm:$0xf]  ;;  %v3069_v16 = vld [vmem:[%s4867_s1 + $0x8] sm:$0xff] }
   0x5   :  { %v2252_v13 = vld [vmem:[%s4868_s0 + $0x18] sm:$0xf0]  ;;  %v3070_v15 = vld [vmem:[%s4867_s1 + $0x10] sm:$0xff]  ;;  %v3000_v17 = vld [vmem:[%s4868_s0 + $0x264] sm:$0xf] }
   0x6   :  { %2852 = vmatmul.msk.bf16.vlgmr.msra.gmra.mxu1 %vm879_vm0, %v2247_v4  ;;  %1097 = vmatpush.bf16.msra.mxu0 %v3074_v5  ;;  %v2255_v14 = vor.u32 %v2926_v12, %v2252_v13  ;;  %v2548_v18 = vld [vmem:[%s4868_s0 + $0x268] sm:$0xf0]  ;;  %v3068_v20 = vld [vmem:[%s4867_s1] sm:$0xff]  ;;  %v2925_v22 = vld [vmem:[%s4868_s0 + $0x4] sm:$0xf0] }
   0x7   :  { %3078 = vmatpush.bf16.msra.mxu2 %v3074_v5  ;;  %2889 = vmatmul.msk.bf16.vlgmr.msra.gmra.mxu3 %vm879_vm0, %v2543_v9  ;;  %v2551_v19 = vor.u32 %v3000_v17, %v2548_v18  ;;  %v2242_v21 = vld [vmem:[%s4868_s0] sm:$0xf]  ;;  %v2997_v24 = vld [vmem:[%s4868_s0 + $0x244] sm:$0xf0]  ;;  %v2928_v27 = vld [vmem:[%s4868_s0 + $0x24] sm:$0xf] }
   0x8   :  { %v2530_v23 = vld [vmem:[%s4868_s0 + $0x240] sm:$0xf]  ;;  %v2243_v25 = vor.u32 %v2925_v22, %v2242_v21  ;;  %v2260_v28 = vld [vmem:[%s4868_s0 + $0x28] sm:$0xf0]  ;;  %v3002_v30 = vld [vmem:[%s4868_s0 + $0x274] sm:$0xf] }
   0x9   :  { %v2531_v26 = vor.u32 %v2997_v24, %v2530_v23  ;;  %v2263_v29 = vor.u32 %v2928_v27, %v2260_v28  ;;  %v2556_v31 = vld [vmem:[%s4868_s0 + $0x278] sm:$0xf0]  ;;  %v2250_v33 = vld [vmem:[%s4868_s0 + $0x10] sm:$0xf]  ;;  %v2927_v34 = vld [vmem:[%s4868_s0 + $0x14] sm:$0xf0] }
   0xa   :  { %1098 = vmatpush.bf16.msra.mxu0 %v3073_v6  ;;  %v2559_v32 = vor.u32 %v3002_v30, %v2556_v31  ;;  %v2538_v35 = vld [vmem:[%s4868_s0 + $0x250] sm:$0xf]  ;;  %v2999_v36 = vld [vmem:[%s4868_s0 + $0x254] sm:$0xf0]  ;;  %v2251_v37 = vor.u32 %v2927_v34, %v2250_v33  ;;  %v2930_v39 = vld [vmem:[%s4868_s0 + $0x34] sm:$0xf] }
   0xb   :  { %3079 = vmatpush.bf16.msra.mxu2 %v3073_v6  ;;  %v2539_v38 = vor.u32 %v2999_v36, %v2538_v35  ;;  %v2268_v40 = vld [vmem:[%s4868_s0 + $0x38] sm:$0xf0]  ;;  %v3004_v42 = vld [vmem:[%s4868_s0 + $0x284] sm:$0xf]  ;;  %v2564_v43 = vld [vmem:[%s4868_s0 + $0x288] sm:$0xf0] }
   0xc   :  { %v2271_v41 = vor.u32 %v2930_v39, %v2268_v40  ;;  %v2567_v44 = vor.u32 %v3004_v42, %v2564_v43  ;;  %v2258_v45 = vld [vmem:[%s4868_s0 + $0x20] sm:$0xf]  ;;  %v2929_v46 = vld [vmem:[%s4868_s0 + $0x24] sm:$0xf0]  ;;  %v2932_v51 = vld [vmem:[%s4868_s0 + $0x44] sm:$0xf] }
   0xd   :  { %v2546_v47 = vld [vmem:[%s4868_s0 + $0x260] sm:$0xf]  ;;  %v3001_v48 = vld [vmem:[%s4868_s0 + $0x264] sm:$0xf0]  ;;  %v2259_v49 = vor.u32 %v2929_v46, %v2258_v45  ;;  %v2276_v52 = vld [vmem:[%s4868_s0 + $0x48] sm:$0xf0] }
   0xe   :  { %1099 = vmatpush.bf16.msra.mxu0 %v3072_v10  ;;  %v2547_v50 = vor.u32 %v3001_v48, %v2546_v47  ;;  %v2279_v53 = vor.u32 %v2932_v51, %v2276_v52  ;;  %v3006_v54 = vld [vmem:[%s4868_s0 + $0x294] sm:$0xf]  ;;  %v2572_v55 = vld [vmem:[%s4868_s0 + $0x298] sm:$0xf0]  ;;  %v2266_v57 = vld [vmem:[%s4868_s0 + $0x30] sm:$0xf] }
   0xf   :  { %3080 = vmatpush.bf16.msra.mxu2 %v3072_v10  ;;  %v2575_v56 = vor.u32 %v3006_v54, %v2572_v55  ;;  %v2931_v58 = vld [vmem:[%s4868_s0 + $0x34] sm:$0xf0]  ;;  %v2554_v59 = vld [vmem:[%s4868_s0 + $0x270] sm:$0xf]  ;;  %v2934_v63 = vld [vmem:[%s4868_s0 + $0x54] sm:$0xf] }
  0x10   :  { %v3003_v60 = vld [vmem:[%s4868_s0 + $0x274] sm:$0xf0]  ;;  %v2267_v61 = vor.u32 %v2931_v58, %v2266_v57  ;;  %v2284_v0 = vld [vmem:[%s4868_s0 + $0x58] sm:$0xf0]  ;;  %v3008_v2 = vld [vmem:[%s4868_s0 + $0x2a4] sm:$0xf] }
  0x11   :  { %v2555_v62 = vor.u32 %v3003_v60, %v2554_v59  ;;  %v2287_v1 = vor.u32 %v2934_v63, %v2284_v0  ;;  %v2580_v3 = vld [vmem:[%s4868_s0 + $0x2a8] sm:$0xf0]  ;;  %v2274_v5 = vld [vmem:[%s4868_s0 + $0x40] sm:$0xf]  ;;  %v2933_v6 = vld [vmem:[%s4868_s0 + $0x44] sm:$0xf0] }
  0x12   :  { %1100 = vmatpush.bf16.msra.mxu0 %v3071_v11  ;;  %v2583_v4 = vor.u32 %v3008_v2, %v2580_v3  ;;  %v2562_v7 = vld [vmem:[%s4868_s0 + $0x280] sm:$0xf]  ;;  %v3005_v8 = vld [vmem:[%s4868_s0 + $0x284] sm:$0xf0]  ;;  %v2275_v9 = vor.u32 %v2933_v6, %v2274_v5  ;;  %v2292_v12 = vld [vmem:[%s4868_s0 + $0x68] sm:$0xf0] }
  0x13   :  { %3081 = vmatpush.bf16.msra.mxu2 %v3071_v11  ;;  %v2563_v10 = vor.u32 %v3005_v8, %v2562_v7  ;;  %v2936_v11 = vld [vmem:[%s4868_s0 + $0x64] sm:$0xf]  ;;  %v2282_v17 = vld [vmem:[%s4868_s0 + $0x50] sm:$0xf]  ;;  %v2935_v18 = vld [vmem:[%s4868_s0 + $0x54] sm:$0xf0] }
  0x14   :  { %v2295_v13 = vor.u32 %v2936_v11, %v2292_v12  ;;  %v2283_v21 = vor.u32 %v2935_v18, %v2282_v17  ;;  %v2938_v23 = vld [vmem:[%s4868_s0 + $0x74] sm:$0xf]  ;;  %v2300_v24 = vld [vmem:[%s4868_s0 + $0x78] sm:$0xf0]  ;;  %v2596_v27 = vld [vmem:[%s4868_s0 + $0x2c8] sm:$0xf0] }
  0x15   :  { %v2937_v30 = vld [vmem:[%s4868_s0 + $0x64] sm:$0xf0]  ;;  %v2578_v31 = vld [vmem:[%s4868_s0 + $0x2a0] sm:$0xf]  ;;  %v2940_v35 = vld [vmem:[%s4868_s0 + $0x84] sm:$0xf] }
  0x16   :  { %2853 = vmatmul.msk.bf16.gmra.mxu1 %vm879_vm0, %v2255_v14  ;;  %1101 = vmatpush.bf16.msra.mxu0 %v3070_v15  ;;  %v3010_v14 = vld [vmem:[%s4868_s0 + $0x2b4] sm:$0xf]  ;;  %v2308_v36 = vld [vmem:[%s4868_s0 + $0x88] sm:$0xf0]  ;;  %v2604_v40 = vld [vmem:[%s4868_s0 + $0x2d8] sm:$0xf0] }
  0x17   :  { %3082 = vmatpush.bf16.msra.mxu2 %v3070_v15  ;;  %2890 = vmatmul.msk.bf16.gmra.mxu3 %vm879_vm0, %v2551_v19  ;;  %v2588_v15 = vld [vmem:[%s4868_s0 + $0x2b8] sm:$0xf0]  ;;  %v2570_v19 = vld [vmem:[%s4868_s0 + $0x290] sm:$0xf]  ;;  %v3014_v39 = vld [vmem:[%s4868_s0 + $0x2d4] sm:$0xf] }
  0x18   :  { %v2298_v42 = vld [vmem:[%s4868_s0 + $0x70] sm:$0xf]  ;;  %v2939_v43 = vld [vmem:[%s4868_s0 + $0x74] sm:$0xf0]  ;;  %v2316_v51 = vld [vmem:[%s4868_s0 + $0x98] sm:$0xf0] }
  0x19   :  { %v2586_v45 = vld [vmem:[%s4868_s0 + $0x2b0] sm:$0xf]  ;;  %v3011_v46 = vld [vmem:[%s4868_s0 + $0x2b4] sm:$0xf0]  ;;  %v2299_v47 = vor.u32 %v2939_v43, %v2298_v42  ;;  %v3016_v55 = vld [vmem:[%s4868_s0 + $0x2e4] sm:$0xf] }
  0x1a   :  { %1102 = vmatpush.bf16.msra.mxu0 %v3069_v16  ;;  %v2306_v58 = vld [vmem:[%s4868_s0 + $0x80] sm:$0xf]  ;;  %v2941_v59 = vld [vmem:[%s4868_s0 + $0x84] sm:$0xf0]  ;;  %v2324_v5 = vld [vmem:[%s4868_s0 + $0xa8] sm:$0xf0] }
  0x1b   :  { %3083 = vmatpush.bf16.msra.mxu2 %v3069_v16  ;;  %v2591_v16 = vor.u32 %v3010_v14, %v2588_v15  ;;  %v2307_v63 = vor.u32 %v2941_v59, %v2306_v58  ;;  %v3018_v12 = vld [vmem:[%s4868_s0 + $0x2f4] sm:$0xf]  ;;  %v2314_v15 = vld [vmem:[%s4868_s0 + $0x90] sm:$0xf]  ;;  %v3017_v42 = vld [vmem:[%s4868_s0 + $0x2e4] sm:$0xf0] }
  0x1c   :  { %v2602_v18 = vld [vmem:[%s4868_s0 + $0x2d0] sm:$0xf]  ;;  %v3022_v59 = vld [vmem:[%s4868_s0 + $0x314] sm:$0xf] }
  0x1e   :  { %1103 = vmatpush.bf16.msra.mxu0 %v3068_v20 }
  0x1f   :  { %3084 = vmatpush.bf16.msra.mxu2 %v3068_v20  ;;  %v3007_v20 = vld [vmem:[%s4868_s0 + $0x294] sm:$0xf0] }
  0x20   :  { %v2571_v22 = vor.u32 %v3007_v20, %v2570_v19  ;;  %v3015_v19 = vld [vmem:[%s4868_s0 + $0x2d4] sm:$0xf0] }
  0x21   :  { %1104 = vmatmul.bf16.vlgmr.msra.gmra.mxu0 %v2243_v25  ;;  %v2303_v25 = vor.u32 %v2938_v23, %v2300_v24  ;;  %v2603_v24 = vor.u32 %v3015_v19, %v2602_v18 }
  0x22   :  { %1284 = vmatmul.bf16.vlgmr.msra.gmra.mxu2 %v2531_v26  ;;  %v3012_v26 = vld [vmem:[%s4868_s0 + $0x2c4] sm:$0xf] }
  0x23   :  { %v2599_v28 = vor.u32 %v3012_v26, %v2596_v27  ;;  %v2946_v26 = vld [vmem:[%s4868_s0 + $0xb4] sm:$0xf]  ;;  %v2332_v27 = vld [vmem:[%s4868_s0 + $0xb8] sm:$0xf0] }
  0x26   :  { %2854 = vmatmul.msk.bf16.gmra.mxu1 %vm879_vm0, %v2263_v29  ;;  %v2290_v29 = vld [vmem:[%s4868_s0 + $0x60] sm:$0xf] }
  0x27   :  { %2891 = vmatmul.msk.bf16.gmra.mxu3 %vm879_vm0, %v2559_v32  ;;  %v3009_v32 = vld [vmem:[%s4868_s0 + $0x2a4] sm:$0xf0]  ;;  %v2291_v33 = vor.u32 %v2937_v30, %v2290_v29 }
  0x28   :  { %v2579_v34 = vor.u32 %v3009_v32, %v2578_v31 }
  0x31   :  { %1109 = vmatmul.bf16.gmra.mxu0 %v2251_v37  ;;  %v2311_v37 = vor.u32 %v2940_v35, %v2308_v36  ;;  %v3020_v35 = vld [vmem:[%s4868_s0 + $0x304] sm:$0xf]  ;;  %v2628_v36 = vld [vmem:[%s4868_s0 + $0x308] sm:$0xf0] }
  0x32   :  { %1289 = vmatmul.bf16.gmra.mxu2 %v2539_v38 }
  0x36   :  { %2855 = vmatmul.msk.bf16.gmra.mxu1 %vm879_vm0, %v2271_v41  ;;  %v2607_v41 = vor.u32 %v3014_v39, %v2604_v40  ;;  %v2945_v39 = vld [vmem:[%s4868_s0 + $0xa4] sm:$0xf0] }
  0x37   :  { %2892 = vmatmul.msk.bf16.gmra.mxu3 %vm879_vm0, %v2567_v44 }
  0x41   :  { %1114 = vmatmul.bf16.gmra.mxu0 %v2259_v49  ;;  %v2587_v49 = vor.u32 %v3011_v46, %v2586_v45 }
  0x42   :  { %1294 = vmatmul.bf16.gmra.mxu2 %v2547_v50  ;;  %v2942_v50 = vld [vmem:[%s4868_s0 + $0x94] sm:$0xf] }
  0x43   :  { %v2319_v52 = vor.u32 %v2942_v50, %v2316_v51  ;;  %v2948_v50 = vld [vmem:[%s4868_s0 + $0xc4] sm:$0xf]  ;;  %v2340_v51 = vld [vmem:[%s4868_s0 + $0xc8] sm:$0xf0] }
  0x46   :  { %2856 = vmatmul.msk.bf16.gmra.mxu1 %vm879_vm0, %v2279_v53 }
  0x47   :  { %2893 = vmatmul.msk.bf16.gmra.mxu3 %vm879_vm0, %v2575_v56  ;;  %v2612_v56 = vld [vmem:[%s4868_s0 + $0x2e8] sm:$0xf0] }
  0x48   :  { %v2615_v57 = vor.u32 %v3016_v55, %v2612_v56 }
  0x51   :  { %1119 = vmatmul.bf16.gmra.mxu0 %v2267_v61  ;;  %v2594_v61 = vld [vmem:[%s4868_s0 + $0x2c0] sm:$0xf] }
  0x52   :  { %1299 = vmatmul.bf16.gmra.mxu2 %v2555_v62  ;;  %v3013_v62 = vld [vmem:[%s4868_s0 + $0x2c4] sm:$0xf0] }
  0x53   :  { %v2595_v2 = vor.u32 %v3013_v62, %v2594_v61  ;;  %v2330_v62 = vld [vmem:[%s4868_s0 + $0xb0] sm:$0xf] }
  0x56   :  { %2857 = vmatmul.msk.bf16.gmra.mxu1 %vm879_vm0, %v2287_v1 }
  0x57   :  { %2894 = vmatmul.msk.bf16.gmra.mxu3 %vm879_vm0, %v2583_v4  ;;  %v2944_v4 = vld [vmem:[%s4868_s0 + $0xa4] sm:$0xf] }
  0x58   :  { %v2327_v6 = vor.u32 %v2944_v4, %v2324_v5 }
  0x61   :  { %1124 = vmatmul.bf16.gmra.mxu0 %v2275_v9 }
  0x62   :  { %1304 = vmatmul.bf16.gmra.mxu2 %v2563_v10 }
  0x66   :  { %2858 = vmatmul.msk.bf16.gmra.mxu1 %vm879_vm0, %v2295_v13  ;;  %v2620_v13 = vld [vmem:[%s4868_s0 + $0x2f8] sm:$0xf0] }
  0x67   :  { %2895 = vmatmul.msk.bf16.gmra.mxu3 %vm879_vm0, %v2591_v16  ;;  %v2623_v14 = vor.u32 %v3018_v12, %v2620_v13  ;;  %v2943_v16 = vld [vmem:[%s4868_s0 + $0x94] sm:$0xf0] }
  0x71   :  { %1129 = vmatmul.bf16.gmra.mxu0 %v2283_v21  ;;  %v2315_v21 = vor.u32 %v2943_v16, %v2314_v15  ;;  %v2348_v15 = vld [vmem:[%s4868_s0 + $0xd8] sm:$0xf0] }
  0x72   :  { %1309 = vmatmul.bf16.gmra.mxu2 %v2571_v22 }
  0x76   :  { %2859 = vmatmul.msk.bf16.gmra.mxu1 %vm879_vm0, %v2303_v25 }
  0x77   :  { %2896 = vmatmul.msk.bf16.gmra.mxu3 %vm879_vm0, %v2599_v28  ;;  %v2335_v28 = vor.u32 %v2946_v26, %v2332_v27  ;;  %v2644_v26 = vld [vmem:[%s4868_s0 + $0x328] sm:$0xf0] }
  0x81   :  { %1134 = vmatmul.bf16.gmra.mxu0 %v2291_v33 }
  0x82   :  { %1314 = vmatmul.bf16.gmra.mxu2 %v2579_v34 }
  0x83   :  { %v1474_v38 = vpop.f32.mrf.mxu1 }
  0x86   :  { %2860 = vmatmul.msk.bf16.gmra.mxu1 %vm879_vm0, %v2311_v37  ;;  %v2631_v37 = vor.u32 %v3020_v35, %v2628_v36 }
  0x87   :  { %2897 = vmatmul.msk.bf16.gmra.mxu3 %vm879_vm0, %v2607_v41  ;;  %v2610_v41 = vld [vmem:[%s4868_s0 + $0x2e0] sm:$0xf] }
  0x8a   :  { %v1659_v48 = vpop.f32.mrf.mxu3 }
  0x8b   :  { %v1476_v44 = vpop.f32.mrf.mxu1 }
  0x91   :  { %1139 = vmatmul.bf16.gmra.mxu0 %v2299_v47 }
  0x92   :  { %1319 = vmatmul.bf16.gmra.mxu2 %v2587_v49  ;;  %v3363_v54 = vpop.f32.mrf.mxu3 }
  0x93   :  { %v1479_v53 = vpop.f32.mrf.mxu1 }
  0x96   :  { %2861 = vmatmul.msk.bf16.gmra.mxu1 %vm879_vm0, %v2319_v52  ;;  %v2343_v52 = vor.u32 %v2948_v50, %v2340_v51 }
  0x97   :  { %2898 = vmatmul.msk.bf16.gmra.mxu3 %vm879_vm0, %v2615_v57 }
  0x9a   :  { %v3385_v0 = vpop.f32.mrf.mxu3 }
  0x9b   :  { %v1481_v60 = vpop.f32.mrf.mxu1 }
  0x9e   :  { %v1105_v1 = vpop.f32.mrf.mxu0 }
  0x9f   :  { %v3387_v3 = vadd.f32 %v1474_v38, %v1105_v1  ;;  %v2322_v38 = vld [vmem:[%s4868_s0 + $0xa0] sm:$0xf]  ;;  %v2618_v1 = vld [vmem:[%s4868_s0 + $0x2f0] sm:$0xf] }
  0xa1   :  { %1144 = vmatmul.bf16.gmra.mxu0 %v2307_v63  ;;  %v2947_v63 = vld [vmem:[%s4868_s0 + $0xb4] sm:$0xf0] }
  0xa2   :  { %1324 = vmatmul.bf16.gmra.mxu2 %v2595_v2  ;;  %v3397_v9 = vpop.f32.mrf.mxu3  ;;  %v3019_v2 = vld [vmem:[%s4868_s0 + $0x2f4] sm:$0xf0]  ;;  %v2331_v5 = vor.u32 %v2947_v63, %v2330_v62 }
  0xa3   :  { %v1484_v7 = vpop.f32.mrf.mxu1  ;;  %v2619_v12 = vor.u32 %v3019_v2, %v2618_v1  ;;  %v3023_v62 = vld [vmem:[%s4868_s0 + $0x314] sm:$0xf0] }
  0xa5   :  { %v3395_v8 = vpop.f32.mrf.mxu2 }
  0xa6   :  { %4873 = vst [vmem:[#allocation2_spill] sm:$0xff] %v3395_v8  ;;  %2862 = vmatmul.msk.bf16.gmra.mxu1 %vm879_vm0, %v2327_v6  ;;  %v1107_v10 = vpop.f32.mrf.mxu0 }
  0xa7   :  { %v3400_v11 = vadd.f32 %v1476_v44, %v1107_v10  ;;  %2899 = vmatmul.msk.bf16.gmra.mxu3 %vm879_vm0, %v2623_v14  ;;  %v2323_v44 = vor.u32 %v2945_v39, %v2322_v38  ;;  %v2950_v14 = vld [vmem:[%s4868_s0 + $0xd4] sm:$0xf] }
  0xa8   :  { %v2351_v16 = vor.u32 %v2950_v14, %v2348_v15  ;;  %v2364_v14 = vld [vmem:[%s4868_s0 + $0xf8] sm:$0xf0] }
  0xaa   :  { %v3423_v22 = vpop.f32.mrf.mxu3 }
  0xab   :  { %v1486_v17 = vpop.f32.mrf.mxu1 }
  0xad   :  { %v3421_v20 = vpop.f32.mrf.mxu2 }
  0xae   :  { %4874 = vst [vmem:[#allocation3_spill] sm:$0xff] %v3421_v20  ;;  %v1110_v23 = vpop.f32.mrf.mxu0  ;;  %v2412_v20 = vld [vmem:[%s4868_s0 + $0x158] sm:$0xf0] }
  0xaf   :  { %v3425_v25 = vadd.f32 %v1479_v53, %v1110_v23 }
  0xb1   :  { %1149 = vmatmul.bf16.gmra.mxu0 %v2315_v21 }
  0xb2   :  { %1329 = vmatmul.bf16.gmra.mxu2 %v2603_v24  ;;  %v3433_v31 = vpop.f32.mrf.mxu3  ;;  %v3024_v24 = vld [vmem:[%s4868_s0 + $0x324] sm:$0xf] }
  0xb3   :  { %v1489_v29 = vpop.f32.mrf.mxu1  ;;  %v2647_v27 = vor.u32 %v3024_v24, %v2644_v26  ;;  %v3028_v26 = vld [vmem:[%s4868_s0 + $0x344] sm:$0xf] }
  0xb5   :  { %v1290_v30 = vpop.f32.mrf.mxu2 }
  0xb6   :  { %v3435_v32 = vadd.f32 %v1659_v48, %v1290_v30  ;;  %2863 = vmatmul.msk.bf16.gmra.mxu1 %vm879_vm0, %v2335_v28  ;;  %v1112_v33 = vpop.f32.mrf.mxu0  ;;  %v2611_v48 = vor.u32 %v3017_v42, %v2610_v41  ;;  %v2338_v28 = vld [vmem:[%s4868_s0 + $0xc0] sm:$0xf]  ;;  %v2952_v42 = vld [vmem:[%s4868_s0 + $0xe4] sm:$0xf] }
  0xb7   :  { %v3438_v34 = vadd.f32 %v1481_v60, %v1112_v33  ;;  %2900 = vmatmul.msk.bf16.gmra.mxu3 %vm879_vm0, %v2631_v37  ;;  %v2636_v60 = vld [vmem:[%s4868_s0 + $0x318] sm:$0xf0]  ;;  %v2626_v30 = vld [vmem:[%s4868_s0 + $0x300] sm:$0xf]  ;;  %v3021_v33 = vld [vmem:[%s4868_s0 + $0x304] sm:$0xf0] }
  0xb8   :  { %v2639_v61 = vor.u32 %v3022_v59, %v2636_v60  ;;  %v2346_v59 = vld [vmem:[%s4868_s0 + $0xd0] sm:$0xf] }
  0xba   :  { %v3459_v45 = vpop.f32.mrf.mxu3 }
  0xbb   :  { %v1491_v40 = vpop.f32.mrf.mxu1 }
  0xbd   :  { %v1292_v43 = vpop.f32.mrf.mxu2 }
  0xbe   :  { %v3462_v46 = vadd.f32 %v3363_v54, %v1292_v43  ;;  %v1115_v47 = vpop.f32.mrf.mxu0  ;;  %v2356_v43 = vld [vmem:[%s4868_s0 + $0xe8] sm:$0xf0] }
  0xbf   :  { %v3464_v49 = vadd.f32 %v1484_v7, %v1115_v47 }
  0xc1   :  { %1154 = vmatmul.bf16.gmra.mxu0 %v2323_v44  ;;  %v2359_v44 = vor.u32 %v2952_v42, %v2356_v43 }
  0xc2   :  { %1334 = vmatmul.bf16.gmra.mxu2 %v2611_v48  ;;  %v3472_v56 = vpop.f32.mrf.mxu3 }
  0xc3   :  { %v1494_v53 = vpop.f32.mrf.mxu1 }
  0xc5   :  { %v1295_v55 = vpop.f32.mrf.mxu2 }
  0xc6   :  { %v3475_v54 = vadd.f32 %v3385_v0, %v1295_v55  ;;  %2864 = vmatmul.msk.bf16.gmra.mxu1 %vm879_vm0, %v2343_v52  ;;  %v1117_v57 = vpop.f32.mrf.mxu0  ;;  %v2652_v55 = vld [vmem:[%s4868_s0 + $0x338] sm:$0xf0] }
  0xc7   :  { %v3478_v58 = vadd.f32 %v1486_v17, %v1117_v57  ;;  %2901 = vmatmul.msk.bf16.gmra.mxu3 %vm879_vm0, %v2639_v61  ;;  %v2634_v61 = vld [vmem:[%s4868_s0 + $0x310] sm:$0xf] }
  0xca   :  { %v3499_v6 = vpop.f32.mrf.mxu3 }
  0xcb   :  { %v1496_v0 = vpop.f32.mrf.mxu1 }
  0xcd   :  { %v1297_v4 = vpop.f32.mrf.mxu2 }
  0xce   :  { %v3502_v7 = vadd.f32 %v3397_v9, %v1297_v4  ;;  %v1120_v10 = vpop.f32.mrf.mxu0 }
  0xcf   :  { %v3504_v13 = vadd.f32 %v1489_v29, %v1120_v10 }
  0xd1   :  { %1159 = vmatmul.bf16.gmra.mxu0 %v2331_v5  ;;  %v2635_v5 = vor.u32 %v3023_v62, %v2634_v61  ;;  %v3030_v61 = vld [vmem:[%s4868_s0 + $0x354] sm:$0xf]  ;;  %v2668_v62 = vld [vmem:[%s4868_s0 + $0x358] sm:$0xf0] }
  0xd2   :  { %1339 = vmatmul.bf16.gmra.mxu2 %v2619_v12  ;;  %v3512_v19 = vpop.f32.mrf.mxu3  ;;  %v2954_v12 = vld [vmem:[%s4868_s0 + $0xf4] sm:$0xf] }
  0xd3   :  { %v1499_v17 = vpop.f32.mrf.mxu1  ;;  %v2367_v15 = vor.u32 %v2954_v12, %v2364_v14 }
  0xd5   :  { %v1300_v18 = vpop.f32.mrf.mxu2 }
  0xd6   :  { %v3515_v9 = vadd.f32 %v3423_v22, %v1300_v18  ;;  %2865 = vmatmul.msk.bf16.gmra.mxu1 %vm879_vm0, %v2351_v16  ;;  %v1122_v21 = vpop.f32.mrf.mxu0  ;;  %v2949_v22 = vld [vmem:[%s4868_s0 + $0xc4] sm:$0xf0] }
  0xd7   :  { %v3518_v23 = vadd.f32 %v1491_v40, %v1122_v21  ;;  %2902 = vmatmul.msk.bf16.gmra.mxu3 %vm879_vm0, %v2647_v27  ;;  %v2339_v36 = vor.u32 %v2949_v22, %v2338_v28  ;;  %v2627_v40 = vor.u32 %v3021_v33, %v2626_v30  ;;  %v2660_v27 = vld [vmem:[%s4868_s0 + $0x348] sm:$0xf0]  ;;  %v2354_v22 = vld [vmem:[%s4868_s0 + $0xe0] sm:$0xf]  ;;  %v3025_v33 = vld [vmem:[%s4868_s0 + $0x324] sm:$0xf0] }
  0xd8   :  { %v2663_v28 = vor.u32 %v3028_v26, %v2660_v27  ;;  %v2642_v30 = vld [vmem:[%s4868_s0 + $0x320] sm:$0xf] }
  0xd9   :  { %v2643_v43 = vor.u32 %v3025_v33, %v2642_v30 }
  0xda   :  { %v3539_v37 = vpop.f32.mrf.mxu3 }
  0xdb   :  { %v1501_v29 = vpop.f32.mrf.mxu1 }
  0xdd   :  { %v1302_v35 = vpop.f32.mrf.mxu2 }
  0xde   :  { %v3542_v38 = vadd.f32 %v3433_v31, %v1302_v35  ;;  %v1125_v39 = vpop.f32.mrf.mxu0 }
  0xdf   :  { %v3544_v41 = vadd.f32 %v1494_v53, %v1125_v39  ;;  %v3026_v53 = vld [vmem:[%s4868_s0 + $0x334] sm:$0xf] }
  0xe0   :  { %v2655_v57 = vor.u32 %v3026_v53, %v2652_v55 }
  0xe1   :  { %1164 = vmatmul.bf16.gmra.mxu0 %v2339_v36 }
  0xe2   :  { %1344 = vmatmul.bf16.gmra.mxu2 %v2627_v40  ;;  %v3552_v50 = vpop.f32.mrf.mxu3 }
  0xe3   :  { %v1504_v47 = vpop.f32.mrf.mxu1 }
  0xe5   :  { %v1305_v48 = vpop.f32.mrf.mxu2 }
  0xe6   :  { %v3555_v31 = vadd.f32 %v3459_v45, %v1305_v48  ;;  %2866 = vmatmul.msk.bf16.gmra.mxu1 %vm879_vm0, %v2359_v44  ;;  %v1127_v51 = vpop.f32.mrf.mxu0  ;;  %v2951_v45 = vld [vmem:[%s4868_s0 + $0xd4] sm:$0xf0]  ;;  %v2956_v48 = vld [vmem:[%s4868_s0 + $0x104] sm:$0xf] }
  0xe7   :  { %v3558_v52 = vadd.f32 %v1496_v0, %v1127_v51  ;;  %2903 = vmatmul.msk.bf16.gmra.mxu3 %vm879_vm0, %v2655_v57  ;;  %v2347_v0 = vor.u32 %v2951_v45, %v2346_v59  ;;  %v2372_v51 = vld [vmem:[%s4868_s0 + $0x108] sm:$0xf0] }
  0xe8   :  { %v2375_v53 = vor.u32 %v2956_v48, %v2372_v51  ;;  %v2370_v51 = vld [vmem:[%s4868_s0 + $0x100] sm:$0xf] }
  0xea   :  { %v3579_v1 = vpop.f32.mrf.mxu3 }
  0xeb   :  { %v1506_v60 = vpop.f32.mrf.mxu1 }
  0xed   :  { %v1307_v63 = vpop.f32.mrf.mxu2 }
  0xee   :  { %v3582_v2 = vadd.f32 %v3472_v56, %v1307_v63  ;;  %v1130_v4 = vpop.f32.mrf.mxu0  ;;  %v2671_v63 = vor.u32 %v3030_v61, %v2668_v62 }
  0xef   :  { %v3584_v10 = vadd.f32 %v1499_v17, %v1130_v4  ;;  %v2650_v4 = vld [vmem:[%s4868_s0 + $0x330] sm:$0xf] }
  0xf1   :  { %1169 = vmatmul.bf16.gmra.mxu0 %v2347_v0  ;;  %v2362_v0 = vld [vmem:[%s4868_s0 + $0xf0] sm:$0xf] }
  0xf2   :  { %1349 = vmatmul.bf16.gmra.mxu2 %v2635_v5  ;;  %v3592_v21 = vpop.f32.mrf.mxu3  ;;  %v3027_v5 = vld [vmem:[%s4868_s0 + $0x334] sm:$0xf0] }
  0xf3   :  { %v1509_v16 = vpop.f32.mrf.mxu1  ;;  %v2651_v26 = vor.u32 %v3027_v5, %v2650_v4  ;;  %v2960_v5 = vld [vmem:[%s4868_s0 + $0x124] sm:$0xf] }
  0xf5   :  { %v1310_v18 = vpop.f32.mrf.mxu2 }
  0xf6   :  { %v3595_v56 = vadd.f32 %v3499_v6, %v1310_v18  ;;  %2867 = vmatmul.msk.bf16.gmra.mxu1 %vm879_vm0, %v2367_v15  ;;  %v1132_v17 = vpop.f32.mrf.mxu0  ;;  %v2953_v6 = vld [vmem:[%s4868_s0 + $0xe4] sm:$0xf0] }
  0xf7   :  { %v3598_v24 = vadd.f32 %v1501_v29, %v1132_v17  ;;  %2904 = vmatmul.msk.bf16.gmra.mxu3 %vm879_vm0, %v2663_v28  ;;  %v2355_v36 = vor.u32 %v2953_v6, %v2354_v22  ;;  %v2958_v28 = vld [vmem:[%s4868_s0 + $0x114] sm:$0xf]  ;;  %v2380_v22 = vld [vmem:[%s4868_s0 + $0x118] sm:$0xf0] }
  0xf8   :  { %v2383_v6 = vor.u32 %v2958_v28, %v2380_v22 }
  0xfa   :  { %v3619_v39 = vpop.f32.mrf.mxu3 }
  0xfb   :  { %v1511_v29 = vpop.f32.mrf.mxu1 }
  0xfd   :  { %v1312_v35 = vpop.f32.mrf.mxu2 }
  0xfe   :  { %v3622_v40 = vadd.f32 %v3512_v19, %v1312_v35  ;;  %v1135_v42 = vpop.f32.mrf.mxu0 }
  0xff   :  { %v3624_v44 = vadd.f32 %v1504_v47, %v1135_v42  ;;  %v3032_v42 = vld [vmem:[%s4868_s0 + $0x364] sm:$0xf] }
 0x101   :  { %1174 = vmatmul.bf16.gmra.mxu0 %v2355_v36 }
 0x102   :  { %1354 = vmatmul.bf16.gmra.mxu2 %v2643_v43  ;;  %v3632_v59 = vpop.f32.mrf.mxu3  ;;  %v2676_v43 = vld [vmem:[%s4868_s0 + $0x368] sm:$0xf0] }
 0x103   :  { %v1514_v55 = vpop.f32.mrf.mxu1  ;;  %v2679_v48 = vor.u32 %v3032_v42, %v2676_v43  ;;  %v2378_v42 = vld [vmem:[%s4868_s0 + $0x110] sm:$0xf] }
 0x104   :  { %v2666_v43 = vld [vmem:[%s4868_s0 + $0x350] sm:$0xf] }
 0x105   :  { %v1315_v57 = vpop.f32.mrf.mxu2 }
 0x106   :  { %v3635_v19 = vadd.f32 %v3539_v37, %v1315_v57  ;;  %2868 = vmatmul.msk.bf16.gmra.mxu1 %vm879_vm0, %v2375_v53  ;;  %v1137_v47 = vpop.f32.mrf.mxu0  ;;  %v2955_v37 = vld [vmem:[%s4868_s0 + $0xf4] sm:$0xf0]  ;;  %v2658_v53 = vld [vmem:[%s4868_s0 + $0x340] sm:$0xf]  ;;  %v3029_v57 = vld [vmem:[%s4868_s0 + $0x344] sm:$0xf0] }
 0x107   :  { %v3638_v45 = vadd.f32 %v1506_v60, %v1137_v47  ;;  %2905 = vmatmul.msk.bf16.gmra.mxu3 %vm879_vm0, %v2671_v63  ;;  %v2363_v14 = vor.u32 %v2955_v37, %v2362_v0  ;;  %v2659_v37 = vor.u32 %v3029_v57, %v2658_v53 }
 0x10a   :  { %v3659_v15 = vpop.f32.mrf.mxu3 }
 0x10b   :  { %v1516_v60 = vpop.f32.mrf.mxu1 }
 0x10d   :  { %v1317_v12 = vpop.f32.mrf.mxu2 }
 0x10e   :  { %v3662_v18 = vadd.f32 %v3552_v50, %v1317_v12  ;;  %v1140_v17 = vpop.f32.mrf.mxu0  ;;  %v2388_v12 = vld [vmem:[%s4868_s0 + $0x128] sm:$0xf0] }
 0x10f   :  { %v3664_v27 = vadd.f32 %v1509_v16, %v1140_v17 }
 0x111   :  { %1179 = vmatmul.bf16.gmra.mxu0 %v2363_v14  ;;  %v2391_v14 = vor.u32 %v2960_v5, %v2388_v12  ;;  %v2396_v5 = vld [vmem:[%s4868_s0 + $0x138] sm:$0xf0] }
 0x112   :  { %1359 = vmatmul.bf16.gmra.mxu2 %v2651_v26  ;;  %v3672_v35 = vpop.f32.mrf.mxu3 }
 0x113   :  { %v1519_v30 = vpop.f32.mrf.mxu1 }
 0x115   :  { %v1320_v33 = vpop.f32.mrf.mxu2 }
 0x116   :  { %v3675_v50 = vadd.f32 %v3579_v1, %v1320_v33  ;;  %2869 = vmatmul.msk.bf16.gmra.mxu1 %vm879_vm0, %v2383_v6  ;;  %v1142_v16 = vpop.f32.mrf.mxu0  ;;  %v2957_v1 = vld [vmem:[%s4868_s0 + $0x104] sm:$0xf0]  ;;  %v3034_v6 = vld [vmem:[%s4868_s0 + $0x374] sm:$0xf]  ;;  %v2684_v33 = vld [vmem:[%s4868_s0 + $0x378] sm:$0xf0] }
 0x117   :  { %v3678_v36 = vadd.f32 %v1511_v29, %v1142_v16  ;;  %2906 = vmatmul.msk.bf16.gmra.mxu3 %vm879_vm0, %v2679_v48  ;;  %v2371_v61 = vor.u32 %v2957_v1, %v2370_v51  ;;  %v2687_v16 = vor.u32 %v3034_v6, %v2684_v33  ;;  %v3031_v48 = vld [vmem:[%s4868_s0 + $0x354] sm:$0xf0]  ;;  %v3036_v33 = vld [vmem:[%s4868_s0 + $0x384] sm:$0xf] }
 0x11a   :  { %v3699_v62 = vpop.f32.mrf.mxu3 }
 0x11b   :  { %v1521_v29 = vpop.f32.mrf.mxu1 }
 0x11d   :  { %v1322_v47 = vpop.f32.mrf.mxu2 }
 0x11e   :  { %v3702_v63 = vadd.f32 %v3592_v21, %v1322_v47  ;;  %v1145_v0 = vpop.f32.mrf.mxu0 }
 0x11f   :  { %v3704_v4 = vadd.f32 %v1514_v55, %v1145_v0 }
 0x121   :  { %1184 = vmatmul.bf16.gmra.mxu0 %v2371_v61  ;;  %v2667_v61 = vor.u32 %v3031_v48, %v2666_v43  ;;  %v2674_v43 = vld [vmem:[%s4868_s0 + $0x360] sm:$0xf]  ;;  %v3033_v48 = vld [vmem:[%s4868_s0 + $0x364] sm:$0xf0] }
 0x122   :  { %1364 = vmatmul.bf16.gmra.mxu2 %v2659_v37  ;;  %v3712_v28 = vpop.f32.mrf.mxu3  ;;  %v2962_v37 = vld [vmem:[%s4868_s0 + $0x134] sm:$0xf] }
 0x123   :  { %v1524_v17 = vpop.f32.mrf.mxu1  ;;  %v2399_v12 = vor.u32 %v2962_v37, %v2396_v5  ;;  %v2675_v5 = vor.u32 %v3033_v48, %v2674_v43  ;;  %v3038_v43 = vld [vmem:[%s4868_s0 + $0x394] sm:$0xf]  ;;  %v2700_v48 = vld [vmem:[%s4868_s0 + $0x398] sm:$0xf0] }
 0x125   :  { %v1325_v26 = vpop.f32.mrf.mxu2 }
 0x126   :  { %v3715_v21 = vadd.f32 %v3619_v39, %v1325_v26  ;;  %2870 = vmatmul.msk.bf16.gmra.mxu1 %vm879_vm0, %v2391_v14  ;;  %v1147_v55 = vpop.f32.mrf.mxu0  ;;  %v2959_v39 = vld [vmem:[%s4868_s0 + $0x114] sm:$0xf0] }
 0x127   :  { %v3718_v22 = vadd.f32 %v1516_v60, %v1147_v55  ;;  %2907 = vmatmul.msk.bf16.gmra.mxu3 %vm879_vm0, %v2687_v16  ;;  %v2379_v1 = vor.u32 %v2959_v39, %v2378_v42  ;;  %v2692_v16 = vld [vmem:[%s4868_s0 + $0x388] sm:$0xf0]  ;;  %v2386_v39 = vld [vmem:[%s4868_s0 + $0x120] sm:$0xf] }
 0x128   :  { %v2695_v42 = vor.u32 %v3036_v33, %v2692_v16 }
 0x12a   :  { %v3739_v53 = vpop.f32.mrf.mxu3 }
 0x12b   :  { %v1526_v60 = vpop.f32.mrf.mxu1 }
 0x12d   :  { %v1327_v51 = vpop.f32.mrf.mxu2 }
 0x12e   :  { %v3742_v57 = vadd.f32 %v3632_v59, %v1327_v51  ;;  %v1150_v47 = vpop.f32.mrf.mxu0 }
 0x12f   :  { %v3744_v0 = vadd.f32 %v1519_v30, %v1150_v47 }
 0x131   :  { %1189 = vmatmul.bf16.gmra.mxu0 %v2379_v1 }
 0x132   :  { %1369 = vmatmul.bf16.gmra.mxu2 %v2667_v61  ;;  %v3752_v55 = vpop.f32.mrf.mxu3 }
 0x133   :  { %v1529_v14 = vpop.f32.mrf.mxu1 }
 0x135   :  { %v1330_v26 = vpop.f32.mrf.mxu2 }
 0x136   :  { %v3755_v59 = vadd.f32 %v3659_v15, %v1330_v26  ;;  %2871 = vmatmul.msk.bf16.gmra.mxu1 %vm879_vm0, %v2399_v12  ;;  %v1152_v30 = vpop.f32.mrf.mxu0  ;;  %v2961_v15 = vld [vmem:[%s4868_s0 + $0x124] sm:$0xf0]  ;;  %v2964_v26 = vld [vmem:[%s4868_s0 + $0x144] sm:$0xf] }
 0x137   :  { %v3758_v6 = vadd.f32 %v1521_v29, %v1152_v30  ;;  %2908 = vmatmul.msk.bf16.gmra.mxu3 %vm879_vm0, %v2695_v42  ;;  %v2387_v1 = vor.u32 %v2961_v15, %v2386_v39  ;;  %v2404_v30 = vld [vmem:[%s4868_s0 + $0x148] sm:$0xf0] }
 0x138   :  { %v2407_v33 = vor.u32 %v2964_v26, %v2404_v30 }
 0x13a   :  { %v3779_v47 = vpop.f32.mrf.mxu3 }
 0x13b   :  { %v1531_v29 = vpop.f32.mrf.mxu1 }
 0x13d   :  { %v1332_v51 = vpop.f32.mrf.mxu2 }
 0x13e   :  { %v3782_v61 = vadd.f32 %v3672_v35, %v1332_v51  ;;  %v1155_v37 = vpop.f32.mrf.mxu0  ;;  %v2703_v51 = vor.u32 %v3038_v43, %v2700_v48 }
 0x13f   :  { %v3784_v12 = vadd.f32 %v1524_v17, %v1155_v37  ;;  %v2682_v37 = vld [vmem:[%s4868_s0 + $0x370] sm:$0xf] }
 0x141   :  { %1194 = vmatmul.bf16.gmra.mxu0 %v2387_v1  ;;  %v2394_v1 = vld [vmem:[%s4868_s0 + $0x130] sm:$0xf] }
 0x142   :  { %1374 = vmatmul.bf16.gmra.mxu2 %v2675_v5  ;;  %v3792_v39 = vpop.f32.mrf.mxu3  ;;  %v3035_v5 = vld [vmem:[%s4868_s0 + $0x374] sm:$0xf0] }
 0x143   :  { %v1534_v16 = vpop.f32.mrf.mxu1  ;;  %v2683_v43 = vor.u32 %v3035_v5, %v2682_v37  ;;  %v3040_v5 = vld [vmem:[%s4868_s0 + $0x3a4] sm:$0xf] }
 0x145   :  { %v1335_v42 = vpop.f32.mrf.mxu2 }
 0x146   :  { %v3795_v35 = vadd.f32 %v3699_v62, %v1335_v42  ;;  %2872 = vmatmul.msk.bf16.gmra.mxu1 %vm879_vm0, %v2407_v33  ;;  %v1157_v17 = vpop.f32.mrf.mxu0  ;;  %v2963_v62 = vld [vmem:[%s4868_s0 + $0x134] sm:$0xf0] }
 0x147   :  { %v3798_v15 = vadd.f32 %v1526_v60, %v1157_v17  ;;  %2909 = vmatmul.msk.bf16.gmra.mxu3 %vm879_vm0, %v2703_v51  ;;  %v2395_v30 = vor.u32 %v2963_v62, %v2394_v1  ;;  %v2966_v51 = vld [vmem:[%s4868_s0 + $0x154] sm:$0xf] }
 0x148   :  { %v2415_v1 = vor.u32 %v2966_v51, %v2412_v20  ;;  %v2708_v20 = vld [vmem:[%s4868_s0 + $0x3a8] sm:$0xf0] }
 0x149   :  { %4875 = vst [vmem:[#allocation4_spill] sm:$0xff] %v3798_v15 }
 0x14a   :  { %v3819_v33 = vpop.f32.mrf.mxu3 }
 0x14b   :  { %v1536_v60 = vpop.f32.mrf.mxu1 }
 0x14d   :  { %v1337_v26 = vpop.f32.mrf.mxu2 }
 0x14e   :  { %v3822_v42 = vadd.f32 %v3712_v28, %v1337_v26  ;;  %v1160_v17 = vpop.f32.mrf.mxu0  ;;  %v2711_v26 = vor.u32 %v3040_v5, %v2708_v20 }
 0x14f   :  { %v3824_v48 = vadd.f32 %v1529_v14, %v1160_v17  ;;  %v3037_v17 = vld [vmem:[%s4868_s0 + $0x384] sm:$0xf0] }
 0x150   :  { %4876 = vst [vmem:[#allocation5_spill] sm:$0xff] %v3822_v42 }
 0x151   :  { %4877 = vst [vmem:[#allocation6_spill] sm:$0xff] %v3824_v48  ;;  %1199 = vmatmul.bf16.gmra.mxu0 %v2395_v30  ;;  %v2402_v30 = vld [vmem:[%s4868_s0 + $0x140] sm:$0xf] }
 0x152   :  { %1379 = vmatmul.bf16.gmra.mxu2 %v2683_v43  ;;  %v3832_v15 = vpop.f32.mrf.mxu3 }
 0x153   :  { %v1539_v62 = vpop.f32.mrf.mxu1 }
 0x155   :  { %v1340_v8 = vpop.f32.mrf.mxu2 }
 0x156   :  { %v3835_v28 = vadd.f32 %v3739_v53, %v1340_v8  ;;  %2873 = vmatmul.msk.bf16.gmra.mxu1 %vm879_vm0, %v2415_v1  ;;  %v1162_v14 = vpop.f32.mrf.mxu0  ;;  %v2965_v8 = vld [vmem:[%s4868_s0 + $0x144] sm:$0xf0] }
 0x157   :  { %v3838_v37 = vadd.f32 %v1531_v29, %v1162_v14  ;;  %2910 = vmatmul.msk.bf16.gmra.mxu3 %vm879_vm0, %v2711_v26  ;;  %v2690_v29 = vld [vmem:[%s4868_s0 + $0x380] sm:$0xf]  ;;  %v2403_v51 = vor.u32 %v2965_v8, %v2402_v30  ;;  %v2968_v26 = vld [vmem:[%s4868_s0 + $0x164] sm:$0xf] }
 0x158   :  { %4878 = vst [vmem:[#allocation7_spill] sm:$0xff] %v3835_v28  ;;  %v2691_v20 = vor.u32 %v3037_v17, %v2690_v29  ;;  %v2420_v28 = vld [vmem:[%s4868_s0 + $0x168] sm:$0xf0]  ;;  %v3042_v17 = vld [vmem:[%s4868_s0 + $0x3b4] sm:$0xf] }
 0x159   :  { %4879 = vst [vmem:[#allocation8_spill] sm:$0xff] %v3838_v37  ;;  %v2423_v30 = vor.u32 %v2968_v26, %v2420_v28  ;;  %v2716_v28 = vld [vmem:[%s4868_s0 + $0x3b8] sm:$0xf0] }
 0x15a   :  { %v3859_v1 = vpop.f32.mrf.mxu3 }
 0x15b   :  { %v1541_v53 = vpop.f32.mrf.mxu1 }
 0x15d   :  { %v1342_v43 = vpop.f32.mrf.mxu2 }
 0x15e   :  { %v3862_v14 = vadd.f32 %v3752_v55, %v1342_v43  ;;  %v1165_v5 = vpop.f32.mrf.mxu0  ;;  %v2719_v43 = vor.u32 %v3042_v17, %v2716_v28 }
 0x15f   :  { %v3864_v37 = vadd.f32 %v1534_v16, %v1165_v5  ;;  %v3039_v5 = vld [vmem:[%s4868_s0 + $0x394] sm:$0xf0] }
 0x160   :  { %4880 = vst [vmem:[#allocation9_spill] sm:$0xff] %v3862_v14 }
 0x161   :  { %4881 = vst [vmem:[#allocation10_spill] sm:$0xff] %v3864_v37  ;;  %1204 = vmatmul.bf16.gmra.mxu0 %v2403_v51  ;;  %v2410_v51 = vld [vmem:[%s4868_s0 + $0x150] sm:$0xf] }
 0x162   :  { %1384 = vmatmul.bf16.gmra.mxu2 %v2691_v20  ;;  %v3872_v42 = vpop.f32.mrf.mxu3 }
 0x163   :  { %v1544_v8 = vpop.f32.mrf.mxu1 }
 0x165   :  { %v1345_v48 = vpop.f32.mrf.mxu2 }
 0x166   :  { %v3875_v55 = vadd.f32 %v3779_v47, %v1345_v48  ;;  %2874 = vmatmul.msk.bf16.gmra.mxu1 %vm879_vm0, %v2423_v30  ;;  %v1167_v16 = vpop.f32.mrf.mxu0  ;;  %v2967_v47 = vld [vmem:[%s4868_s0 + $0x154] sm:$0xf0]  ;;  %v2698_v48 = vld [vmem:[%s4868_s0 + $0x390] sm:$0xf] }
 0x167   :  { %v3878_v29 = vadd.f32 %v1536_v60, %v1167_v16  ;;  %2911 = vmatmul.msk.bf16.gmra.mxu3 %vm879_vm0, %v2719_v43  ;;  %v2411_v26 = vor.u32 %v2967_v47, %v2410_v51  ;;  %v2699_v28 = vor.u32 %v3039_v5, %v2698_v48  ;;  %v2970_v43 = vld [vmem:[%s4868_s0 + $0x174] sm:$0xf]  ;;  %v3044_v5 = vld [vmem:[%s4868_s0 + $0x3c4] sm:$0xf] }
 0x168   :  { %4882 = vst [vmem:[#allocation11_spill] sm:$0xff] %v3875_v55  ;;  %v2428_v55 = vld [vmem:[%s4868_s0 + $0x178] sm:$0xf0] }
 0x169   :  { %4883 = vst [vmem:[#allocation12_spill] sm:$0xff] %v3878_v29  ;;  %v2431_v51 = vor.u32 %v2970_v43, %v2428_v55  ;;  %v2724_v55 = vld [vmem:[%s4868_s0 + $0x3c8] sm:$0xf0] }
 0x16a   :  { %v3899_v30 = vpop.f32.mrf.mxu3 }
 0x16b   :  { %v1546_v60 = vpop.f32.mrf.mxu1 }
 0x16d   :  { %v1347_v20 = vpop.f32.mrf.mxu2 }
 0x16e   :  { %v3902_v16 = vadd.f32 %v3792_v39, %v1347_v20  ;;  %v1170_v17 = vpop.f32.mrf.mxu0  ;;  %v2727_v20 = vor.u32 %v3044_v5, %v2724_v55 }
 0x16f   :  { %v3904_v29 = vadd.f32 %v1539_v62, %v1170_v17  ;;  %v3041_v17 = vld [vmem:[%s4868_s0 + $0x3a4] sm:$0xf0] }
 0x170   :  { %4884 = vst [vmem:[#allocation13_spill] sm:$0xff] %v3902_v16 }
 0x171   :  { %4885 = vst [vmem:[#allocation14_spill] sm:$0xff] %v3904_v29  ;;  %1209 = vmatmul.bf16.gmra.mxu0 %v2411_v26  ;;  %v2418_v26 = vld [vmem:[%s4868_s0 + $0x160] sm:$0xf] }
 0x172   :  { %1389 = vmatmul.bf16.gmra.mxu2 %v2699_v28  ;;  %v3912_v14 = vpop.f32.mrf.mxu3 }
 0x173   :  { %v1549_v47 = vpop.f32.mrf.mxu1 }
 0x175   :  { %v1350_v37 = vpop.f32.mrf.mxu2 }
 0x176   :  { %v3915_v39 = vadd.f32 %v3819_v33, %v1350_v37  ;;  %2875 = vmatmul.msk.bf16.gmra.mxu1 %vm879_vm0, %v2431_v51  ;;  %v1172_v62 = vpop.f32.mrf.mxu0  ;;  %v2969_v33 = vld [vmem:[%s4868_s0 + $0x164] sm:$0xf0] }
 0x177   :  { %v3918_v48 = vadd.f32 %v1541_v53, %v1172_v62  ;;  %2912 = vmatmul.msk.bf16.gmra.mxu3 %vm879_vm0, %v2727_v20  ;;  %v2706_v53 = vld [vmem:[%s4868_s0 + $0x3a0] sm:$0xf]  ;;  %v2419_v43 = vor.u32 %v2969_v33, %v2418_v26  ;;  %v2972_v20 = vld [vmem:[%s4868_s0 + $0x184] sm:$0xf] }
 0x178   :  { %4886 = vst [vmem:[#allocation15_spill] sm:$0xff] %v3915_v39  ;;  %v2707_v55 = vor.u32 %v3041_v17, %v2706_v53  ;;  %v2436_v39 = vld [vmem:[%s4868_s0 + $0x188] sm:$0xf0]  ;;  %v3046_v17 = vld [vmem:[%s4868_s0 + $0x3d4] sm:$0xf] }
 0x179   :  { %4887 = vst [vmem:[#allocation16_spill] sm:$0xff] %v3918_v48  ;;  %v2439_v26 = vor.u32 %v2972_v20, %v2436_v39  ;;  %v2732_v39 = vld [vmem:[%s4868_s0 + $0x3d8] sm:$0xf0] }
 0x17a   :  { %v3939_v51 = vpop.f32.mrf.mxu3 }
 0x17b   :  { %v1551_v37 = vpop.f32.mrf.mxu1 }
 0x17d   :  { %v1352_v28 = vpop.f32.mrf.mxu2 }
 0x17e   :  { %v3942_v62 = vadd.f32 %v3832_v15, %v1352_v28  ;;  %v1175_v5 = vpop.f32.mrf.mxu0  ;;  %v2735_v28 = vor.u32 %v3046_v17, %v2732_v39 }
 0x17f   :  { %v3944_v48 = vadd.f32 %v1544_v8, %v1175_v5  ;;  %v3043_v5 = vld [vmem:[%s4868_s0 + $0x3b4] sm:$0xf0] }
 0x180   :  { %4888 = vst [vmem:[#allocation17_spill] sm:$0xff] %v3942_v62 }
 0x181   :  { %4889 = vst [vmem:[#allocation18_spill] sm:$0xff] %v3944_v48  ;;  %1214 = vmatmul.bf16.gmra.mxu0 %v2419_v43  ;;  %v2426_v43 = vld [vmem:[%s4868_s0 + $0x170] sm:$0xf] }
 0x182   :  { %1394 = vmatmul.bf16.gmra.mxu2 %v2707_v55  ;;  %v3952_v16 = vpop.f32.mrf.mxu3 }
 0x183   :  { %v1554_v33 = vpop.f32.mrf.mxu1 }
 0x185   :  { %v1355_v29 = vpop.f32.mrf.mxu2 }
 0x186   :  { %v3955_v15 = vadd.f32 %v3859_v1, %v1355_v29  ;;  %2876 = vmatmul.msk.bf16.gmra.mxu1 %vm879_vm0, %v2439_v26  ;;  %v1177_v8 = vpop.f32.mrf.mxu0  ;;  %v2971_v1 = vld [vmem:[%s4868_s0 + $0x174] sm:$0xf0] }
 0x187   :  { %v3958_v53 = vadd.f32 %v1546_v60, %v1177_v8  ;;  %2913 = vmatmul.msk.bf16.gmra.mxu3 %vm879_vm0, %v2735_v28  ;;  %v2714_v60 = vld [vmem:[%s4868_s0 + $0x3b0] sm:$0xf]  ;;  %v2427_v20 = vor.u32 %v2971_v1, %v2426_v43  ;;  %v2974_v28 = vld [vmem:[%s4868_s0 + $0x194] sm:$0xf] }
 0x188   :  { %4890 = vst [vmem:[#allocation19_spill] sm:$0xff] %v3955_v15  ;;  %v2715_v39 = vor.u32 %v3043_v5, %v2714_v60  ;;  %v2444_v15 = vld [vmem:[%s4868_s0 + $0x198] sm:$0xf0]  ;;  %v3048_v5 = vld [vmem:[%s4868_s0 + $0x3e4] sm:$0xf] }
 0x189   :  { %4891 = vst [vmem:[#allocation20_spill] sm:$0xff] %v3958_v53  ;;  %v2447_v43 = vor.u32 %v2974_v28, %v2444_v15  ;;  %v2740_v15 = vld [vmem:[%s4868_s0 + $0x3e8] sm:$0xf0] }
 0x18a   :  { %v3979_v26 = vpop.f32.mrf.mxu3 }
 0x18b   :  { %v1556_v29 = vpop.f32.mrf.mxu1 }
 0x18d   :  { %v1357_v55 = vpop.f32.mrf.mxu2 }
 0x18e   :  { %v3982_v8 = vadd.f32 %v3872_v42, %v1357_v55  ;;  %v1180_v17 = vpop.f32.mrf.mxu0  ;;  %v2743_v55 = vor.u32 %v3048_v5, %v2740_v15 }
 0x18f   :  { %v3984_v53 = vadd.f32 %v1549_v47, %v1180_v17  ;;  %v3045_v17 = vld [vmem:[%s4868_s0 + $0x3c4] sm:$0xf0] }
 0x190   :  { %4892 = vst [vmem:[#allocation21_spill] sm:$0xff] %v3982_v8 }
 0x191   :  { %4893 = vst [vmem:[#allocation22_spill] sm:$0xff] %v3984_v53  ;;  %1219 = vmatmul.bf16.gmra.mxu0 %v2427_v20  ;;  %v2434_v20 = vld [vmem:[%s4868_s0 + $0x180] sm:$0xf] }
 0x192   :  { %1399 = vmatmul.bf16.gmra.mxu2 %v2715_v39  ;;  %v3992_v62 = vpop.f32.mrf.mxu3 }
 0x193   :  { %v1559_v1 = vpop.f32.mrf.mxu1 }
 0x195   :  { %v1360_v48 = vpop.f32.mrf.mxu2 }
 0x196   :  { %v3995_v42 = vadd.f32 %v3899_v30, %v1360_v48  ;;  %2877 = vmatmul.msk.bf16.gmra.mxu1 %vm879_vm0, %v2447_v43  ;;  %v1182_v47 = vpop.f32.mrf.mxu0  ;;  %v2973_v30 = vld [vmem:[%s4868_s0 + $0x184] sm:$0xf0] }
 0x197   :  { %v3998_v60 = vadd.f32 %v1551_v37, %v1182_v47  ;;  %2914 = vmatmul.msk.bf16.gmra.mxu3 %vm879_vm0, %v2743_v55  ;;  %v2722_v37 = vld [vmem:[%s4868_s0 + $0x3c0] sm:$0xf]  ;;  %v2435_v28 = vor.u32 %v2973_v30, %v2434_v20  ;;  %v2976_v55 = vld [vmem:[%s4868_s0 + $0x1a4] sm:$0xf] }
 0x198   :  { %4894 = vst [vmem:[#allocation23_spill] sm:$0xff] %v3995_v42  ;;  %v2723_v15 = vor.u32 %v3045_v17, %v2722_v37  ;;  %v2452_v42 = vld [vmem:[%s4868_s0 + $0x1a8] sm:$0xf0]  ;;  %v3050_v17 = vld [vmem:[%s4868_s0 + $0x3f4] sm:$0xf] }
 0x199   :  { %4895 = vst [vmem:[#allocation24_spill] sm:$0xff] %v3998_v60  ;;  %v2455_v20 = vor.u32 %v2976_v55, %v2452_v42  ;;  %v2748_v42 = vld [vmem:[%s4868_s0 + $0x3f8] sm:$0xf0] }
 0x19a   :  { %v4019_v43 = vpop.f32.mrf.mxu3 }
 0x19b   :  { %v1561_v48 = vpop.f32.mrf.mxu1 }
 0x19d   :  { %v1362_v39 = vpop.f32.mrf.mxu2 }
 0x19e   :  { %v4022_v47 = vadd.f32 %v3912_v14, %v1362_v39  ;;  %v1185_v5 = vpop.f32.mrf.mxu0  ;;  %v2751_v39 = vor.u32 %v3050_v17, %v2748_v42 }
 0x19f   :  { %v4024_v60 = vadd.f32 %v1554_v33, %v1185_v5  ;;  %v3047_v5 = vld [vmem:[%s4868_s0 + $0x3d4] sm:$0xf0] }
 0x1a0   :  { %4896 = vst [vmem:[#allocation25_spill] sm:$0xff] %v4022_v47 }
 0x1a1   :  { %4897 = vst [vmem:[#allocation26_spill] sm:$0xff] %v4024_v60  ;;  %1224 = vmatmul.bf16.gmra.mxu0 %v2435_v28  ;;  %v2442_v28 = vld [vmem:[%s4868_s0 + $0x190] sm:$0xf] }
 0x1a2   :  { %1404 = vmatmul.bf16.gmra.mxu2 %v2723_v15  ;;  %v4032_v8 = vpop.f32.mrf.mxu3 }
 0x1a3   :  { %v1564_v30 = vpop.f32.mrf.mxu1 }
 0x1a5   :  { %v1365_v53 = vpop.f32.mrf.mxu2 }
 0x1a6   :  { %v4035_v14 = vadd.f32 %v3939_v51, %v1365_v53  ;;  %2878 = vmatmul.msk.bf16.gmra.mxu1 %vm879_vm0, %v2455_v20  ;;  %v1187_v33 = vpop.f32.mrf.mxu0  ;;  %v2975_v51 = vld [vmem:[%s4868_s0 + $0x194] sm:$0xf0] }
 0x1a7   :  { %v4038_v37 = vadd.f32 %v1556_v29, %v1187_v33  ;;  %2915 = vmatmul.msk.bf16.gmra.mxu3 %vm879_vm0, %v2751_v39  ;;  %v2730_v29 = vld [vmem:[%s4868_s0 + $0x3d0] sm:$0xf]  ;;  %v2443_v55 = vor.u32 %v2975_v51, %v2442_v28  ;;  %v2978_v39 = vld [vmem:[%s4868_s0 + $0x1b4] sm:$0xf] }
 0x1a8   :  { %4898 = vst [vmem:[#allocation27_spill] sm:$0xff] %v4035_v14  ;;  %v2731_v42 = vor.u32 %v3047_v5, %v2730_v29  ;;  %v2460_v14 = vld [vmem:[%s4868_s0 + $0x1b8] sm:$0xf0]  ;;  %v3052_v5 = vld [vmem:[%s4868_s0 + $0x404] sm:$0xf] }
 0x1a9   :  { %4899 = vst [vmem:[#allocation28_spill] sm:$0xff] %v4038_v37  ;;  %v2463_v28 = vor.u32 %v2978_v39, %v2460_v14  ;;  %v2756_v14 = vld [vmem:[%s4868_s0 + $0x408] sm:$0xf0] }
 0x1aa   :  { %v4059_v20 = vpop.f32.mrf.mxu3 }
 0x1ab   :  { %v1566_v53 = vpop.f32.mrf.mxu1 }
 0x1ad   :  { %v1367_v15 = vpop.f32.mrf.mxu2 }
 0x1ae   :  { %v4062_v33 = vadd.f32 %v3952_v16, %v1367_v15  ;;  %v1190_v17 = vpop.f32.mrf.mxu0  ;;  %v2759_v15 = vor.u32 %v3052_v5, %v2756_v14 }
 0x1af   :  { %v4064_v37 = vadd.f32 %v1559_v1, %v1190_v17  ;;  %v3049_v17 = vld [vmem:[%s4868_s0 + $0x3e4] sm:$0xf0] }
 0x1b0   :  { %4900 = vst [vmem:[#allocation29_spill] sm:$0xff] %v4062_v33  ;;  %v1849_v33 = vsel %vm1834_vm1, %v3425_v25, -inf }
 0x1b1   :  { %4901 = vst [vmem:[#allocation30_spill] sm:$0xff] %v4064_v37  ;;  %1229 = vmatmul.bf16.gmra.mxu0 %v2443_v55  ;;  %v2450_v55 = vld [vmem:[%s4868_s0 + $0x1a0] sm:$0xf] }
 0x1b2   :  { %1409 = vmatmul.bf16.gmra.mxu2 %v2731_v42  ;;  %v4072_v47 = vpop.f32.mrf.mxu3 }
 0x1b3   :  { %v1569_v51 = vpop.f32.mrf.mxu1 }
 0x1b5   :  { %v1370_v60 = vpop.f32.mrf.mxu2 }
 0x1b6   :  { %v4075_v16 = vadd.f32 %v3979_v26, %v1370_v60  ;;  %2879 = vmatmul.msk.bf16.gmra.mxu1 %vm879_vm0, %v2463_v28  ;;  %v1192_v1 = vpop.f32.mrf.mxu0  ;;  %v2977_v26 = vld [vmem:[%s4868_s0 + $0x1a4] sm:$0xf0] }
 0x1b7   :  { %v4078_v29 = vadd.f32 %v1561_v48, %v1192_v1  ;;  %2916 = vmatmul.msk.bf16.gmra.mxu3 %vm879_vm0, %v2759_v15  ;;  %v2738_v48 = vld [vmem:[%s4868_s0 + $0x3e0] sm:$0xf]  ;;  %v2451_v39 = vor.u32 %v2977_v26, %v2450_v55  ;;  %v4112_v55 = vsel %vm1834_vm1, %v3387_v3, -inf }
 0x1b8   :  { %4902 = vst [vmem:[#allocation31_spill] sm:$0xff] %v4075_v16  ;;  %v2739_v14 = vor.u32 %v3049_v17, %v2738_v48  ;;  %v2468_v16 = vld [vmem:[%s4868_s0 + $0x1c8] sm:$0xf0] }
 0x1b9   :  { %4903 = vst [vmem:[#allocation32_spill] sm:$0xff] %v4078_v29  ;;  %v2980_v29 = vld [vmem:[%s4868_s0 + $0x1c4] sm:$0xf] }
 0x1ba   :  { %v4099_v28 = vpop.f32.mrf.mxu3 }
 0x1bb   :  { %v1571_v60 = vpop.f32.mrf.mxu1 }
 0x1bd   :  { %v1372_v42 = vpop.f32.mrf.mxu2 }
 0x1be   :  { %v4102_v1 = vadd.f32 %v3992_v62, %v1372_v42  ;;  %v1195_v5 = vpop.f32.mrf.mxu0 }
 0x1bf   :  { %v1565_v15 = vadd.f32 %v1564_v30, %v1195_v5  ;;  %v2471_v30 = vor.u32 %v2980_v29, %v2468_v16  ;;  %v2764_v16 = vld [vmem:[%s4868_s0 + $0x418] sm:$0xf0] }
 0x1c0   :  { %4904 = vst [vmem:[#allocation33_spill] sm:$0xff] %v4102_v1 }
 0x1c1   :  { %v4115_v26 = vsel %vm1834_vm1, %v1565_v15, -inf  ;;  %1234 = vmatmul.bf16.gmra.mxu0 %v2451_v39  ;;  %v3054_v39 = vld [vmem:[%s4868_s0 + $0x414] sm:$0xf] }
 0x1c2   :  { %1414 = vmatmul.bf16.gmra.mxu2 %v2739_v14  ;;  %v4121_v42 = vpop.f32.mrf.mxu3  ;;  %v2767_v29 = vor.u32 %v3054_v39, %v2764_v16  ;;  %v4135_v14 = vsel %vm1834_vm1, %v3400_v11, -inf  ;;  %v2746_v11 = vld [vmem:[%s4868_s0 + $0x3f0] sm:$0xf] }
 0x1c3   :  { %v4119_v48 = vpop.f32.mrf.mxu1  ;;  %4906 = vst [vmem:[#allocation35_spill] sm:$0xff] %v4135_v14  ;;  %v2476_v14 = vld [vmem:[%s4868_s0 + $0x1d8] sm:$0xf0] }
 0x1c5   :  { %v1375_v17 = vpop.f32.mrf.mxu2 }
 0x1c6   :  { %v4124_v5 = vadd.f32 %v4019_v43, %v1375_v17  ;;  %2880 = vmatmul.msk.bf16.gmra.mxu1 %vm879_vm0, %v2471_v30  ;;  %v1197_v3 = vpop.f32.mrf.mxu0  ;;  %v2979_v30 = vld [vmem:[%s4868_s0 + $0x1b4] sm:$0xf0] }
 0x1c7   :  { %v1567_v1 = vadd.f32 %v1566_v53, %v1197_v3  ;;  %v2458_v53 = vld [vmem:[%s4868_s0 + $0x1b0] sm:$0xf]  ;;  %2917 = vmatmul.msk.bf16.gmra.mxu3 %vm879_vm0, %v2767_v29 }
 0x1c8   :  { %4905 = vst [vmem:[#allocation34_spill] sm:$0xff] %v4124_v5  ;;  %v2459_v39 = vor.u32 %v2979_v30, %v2458_v53  ;;  %v2984_v5 = vld [vmem:[%s4868_s0 + $0x1e4] sm:$0xf] }
 0x1c9   :  { %v4138_v43 = vsel %vm1834_vm1, %v1567_v1, -inf  ;;  %v3051_v1 = vld [vmem:[%s4868_s0 + $0x3f4] sm:$0xf0] }
 0x1ca   :  { %4907 = vst [vmem:[#allocation36_spill] sm:$0xff] %v4138_v43  ;;  %v4157_v16 = vpop.f32.mrf.mxu3  ;;  %v2747_v37 = vor.u32 %v3051_v1, %v2746_v11  ;;  %v2982_v43 = vld [vmem:[%s4868_s0 + $0x1d4] sm:$0xf] }
 0x1cb   :  { %v4149_v17 = vpop.f32.mrf.mxu1 }
 0x1cd   :  { %v1377_v3 = vpop.f32.mrf.mxu2 }
 0x1ce   :  { %v4160_v15 = vadd.f32 %v4032_v8, %v1377_v3  ;;  %v1200_v62 = vpop.f32.mrf.mxu0  ;;  %v2479_v8 = vor.u32 %v2982_v43, %v2476_v14  ;;  %v2772_v14 = vld [vmem:[%s4868_s0 + $0x428] sm:$0xf0] }
 0x1cf   :  { %v1570_v29 = vadd.f32 %v1569_v51, %v1200_v62  ;;  %v1852_v51 = vsel %vm1834_vm1, %v3435_v32, -inf  ;;  %v3056_v32 = vld [vmem:[%s4868_s0 + $0x424] sm:$0xf] }
 0x1d0   :  { %4908 = vst [vmem:[#allocation37_spill] sm:$0xff] %v4160_v15 }
 0x1d1   :  { %v1850_v53 = vsel %vm1834_vm1, %v1570_v29, -inf  ;;  %1239 = vmatmul.bf16.gmra.mxu0 %v2459_v39  ;;  %v1856_v39 = vsel %vm1834_vm1, %v3438_v34, -inf }
 0x1d2   :  { %v1851_v30 = vmax.f32 %v1849_v33, %v1850_v53  ;;  %1419 = vmatmul.bf16.gmra.mxu2 %v2747_v37  ;;  %v4175_v3 = vpop.f32.mrf.mxu3  ;;  %v4182_v33 = vld [vmem:[%s4869_s2] ss:$0 sm:$0xff] }
 0x1d3   :  { %v4173_v62 = vpop.f32.mrf.mxu1 }
 0x1d4   :  { %v1853_v11 = vmax.f32 %v1851_v30, %v1852_v51 }
 0x1d5   :  { %v1380_v1 = vpop.f32.mrf.mxu2 }
 0x1d6   :  { %v1750_v15 = vadd.f32 %v4059_v20, %v1380_v1  ;;  %2881 = vmatmul.msk.bf16.gmra.mxu1 %vm879_vm0, %v2479_v8  ;;  %v1202_v25 = vpop.f32.mrf.mxu0  ;;  %v2775_v20 = vor.u32 %v3056_v32, %v2772_v14  ;;  %v2981_v8 = vld [vmem:[%s4868_s0 + $0x1c4] sm:$0xf0] }
 0x1d7   :  { %v1572_v37 = vadd.f32 %v1571_v60, %v1202_v25  ;;  %v2466_v60 = vld [vmem:[%s4868_s0 + $0x1c0] sm:$0xf]  ;;  %v3053_v1 = vld [vmem:[%s4868_s0 + $0x404] sm:$0xf0] }
 0x1d8   :  { %v1854_v43 = vsel %vm1834_vm1, %v1750_v15, -inf  ;;  %2918 = vmatmul.msk.bf16.gmra.mxu3 %vm879_vm0, %v2775_v20  ;;  %v1859_v15 = vsel %vm1834_vm1, %v3462_v46, -inf  ;;  %v2467_v14 = vor.u32 %v2981_v8, %v2466_v60  ;;  %v1863_v8 = vsel %vm1834_vm1, %v3464_v49, -inf }
 0x1d9   :  { %v1855_v29 = vmax.f32 %v1853_v11, %v1854_v43  ;;  %v1857_v53 = vsel %vm1834_vm1, %v1572_v37, -inf  ;;  %v2754_v11 = vld [vmem:[%s4868_s0 + $0x400] sm:$0xf] }
 0x1da   :  { %v1858_v30 = vmax.f32 %v1856_v39, %v1857_v53  ;;  %v4212_v43 = vpop.f32.mrf.mxu3  ;;  %v2755_v39 = vor.u32 %v3053_v1, %v2754_v11  ;;  %v1866_v11 = vsel %vm1834_vm1, %v3475_v54, -inf  ;;  %v3058_v54 = vld [vmem:[%s4868_s0 + $0x434] sm:$0xf] }
 0x1db   :  { %v2093_v51 = vadd.f32 %v4182_v33, %v1855_v29  ;;  %v4204_v34 = vpop.f32.mrf.mxu1 }
 0x1dc   :  { %v1860_v25 = vmax.f32 %v1858_v30, %v1859_v15  ;;  %v2484_v30 = vld [vmem:[%s4868_s0 + $0x1e8] sm:$0xf0] }
 0x1dd   :  { %v2129_v37 = vmax.f32 %v2093_v51, 0.0  ;;  %v1382_v32 = vpop.f32.mrf.mxu2  ;;  %v2487_v51 = vor.u32 %v2984_v5, %v2484_v30 }
 0x1de   :  { %v1752_v46 = vadd.f32 %v4072_v47, %v1382_v32  ;;  %v1205_v20 = vpop.f32.mrf.mxu0 }
 0x1df   :  { %v2165_v29 = vpack.c.bf16 %v2129_v37, %v2129_v37  ;;  %v1575_v53 = vadd.f32 %v4119_v48, %v1205_v20 }
 0x1e0   :  { %v1861_v60 = vsel %vm1834_vm1, %v1752_v46, -inf }
 0x1e1   :  { %2202 = vst.msk [vmem:[%s4870_s3 + $0x8] sm:$0xf] %vm2199_vm2, %v2165_v29  ;;  %v1862_v47 = vmax.f32 %v1860_v25, %v1861_v60  ;;  %v1864_v48 = vsel %vm1834_vm1, %v1575_v53, -inf  ;;  %1244 = vmatmul.bf16.gmra.mxu0 %v2467_v14 }
 0x1e2   :  { %v1865_v15 = vmax.f32 %v1863_v8, %v1864_v48  ;;  %1424 = vmatmul.bf16.gmra.mxu2 %v2755_v39  ;;  %v4235_v20 = vpop.f32.mrf.mxu3  ;;  %v2780_v39 = vld [vmem:[%s4868_s0 + $0x438] sm:$0xf0]  ;;  %v2983_v48 = vld [vmem:[%s4868_s0 + $0x1d4] sm:$0xf0] }
 0x1e3   :  { %v2094_v1 = vadd.f32 %v4182_v33, %v1862_v47  ;;  %v4233_v37 = vpop.f32.mrf.mxu1  ;;  %v2783_v30 = vor.u32 %v3058_v54, %v2780_v39  ;;  %v2474_v47 = vld [vmem:[%s4868_s0 + $0x1d0] sm:$0xf] }
 0x1e4   :  { %v1867_v49 = vmax.f32 %v1865_v15, %v1866_v11  ;;  %v2762_v11 = vld [vmem:[%s4868_s0 + $0x410] sm:$0xf] }
 0x1e5   :  { %v2130_v32 = vmax.f32 %v2094_v1, 0.0  ;;  %v1385_v46 = vpop.f32.mrf.mxu2  ;;  %v3055_v1 = vld [vmem:[%s4868_s0 + $0x414] sm:$0xf0] }
 0x1e6   :  { %v1755_v25 = vadd.f32 %v4099_v28, %v1385_v46  ;;  %2882 = vmatmul.msk.bf16.gmra.mxu1 %vm879_vm0, %v2487_v51  ;;  %v1207_v14 = vpop.f32.mrf.mxu0  ;;  %v1870_v28 = vsel %vm1834_vm1, %v3478_v58, -inf  ;;  %v1873_v58 = vsel %vm1834_vm1, %v3502_v7, -inf }
 0x1e7   :  { %v2166_v29 = vpack.c.bf16 %v2130_v32, %v2130_v32  ;;  %v1577_v5 = vadd.f32 %v4149_v17, %v1207_v14 }
 0x1e8   :  { %v1868_v53 = vsel %vm1834_vm1, %v1755_v25, -inf  ;;  %2919 = vmatmul.msk.bf16.gmra.mxu3 %vm879_vm0, %v2783_v30  ;;  %v2475_v25 = vor.u32 %v2983_v48, %v2474_v47  ;;  %v2492_v30 = vld [vmem:[%s4868_s0 + $0x1f8] sm:$0xf0]  ;;  %v1880_v47 = vsel %vm1834_vm1, %v3515_v9, -inf  ;;  %v3060_v9 = vld [vmem:[%s4868_s0 + $0x444] sm:$0xf] }
 0x1e9   :  { %2203 = vst.msk [vmem:[%s4870_s3 + $0xc] sm:$0xf] %vm2199_vm2, %v2166_v29  ;;  %v1869_v17 = vmax.f32 %v1867_v49, %v1868_v53  ;;  %v1871_v60 = vsel %vm1834_vm1, %v1577_v5, -inf  ;;  %v2763_v5 = vor.u32 %v3055_v1, %v2762_v11  ;;  %v2986_v53 = vld [vmem:[%s4868_s0 + $0x1f4] sm:$0xf] }
 0x1ea   :  { %v1872_v8 = vmax.f32 %v1870_v28, %v1871_v60  ;;  %v4272_v14 = vpop.f32.mrf.mxu3 }
 0x1eb   :  { %v2095_v15 = vadd.f32 %v4182_v33, %v1869_v17  ;;  %v4264_v51 = vpop.f32.mrf.mxu1  ;;  %v1877_v17 = vsel %vm1834_vm1, %v3504_v13, -inf }
 0x1ec   :  { %v1874_v49 = vmax.f32 %v1872_v8, %v1873_v58  ;;  %v2495_v8 = vor.u32 %v2986_v53, %v2492_v30  ;;  %v2482_v53 = vld [vmem:[%s4868_s0 + $0x1e0] sm:$0xf]  ;;  %v2985_v30 = vld [vmem:[%s4868_s0 + $0x1e4] sm:$0xf0] }
 0x1ed   :  { %v2131_v32 = vmax.f32 %v2095_v15, 0.0  ;;  %v1387_v46 = vpop.f32.mrf.mxu2 }
 0x1ee   :  { %v1757_v7 = vadd.f32 %v4121_v42, %v1387_v46  ;;  %v1210_v29 = vpop.f32.mrf.mxu0 }
 0x1ef   :  { %v2167_v54 = vpack.c.bf16 %v2131_v32, %v2131_v32  ;;  %v1580_v39 = vadd.f32 %v4173_v62, %v1210_v29 }
 0x1f0   :  { %v1875_v28 = vsel %vm1834_vm1, %v1757_v7, -inf  ;;  %v2788_v7 = vld [vmem:[%s4868_s0 + $0x448] sm:$0xf0] }
 0x1f1   :  { %2204 = vst.msk [vmem:[%s4870_s3 + $0x10] sm:$0xf] %vm2199_vm2, %v2167_v54  ;;  %v1876_v42 = vmax.f32 %v1874_v49, %v1875_v28  ;;  %v1878_v62 = vsel %vm1834_vm1, %v1580_v39, -inf  ;;  %1249 = vmatmul.bf16.gmra.mxu0 %v2475_v25 }
 0x1f2   :  { %v1879_v60 = vmax.f32 %v1877_v17, %v1878_v62  ;;  %1429 = vmatmul.bf16.gmra.mxu2 %v2763_v5  ;;  %v4295_v1 = vpop.f32.mrf.mxu3  ;;  %v2791_v5 = vor.u32 %v3060_v9, %v2788_v7  ;;  %v3057_v62 = vld [vmem:[%s4868_s0 + $0x424] sm:$0xf0]  ;;  %v1891_v7 = vsel %vm1834_vm1, %v3544_v41, -inf }
 0x1f3   :  { %v2096_v48 = vadd.f32 %v4182_v33, %v1876_v42  ;;  %v4293_v58 = vpop.f32.mrf.mxu1  ;;  %v2770_v42 = vld [vmem:[%s4868_s0 + $0x420] sm:$0xf] }
 0x1f4   :  { %v1881_v13 = vmax.f32 %v1879_v60, %v1880_v47 }
 0x1f5   :  { %v2132_v15 = vmax.f32 %v2096_v48, 0.0  ;;  %v1390_v11 = vpop.f32.mrf.mxu2  ;;  %v2483_v48 = vor.u32 %v2985_v30, %v2482_v53 }
 0x1f6   :  { %v1760_v49 = vadd.f32 %v4157_v16, %v1390_v11  ;;  %2883 = vmatmul.msk.bf16.gmra.mxu1 %vm879_vm0, %v2495_v8  ;;  %v1212_v32 = vpop.f32.mrf.mxu0  ;;  %v1884_v16 = vsel %vm1834_vm1, %v3518_v23, -inf  ;;  %v1887_v23 = vsel %vm1834_vm1, %v3542_v38, -inf  ;;  %v2771_v11 = vor.u32 %v3057_v62, %v2770_v42 }
 0x1f7   :  { %v2168_v46 = vpack.c.bf16 %v2132_v15, %v2132_v15  ;;  %v1582_v25 = vadd.f32 %v4204_v34, %v1212_v32 }
 0x1f8   :  { %v1882_v29 = vsel %vm1834_vm1, %v1760_v49, -inf  ;;  %2920 = vmatmul.msk.bf16.gmra.mxu3 %vm879_vm0, %v2791_v5 }
 0x1f9   :  { %2205 = vst.msk [vmem:[%s4870_s3 + $0x14] sm:$0xf] %vm2199_vm2, %v2168_v46  ;;  %v1883_v34 = vmax.f32 %v1881_v13, %v1882_v29  ;;  %v1885_v54 = vsel %vm1834_vm1, %v1582_v25, -inf  ;;  %v2988_v46 = vld [vmem:[%s4868_s0 + $0x204] sm:$0xf] }
 0x1fa   :  { %v1886_v39 = vmax.f32 %v1884_v16, %v1885_v54  ;;  %v4332_v13 = vpop.f32.mrf.mxu3  ;;  %v2500_v25 = vld [vmem:[%s4868_s0 + $0x208] sm:$0xf0]  ;;  %v1894_v16 = vsel %vm1834_vm1, %v3555_v31, -inf  ;;  %v3062_v31 = vld [vmem:[%s4868_s0 + $0x454] sm:$0xf] }
 0x1fb   :  { %v2097_v28 = vadd.f32 %v4182_v33, %v1883_v34  ;;  %v4324_v17 = vpop.f32.mrf.mxu1  ;;  %v2503_v5 = vor.u32 %v2988_v46, %v2500_v25  ;;  %v2778_v46 = vld [vmem:[%s4868_s0 + $0x430] sm:$0xf]  ;;  %v3059_v25 = vld [vmem:[%s4868_s0 + $0x434] sm:$0xf0] }
 0x1fc   :  { %v1888_v60 = vmax.f32 %v1886_v39, %v1887_v23 }
 0x1fd   :  { %v2133_v8 = vmax.f32 %v2097_v28, 0.0  ;;  %v1392_v47 = vpop.f32.mrf.mxu2 }
 0x1fe   :  { %v1762_v38 = vadd.f32 %v4175_v3, %v1392_v47  ;;  %v1215_v15 = vpop.f32.mrf.mxu0 }
 0x1ff   :  { %v2169_v49 = vpack.c.bf16 %v2133_v8, %v2133_v8  ;;  %v1585_v32 = vadd.f32 %v4233_v37, %v1215_v15  ;;  %v2490_v15 = vld [vmem:[%s4868_s0 + $0x1f0] sm:$0xf] }
 0x200   :  { %v1889_v9 = vsel %vm1834_vm1, %v1762_v38, -inf }
 0x201   :  { %2206 = vst.msk [vmem:[%s4870_s3 + $0x18] sm:$0xf] %vm2199_vm2, %v2169_v49  ;;  %v1890_v3 = vmax.f32 %v1888_v60, %v1889_v9  ;;  %v1892_v37 = vsel %vm1834_vm1, %v1585_v32, -inf  ;;  %1254 = vmatmul.bf16.gmra.mxu0 %v2483_v48  ;;  %v2796_v60 = vld [vmem:[%s4868_s0 + $0x458] sm:$0xf0] }
 0x202   :  { %v1893_v29 = vmax.f32 %v1891_v7, %v1892_v37  ;;  %1434 = vmatmul.bf16.gmra.mxu2 %v2771_v11  ;;  %v4355_v30 = vpop.f32.mrf.mxu3  ;;  %v2799_v47 = vor.u32 %v3062_v31, %v2796_v60  ;;  %v2987_v11 = vld [vmem:[%s4868_s0 + $0x1f4] sm:$0xf0]  ;;  %v1908_v31 = vsel %vm1834_vm1, %v3595_v56, -inf  ;;  %v3064_v56 = vld [vmem:[%s4868_s0 + $0x464] sm:$0xf] }
 0x203   :  { %v2098_v34 = vadd.f32 %v4182_v33, %v1890_v3  ;;  %v4353_v54 = vpop.f32.mrf.mxu1  ;;  %v2491_v37 = vor.u32 %v2987_v11, %v2490_v15 }
 0x204   :  { %v1895_v41 = vmax.f32 %v1893_v29, %v1894_v16  ;;  %v2779_v16 = vor.u32 %v3059_v25, %v2778_v46 }
 0x205   :  { %v2134_v39 = vmax.f32 %v2098_v34, 0.0  ;;  %v1395_v53 = vpop.f32.mrf.mxu2 }
 0x206   :  { %v1765_v23 = vadd.f32 %v4212_v43, %v1395_v53  ;;  %2884 = vmatmul.msk.bf16.gmra.mxu1 %vm879_vm0, %v2503_v5  ;;  %v1217_v28 = vpop.f32.mrf.mxu0  ;;  %v1898_v43 = vsel %vm1834_vm1, %v3558_v52, -inf  ;;  %v1901_v52 = vsel %vm1834_vm1, %v3582_v2, -inf  ;;  %v2508_v53 = vld [vmem:[%s4868_s0 + $0x218] sm:$0xf0] }
 0x207   :  { %v2170_v42 = vpack.c.bf16 %v2134_v39, %v2134_v39  ;;  %v1587_v62 = vadd.f32 %v4264_v51, %v1217_v28  ;;  %v2990_v39 = vld [vmem:[%s4868_s0 + $0x214] sm:$0xf]  ;;  %v1905_v28 = vsel %vm1834_vm1, %v3584_v10, -inf }
 0x208   :  { %v1896_v8 = vsel %vm1834_vm1, %v1765_v23, -inf  ;;  %2921 = vmatmul.msk.bf16.gmra.mxu3 %vm879_vm0, %v2799_v47 }
 0x209   :  { %2207 = vst.msk [vmem:[%s4870_s3 + $0x1c] sm:$0xf] %vm2199_vm2, %v2170_v42  ;;  %v1897_v51 = vmax.f32 %v1895_v41, %v1896_v8  ;;  %v1899_v48 = vsel %vm1834_vm1, %v1587_v62, -inf  ;;  %v2511_v62 = vor.u32 %v2990_v39, %v2508_v53 }
 0x20a   :  { %v1900_v38 = vmax.f32 %v1898_v43, %v1899_v48  ;;  %v4392_v29 = vpop.f32.mrf.mxu3 }
 0x20b   :  { %v2099_v49 = vadd.f32 %v4182_v33, %v1897_v51  ;;  %v4384_v32 = vpop.f32.mrf.mxu1 }
 0x20c   :  { %v1902_v9 = vmax.f32 %v1900_v38, %v1901_v52  ;;  %v2804_v52 = vld [vmem:[%s4868_s0 + $0x468] sm:$0xf0] }
 0x20d   :  { %v2135_v7 = vmax.f32 %v2099_v49, 0.0  ;;  %v1397_v3 = vpop.f32.mrf.mxu2  ;;  %v2807_v46 = vor.u32 %v3064_v56, %v2804_v52 }
 0x20e   :  { %v1767_v2 = vadd.f32 %v4235_v20, %v1397_v3  ;;  %v1220_v5 = vpop.f32.mrf.mxu0  ;;  %v2989_v3 = vld [vmem:[%s4868_s0 + $0x204] sm:$0xf0] }
 0x20f   :  { %v2171_v34 = vpack.c.bf16 %v2135_v7, %v2135_v7  ;;  %v1590_v41 = vadd.f32 %v4293_v58, %v1220_v5  ;;  %v2498_v7 = vld [vmem:[%s4868_s0 + $0x200] sm:$0xf] }
 0x210   :  { %v1903_v23 = vsel %vm1834_vm1, %v1767_v2, -inf  ;;  %v2786_v5 = vld [vmem:[%s4868_s0 + $0x440] sm:$0xf]  ;;  %v2499_v53 = vor.u32 %v2989_v3, %v2498_v7 }
 0x211   :  { %2208 = vst.msk [vmem:[%s4870_s3 + $0x20] sm:$0xf] %vm2199_vm2, %v2171_v34  ;;  %v1904_v20 = vmax.f32 %v1902_v9, %v1903_v23  ;;  %v1906_v58 = vsel %vm1834_vm1, %v1590_v41, -inf  ;;  %1259 = vmatmul.bf16.gmra.mxu0 %v2491_v37 }
 0x212   :  { %v1907_v42 = vmax.f32 %v1905_v28, %v1906_v58  ;;  %1439 = vmatmul.bf16.gmra.mxu2 %v2779_v16  ;;  %v4415_v51 = vpop.f32.mrf.mxu3  ;;  %v3061_v16 = vld [vmem:[%s4868_s0 + $0x444] sm:$0xf0] }
 0x213   :  { %v2100_v60 = vadd.f32 %v4182_v33, %v1904_v20  ;;  %v4413_v8 = vpop.f32.mrf.mxu1 }
 0x214   :  { %v1909_v10 = vmax.f32 %v1907_v42, %v1908_v31  ;;  %v2992_v42 = vld [vmem:[%s4868_s0 + $0x224] sm:$0xf] }
 0x215   :  { %v2136_v47 = vmax.f32 %v2100_v60, 0.0  ;;  %v1400_v43 = vpop.f32.mrf.mxu2 }
 0x216   :  { %v1770_v48 = vadd.f32 %v4272_v14, %v1400_v43  ;;  %2885 = vmatmul.msk.bf16.gmra.mxu1 %vm879_vm0, %v2511_v62  ;;  %v1222_v38 = vpop.f32.mrf.mxu0  ;;  %v1912_v14 = vsel %vm1834_vm1, %v3598_v24, -inf  ;;  %v1915_v24 = vsel %vm1834_vm1, %v3622_v40, -inf  ;;  %v2787_v40 = vor.u32 %v3061_v16, %v2786_v5  ;;  %v2516_v62 = vld [vmem:[%s4868_s0 + $0x228] sm:$0xf0]  ;;  %v2991_v5 = vld [vmem:[%s4868_s0 + $0x214] sm:$0xf0] }
 0x217   :  { %v2172_v15 = vpack.c.bf16 %v2136_v47, %v2136_v47  ;;  %v1592_v11 = vadd.f32 %v4324_v17, %v1222_v38  ;;  %v2519_v43 = vor.u32 %v2992_v42, %v2516_v62 }
 0x218   :  { %v1910_v49 = vsel %vm1834_vm1, %v1770_v48, -inf  ;;  %2922 = vmatmul.msk.bf16.gmra.mxu3 %vm879_vm0, %v2807_v46  ;;  %v1922_v48 = vsel %vm1834_vm1, %v3635_v19, -inf  ;;  %v2812_v19 = vld [vmem:[%s4868_s0 + $0x478] sm:$0xf0] }
 0x219   :  { %2209 = vst.msk [vmem:[%s4870_s3 + $0x24] sm:$0xf] %vm2199_vm2, %v2172_v15  ;;  %v1911_v17 = vmax.f32 %v1909_v10, %v1910_v49  ;;  %v1913_v25 = vsel %vm1834_vm1, %v1592_v11, -inf }
 0x21a   :  { %v1914_v9 = vmax.f32 %v1912_v14, %v1913_v25  ;;  %v4460_v31 = vpop.f32.mrf.mxu3 }
 0x21b   :  { %v2101_v37 = vadd.f32 %v4182_v33, %v1911_v17  ;;  %v4444_v2 = vpop.f32.mrf.mxu1  ;;  %v3066_v17 = vld [vmem:[%s4868_s0 + $0x474] sm:$0xf] }
 0x21c   :  { %v1916_v34 = vmax.f32 %v1914_v9, %v1915_v24  ;;  %v2815_v9 = vor.u32 %v3066_v17, %v2812_v19 }
 0x21d   :  { %v2137_v41 = vmax.f32 %v2101_v37, 0.0  ;;  %v1402_v39 = vpop.f32.mrf.mxu2  ;;  %v2506_v37 = vld [vmem:[%s4868_s0 + $0x210] sm:$0xf] }
 0x21e   :  { %v1772_v23 = vadd.f32 %v4295_v1, %v1402_v39  ;;  %v1225_v28 = vpop.f32.mrf.mxu0  ;;  %v1919_v1 = vsel %vm1834_vm1, %v3624_v44, -inf  ;;  %v3063_v39 = vld [vmem:[%s4868_s0 + $0x454] sm:$0xf0] }
 0x21f   :  { %v2173_v20 = vpack.c.bf16 %v2137_v41, %v2137_v41  ;;  %v1595_v58 = vadd.f32 %v4353_v54, %v1225_v28  ;;  %v2794_v41 = vld [vmem:[%s4868_s0 + $0x450] sm:$0xf] }
 0x220   :  { %v1917_v60 = vsel %vm1834_vm1, %v1772_v23, -inf }
 0x221   :  { %2210 = vst.msk [vmem:[%s4870_s3 + $0x28] sm:$0xf] %vm2199_vm2, %v2173_v20  ;;  %v1918_v54 = vmax.f32 %v1916_v34, %v1917_v60  ;;  %v1920_v10 = vsel %vm1834_vm1, %v1595_v58, -inf  ;;  %1264 = vmatmul.bf16.gmra.mxu0 %v2499_v53  ;;  %v2994_v60 = vld [vmem:[%s4868_s0 + $0x234] sm:$0xf] }
 0x222   :  { %v1921_v47 = vmax.f32 %v1919_v1, %v1920_v10  ;;  %1444 = vmatmul.bf16.gmra.mxu2 %v2787_v40  ;;  %v4492_v3 = vpop.f32.mrf.mxu3  ;;  %v2507_v40 = vor.u32 %v2991_v5, %v2506_v37  ;;  %v2524_v1 = vld [vmem:[%s4868_s0 + $0x238] sm:$0xf0]  ;;  %v1933_v10 = vsel %vm1834_vm1, %v3664_v27, -inf  ;;  %v3065_v37 = vld [vmem:[%s4868_s0 + $0x464] sm:$0xf0] }
 0x223   :  { %v2102_v38 = vadd.f32 %v4182_v33, %v1918_v54  ;;  %v4473_v15 = vpop.f32.mrf.mxu1 }
 0x224   :  { %v1923_v44 = vmax.f32 %v1921_v47, %v1922_v48  ;;  %v1936_v48 = vsel %vm1834_vm1, %v3675_v50, -inf  ;;  %v1940_v50 = vsel %vm1834_vm1, %v3678_v36, -inf  ;;  %v1943_v36 = vsel %vm1834_vm1, %v3702_v63, -inf }
 0x225   :  { %v2138_v11 = vmax.f32 %v2102_v38, 0.0  ;;  %v1405_v56 = vpop.f32.mrf.mxu2 }
 0x226   :  { %v1775_v52 = vadd.f32 %v4332_v13, %v1405_v56  ;;  %2886 = vmatmul.msk.bf16.gmra.mxu1 %vm879_vm0, %v2519_v43  ;;  %v1227_v49 = vpop.f32.mrf.mxu0  ;;  %v1926_v13 = vsel %vm1834_vm1, %v3638_v45, -inf  ;;  %v1929_v45 = vsel %vm1834_vm1, %v3662_v18, -inf  ;;  %v2795_v18 = vor.u32 %v3063_v39, %v2794_v41 }
 0x227   :  { %v2174_v46 = vpack.c.bf16 %v2138_v11, %v2138_v11  ;;  %v1597_v14 = vadd.f32 %v4384_v32, %v1227_v49  ;;  %v2527_v43 = vor.u32 %v2994_v60, %v2524_v1  ;;  %v1950_v1 = vsel %vm1834_vm1, %v3715_v21, -inf }
 0x228   :  { %v1924_v25 = vsel %vm1834_vm1, %v1775_v52, -inf  ;;  %2923 = vmatmul.msk.bf16.gmra.mxu3 %vm879_vm0, %v2815_v9  ;;  %v1954_v21 = vsel %vm1834_vm1, %v3718_v22, -inf  ;;  %v1957_v22 = vsel %vm1834_vm1, %v3742_v57, -inf }
 0x229   :  { %2211 = vst.msk [vmem:[%s4870_s3 + $0x2c] sm:$0xf] %vm2199_vm2, %v2174_v46  ;;  %v1925_v32 = vmax.f32 %v1923_v44, %v1924_v25  ;;  %v1927_v7 = vsel %vm1834_vm1, %v1597_v14, -inf }
 0x22a   :  { %v1928_v24 = vmax.f32 %v1926_v13, %v1927_v7  ;;  %v4533_v27 = vpop.f32.mrf.mxu3  ;;  %v2514_v13 = vld [vmem:[%s4868_s0 + $0x220] sm:$0xf] }
 0x22b   :  { %v2103_v16 = vadd.f32 %v4182_v33, %v1925_v32  ;;  %v4504_v34 = vpop.f32.mrf.mxu1 }
 0x22c   :  { %v1930_v53 = vmax.f32 %v1928_v24, %v1929_v45  ;;  %v2802_v24 = vld [vmem:[%s4868_s0 + $0x460] sm:$0xf] }
 0x22d   :  { %v2139_v23 = vmax.f32 %v2103_v16, 0.0  ;;  %v1407_v28 = vpop.f32.mrf.mxu2 }
 0x22e   :  { %v1777_v20 = vadd.f32 %v4355_v30, %v1407_v28  ;;  %v1230_v58 = vpop.f32.mrf.mxu0 }
 0x22f   :  { %v2175_v42 = vpack.c.bf16 %v2139_v23, %v2139_v23  ;;  %v1600_v62 = vadd.f32 %v4413_v8, %v1230_v58  ;;  %v2803_v23 = vor.u32 %v3065_v37, %v2802_v24  ;;  %v2532_v58 = vld [vmem:[%s4868_s0 + $0x248] sm:$0xf0] }
 0x230   :  { %v1931_v54 = vsel %vm1834_vm1, %v1777_v20, -inf  ;;  %v2996_v20 = vld [vmem:[%s4868_s0 + $0x244] sm:$0xf] }
 0x231   :  { %2212 = vst.msk [vmem:[%s4870_s3 + $0x30] sm:$0xf] %vm2199_vm2, %v2175_v42  ;;  %v1932_v30 = vmax.f32 %v1930_v53, %v1931_v54  ;;  %v1934_v8 = vsel %vm1834_vm1, %v1600_v62, -inf  ;;  %1269 = vmatmul.bf16.gmra.mxu0 %v2507_v40  ;;  %v1947_v42 = vsel %vm1834_vm1, %v3704_v4, -inf  ;;  %v2535_v60 = vor.u32 %v2996_v20, %v2532_v58 }
 0x232   :  { %v1935_v47 = vmax.f32 %v1933_v10, %v1934_v8  ;;  %1449 = vmatmul.bf16.gmra.mxu2 %v2795_v18  ;;  %v4563_v39 = vpop.f32.mrf.mxu3 }
 0x233   :  { %v2104_v38 = vadd.f32 %v4182_v33, %v1932_v30  ;;  %v4531_v44 = vpop.f32.mrf.mxu1 }
 0x234   :  { %v1937_v11 = vmax.f32 %v1935_v47, %v1936_v48 }
 0x235   :  { %v2140_v56 = vmax.f32 %v2104_v38, 0.0  ;;  %v1410_v52 = vpop.f32.mrf.mxu2 }
 0x236   :  { %v1780_v49 = vadd.f32 %v4392_v29, %v1410_v52  ;;  %2887 = vmatmul.msk.bf16.gmra.mxu1 %vm879_vm0, %v2527_v43  ;;  %v1232_v46 = vpop.f32.mrf.mxu0 }
 0x237   :  { %v2176_v14 = vpack.c.bf16 %v2140_v56, %v2140_v56  ;;  %v1602_v17 = vadd.f32 %v4444_v2, %v1232_v46  ;;  %v2993_v2 = vld [vmem:[%s4868_s0 + $0x224] sm:$0xf0]  ;;  %v2995_v46 = vld [vmem:[%s4868_s0 + $0x234] sm:$0xf0] }
 0x238   :  { %v1938_v19 = vsel %vm1834_vm1, %v1780_v49, -inf  ;;  %v2515_v41 = vor.u32 %v2993_v2, %v2514_v13 }
 0x239   :  { %2213 = vst.msk [vmem:[%s4870_s3 + $0x34] sm:$0xf] %vm2199_vm2, %v2176_v14  ;;  %v1939_v25 = vmax.f32 %v1937_v11, %v1938_v19  ;;  %v1941_v9 = vsel %vm1834_vm1, %v1602_v17, -inf  ;;  %v2810_v19 = vld [vmem:[%s4868_s0 + $0x470] sm:$0xf] }
 0x23a   :  { %v1942_v29 = vmax.f32 %v1940_v50, %v1941_v9  ;;  %v4589_v11 = vpop.f32.mrf.mxu3  ;;  %v3067_v50 = vld [vmem:[%s4868_s0 + $0x474] sm:$0xf0] }
 0x23b   :  { %v2105_v32 = vadd.f32 %v4182_v33, %v1939_v25  ;;  %v4555_v7 = vpop.f32.mrf.mxu1  ;;  %v2811_v57 = vor.u32 %v3067_v50, %v2810_v19 }
 0x23c   :  { %v1944_v5 = vmax.f32 %v1942_v29, %v1943_v36 }
 0x23d   :  { %v2141_v45 = vmax.f32 %v2105_v32, 0.0  ;;  %v1412_v16 = vpop.f32.mrf.mxu2 }
 0x23e   :  { %v1782_v63 = vadd.f32 %v4415_v51, %v1412_v16  ;;  %v1235_v53 = vpop.f32.mrf.mxu0 }
 0x23f   :  { %v2177_v28 = vpack.c.bf16 %v2141_v45, %v2141_v45  ;;  %v1605_v40 = vadd.f32 %v4473_v15, %v1235_v53 }
 0x240   :  { %v1945_v18 = vsel %vm1834_vm1, %v1782_v63, -inf }
 0x241   :  { %2214 = vst.msk [vmem:[%s4870_s3 + $0x38] sm:$0xf] %vm2199_vm2, %v2177_v28  ;;  %v1946_v51 = vmax.f32 %v1944_v5, %v1945_v18  ;;  %v1948_v15 = vsel %vm1834_vm1, %v1605_v40, -inf  ;;  %1274 = vmatmul.bf16.gmra.mxu0 %v2515_v41  ;;  %v1961_v5 = vsel %vm1834_vm1, %v3744_v0, -inf }
 0x242   :  { %v1949_v62 = vmax.f32 %v1947_v42, %v1948_v15  ;;  %1454 = vmatmul.bf16.gmra.mxu2 %v2803_v23 }
 0x243   :  { %v2106_v54 = vadd.f32 %v4182_v33, %v1946_v51  ;;  %v4584_v10 = vpop.f32.mrf.mxu1  ;;  %v1968_v51 = vsel %vm1834_vm1, %v3758_v6, -inf }
 0x244   :  { %v1951_v4 = vmax.f32 %v1949_v62, %v1950_v1 }
 0x245   :  { %v2142_v30 = vmax.f32 %v2106_v54, 0.0  ;;  %v1415_v8 = vpop.f32.mrf.mxu2 }
 0x246   :  { %v1785_v47 = vadd.f32 %v4460_v31, %v1415_v8  ;;  %2888 = vmatmul.msk.bf16.gmra.mxu1 %vm879_vm0, %v2535_v60  ;;  %v1237_v43 = vpop.f32.mrf.mxu0 }
 0x247   :  { %v2178_v48 = vpack.c.bf16 %v2142_v30, %v2142_v30  ;;  %v1607_v38 = vadd.f32 %v4504_v34, %v1237_v43  ;;  %v2522_v34 = vld [vmem:[%s4868_s0 + $0x230] sm:$0xf] }
 0x248   :  { %v1952_v56 = vsel %vm1834_vm1, %v1785_v47, -inf  ;;  %v2523_v13 = vor.u32 %v2995_v46, %v2522_v34 }
 0x249   :  { %2215 = vst.msk [vmem:[%s4870_s3 + $0x3c] sm:$0xf] %vm2199_vm2, %v2178_v48  ;;  %v1953_v52 = vmax.f32 %v1951_v4, %v1952_v56  ;;  %v1955_v31 = vsel %vm1834_vm1, %v1607_v38, -inf  ;;  %v1975_v38 = vsel %vm1834_vm1, %v3784_v12, -inf }
 0x24a   :  { %v1956_v49 = vmax.f32 %v1954_v21, %v1955_v31 }
 0x24b   :  { %v2107_v14 = vadd.f32 %v4182_v33, %v1953_v52  ;;  %v4608_v17 = vpop.f32.mrf.mxu1 }
 0x24c   :  { %v1958_v25 = vmax.f32 %v1956_v49, %v1957_v22 }
 0x24d   :  { %v2143_v9 = vmax.f32 %v2107_v14, 0.0  ;;  %v1417_v29 = vpop.f32.mrf.mxu2 }
 0x24e   :  { %v1787_v2 = vadd.f32 %v4492_v3, %v1417_v29  ;;  %v1240_v36 = vpop.f32.mrf.mxu0  ;;  %v1796_v3 = vpop.f32.mrf.mxu3 }
 0x24f   :  { %v2179_v32 = vpack.c.bf16 %v2143_v9, %v2143_v9  ;;  %v1610_v24 = vadd.f32 %v4531_v44, %v1240_v36  ;;  %v1964_v44 = vsel %vm1834_vm1, %v3755_v59, -inf }
 0x250   :  { %v1959_v37 = vsel %vm1834_vm1, %v1787_v2, -inf  ;;  %v4910_v2 = vld [vmem:[#allocation5_spill] sm:$0xff] }
 0x251   :  { %2216 = vst.msk [vmem:[%s4870_s3 + $0x40] sm:$0xf] %vm2199_vm2, %v2179_v32  ;;  %v1960_v45 = vmax.f32 %v1958_v25, %v1959_v37  ;;  %v1962_v16 = vsel %vm1834_vm1, %v1610_v24, -inf  ;;  %1279 = vmatmul.bf16.gmra.mxu0 %v2523_v13  ;;  %v4909_v25 = vld [vmem:[#allocation4_spill] sm:$0xff] }
 0x252   :  { %v1963_v41 = vmax.f32 %v1961_v5, %v1962_v16  ;;  %1459 = vmatmul.bf16.gmra.mxu2 %v2811_v57  ;;  %v1982_v9 = vsel %vm1834_vm1, %v4909_v25, -inf }
 0x253   :  { %v2108_v63 = vadd.f32 %v4182_v33, %v1960_v45  ;;  %v1619_v53 = vpop.f32.mrf.mxu1 }
 0x254   :  { %v1965_v23 = vmax.f32 %v1963_v41, %v1964_v44 }
 0x255   :  { %v2144_v0 = vmax.f32 %v2108_v63, 0.0  ;;  %v1420_v28 = vpop.f32.mrf.mxu2  ;;  %v4911_v63 = vld [vmem:[#allocation6_spill] sm:$0xff] }
 0x256   :  { %v1790_v40 = vadd.f32 %v4533_v27, %v1420_v28  ;;  %v1242_v20 = vpop.f32.mrf.mxu0  ;;  %v1971_v27 = vsel %vm1834_vm1, %v3782_v61, -inf  ;;  %v1799_v1 = vpop.f32.mrf.mxu3 }
 0x257   :  { %v2180_v58 = vpack.c.bf16 %v2144_v0, %v2144_v0  ;;  %v1612_v18 = vadd.f32 %v4555_v7, %v1242_v20  ;;  %v4912_v20 = vld [vmem:[#allocation7_spill] sm:$0xff] }
 0x258   :  { %v1966_v42 = vsel %vm1834_vm1, %v1790_v40, -inf }
 0x259   :  { %2217 = vst.msk [vmem:[%s4870_s3 + $0x44] sm:$0xf] %vm2199_vm2, %v2180_v58  ;;  %v1967_v59 = vmax.f32 %v1965_v23, %v1966_v42  ;;  %v1969_v15 = vsel %vm1834_vm1, %v1612_v18, -inf  ;;  %v1989_v23 = vsel %vm1834_vm1, %v4911_v63, -inf }
 0x25a   :  { %v1970_v62 = vmax.f32 %v1968_v51, %v1969_v15 }
 0x25b   :  { %v2109_v60 = vadd.f32 %v4182_v33, %v1967_v59  ;;  %v1621_v7 = vpop.f32.mrf.mxu1 }
 0x25c   :  { %v1972_v54 = vmax.f32 %v1970_v62, %v1971_v27 }
 0x25d   :  { %v2145_v4 = vmax.f32 %v2109_v60, 0.0  ;;  %v1422_v30 = vpop.f32.mrf.mxu2 }
 0x25e   :  { %v1792_v6 = vadd.f32 %v4563_v39, %v1422_v30  ;;  %v1245_v8 = vpop.f32.mrf.mxu0  ;;  %v1978_v39 = vsel %vm1834_vm1, %v3795_v35, -inf  ;;  %v1801_v46 = vpop.f32.mrf.mxu3 }
 0x25f   :  { %v2181_v47 = vpack.c.bf16 %v2145_v4, %v2145_v4  ;;  %v1615_v43 = vadd.f32 %v4584_v10, %v1245_v8 }
 0x260   :  { %v1973_v48 = vsel %vm1834_vm1, %v1792_v6, -inf }
 0x261   :  { %2218 = vst.msk [vmem:[%s4870_s3 + $0x48] sm:$0xf] %vm2199_vm2, %v2181_v47  ;;  %v1974_v61 = vmax.f32 %v1972_v54, %v1973_v48  ;;  %v1976_v56 = vsel %vm1834_vm1, %v1615_v43, -inf  ;;  %v4913_v54 = vld [vmem:[#allocation8_spill] sm:$0xff]  ;;  %v4914_v43 = vld [vmem:[#allocation9_spill] sm:$0xff] }
 0x262   :  { %v1977_v21 = vmax.f32 %v1975_v38, %v1976_v56  ;;  %v1996_v4 = vsel %vm1834_vm1, %v4913_v54, -inf }
 0x263   :  { %v2110_v52 = vadd.f32 %v4182_v33, %v1974_v61  ;;  %v1624_v10 = vpop.f32.mrf.mxu1 }
 0x264   :  { %v1979_v31 = vmax.f32 %v1977_v21, %v1978_v39 }
 0x265   :  { %v2146_v49 = vmax.f32 %v2110_v52, 0.0  ;;  %v1425_v34 = vpop.f32.mrf.mxu2 }
 0x266   :  { %v1795_v12 = vadd.f32 %v4589_v11, %v1425_v34  ;;  %v1247_v22 = vpop.f32.mrf.mxu0  ;;  %v1985_v11 = vsel %vm1834_vm1, %v4910_v2, -inf  ;;  %v1804_v41 = vpop.f32.mrf.mxu3  ;;  %v4915_v34 = vld [vmem:[#allocation10_spill] sm:$0xff] }
 0x267   :  { %v2182_v14 = vpack.c.bf16 %v2146_v49, %v2146_v49  ;;  %v1617_v19 = vadd.f32 %v4608_v17, %v1247_v22 }
 0x268   :  { %v1980_v50 = vsel %vm1834_vm1, %v1795_v12, -inf  ;;  %v2003_v12 = vsel %vm1834_vm1, %v4915_v34, -inf }
 0x269   :  { %2219 = vst.msk [vmem:[%s4870_s3 + $0x4c] sm:$0xf] %vm2199_vm2, %v2182_v14  ;;  %v1981_v35 = vmax.f32 %v1979_v31, %v1980_v50  ;;  %v1983_v29 = vsel %vm1834_vm1, %v1617_v19, -inf  ;;  %v4916_v50 = vld [vmem:[#allocation11_spill] sm:$0xff] }
 0x26a   :  { %v1984_v13 = vmax.f32 %v1982_v9, %v1983_v29 }
 0x26b   :  { %v2111_v36 = vadd.f32 %v4182_v33, %v1981_v35  ;;  %v1626_v17 = vpop.f32.mrf.mxu1 }
 0x26c   :  { %v1986_v57 = vmax.f32 %v1984_v13, %v1985_v11 }
 0x26d   :  { %v2147_v32 = vmax.f32 %v2111_v36, 0.0  ;;  %v1427_v24 = vpop.f32.mrf.mxu2 }
 0x26e   :  { %v1797_v37 = vadd.f32 %v1796_v3, %v1427_v24  ;;  %v1250_v5 = vpop.f32.mrf.mxu0  ;;  %v1992_v3 = vsel %vm1834_vm1, %v4912_v20, -inf  ;;  %v1806_v8 = vpop.f32.mrf.mxu3  ;;  %v4917_v24 = vld [vmem:[#allocation12_spill] sm:$0xff] }
 0x26f   :  { %v2183_v45 = vpack.c.bf16 %v2147_v32, %v2147_v32  ;;  %v1620_v16 = vadd.f32 %v1619_v53, %v1250_v5 }
 0x270   :  { %v1987_v44 = vsel %vm1834_vm1, %v1797_v37, -inf  ;;  %v2010_v37 = vsel %vm1834_vm1, %v4917_v24, -inf }
 0x271   :  { %2220 = vst.msk [vmem:[%s4870_s3 + $0x50] sm:$0xf] %vm2199_vm2, %v2183_v45  ;;  %v1988_v0 = vmax.f32 %v1986_v57, %v1987_v44  ;;  %v1990_v28 = vsel %vm1834_vm1, %v1620_v16, -inf  ;;  %v4918_v44 = vld [vmem:[#allocation13_spill] sm:$0xff] }
 0x272   :  { %v1991_v40 = vmax.f32 %v1989_v23, %v1990_v28 }
 0x273   :  { %v2112_v53 = vadd.f32 %v4182_v33, %v1988_v0  ;;  %v1629_v58 = vpop.f32.mrf.mxu1 }
 0x274   :  { %v1993_v18 = vmax.f32 %v1991_v40, %v1992_v3 }
 0x275   :  { %v2148_v42 = vmax.f32 %v2112_v53, 0.0  ;;  %v1430_v51 = vpop.f32.mrf.mxu2 }
 0x276   :  { %v1800_v59 = vadd.f32 %v1799_v1, %v1430_v51  ;;  %v1252_v15 = vpop.f32.mrf.mxu0  ;;  %v1999_v1 = vsel %vm1834_vm1, %v4914_v43, -inf  ;;  %v1809_v9 = vpop.f32.mrf.mxu3  ;;  %v4919_v51 = vld [vmem:[#allocation14_spill] sm:$0xff] }
 0x277   :  { %v2184_v62 = vpack.c.bf16 %v2148_v42, %v2148_v42  ;;  %v1622_v27 = vadd.f32 %v1621_v7, %v1252_v15 }
 0x278   :  { %v1994_v60 = vsel %vm1834_vm1, %v1800_v59, -inf  ;;  %v2017_v59 = vsel %vm1834_vm1, %v4919_v51, -inf }
 0x279   :  { %2221 = vst.msk [vmem:[%s4870_s3 + $0x54] sm:$0xf] %vm2199_vm2, %v2184_v62  ;;  %v1995_v30 = vmax.f32 %v1993_v18, %v1994_v60  ;;  %v1997_v6 = vsel %vm1834_vm1, %v1622_v27, -inf  ;;  %v4920_v27 = vld [vmem:[#allocation15_spill] sm:$0xff] }
 0x27a   :  { %v1998_v47 = vmax.f32 %v1996_v4, %v1997_v6  ;;  %v2020_v60 = vsel %vm1834_vm1, %v4920_v27, -inf }
 0x27b   :  { %v2113_v7 = vadd.f32 %v4182_v33, %v1995_v30  ;;  %v1631_v48 = vpop.f32.mrf.mxu1 }
 0x27c   :  { %v2000_v38 = vmax.f32 %v1998_v47, %v1999_v1 }
 0x27d   :  { %v2149_v61 = vmax.f32 %v2113_v7, 0.0  ;;  %v1432_v56 = vpop.f32.mrf.mxu2 }
 0x27e   :  { %v1802_v21 = vadd.f32 %v1801_v46, %v1432_v56  ;;  %v1255_v39 = vpop.f32.mrf.mxu0  ;;  %v2006_v46 = vsel %vm1834_vm1, %v4916_v50, -inf  ;;  %v1811_v40 = vpop.f32.mrf.mxu3  ;;  %v4921_v56 = vld [vmem:[#allocation16_spill] sm:$0xff] }
 0x27f   :  { %v2185_v52 = vpack.c.bf16 %v2149_v61, %v2149_v61  ;;  %v1625_v31 = vadd.f32 %v1624_v10, %v1255_v39 }
 0x280   :  { %v2001_v49 = vsel %vm1834_vm1, %v1802_v21, -inf  ;;  %v2024_v21 = vsel %vm1834_vm1, %v4921_v56, -inf }
 0x281   :  { %2222 = vst.msk [vmem:[%s4870_s3 + $0x58] sm:$0xf] %vm2199_vm2, %v2185_v52  ;;  %v2002_v22 = vmax.f32 %v2000_v38, %v2001_v49  ;;  %v2004_v14 = vsel %vm1834_vm1, %v1625_v31, -inf  ;;  %v4922_v49 = vld [vmem:[#allocation17_spill] sm:$0xff] }
 0x282   :  { %v2005_v19 = vmax.f32 %v2003_v12, %v2004_v14  ;;  %v2027_v34 = vsel %vm1834_vm1, %v4922_v49, -inf }
 0x283   :  { %v2114_v25 = vadd.f32 %v4182_v33, %v2002_v22  ;;  %v1634_v10 = vpop.f32.mrf.mxu1 }
 0x284   :  { %v2007_v35 = vmax.f32 %v2005_v19, %v2006_v46 }
 0x285   :  { %v2150_v29 = vmax.f32 %v2114_v25, 0.0  ;;  %v1435_v13 = vpop.f32.mrf.mxu2 }
 0x286   :  { %v1805_v2 = vadd.f32 %v1804_v41, %v1435_v13  ;;  %v1257_v11 = vpop.f32.mrf.mxu0  ;;  %v2013_v41 = vsel %vm1834_vm1, %v4918_v44, -inf  ;;  %v1814_v38 = vpop.f32.mrf.mxu3 }
 0x287   :  { %v2186_v36 = vpack.c.bf16 %v2150_v29, %v2150_v29  ;;  %v1627_v57 = vadd.f32 %v1626_v17, %v1257_v11  ;;  %v4923_v29 = vld [vmem:[#allocation18_spill] sm:$0xff] }
 0x288   :  { %v2008_v32 = vsel %vm1834_vm1, %v1805_v2, -inf  ;;  %v2031_v13 = vsel %vm1834_vm1, %v4923_v29, -inf }
 0x289   :  { %2223 = vst.msk [vmem:[%s4870_s3 + $0x5c] sm:$0xf] %vm2199_vm2, %v2186_v36  ;;  %v2009_v5 = vmax.f32 %v2007_v35, %v2008_v32  ;;  %v2011_v45 = vsel %vm1834_vm1, %v1627_v57, -inf  ;;  %v4924_v32 = vld [vmem:[#allocation19_spill] sm:$0xff] }
 0x28a   :  { %v2012_v16 = vmax.f32 %v2010_v37, %v2011_v45  ;;  %v2034_v24 = vsel %vm1834_vm1, %v4924_v32, -inf }
 0x28b   :  { %v2115_v63 = vadd.f32 %v4182_v33, %v2009_v5  ;;  %v1636_v17 = vpop.f32.mrf.mxu1 }
 0x28c   :  { %v2014_v23 = vmax.f32 %v2012_v16, %v2013_v41 }
 0x28d   :  { %v2151_v0 = vmax.f32 %v2115_v63, 0.0  ;;  %v1437_v28 = vpop.f32.mrf.mxu2 }
 0x28e   :  { %v1807_v20 = vadd.f32 %v1806_v8, %v1437_v28  ;;  %v1260_v3 = vpop.f32.mrf.mxu0  ;;  %v1816_v36 = vpop.f32.mrf.mxu3  ;;  %v4925_v28 = vld [vmem:[#allocation20_spill] sm:$0xff] }
 0x28f   :  { %v2187_v53 = vpack.c.bf16 %v2151_v0, %v2151_v0  ;;  %v1630_v18 = vadd.f32 %v1629_v58, %v1260_v3  ;;  %v4725_v58 = vld [vmem:[%s4869_s2] ss:$0 sm:$0xff] }
 0x290   :  { %v2015_v42 = vsel %vm1834_vm1, %v1807_v20, -inf }
 0x291   :  { %2224 = vst.msk [vmem:[%s4870_s3 + $0x60] sm:$0xf] %vm2199_vm2, %v2187_v53  ;;  %v2016_v33 = vmax.f32 %v2014_v23, %v2015_v42  ;;  %v2018_v15 = vsel %vm1834_vm1, %v1630_v18, -inf  ;;  %v4926_v18 = vld [vmem:[#allocation21_spill] sm:$0xff] }
 0x292   :  { %v2019_v62 = vmax.f32 %v2017_v59, %v2018_v15  ;;  %v2041_v42 = vsel %vm1834_vm1, %v4926_v18, -inf }
 0x293   :  { %v2116_v54 = vadd.f32 %v4725_v58, %v2016_v33  ;;  %v1639_v4 = vpop.f32.mrf.mxu1 }
 0x294   :  { %v2021_v30 = vmax.f32 %v2019_v62, %v2020_v60 }
 0x295   :  { %v2152_v6 = vmax.f32 %v2116_v54, 0.0  ;;  %v1440_v8 = vpop.f32.mrf.mxu2 }
 0x296   :  { %v1810_v47 = vadd.f32 %v1809_v9, %v1440_v8  ;;  %v1262_v43 = vpop.f32.mrf.mxu0  ;;  %v1819_v59 = vpop.f32.mrf.mxu3  ;;  %v4927_v8 = vld [vmem:[#allocation22_spill] sm:$0xff] }
 0x297   :  { %v2188_v1 = vpack.c.bf16 %v2152_v6, %v2152_v6  ;;  %v1632_v7 = vadd.f32 %v1631_v48, %v1262_v43 }
 0x298   :  { %v2022_v61 = vsel %vm1834_vm1, %v1810_v47, -inf  ;;  %v2045_v47 = vsel %vm1834_vm1, %v4927_v8, -inf  ;;  %v4936_v8 = vld [vmem:[#allocation28_spill] sm:$0xff] }
 0x299   :  { %2225 = vst.msk [vmem:[%s4870_s3 + $0x64] sm:$0xf] %vm2199_vm2, %v2188_v1  ;;  %v2023_v39 = vmax.f32 %v2021_v30, %v2022_v61  ;;  %v2025_v52 = vsel %vm1834_vm1, %v1632_v7, -inf }
 0x29a   :  { %v2026_v31 = vmax.f32 %v2024_v21, %v2025_v52 }
 0x29b   :  { %v2117_v48 = vadd.f32 %v4725_v58, %v2023_v39  ;;  %v1641_v12 = vpop.f32.mrf.mxu1 }
 0x29c   :  { %v2028_v22 = vmax.f32 %v2026_v31, %v2027_v34 }
 0x29d   :  { %v2153_v14 = vmax.f32 %v2117_v48, 0.0  ;;  %v1442_v19 = vpop.f32.mrf.mxu2 }
 0x29e   :  { %v1812_v50 = vadd.f32 %v1811_v40, %v1442_v19  ;;  %v1265_v46 = vpop.f32.mrf.mxu0  ;;  %v2038_v40 = vsel %vm1834_vm1, %v4925_v28, -inf  ;;  %v1821_v31 = vpop.f32.mrf.mxu3  ;;  %v4929_v19 = vld [vmem:[#allocation24_spill] sm:$0xff] }
 0x29f   :  { %v2189_v25 = vpack.c.bf16 %v2153_v14, %v2153_v14  ;;  %v1635_v9 = vadd.f32 %v1634_v10, %v1265_v46 }
 0x2a0   :  { %v2029_v35 = vsel %vm1834_vm1, %v1812_v50, -inf  ;;  %v2052_v50 = vsel %vm1834_vm1, %v4929_v19, -inf }
 0x2a1   :  { %2226 = vst.msk [vmem:[%s4870_s3 + $0x68] sm:$0xf] %vm2199_vm2, %v2189_v25  ;;  %v2030_v2 = vmax.f32 %v2028_v22, %v2029_v35  ;;  %v2032_v11 = vsel %vm1834_vm1, %v1635_v9, -inf  ;;  %v4930_v35 = vld [vmem:[#allocation25_spill] sm:$0xff] }
 0x2a2   :  { %v2033_v57 = vmax.f32 %v2031_v13, %v2032_v11  ;;  %v2055_v29 = vsel %vm1834_vm1, %v4930_v35, -inf }
 0x2a3   :  { %v2118_v10 = vadd.f32 %v4725_v58, %v2030_v2  ;;  %v1644_v37 = vpop.f32.mrf.mxu1 }
 0x2a4   :  { %v2035_v5 = vmax.f32 %v2033_v57, %v2034_v24 }
 0x2a5   :  { %v2154_v45 = vmax.f32 %v2118_v10, 0.0  ;;  %v1445_v16 = vpop.f32.mrf.mxu2 }
 0x2a6   :  { %v1815_v44 = vadd.f32 %v1814_v38, %v1445_v16  ;;  %v1267_v41 = vpop.f32.mrf.mxu0  ;;  %v4928_v38 = vld [vmem:[#allocation23_spill] sm:$0xff]  ;;  %v1824_v10 = vpop.f32.mrf.mxu3  ;;  %v4931_v16 = vld [vmem:[#allocation26_spill] sm:$0xff] }
 0x2a7   :  { %v2190_v63 = vpack.c.bf16 %v2154_v45, %v2154_v45  ;;  %v1637_v23 = vadd.f32 %v1636_v17, %v1267_v41  ;;  %v2048_v61 = vsel %vm1834_vm1, %v4928_v38, -inf }
 0x2a8   :  { %v2036_v0 = vsel %vm1834_vm1, %v1815_v44, -inf  ;;  %v2059_v44 = vsel %vm1834_vm1, %v4931_v16, -inf }
 0x2a9   :  { %2227 = vst.msk [vmem:[%s4870_s3 + $0x6c] sm:$0xf] %vm2199_vm2, %v2190_v63  ;;  %v2037_v20 = vmax.f32 %v2035_v5, %v2036_v0  ;;  %v2039_v3 = vsel %vm1834_vm1, %v1637_v23, -inf  ;;  %v4932_v0 = vld [vmem:[#allocation27_spill] sm:$0xff] }
 0x2aa   :  { %v2040_v53 = vmax.f32 %v2038_v40, %v2039_v3  ;;  %v2062_v28 = vsel %vm1834_vm1, %v4932_v0, -inf }
 0x2ab   :  { %v2119_v51 = vadd.f32 %v4725_v58, %v2037_v20  ;;  %v1646_v17 = vpop.f32.mrf.mxu1  ;;  %v4933_v20 = vld [vmem:[#allocation2_spill] sm:$0xff] }
 0x2ac   :  { %v2042_v33 = vmax.f32 %v2040_v53, %v2041_v42 }
 0x2ad   :  { %v2155_v15 = vmax.f32 %v2119_v51, 0.0  ;;  %v1447_v62 = vpop.f32.mrf.mxu2 }
 0x2ae   :  { %v1817_v27 = vadd.f32 %v1816_v36, %v1447_v62  ;;  %v1270_v60 = vpop.f32.mrf.mxu0  ;;  %v4934_v62 = vmax.f32 %v4112_v55, %v4115_v26 }
 0x2af   :  { %v2191_v54 = vpack.c.bf16 %v2155_v15, %v2155_v15  ;;  %v1640_v30 = vadd.f32 %v1639_v4, %v1270_v60 }
 0x2b0   :  { %v2043_v6 = vsel %vm1834_vm1, %v1817_v27, -inf }
 0x2b1   :  { %2228 = vst.msk [vmem:[%s4870_s3 + $0x70] sm:$0xf] %vm2199_vm2, %v2191_v54  ;;  %v2044_v43 = vmax.f32 %v2042_v33, %v2043_v6  ;;  %v2046_v1 = vsel %vm1834_vm1, %v1640_v30, -inf  ;;  %v4935_v54 = vld [vmem:[#allocation34_spill] sm:$0xff] }
 0x2b2   :  { %v2047_v7 = vmax.f32 %v2045_v47, %v2046_v1  ;;  %v1840_v30 = vsel %vm1834_vm1, %v4935_v54, -inf  ;;  %v2066_v47 = vsel %vm1834_vm1, %v4936_v8, -inf }
 0x2b3   :  { %v2120_v56 = vadd.f32 %v4725_v58, %v2044_v43  ;;  %v4772_v4 = vpop.f32.mrf.mxu1 }
 0x2b4   :  { %v2049_v21 = vmax.f32 %v2047_v7, %v2048_v61  ;;  %v1826_v7 = vpop.f32.mrf.mxu3 }
 0x2b5   :  { %v2156_v39 = vmax.f32 %v2120_v56, 0.0  ;;  %v1450_v52 = vpop.f32.mrf.mxu2 }
 0x2b6   :  { %v1820_v49 = vadd.f32 %v1819_v59, %v1450_v52  ;;  %v1272_v34 = vpop.f32.mrf.mxu0 }
 0x2b7   :  { %v2192_v48 = vpack.c.bf16 %v2156_v39, %v2156_v39  ;;  %v1642_v22 = vadd.f32 %v1641_v12, %v1272_v34  ;;  %v4938_v39 = vld [vmem:[#allocation3_spill] sm:$0xff] }
 0x2b8   :  { %v2050_v14 = vsel %vm1834_vm1, %v1820_v49, -inf }
 0x2b9   :  { %2229 = vst.msk [vmem:[%s4870_s3 + $0x74] sm:$0xf] %vm2199_vm2, %v2192_v48  ;;  %v2051_v46 = vmax.f32 %v2049_v21, %v2050_v14  ;;  %v2053_v25 = vsel %vm1834_vm1, %v1642_v22, -inf }
 0x2ba   :  { %v2054_v9 = vmax.f32 %v2052_v50, %v2053_v25  ;;  %v4939_v25 = vld [vmem:[#allocation35_spill] sm:$0xff] }
 0x2bb   :  { %v2121_v13 = vadd.f32 %v4725_v58, %v2051_v46  ;;  %v4785_v12 = vpop.f32.mrf.mxu1 }
 0x2bc   :  { %v2056_v2 = vmax.f32 %v2054_v9, %v2055_v29  ;;  %v4940_v9 = vld [vmem:[#allocation36_spill] sm:$0xff] }
 0x2bd   :  { %v2157_v11 = vmax.f32 %v2121_v13, 0.0  ;;  %v1452_v36 = vpop.f32.mrf.mxu2  ;;  %v4941_v35 = vmax.f32 %v4939_v25, %v4940_v9 }
 0x2be   :  { %v1822_v57 = vadd.f32 %v1821_v31, %v1452_v36  ;;  %v1275_v32 = vpop.f32.mrf.mxu0 }
 0x2bf   :  { %v2193_v24 = vpack.c.bf16 %v2157_v11, %v2157_v11  ;;  %v1645_v5 = vadd.f32 %v1644_v37, %v1275_v32 }
 0x2c0   :  { %v2057_v45 = vsel %vm1834_vm1, %v1822_v57, -inf  ;;  %v4943_v57 = vld [vmem:[#allocation30_spill] sm:$0xff] }
 0x2c1   :  { %2230 = vst.msk [vmem:[%s4870_s3 + $0x78] sm:$0xf] %vm2199_vm2, %v2193_v24  ;;  %v2058_v41 = vmax.f32 %v2056_v2, %v2057_v45  ;;  %v2060_v63 = vsel %vm1834_vm1, %v1645_v5, -inf  ;;  %v4942_v2 = vld [vmem:[#allocation37_spill] sm:$0xff]  ;;  %v2073_v32 = vsel %vm1834_vm1, %v4943_v57, -inf  ;;  %v4944_v45 = vld [vmem:[#allocation31_spill] sm:$0xff] }
 0x2c2   :  { %v2061_v23 = vmax.f32 %v2059_v44, %v2060_v63  ;;  %v1847_v11 = vsel %vm1834_vm1, %v4942_v2, -inf  ;;  %v2076_v16 = vsel %vm1834_vm1, %v4944_v45, -inf  ;;  %v1829_v63 = vpop.f32.mrf.mxu3 }
 0x2c3   :  { %v2122_v40 = vadd.f32 %v4725_v58, %v2058_v41  ;;  %v1654_v37 = vpop.f32.mrf.mxu1 }
 0x2c4   :  { %v1655_v3 = vadd.f32 %v1654_v37, %v4933_v20  ;;  %v2063_v53 = vmax.f32 %v2061_v23, %v2062_v28 }
 0x2c5   :  { %v2158_v18 = vmax.f32 %v2122_v40, 0.0  ;;  %v1455_v42 = vpop.f32.mrf.mxu2 }
 0x2c6   :  { %v1838_v51 = vsel %vm1834_vm1, %v1655_v3, -inf  ;;  %v1825_v59 = vadd.f32 %v1824_v10, %v1455_v42  ;;  %v1277_v33 = vpop.f32.mrf.mxu0 }
 0x2c7   :  { %v2194_v15 = vpack.c.bf16 %v2158_v18, %v2158_v18  ;;  %v1839_v27 = vmax.f32 %v4934_v62, %v1838_v51  ;;  %v1647_v60 = vadd.f32 %v1646_v17, %v1277_v33  ;;  %v4937_v17 = vld [vmem:[#allocation29_spill] sm:$0xff]  ;;  %v4945_v51 = vld [vmem:[#allocation32_spill] sm:$0xff] }
 0x2c8   :  { %v2064_v6 = vsel %vm1834_vm1, %v1825_v59, -inf  ;;  %v2069_v38 = vsel %vm1834_vm1, %v4937_v17, -inf  ;;  %v2080_v59 = vsel %vm1834_vm1, %v4945_v51, -inf }
 0x2c9   :  { %2231 = vst.msk [vmem:[%s4870_s3 + $0x7c] sm:$0xf] %vm2199_vm2, %v2194_v15  ;;  %v1841_v43 = vmax.f32 %v1839_v27, %v1840_v30  ;;  %v2065_v1 = vmax.f32 %v2063_v53, %v2064_v6  ;;  %v2067_v55 = vsel %vm1834_vm1, %v1647_v60, -inf }
 0x2ca   :  { %v2068_v26 = vmax.f32 %v2066_v47, %v2067_v55  ;;  %v1831_v6 = vpop.f32.mrf.mxu3 }
 0x2cb   :  { %v2091_v61 = vadd.f32 %v4725_v58, %v1841_v43  ;;  %v2123_v56 = vadd.f32 %v4725_v58, %v2065_v1  ;;  %v1656_v21 = vpop.f32.mrf.mxu1 }
 0x2cc   :  { %v1657_v52 = vadd.f32 %v1656_v21, %v4938_v39  ;;  %v2070_v31 = vmax.f32 %v2068_v26, %v2069_v38 }
 0x2cd   :  { %v2127_v49 = vmax.f32 %v2091_v61, 0.0  ;;  %v2159_v34 = vmax.f32 %v2123_v56, 0.0  ;;  %v1457_v48 = vpop.f32.mrf.mxu2 }
 0x2ce   :  { %v1845_v22 = vsel %vm1834_vm1, %v1657_v52, -inf  ;;  %v1827_v14 = vadd.f32 %v1826_v7, %v1457_v48  ;;  %v1280_v19 = vpop.f32.mrf.mxu0 }
 0x2cf   :  { %v2163_v50 = vpack.c.bf16 %v2127_v49, %v2127_v49  ;;  %v2195_v46 = vpack.c.bf16 %v2159_v34, %v2159_v34  ;;  %v1846_v29 = vmax.f32 %v4941_v35, %v1845_v22  ;;  %v1650_v13 = vadd.f32 %v4772_v4, %v1280_v19 }
 0x2d0   :  { %v2071_v36 = vsel %vm1834_vm1, %v1827_v14, -inf }
 0x2d1   :  { %2200 = vst.msk [vmem:[%s4870_s3] sm:$0xf] %vm2199_vm2, %v2163_v50  ;;  %v1848_v24 = vmax.f32 %v1846_v29, %v1847_v11  ;;  %v2072_v10 = vmax.f32 %v2070_v31, %v2071_v36  ;;  %v2074_v5 = vsel %vm1834_vm1, %v1650_v13, -inf }
 0x2d2   :  { %2232 = vst.msk [vmem:[%s4870_s3 + $0x80] sm:$0xf] %vm2199_vm2, %v2195_v46  ;;  %v2075_v4 = vmax.f32 %v2073_v32, %v2074_v5 }
 0x2d3   :  { %v2092_v44 = vadd.f32 %v4725_v58, %v1848_v24  ;;  %v2124_v41 = vadd.f32 %v4725_v58, %v2072_v10 }
 0x2d4   :  { %v2077_v23 = vmax.f32 %v2075_v4, %v2076_v16 }
 0x2d5   :  { %v2128_v0 = vmax.f32 %v2092_v44, 0.0  ;;  %v2160_v28 = vmax.f32 %v2124_v41, 0.0  ;;  %v1460_v40 = vpop.f32.mrf.mxu2 }
 0x2d6   :  { %v1830_v37 = vadd.f32 %v1829_v63, %v1460_v40  ;;  %v1282_v20 = vpop.f32.mrf.mxu0 }
 0x2d7   :  { %v2164_v3 = vpack.c.bf16 %v2128_v0, %v2128_v0  ;;  %v2196_v53 = vpack.c.bf16 %v2160_v28, %v2160_v28  ;;  %v1652_v18 = vadd.f32 %v4785_v12, %v1282_v20  ;;  %v4946_v12 = vld [vmem:[#allocation33_spill] sm:$0xff] }
 0x2d8   :  { %v2078_v42 = vsel %vm1834_vm1, %v1830_v37, -inf  ;;  %v2083_v27 = vsel %vm1834_vm1, %v4946_v12, -inf }
 0x2d9   :  { %2201 = vst.msk [vmem:[%s4870_s3 + $0x4] sm:$0xf] %vm2199_vm2, %v2164_v3  ;;  %v2079_v33 = vmax.f32 %v2077_v23, %v2078_v42  ;;  %v2081_v15 = vsel %vm1834_vm1, %v1652_v18, -inf }
 0x2da   :  { %2233 = vst.msk [vmem:[%s4870_s3 + $0x84] sm:$0xf] %vm2199_vm2, %v2196_v53  ;;  %v2082_v62 = vmax.f32 %v2080_v59, %v2081_v15 }
 0x2db   :  { %v2125_v60 = vadd.f32 %v4725_v58, %v2079_v33 }
 0x2dc   :  { %v2084_v54 = vmax.f32 %v2082_v62, %v2083_v27 }
 0x2dd   :  { %v2161_v30 = vmax.f32 %v2125_v60, 0.0  ;;  %v1462_v8 = vpop.f32.mrf.mxu2 }
 0x2de   :  { %v1832_v47 = vadd.f32 %v1831_v6, %v1462_v8 }
 0x2df   :  { %v2197_v43 = vpack.c.bf16 %v2161_v30, %v2161_v30 }
 0x2e0   :  { %v2085_v1 = vsel %vm1834_vm1, %v1832_v47, -inf }
 0x2e1   :  { %2234 = vst.msk [vmem:[%s4870_s3 + $0x88] sm:$0xf] %vm2199_vm2, %v2197_v43  ;;  %v2086_v7 = vmax.f32 %v2084_v54, %v2085_v1 }
 0x2e3   :  { %v2126_v55 = vadd.f32 %v4725_v58, %v2086_v7 }
 0x2e5   :  { %v2162_v26 = vmax.f32 %v2126_v55, 0.0 }
 0x2e7   :  { %v2198_v17 = vpack.c.bf16 %v2162_v26, %v2162_v26 }
 0x2e9   :  { %2235 = vst.msk [vmem:[%s4870_s3 + $0x8c] sm:$0xf] %vm2199_vm2, %v2198_v17 }

// kernel: cnn_forward.6
= control target key start
LH: loop header
LB: loop body
LE: loop exit
PB: predicated region body
PF: predicated region fallthrough
CT: control target
= control target key end

     0   :  { %vm539_vm0 = vcmask 261120   ;;  %vm927_vm1 = vcmask 523264   ;;  %vm1032_vm2 = vcmask 519168   ;;  %s2225_s1 = inlined_call_operand.vmem [shape: bf16[288,64], index: 1, kind: input, shape index: {}]   ;;  %s2226_s0 = inlined_call_operand.vmem [shape: bf16[4,80,288], index: 0, kind: input, shape index: {}]   ;;  %s2227_s2 = inlined_call_operand.vmem [shape: f32[1,64], index: 2, kind: input, shape index: {}]   ;;  %s2228_s3 = inlined_call_operand.vmem [shape: bf16[80,64], index: 3, kind: output, shape index: {}]  }
   0x1   :  { %v1446_v0 = vld [vmem:[%s2225_s1 + $0x38] sm:$0xff]  ;;  %v1505_v2 = vld [vmem:[%s2225_s1 + $0x88] sm:$0xff]  ;;  %v1445_v3 = vld [vmem:[%s2225_s1 + $0x30] sm:$0xff] }
   0x2   :  { %v1454_v1 = vld [vmem:[%s2225_s1 + $0x78] sm:$0xff]  ;;  %600 = vmatpush.bf16.msra.mxu0 %v1446_v0  ;;  %1457 = vmatpush.bf16.msra.mxu3 %v1446_v0  ;;  %v1453_v4 = vld [vmem:[%s2225_s1 + $0x70] sm:$0xff]  ;;  %v1517_v5 = vld [vmem:[%s2225_s1 + $0x80] sm:$0xff] }
   0x3   :  { %709 = vmatpush.bf16.msra.mxu1 %v1454_v1  ;;  %824 = vmatpush.bf16.msra.mxu2 %v1505_v2  ;;  %v1057_v6 = vld [vmem:[%s2226_s0 + $0x8] sm:$0xf]  ;;  %v1381_v7 = vld [vmem:[%s2226_s0 + $0x10] sm:$0xf0]  ;;  %v1443_v11 = vld [vmem:[%s2225_s1 + $0x20] sm:$0xff] }
   0x4   :  { %v1058_v8 = vor.u32 %v1381_v7, %v1057_v6  ;;  %v1444_v9 = vld [vmem:[%s2225_s1 + $0x28] sm:$0xff]  ;;  %v1451_v12 = vld [vmem:[%s2225_s1 + $0x60] sm:$0xff]  ;;  %v1442_v13 = vld [vmem:[%s2225_s1 + $0x18] sm:$0xff] }
   0x5   :  { %v1452_v10 = vld [vmem:[%s2225_s1 + $0x68] sm:$0xff]  ;;  %v1450_v14 = vld [vmem:[%s2225_s1 + $0x58] sm:$0xff]  ;;  %v1441_v15 = vld [vmem:[%s2225_s1 + $0x10] sm:$0xff] }
   0x6   :  { %601 = vmatpush.bf16.msra.mxu0 %v1445_v3  ;;  %1458 = vmatpush.bf16.msra.mxu3 %v1445_v3  ;;  %v1449_v16 = vld [vmem:[%s2225_s1 + $0x50] sm:$0xff]  ;;  %v1069_v17 = vld [vmem:[%s2226_s0 + $0x20] sm:$0xf]  ;;  %v1384_v18 = vld [vmem:[%s2226_s0 + $0x28] sm:$0xf0] }
   0x7   :  { %710 = vmatpush.bf16.msra.mxu1 %v1453_v4  ;;  %825 = vmatpush.bf16.msra.mxu2 %v1517_v5  ;;  %v1070_v19 = vor.u32 %v1384_v18, %v1069_v17  ;;  %v1440_v20 = vld [vmem:[%s2225_s1 + $0x8] sm:$0xff]  ;;  %v1439_v22 = vld [vmem:[%s2225_s1] sm:$0xff]  ;;  %v1425_v27 = vld [vmem:[%s2226_s0 + $0x170] sm:$0xf0] }
   0x8   :  { %v1448_v21 = vld [vmem:[%s2225_s1 + $0x48] sm:$0xff]  ;;  %v1447_v23 = vld [vmem:[%s2225_s1 + $0x40] sm:$0xff]  ;;  %v1051_v29 = vld [vmem:[%s2226_s0 + $0xc] sm:$0xf0] }
   0x9   :  { %v1049_v24 = vld [vmem:[%s2226_s0] sm:$0xf]  ;;  %v1380_v25 = vld [vmem:[%s2226_s0 + $0x8] sm:$0xf0]  ;;  %v1229_v26 = vld [vmem:[%s2226_s0 + $0x168] sm:$0xf] }
   0xa   :  { %1359 = vmatmul.msk.bf16.vlgmr.msra.gmra.mxu2 %vm539_vm0, %v1058_v8  ;;  %602 = vmatpush.bf16.msra.mxu0 %v1444_v9  ;;  %v1379_v28 = vld [vmem:[%s2226_s0 + $0x4] sm:$0xf]  ;;  %v1050_v30 = vor.u32 %v1380_v25, %v1049_v24  ;;  %v1230_v31 = vor.u32 %v1425_v27, %v1229_v26  ;;  %v1081_v33 = vld [vmem:[%s2226_s0 + $0x38] sm:$0xf]  ;;  %v1241_v38 = vld [vmem:[%s2226_s0 + $0x180] sm:$0xf] }
   0xb   :  { %1459 = vmatpush.bf16.msra.mxu3 %v1444_v9  ;;  %711 = vmatpush.bf16.msra.mxu1 %v1452_v10  ;;  %v1054_v32 = vor.u32 %v1379_v28, %v1051_v29  ;;  %v1387_v34 = vld [vmem:[%s2226_s0 + $0x40] sm:$0xf0]  ;;  %v1061_v36 = vld [vmem:[%s2226_s0 + $0x18] sm:$0xf]  ;;  %v1428_v39 = vld [vmem:[%s2226_s0 + $0x188] sm:$0xf0] }
   0xc   :  { %v1082_v35 = vor.u32 %v1387_v34, %v1081_v33  ;;  %v1383_v37 = vld [vmem:[%s2226_s0 + $0x20] sm:$0xf0]  ;;  %v1382_v40 = vld [vmem:[%s2226_s0 + $0x1c] sm:$0xf]  ;;  %v1063_v41 = vld [vmem:[%s2226_s0 + $0x24] sm:$0xf0]  ;;  %v1242_v43 = vor.u32 %v1428_v39, %v1241_v38 }
   0xd   :  { %v1062_v42 = vor.u32 %v1383_v37, %v1061_v36  ;;  %v1066_v44 = vor.u32 %v1382_v40, %v1063_v41  ;;  %v1093_v45 = vld [vmem:[%s2226_s0 + $0x50] sm:$0xf]  ;;  %v1390_v46 = vld [vmem:[%s2226_s0 + $0x58] sm:$0xf0]  ;;  %v1253_v50 = vld [vmem:[%s2226_s0 + $0x198] sm:$0xf] }
   0xe   :  { %603 = vmatpush.bf16.msra.mxu0 %v1443_v11  ;;  %v1094_v47 = vor.u32 %v1390_v46, %v1093_v45  ;;  %v1073_v48 = vld [vmem:[%s2226_s0 + $0x30] sm:$0xf]  ;;  %v1386_v49 = vld [vmem:[%s2226_s0 + $0x38] sm:$0xf0]  ;;  %v1431_v51 = vld [vmem:[%s2226_s0 + $0x1a0] sm:$0xf0] }
   0xf   :  { %1460 = vmatpush.bf16.msra.mxu3 %v1443_v11  ;;  %712 = vmatpush.bf16.msra.mxu1 %v1451_v12  ;;  %v1385_v52 = vld [vmem:[%s2226_s0 + $0x34] sm:$0xf]  ;;  %v1075_v53 = vld [vmem:[%s2226_s0 + $0x3c] sm:$0xf0]  ;;  %v1074_v54 = vor.u32 %v1386_v49, %v1073_v48  ;;  %v1254_v55 = vor.u32 %v1431_v51, %v1253_v50  ;;  %v1105_v57 = vld [vmem:[%s2226_s0 + $0x68] sm:$0xf] }
  0x10   :  { %v1078_v56 = vor.u32 %v1385_v52, %v1075_v53  ;;  %v1393_v58 = vld [vmem:[%s2226_s0 + $0x70] sm:$0xf0]  ;;  %v1085_v60 = vld [vmem:[%s2226_s0 + $0x48] sm:$0xf]  ;;  %v1265_v62 = vld [vmem:[%s2226_s0 + $0x1b0] sm:$0xf] }
  0x11   :  { %v1106_v59 = vor.u32 %v1393_v58, %v1105_v57  ;;  %v1389_v61 = vld [vmem:[%s2226_s0 + $0x50] sm:$0xf0]  ;;  %v1434_v63 = vld [vmem:[%s2226_s0 + $0x1b8] sm:$0xf0]  ;;  %v1388_v0 = vld [vmem:[%s2226_s0 + $0x4c] sm:$0xf] }
  0x12   :  { %604 = vmatpush.bf16.msra.mxu0 %v1442_v13  ;;  %v1266_v3 = vor.u32 %v1434_v63, %v1265_v62  ;;  %v1396_v6 = vld [vmem:[%s2226_s0 + $0x88] sm:$0xf0]  ;;  %v1097_v8 = vld [vmem:[%s2226_s0 + $0x60] sm:$0xf]  ;;  %v1437_v11 = vld [vmem:[%s2226_s0 + $0x1d0] sm:$0xf0] }
  0x13   :  { %1461 = vmatpush.bf16.msra.mxu3 %v1442_v13  ;;  %713 = vmatpush.bf16.msra.mxu1 %v1450_v14  ;;  %v1392_v9 = vld [vmem:[%s2226_s0 + $0x68] sm:$0xf0]  ;;  %v1099_v13 = vld [vmem:[%s2226_s0 + $0x6c] sm:$0xf0]  ;;  %v1129_v17 = vld [vmem:[%s2226_s0 + $0x98] sm:$0xf] }
  0x14   :  { %v1399_v18 = vld [vmem:[%s2226_s0 + $0xa0] sm:$0xf0]  ;;  %v1424_v24 = vld [vmem:[%s2226_s0 + $0x16c] sm:$0xf]  ;;  %v1231_v25 = vld [vmem:[%s2226_s0 + $0x174] sm:$0xf0] }
  0x15   :  { %v1234_v28 = vor.u32 %v1424_v24, %v1231_v25  ;;  %v1141_v29 = vld [vmem:[%s2226_s0 + $0xb0] sm:$0xf]  ;;  %v1398_v33 = vld [vmem:[%s2226_s0 + $0x98] sm:$0xf0]  ;;  %v1397_v34 = vld [vmem:[%s2226_s0 + $0x94] sm:$0xf] }
  0x16   :  { %605 = vmatpush.bf16.msra.mxu0 %v1441_v15  ;;  %v1427_v36 = vld [vmem:[%s2226_s0 + $0x184] sm:$0xf]  ;;  %v1243_v37 = vld [vmem:[%s2226_s0 + $0x18c] sm:$0xf0]  ;;  %v1153_v41 = vld [vmem:[%s2226_s0 + $0xc8] sm:$0xf] }
  0x17   :  { %1462 = vmatpush.bf16.msra.mxu3 %v1441_v15  ;;  %714 = vmatpush.bf16.msra.mxu1 %v1449_v16  ;;  %v1246_v40 = vor.u32 %v1427_v36, %v1243_v37  ;;  %v1401_v45 = vld [vmem:[%s2226_s0 + $0xb0] sm:$0xf0]  ;;  %v1400_v46 = vld [vmem:[%s2226_s0 + $0xac] sm:$0xf]  ;;  %v1430_v48 = vld [vmem:[%s2226_s0 + $0x19c] sm:$0xf] }
  0x18   :  { %v1255_v49 = vld [vmem:[%s2226_s0 + $0x1a4] sm:$0xf0]  ;;  %v1145_v58 = vld [vmem:[%s2226_s0 + $0xc0] sm:$0xf]  ;;  %v1433_v62 = vld [vmem:[%s2226_s0 + $0x1b4] sm:$0xf] }
  0x19   :  { %v1258_v53 = vor.u32 %v1430_v48, %v1255_v49  ;;  %v1267_v63 = vld [vmem:[%s2226_s0 + $0x1bc] sm:$0xf0] }
  0x1a   :  { %1360 = vmatmul.msk.bf16.gmra.mxu2 %vm539_vm0, %v1070_v19  ;;  %606 = vmatpush.bf16.msra.mxu0 %v1440_v20  ;;  %v1130_v19 = vor.u32 %v1399_v18, %v1129_v17  ;;  %v1157_v17 = vld [vmem:[%s2226_s0 + $0xd8] sm:$0xf]  ;;  %v1407_v18 = vld [vmem:[%s2226_s0 + $0xe0] sm:$0xf0] }
  0x1b   :  { %1463 = vmatpush.bf16.msra.mxu3 %v1440_v20  ;;  %715 = vmatpush.bf16.msra.mxu1 %v1448_v21  ;;  %v1109_v20 = vld [vmem:[%s2226_s0 + $0x78] sm:$0xf]  ;;  %v1158_v25 = vor.u32 %v1407_v18, %v1157_v17 }
  0x1e   :  { %607 = vmatpush.bf16.msra.mxu0 %v1439_v22 }
  0x1f   :  { %1464 = vmatpush.bf16.msra.mxu3 %v1439_v22  ;;  %716 = vmatpush.bf16.msra.mxu1 %v1447_v23  ;;  %v1394_v22 = vld [vmem:[%s2226_s0 + $0x7c] sm:$0xf] }
  0x21   :  { %608 = vmatmul.bf16.vlgmr.msra.gmra.mxu0 %v1050_v30  ;;  %v1402_v30 = vld [vmem:[%s2226_s0 + $0xb8] sm:$0xf0] }
  0x22   :  { %683 = vmatmul.bf16.vlgmr.msra.gmra.mxu3 %v1230_v31  ;;  %717 = vmatmul.bf16.vlgmr.msra.gmra.mxu1 %v1054_v32  ;;  %v1142_v31 = vor.u32 %v1402_v30, %v1141_v29  ;;  %v1121_v32 = vld [vmem:[%s2226_s0 + $0x90] sm:$0xf] }
  0x23   :  { %1465 = vmatpush.bf16.msrb.mxu3 %v1454_v1  ;;  %v1087_v1 = vld [vmem:[%s2226_s0 + $0x54] sm:$0xf0]  ;;  %v1122_v38 = vor.u32 %v1398_v33, %v1121_v32  ;;  %v1189_v32 = vld [vmem:[%s2226_s0 + $0x110] sm:$0xf]  ;;  %v1414_v33 = vld [vmem:[%s2226_s0 + $0x118] sm:$0xf0] }
  0x24   :  { %v1190_v37 = vor.u32 %v1414_v33, %v1189_v32  ;;  %v1415_v32 = vld [vmem:[%s2226_s0 + $0x124] sm:$0xf]  ;;  %v1195_v33 = vld [vmem:[%s2226_s0 + $0x12c] sm:$0xf0] }
  0x27   :  { %1466 = vmatpush.bf16.msrb.mxu3 %v1453_v4  ;;  %v1090_v4 = vor.u32 %v1388_v0, %v1087_v1 }
  0x2a   :  { %1361 = vmatmul.msk.bf16.gmra.mxu2 %vm539_vm0, %v1082_v35  ;;  %v1123_v35 = vld [vmem:[%s2226_s0 + $0x9c] sm:$0xf0] }
  0x2b   :  { %1467 = vmatpush.bf16.msrb.mxu3 %v1452_v10  ;;  %v1277_v10 = vld [vmem:[%s2226_s0 + $0x1c8] sm:$0xf]  ;;  %v1126_v39 = vor.u32 %v1397_v34, %v1123_v35 }
  0x2c   :  { %v1278_v15 = vor.u32 %v1437_v11, %v1277_v10 }
  0x2f   :  { %1468 = vmatpush.bf16.msrb.mxu3 %v1451_v12  ;;  %v1391_v12 = vld [vmem:[%s2226_s0 + $0x64] sm:$0xf] }
  0x31   :  { %613 = vmatmul.bf16.gmra.mxu0 %v1062_v42  ;;  %v1405_v42 = vld [vmem:[%s2226_s0 + $0xd0] sm:$0xf0] }
  0x32   :  { %688 = vmatmul.bf16.gmra.mxu3 %v1242_v43  ;;  %722 = vmatmul.bf16.gmra.mxu1 %v1066_v44  ;;  %v1154_v43 = vor.u32 %v1405_v42, %v1153_v41  ;;  %v1133_v44 = vld [vmem:[%s2226_s0 + $0xa8] sm:$0xf]  ;;  %v1169_v41 = vld [vmem:[%s2226_s0 + $0xf0] sm:$0xf]  ;;  %v1410_v42 = vld [vmem:[%s2226_s0 + $0xf8] sm:$0xf0] }
  0x33   :  { %1469 = vmatpush.bf16.msrb.mxu3 %v1450_v14  ;;  %v1098_v14 = vor.u32 %v1392_v9, %v1097_v8  ;;  %v1134_v51 = vor.u32 %v1401_v45, %v1133_v44  ;;  %v1177_v8 = vld [vmem:[%s2226_s0 + $0xf8] sm:$0xf]  ;;  %v1411_v9 = vld [vmem:[%s2226_s0 + $0x100] sm:$0xf0]  ;;  %v1171_v44 = vld [vmem:[%s2226_s0 + $0xfc] sm:$0xf0]  ;;  %v1170_v49 = vor.u32 %v1410_v42, %v1169_v41  ;;  %v1198_v42 = vor.u32 %v1415_v32, %v1195_v33 }
  0x34   :  { %v1261_v45 = vld [vmem:[%s2226_s0 + $0x1a0] sm:$0xf] }
  0x37   :  { %1470 = vmatpush.bf16.msrb.mxu3 %v1449_v16  ;;  %v1102_v16 = vor.u32 %v1391_v12, %v1099_v13  ;;  %v1178_v13 = vor.u32 %v1411_v9, %v1177_v8 }
  0x3a   :  { %1362 = vmatmul.msk.bf16.gmra.mxu2 %vm539_vm0, %v1094_v47  ;;  %v1135_v47 = vld [vmem:[%s2226_s0 + $0xb4] sm:$0xf0] }
  0x3b   :  { %1471 = vmatpush.bf16.msrb.mxu3 %v1448_v21  ;;  %v1395_v21 = vld [vmem:[%s2226_s0 + $0x80] sm:$0xf0]  ;;  %v1138_v52 = vor.u32 %v1400_v46, %v1135_v47  ;;  %v1432_v46 = vld [vmem:[%s2226_s0 + $0x1a8] sm:$0xf0] }
  0x3c   :  { %v1110_v26 = vor.u32 %v1395_v21, %v1109_v20  ;;  %v1159_v20 = vld [vmem:[%s2226_s0 + $0xe4] sm:$0xf0]  ;;  %v1436_v21 = vld [vmem:[%s2226_s0 + $0x1cc] sm:$0xf] }
  0x3f   :  { %1472 = vmatpush.bf16.msrb.mxu3 %v1447_v23  ;;  %v1111_v23 = vld [vmem:[%s2226_s0 + $0x84] sm:$0xf0] }
  0x40   :  { %v1114_v27 = vor.u32 %v1394_v22, %v1111_v23  ;;  %v1279_v22 = vld [vmem:[%s2226_s0 + $0x1d4] sm:$0xf0] }
  0x41   :  { %618 = vmatmul.bf16.gmra.mxu0 %v1074_v54  ;;  %v1165_v54 = vld [vmem:[%s2226_s0 + $0xe0] sm:$0xf] }
  0x42   :  { %693 = vmatmul.bf16.gmra.mxu3 %v1254_v55  ;;  %727 = vmatmul.bf16.gmra.mxu1 %v1078_v56  ;;  %v1408_v55 = vld [vmem:[%s2226_s0 + $0xe8] sm:$0xf0] }
  0x43   :  { %1473 = vmatpush.bf16.msra.mxu3 %v1505_v2  ;;  %v1086_v2 = vor.u32 %v1389_v61, %v1085_v60  ;;  %v1166_v57 = vor.u32 %v1408_v55, %v1165_v54  ;;  %v1403_v60 = vld [vmem:[%s2226_s0 + $0xc4] sm:$0xf]  ;;  %v1147_v61 = vld [vmem:[%s2226_s0 + $0xcc] sm:$0xf0] }
  0x47   :  { %1474 = vmatpush.bf16.msra.mxu3 %v1517_v5  ;;  %v1117_v5 = vld [vmem:[%s2226_s0 + $0x80] sm:$0xf] }
  0x48   :  { %v1118_v7 = vor.u32 %v1396_v6, %v1117_v5 }
  0x4a   :  { %1363 = vmatmul.msk.bf16.gmra.mxu2 %vm539_vm0, %v1106_v59  ;;  %v1404_v59 = vld [vmem:[%s2226_s0 + $0xc8] sm:$0xf0] }
  0x4b   :  { %v1146_v1 = vor.u32 %v1404_v59, %v1145_v58 }
  0x51   :  { %623 = vmatmul.bf16.gmra.mxu0 %v1086_v2 }
  0x52   :  { %698 = vmatmul.bf16.gmra.mxu3 %v1266_v3  ;;  %732 = vmatmul.bf16.gmra.mxu1 %v1090_v4  ;;  %v1150_v3 = vor.u32 %v1403_v60, %v1147_v61  ;;  %v1270_v4 = vor.u32 %v1433_v62, %v1267_v63 }
  0x5a   :  { %1364 = vmatmul.msk.bf16.gmra.mxu2 %vm539_vm0, %v1118_v7 }
  0x61   :  { %628 = vmatmul.bf16.gmra.mxu0 %v1098_v14 }
  0x62   :  { %703 = vmatmul.bf16.gmra.mxu3 %v1278_v15  ;;  %737 = vmatmul.bf16.gmra.mxu1 %v1102_v16 }
  0x6a   :  { %1365 = vmatmul.msk.bf16.gmra.mxu2 %vm539_vm0, %v1130_v19  ;;  %v1406_v19 = vld [vmem:[%s2226_s0 + $0xdc] sm:$0xf] }
  0x71   :  { %633 = vmatmul.bf16.gmra.mxu0 %v1110_v26 }
  0x72   :  { %742 = vmatmul.bf16.gmra.mxu1 %v1114_v27  ;;  %792 = vmatmul.bf16.vlgmr.msrb.gmra.mxu3 %v1234_v28  ;;  %v1162_v27 = vor.u32 %v1406_v19, %v1159_v20  ;;  %v1282_v28 = vor.u32 %v1436_v21, %v1279_v22  ;;  %v1213_v19 = vld [vmem:[%s2226_s0 + $0x140] sm:$0xf]  ;;  %v1420_v20 = vld [vmem:[%s2226_s0 + $0x148] sm:$0xf0] }
  0x7a   :  { %1366 = vmatmul.msk.bf16.gmra.mxu2 %vm539_vm0, %v1142_v31 }
  0x81   :  { %638 = vmatmul.bf16.gmra.mxu0 %v1122_v38 }
  0x82   :  { %747 = vmatmul.bf16.gmra.mxu1 %v1126_v39  ;;  %797 = vmatmul.bf16.gmra.mxu3 %v1246_v40 }
  0x8a   :  { %1367 = vmatmul.msk.bf16.gmra.mxu2 %vm539_vm0, %v1154_v43  ;;  %v1409_v43 = vld [vmem:[%s2226_s0 + $0xf4] sm:$0xf] }
  0x8d   :  { %v827_v50 = vpop.f32.mrf.mxu2 }
  0x91   :  { %643 = vmatmul.bf16.gmra.mxu0 %v1134_v51  ;;  %v1174_v51 = vor.u32 %v1409_v43, %v1171_v44 }
  0x92   :  { %752 = vmatmul.bf16.gmra.mxu1 %v1138_v52  ;;  %802 = vmatmul.bf16.gmra.mxu3 %v1258_v53  ;;  %v1262_v52 = vor.u32 %v1432_v46, %v1261_v45 }
  0x95   :  { %v829_v56 = vpop.f32.mrf.mxu2 }
  0x9a   :  { %1368 = vmatmul.msk.bf16.gmra.mxu2 %vm539_vm0, %v1166_v57  ;;  %v1417_v57 = vld [vmem:[%s2226_s0 + $0x130] sm:$0xf0] }
  0x9d   :  { %v832_v0 = vpop.f32.mrf.mxu2 }
  0x9e   :  { %v609_v2 = vpop.f32.mrf.mxu0 }
  0x9f   :  { %v718_v5 = vpop.f32.mrf.mxu1 }
  0xa0   :  { %v719_v6 = vadd.f32 %v718_v5, %v609_v2  ;;  %v1413_v2 = vld [vmem:[%s2226_s0 + $0x110] sm:$0xf0]  ;;  %v1273_v5 = vld [vmem:[%s2226_s0 + $0x1b8] sm:$0xf] }
  0xa1   :  { %648 = vmatmul.bf16.gmra.mxu0 %v1146_v1  ;;  %v1181_v1 = vld [vmem:[%s2226_s0 + $0x108] sm:$0xf] }
  0xa2   :  { %v1790_v7 = vadd.f32 %v827_v50, %v719_v6  ;;  %757 = vmatmul.bf16.gmra.mxu1 %v1150_v3  ;;  %807 = vmatmul.bf16.gmra.mxu3 %v1270_v4  ;;  %v1412_v3 = vld [vmem:[%s2226_s0 + $0x10c] sm:$0xf]  ;;  %v1183_v4 = vld [vmem:[%s2226_s0 + $0x114] sm:$0xf0]  ;;  %v1435_v6 = vld [vmem:[%s2226_s0 + $0x1c0] sm:$0xf0] }
  0xa5   :  { %v1798_v10 = vpop.f32.mrf.mxu3  ;;  %v834_v11 = vpop.f32.mrf.mxu2 }
  0xa6   :  { %v611_v12 = vpop.f32.mrf.mxu0 }
  0xa7   :  { %v720_v14 = vpop.f32.mrf.mxu1 }
  0xa8   :  { %v721_v15 = vadd.f32 %v720_v14, %v611_v12  ;;  %v1274_v14 = vor.u32 %v1435_v6, %v1273_v5 }
  0xaa   :  { %v1800_v16 = vadd.f32 %v829_v56, %v721_v15  ;;  %1369 = vmatmul.msk.bf16.gmra.mxu2 %vm539_vm0, %v1178_v13  ;;  %v1201_v56 = vld [vmem:[%s2226_s0 + $0x128] sm:$0xf]  ;;  %v1186_v13 = vor.u32 %v1412_v3, %v1183_v4 }
  0xab   :  { %v1202_v61 = vor.u32 %v1417_v57, %v1201_v56 }
  0xac   :  { %v1984_v32 = vsel %vm927_vm1, %v1800_v16, -inf  ;;  %v1249_v16 = vld [vmem:[%s2226_s0 + $0x188] sm:$0xf] }
  0xad   :  { %v1821_v23 = vpop.f32.mrf.mxu3  ;;  %v837_v24 = vpop.f32.mrf.mxu2 }
  0xae   :  { %v614_v26 = vpop.f32.mrf.mxu0 }
  0xaf   :  { %v723_v29 = vpop.f32.mrf.mxu1 }
  0xb0   :  { %v724_v30 = vadd.f32 %v723_v29, %v614_v26  ;;  %v1193_v29 = vld [vmem:[%s2226_s0 + $0x120] sm:$0xf] }
  0xb1   :  { %653 = vmatmul.bf16.gmra.mxu0 %v1158_v25  ;;  %v1214_v25 = vor.u32 %v1420_v20, %v1213_v19 }
  0xb2   :  { %v1823_v31 = vadd.f32 %v832_v0, %v724_v30  ;;  %762 = vmatmul.bf16.gmra.mxu1 %v1162_v27  ;;  %812 = vmatmul.bf16.gmra.mxu3 %v1282_v28  ;;  %v1416_v30 = vld [vmem:[%s2226_s0 + $0x128] sm:$0xf0] }
  0xb5   :  { %v1831_v34 = vpop.f32.mrf.mxu3  ;;  %v839_v35 = vpop.f32.mrf.mxu2 }
  0xb6   :  { %v616_v36 = vpop.f32.mrf.mxu0 }
  0xb7   :  { %v725_v38 = vpop.f32.mrf.mxu1 }
  0xb8   :  { %v726_v39 = vadd.f32 %v725_v38, %v616_v36  ;;  %v1438_v36 = vld [vmem:[%s2226_s0 + $0x1d8] sm:$0xf0] }
  0xba   :  { %v1833_v40 = vadd.f32 %v834_v11, %v726_v39  ;;  %1370 = vmatmul.msk.bf16.gmra.mxu2 %vm539_vm0, %v1190_v37  ;;  %v1182_v11 = vor.u32 %v1413_v2, %v1181_v1  ;;  %v1194_v39 = vor.u32 %v1416_v30, %v1193_v29  ;;  %v1421_v29 = vld [vmem:[%s2226_s0 + $0x154] sm:$0xf]  ;;  %v1219_v30 = vld [vmem:[%s2226_s0 + $0x15c] sm:$0xf0] }
  0xbd   :  { %v1854_v47 = vpop.f32.mrf.mxu3  ;;  %v842_v48 = vpop.f32.mrf.mxu2 }
  0xbe   :  { %v619_v50 = vpop.f32.mrf.mxu0 }
  0xbf   :  { %v728_v53 = vpop.f32.mrf.mxu1 }
  0xc0   :  { %v729_v54 = vadd.f32 %v728_v53, %v619_v50 }
  0xc1   :  { %658 = vmatmul.bf16.gmra.mxu0 %v1170_v49  ;;  %v1423_v49 = vld [vmem:[%s2226_s0 + $0x160] sm:$0xf0] }
  0xc2   :  { %v1856_v55 = vadd.f32 %v837_v24, %v729_v54  ;;  %767 = vmatmul.bf16.gmra.mxu1 %v1174_v51  ;;  %1376 = vmatmul.msk.bf16.vlgmr.msra.gmra.mxu3 %vm539_vm0, %v1262_v52 }
  0xc5   :  { %v1865_v58 = vpop.f32.mrf.mxu3  ;;  %v844_v59 = vpop.f32.mrf.mxu2 }
  0xc6   :  { %v621_v60 = vpop.f32.mrf.mxu0 }
  0xc7   :  { %v730_v62 = vpop.f32.mrf.mxu1 }
  0xc8   :  { %v731_v63 = vadd.f32 %v730_v62, %v621_v60  ;;  %v1419_v60 = vld [vmem:[%s2226_s0 + $0x140] sm:$0xf0]  ;;  %v1207_v62 = vld [vmem:[%s2226_s0 + $0x144] sm:$0xf0] }
  0xca   :  { %v1867_v0 = vadd.f32 %v839_v35, %v731_v63  ;;  %1371 = vmatmul.msk.bf16.gmra.mxu2 %vm539_vm0, %v1202_v61  ;;  %v1285_v35 = vld [vmem:[%s2226_s0 + $0x1d0] sm:$0xf]  ;;  %v1418_v61 = vld [vmem:[%s2226_s0 + $0x13c] sm:$0xf] }
  0xcb   :  { %v1286_v43 = vor.u32 %v1438_v36, %v1285_v35  ;;  %v1210_v4 = vor.u32 %v1418_v61, %v1207_v62 }
  0xcd   :  { %v1888_v8 = vpop.f32.mrf.mxu3  ;;  %v847_v9 = vpop.f32.mrf.mxu2 }
  0xce   :  { %v624_v12 = vpop.f32.mrf.mxu0 }
  0xcf   :  { %v733_v15 = vpop.f32.mrf.mxu1 }
  0xd0   :  { %v734_v17 = vadd.f32 %v733_v15, %v624_v12  ;;  %v1426_v12 = vld [vmem:[%s2226_s0 + $0x178] sm:$0xf0] }
  0xd1   :  { %663 = vmatmul.bf16.gmra.mxu0 %v1182_v11  ;;  %v1237_v11 = vld [vmem:[%s2226_s0 + $0x170] sm:$0xf] }
  0xd2   :  { %v1890_v18 = vadd.f32 %v842_v48, %v734_v17  ;;  %772 = vmatmul.bf16.gmra.mxu1 %v1186_v13  ;;  %1377 = vmatmul.msk.bf16.gmra.mxu3 %vm539_vm0, %v1274_v14  ;;  %v1225_v48 = vld [vmem:[%s2226_s0 + $0x158] sm:$0xf]  ;;  %v1960_v13 = vsel %vm927_vm1, %v1790_v7, -inf  ;;  %v1217_v7 = vld [vmem:[%s2226_s0 + $0x150] sm:$0xf] }
  0xd3   :  { %v1226_v53 = vor.u32 %v1423_v49, %v1225_v48  ;;  %v1429_v48 = vld [vmem:[%s2226_s0 + $0x190] sm:$0xf0]  ;;  %v2001_v49 = vsel %vm927_vm1, %v1823_v31, -inf  ;;  %v2013_v31 = vsel %vm927_vm1, %v1833_v40, -inf }
  0xd5   :  { %v1899_v21 = vpop.f32.mrf.mxu3  ;;  %v849_v22 = vpop.f32.mrf.mxu2 }
  0xd6   :  { %v626_v24 = vpop.f32.mrf.mxu0 }
  0xd7   :  { %v735_v26 = vpop.f32.mrf.mxu1 }
  0xd8   :  { %v736_v27 = vadd.f32 %v735_v26, %v626_v24 }
  0xda   :  { %v1901_v28 = vadd.f32 %v844_v59, %v736_v27  ;;  %1372 = vmatmul.msk.bf16.gmra.mxu2 %vm539_vm0, %v1214_v25  ;;  %v1205_v59 = vld [vmem:[%s2226_s0 + $0x138] sm:$0xf]  ;;  %v1422_v27 = vld [vmem:[%s2226_s0 + $0x158] sm:$0xf0] }
  0xdb   :  { %v1206_v2 = vor.u32 %v1419_v60, %v1205_v59  ;;  %v1250_v59 = vor.u32 %v1429_v48, %v1249_v16 }
  0xdd   :  { %v1922_v37 = vpop.f32.mrf.mxu3  ;;  %v852_v38 = vpop.f32.mrf.mxu2 }
  0xde   :  { %v629_v41 = vpop.f32.mrf.mxu0 }
  0xdf   :  { %v738_v44 = vpop.f32.mrf.mxu1 }
  0xe0   :  { %v739_v45 = vadd.f32 %v738_v44, %v629_v41 }
  0xe1   :  { %668 = vmatmul.bf16.gmra.mxu0 %v1194_v39  ;;  %v1218_v39 = vor.u32 %v1422_v27, %v1217_v7  ;;  %v2035_v27 = vsel %vm927_vm1, %v1867_v0, -inf }
  0xe2   :  { %v1924_v46 = vadd.f32 %v847_v9, %v739_v45  ;;  %777 = vmatmul.bf16.gmra.mxu1 %v1198_v42  ;;  %1378 = vmatmul.msk.bf16.gmra.mxu3 %vm539_vm0, %v1286_v43  ;;  %v1222_v42 = vor.u32 %v1421_v29, %v1219_v30 }
  0xe5   :  { %v1933_v50 = vpop.f32.mrf.mxu3  ;;  %v854_v51 = vpop.f32.mrf.mxu2 }
  0xe6   :  { %v631_v52 = vpop.f32.mrf.mxu0 }
  0xe7   :  { %v740_v54 = vpop.f32.mrf.mxu1 }
  0xe8   :  { %v741_v56 = vadd.f32 %v740_v54, %v631_v52 }
  0xea   :  { %v1935_v57 = vadd.f32 %v849_v22, %v741_v56  ;;  %1373 = vmatmul.msk.bf16.gmra.mxu2 %vm539_vm0, %v1226_v53  ;;  %v1238_v22 = vor.u32 %v1426_v12, %v1237_v11  ;;  %v2024_v12 = vsel %vm927_vm1, %v1856_v55, -inf }
  0xed   :  { %v1950_v63 = vpop.f32.mrf.mxu3  ;;  %v857_v1 = vpop.f32.mrf.mxu2 }
  0xee   :  { %v634_v3 = vpop.f32.mrf.mxu0 }
  0xef   :  { %v743_v5 = vpop.f32.mrf.mxu1 }
  0xf0   :  { %v744_v6 = vadd.f32 %v743_v5, %v634_v3 }
  0xf1   :  { %673 = vmatmul.bf16.gmra.mxu0 %v1206_v2 }
  0xf2   :  { %v853_v9 = vadd.f32 %v852_v38, %v744_v6  ;;  %782 = vmatmul.bf16.gmra.mxu1 %v1210_v4 }
  0xf4   :  { %v1963_v14 = vsel %vm927_vm1, %v853_v9, -inf }
  0xf5   :  { %v930_v15 = vmax.f32 %v1960_v13, %v1963_v14  ;;  %v1967_v17 = vpop.f32.mrf.mxu3  ;;  %v859_v19 = vpop.f32.mrf.mxu2 }
  0xf6   :  { %v636_v20 = vpop.f32.mrf.mxu0 }
  0xf7   :  { %v745_v24 = vpop.f32.mrf.mxu1 }
  0xf8   :  { %v746_v25 = vadd.f32 %v745_v24, %v636_v20 }
  0xfa   :  { %v855_v26 = vadd.f32 %v854_v51, %v746_v25  ;;  %1374 = vmatmul.msk.bf16.gmra.mxu2 %vm539_vm0, %v1238_v22 }
  0xfc   :  { %v1987_v33 = vsel %vm927_vm1, %v855_v26, -inf }
  0xfd   :  { %v937_v35 = vmax.f32 %v1984_v32, %v1987_v33  ;;  %v1991_v36 = vpop.f32.mrf.mxu3  ;;  %v862_v38 = vpop.f32.mrf.mxu2 }
  0xfe   :  { %v639_v41 = vpop.f32.mrf.mxu0 }
  0xff   :  { %v748_v43 = vpop.f32.mrf.mxu1 }
 0x100   :  { %v749_v44 = vadd.f32 %v748_v43, %v639_v41 }
 0x101   :  { %678 = vmatmul.bf16.gmra.mxu0 %v1218_v39 }
 0x102   :  { %v858_v45 = vadd.f32 %v857_v1, %v749_v44  ;;  %787 = vmatmul.bf16.gmra.mxu1 %v1222_v42  ;;  %v2046_v44 = vsel %vm927_vm1, %v1890_v18, -inf }
 0x104   :  { %v2004_v51 = vsel %vm927_vm1, %v858_v45, -inf }
 0x105   :  { %v944_v52 = vmax.f32 %v2001_v49, %v2004_v51  ;;  %v2008_v53 = vpop.f32.mrf.mxu3  ;;  %v864_v54 = vpop.f32.mrf.mxu2 }
 0x106   :  { %v641_v56 = vpop.f32.mrf.mxu0 }
 0x107   :  { %v750_v60 = vpop.f32.mrf.mxu1 }
 0x108   :  { %v751_v61 = vadd.f32 %v750_v60, %v641_v56  ;;  %v2055_v60 = vsel %vm927_vm1, %v1901_v28, -inf }
 0x10a   :  { %v860_v62 = vadd.f32 %v859_v19, %v751_v61  ;;  %1375 = vmatmul.msk.bf16.gmra.mxu2 %vm539_vm0, %v1250_v59 }
 0x10c   :  { %v2016_v1 = vsel %vm927_vm1, %v860_v62, -inf }
 0x10d   :  { %v951_v2 = vmax.f32 %v2013_v31, %v2016_v1  ;;  %v867_v3 = vpop.f32.mrf.mxu2  ;;  %v2020_v5 = vpop.f32.mrf.mxu3  ;;  %v2121_v31 = vld [vmem:[%s2227_s2] ss:$0 sm:$0xff] }
 0x10e   :  { %v644_v4 = vpop.f32.mrf.mxu0 }
 0x10f   :  { %v753_v6 = vpop.f32.mrf.mxu1 }
 0x110   :  { %v754_v9 = vadd.f32 %v753_v6, %v644_v4 }
 0x112   :  { %v863_v11 = vadd.f32 %v862_v38, %v754_v9 }
 0x114   :  { %v2027_v40 = vsel %vm927_vm1, %v863_v11, -inf }
 0x115   :  { %v958_v19 = vmax.f32 %v2024_v12, %v2027_v40  ;;  %v869_v20 = vpop.f32.mrf.mxu2  ;;  %v2031_v26 = vpop.f32.mrf.mxu3 }
 0x116   :  { %v646_v22 = vpop.f32.mrf.mxu0  ;;  %v804_v49 = vadd.f32 %v2031_v26, %v1865_v58 }
 0x117   :  { %v755_v24 = vpop.f32.mrf.mxu1 }
 0x118   :  { %v756_v25 = vadd.f32 %v755_v24, %v646_v22 }
 0x11a   :  { %v865_v7 = vadd.f32 %v864_v54, %v756_v25 }
 0x11c   :  { %v2038_v55 = vsel %vm927_vm1, %v865_v7, -inf }
 0x11d   :  { %v965_v29 = vmax.f32 %v2035_v27, %v2038_v55  ;;  %v872_v30 = vpop.f32.mrf.mxu2  ;;  %v2042_v43 = vpop.f32.mrf.mxu3 }
 0x11e   :  { %v649_v38 = vpop.f32.mrf.mxu0  ;;  %v806_v26 = vadd.f32 %v2042_v43, %v1888_v8 }
 0x11f   :  { %v758_v39 = vpop.f32.mrf.mxu1 }
 0x120   :  { %v759_v41 = vadd.f32 %v758_v39, %v649_v38 }
 0x122   :  { %v868_v42 = vadd.f32 %v867_v3, %v759_v41 }
 0x124   :  { %v2049_v0 = vsel %vm927_vm1, %v868_v42, -inf }
 0x125   :  { %v972_v45 = vmax.f32 %v2046_v44, %v2049_v0  ;;  %v874_v16 = vpop.f32.mrf.mxu2  ;;  %v2060_v18 = vpop.f32.mrf.mxu3 }
 0x126   :  { %v651_v48 = vpop.f32.mrf.mxu0 }
 0x127   :  { %v760_v54 = vpop.f32.mrf.mxu1 }
 0x128   :  { %v761_v56 = vadd.f32 %v760_v54, %v651_v48 }
 0x12a   :  { %v870_v59 = vadd.f32 %v869_v20, %v761_v56  ;;  %v2066_v20 = vsel %vm927_vm1, %v1924_v46, -inf }
 0x12c   :  { %v2058_v61 = vsel %vm927_vm1, %v870_v59, -inf }
 0x12d   :  { %v979_v62 = vmax.f32 %v2055_v60, %v2058_v61  ;;  %v877_v3 = vpop.f32.mrf.mxu2  ;;  %v2073_v7 = vpop.f32.mrf.mxu3 }
 0x12e   :  { %v654_v4 = vpop.f32.mrf.mxu0 }
 0x12f   :  { %v763_v6 = vpop.f32.mrf.mxu1 }
 0x130   :  { %v764_v9 = vadd.f32 %v763_v6, %v654_v4 }
 0x132   :  { %v873_v11 = vadd.f32 %v872_v30, %v764_v9  ;;  %v2077_v30 = vsel %vm927_vm1, %v1935_v57, -inf }
 0x134   :  { %v2069_v28 = vsel %vm927_vm1, %v873_v11, -inf }
 0x135   :  { %v986_v22 = vmax.f32 %v2066_v20, %v2069_v28  ;;  %v879_v24 = vpop.f32.mrf.mxu2  ;;  %v2084_v4 = vpop.f32.mrf.mxu3 }
 0x136   :  { %v656_v25 = vpop.f32.mrf.mxu0 }
 0x137   :  { %v765_v38 = vpop.f32.mrf.mxu1 }
 0x138   :  { %v766_v39 = vadd.f32 %v765_v38, %v656_v25 }
 0x13a   :  { %v875_v41 = vadd.f32 %v874_v16, %v766_v39 }
 0x13c   :  { %v2080_v46 = vsel %vm927_vm1, %v875_v41, -inf }
 0x13d   :  { %v882_v48 = vpop.f32.mrf.mxu2  ;;  %v2092_v41 = vpop.f32.mrf.mxu3 }
 0x13e   :  { %v659_v54 = vpop.f32.mrf.mxu0 }
 0x13f   :  { %v768_v56 = vpop.f32.mrf.mxu1 }
 0x140   :  { %v769_v59 = vadd.f32 %v768_v56, %v659_v54 }
 0x142   :  { %v878_v6 = vadd.f32 %v877_v3, %v769_v59 }
 0x144   :  { %v931_v9 = vsel %vm927_vm1, %v878_v6, -inf }
 0x145   :  { %v884_v16 = vpop.f32.mrf.mxu2  ;;  %v2090_v57 = vmax.f32 %v930_v15, %v931_v9  ;;  %v912_v15 = vpop.f32.mrf.mxu3 }
 0x146   :  { %v661_v11 = vpop.f32.mrf.mxu0 }
 0x147   :  { %v770_v25 = vpop.f32.mrf.mxu1 }
 0x148   :  { %v771_v38 = vadd.f32 %v770_v25, %v661_v11 }
 0x14a   :  { %v880_v39 = vadd.f32 %v879_v24, %v771_v38 }
 0x14c   :  { %v938_v42 = vsel %vm927_vm1, %v880_v39, -inf }
 0x14d   :  { %v887_v54 = vpop.f32.mrf.mxu2  ;;  %v2098_v3 = vmax.f32 %v937_v35, %v938_v42 }
 0x14e   :  { %v664_v56 = vpop.f32.mrf.mxu0 }
 0x14f   :  { %v773_v59 = vpop.f32.mrf.mxu1 }
 0x150   :  { %v774_v6 = vadd.f32 %v773_v59, %v664_v56 }
 0x152   :  { %v883_v13 = vadd.f32 %v882_v48, %v774_v6  ;;  %v914_v48 = vpop.f32.mrf.mxu3 }
 0x153   :  { %v915_v12 = vadd.f32 %v914_v48, %v806_v26 }
 0x154   :  { %v945_v14 = vsel %vm927_vm1, %v883_v13, -inf }
 0x155   :  { %v889_v9 = vpop.f32.mrf.mxu2  ;;  %v2104_v24 = vmax.f32 %v944_v52, %v945_v14  ;;  %v913_v52 = vadd.f32 %v912_v15, %v804_v49 }
 0x156   :  { %v666_v11 = vpop.f32.mrf.mxu0 }
 0x157   :  { %v775_v25 = vpop.f32.mrf.mxu1 }
 0x158   :  { %v776_v38 = vadd.f32 %v775_v25, %v666_v11 }
 0x15a   :  { %v885_v39 = vadd.f32 %v884_v16, %v776_v38  ;;  %v917_v15 = vpop.f32.mrf.mxu3 }
 0x15c   :  { %v952_v32 = vsel %vm927_vm1, %v885_v39, -inf }
 0x15d   :  { %v892_v33 = vpop.f32.mrf.mxu2  ;;  %v2110_v35 = vmax.f32 %v951_v2, %v952_v32  ;;  %v961_v2 = vsel %vm927_vm1, %v913_v52, -inf }
 0x15e   :  { %v669_v42 = vpop.f32.mrf.mxu0 }
 0x15f   :  { %v778_v56 = vpop.f32.mrf.mxu1 }
 0x160   :  { %v779_v51 = vadd.f32 %v778_v56, %v669_v42  ;;  %v968_v42 = vsel %vm927_vm1, %v915_v12, -inf }
 0x162   :  { %v888_v59 = vadd.f32 %v887_v54, %v779_v51  ;;  %v919_v55 = vpop.f32.mrf.mxu3 }
 0x164   :  { %v959_v6 = vsel %vm927_vm1, %v888_v59, -inf }
 0x165   :  { %v960_v16 = vmax.f32 %v958_v19, %v959_v6  ;;  %v894_v1 = vpop.f32.mrf.mxu2 }
 0x166   :  { %v671_v13 = vpop.f32.mrf.mxu0 }
 0x167   :  { %v962_v14 = vmax.f32 %v960_v16, %v961_v2  ;;  %v780_v58 = vpop.f32.mrf.mxu1 }
 0x168   :  { %v781_v54 = vadd.f32 %v780_v58, %v671_v13 }
 0x169   :  { %v1006_v11 = vadd.f32 %v2121_v31, %v962_v14 }
 0x16a   :  { %v890_v40 = vadd.f32 %v889_v9, %v781_v54  ;;  %v809_v9 = vadd.f32 %v2060_v18, %v1899_v21 }
 0x16b   :  { %v1016_v19 = vmax.f32 %v1006_v11, 0.0 }
 0x16c   :  { %v966_v25 = vsel %vm927_vm1, %v890_v40, -inf  ;;  %v918_v51 = vadd.f32 %v917_v15, %v809_v9  ;;  %v922_v15 = vpop.f32.mrf.mxu3 }
 0x16d   :  { %v1026_v38 = vpack.c.bf16 %v1016_v19, %v1016_v19  ;;  %v967_v39 = vmax.f32 %v965_v29, %v966_v25  ;;  %v897_v32 = vpop.f32.mrf.mxu2 }
 0x16e   :  { %v674_v56 = vpop.f32.mrf.mxu0  ;;  %v975_v2 = vsel %vm927_vm1, %v918_v51, -inf }
 0x16f   :  { %1037 = vst.msk [vmem:[%s2228_s3 + $0x10] sm:$0xf] %vm1032_vm2, %v1026_v38  ;;  %v969_v8 = vmax.f32 %v967_v39, %v968_v42  ;;  %v783_v43 = vpop.f32.mrf.mxu1 }
 0x170   :  { %v784_v48 = vadd.f32 %v783_v43, %v674_v56 }
 0x171   :  { %v1007_v49 = vadd.f32 %v2121_v31, %v969_v8  ;;  %v796_v8 = vadd.f32 %v1991_v36, %v1821_v23 }
 0x172   :  { %v893_v27 = vadd.f32 %v892_v33, %v784_v48  ;;  %v811_v33 = vadd.f32 %v2073_v7, %v1922_v37 }
 0x173   :  { %v1017_v29 = vmax.f32 %v1007_v49, 0.0 }
 0x174   :  { %v973_v52 = vsel %vm927_vm1, %v893_v27, -inf  ;;  %v920_v26 = vadd.f32 %v919_v55, %v811_v33  ;;  %v816_v55 = vadd.f32 %v2092_v41, %v1950_v63  ;;  %v799_v63 = vadd.f32 %v2008_v53, %v1831_v34 }
 0x175   :  { %v1027_v59 = vpack.c.bf16 %v1017_v29, %v1017_v29  ;;  %v974_v6 = vmax.f32 %v972_v45, %v973_v52  ;;  %v899_v16 = vpop.f32.mrf.mxu2  ;;  %v794_v45 = vadd.f32 %v1967_v17, %v1798_v10  ;;  %v814_v17 = vadd.f32 %v2084_v4, %v1933_v50 }
 0x176   :  { %v676_v13 = vpop.f32.mrf.mxu0  ;;  %v982_v37 = vsel %vm927_vm1, %v920_v26, -inf }
 0x177   :  { %1038 = vst.msk [vmem:[%s2228_s3 + $0x14] sm:$0xf] %vm1032_vm2, %v1027_v59  ;;  %v976_v21 = vmax.f32 %v974_v6, %v975_v2  ;;  %v785_v18 = vpop.f32.mrf.mxu1 }
 0x178   :  { %v786_v14 = vadd.f32 %v785_v18, %v676_v13  ;;  %v2229_v18 = vmax.f32 %v2077_v30, %v2080_v46 }
 0x179   :  { %v1008_v58 = vadd.f32 %v2121_v31, %v976_v21 }
 0x17a   :  { %v895_v44 = vadd.f32 %v894_v1, %v786_v14 }
 0x17b   :  { %v1018_v0 = vmax.f32 %v1008_v58, 0.0 }
 0x17c   :  { %v980_v54 = vsel %vm927_vm1, %v895_v44, -inf }
 0x17d   :  { %v1028_v11 = vpack.c.bf16 %v1018_v0, %v1018_v0  ;;  %v981_v12 = vmax.f32 %v979_v62, %v980_v54  ;;  %v902_v40 = vpop.f32.mrf.mxu2  ;;  %v923_v62 = vadd.f32 %v922_v15, %v814_v17  ;;  %v801_v0 = vadd.f32 %v2020_v5, %v1854_v47 }
 0x17e   :  { %v903_v7 = vadd.f32 %v902_v40, %v794_v45  ;;  %v679_v19 = vpop.f32.mrf.mxu0 }
 0x17f   :  { %1039 = vst.msk [vmem:[%s2228_s3 + $0x18] sm:$0xf] %vm1032_vm2, %v1028_v11  ;;  %v983_v1 = vmax.f32 %v981_v12, %v982_v37  ;;  %v788_v10 = vpop.f32.mrf.mxu1  ;;  %v989_v49 = vsel %vm927_vm1, %v923_v62, -inf }
 0x180   :  { %v933_v25 = vsel %vm927_vm1, %v903_v7, -inf  ;;  %v789_v38 = vadd.f32 %v788_v10, %v679_v19 }
 0x181   :  { %v1009_v60 = vadd.f32 %v2121_v31, %v983_v1  ;;  %v934_v61 = vmax.f32 %v2090_v57, %v933_v25 }
 0x182   :  { %v898_v39 = vadd.f32 %v897_v32, %v789_v38  ;;  %v924_v32 = vpop.f32.mrf.mxu3 }
 0x183   :  { %v1019_v42 = vmax.f32 %v1009_v60, 0.0  ;;  %v1002_v56 = vadd.f32 %v2121_v31, %v934_v61  ;;  %v925_v52 = vadd.f32 %v924_v32, %v816_v55 }
 0x184   :  { %v987_v43 = vsel %vm927_vm1, %v898_v39, -inf }
 0x185   :  { %v1029_v9 = vpack.c.bf16 %v1019_v42, %v1019_v42  ;;  %v1012_v48 = vmax.f32 %v1002_v56, 0.0  ;;  %v988_v50 = vmax.f32 %v986_v22, %v987_v43  ;;  %v904_v4 = vpop.f32.mrf.mxu2  ;;  %v996_v58 = vsel %vm927_vm1, %v925_v52, -inf }
 0x186   :  { %v905_v57 = vadd.f32 %v904_v4, %v796_v8  ;;  %v681_v51 = vpop.f32.mrf.mxu0 }
 0x187   :  { %1040 = vst.msk [vmem:[%s2228_s3 + $0x1c] sm:$0xf] %vm1032_vm2, %v1029_v9  ;;  %v1022_v23 = vpack.c.bf16 %v1012_v48, %v1012_v48  ;;  %v990_v36 = vmax.f32 %v988_v50, %v989_v49  ;;  %v790_v27 = vpop.f32.mrf.mxu1 }
 0x188   :  { %v940_v20 = vsel %vm927_vm1, %v905_v57, -inf  ;;  %v791_v28 = vadd.f32 %v790_v27, %v681_v51 }
 0x189   :  { %1033 = vst.msk [vmem:[%s2228_s3] sm:$0xf] %vm1032_vm2, %v1022_v23  ;;  %v1010_v22 = vadd.f32 %v2121_v31, %v990_v36  ;;  %v941_v29 = vmax.f32 %v2098_v3, %v940_v20 }
 0x18a   :  { %v900_v59 = vadd.f32 %v899_v16, %v791_v28 }
 0x18b   :  { %v1020_v6 = vmax.f32 %v1010_v22, 0.0  ;;  %v1003_v2 = vadd.f32 %v2121_v31, %v941_v29 }
 0x18c   :  { %v994_v41 = vsel %vm927_vm1, %v900_v59, -inf }
 0x18d   :  { %v1030_v13 = vpack.c.bf16 %v1020_v6, %v1020_v6  ;;  %v1013_v21 = vmax.f32 %v1003_v2, 0.0  ;;  %v995_v33 = vmax.f32 %v2229_v18, %v994_v41  ;;  %v907_v14 = vpop.f32.mrf.mxu2 }
 0x18e   :  { %v908_v3 = vadd.f32 %v907_v14, %v799_v63 }
 0x18f   :  { %1041 = vst.msk [vmem:[%s2228_s3 + $0x20] sm:$0xf] %vm1032_vm2, %v1030_v13  ;;  %v1023_v16 = vpack.c.bf16 %v1013_v21, %v1013_v21  ;;  %v997_v26 = vmax.f32 %v995_v33, %v996_v58 }
 0x190   :  { %v947_v34 = vsel %vm927_vm1, %v908_v3, -inf }
 0x191   :  { %1034 = vst.msk [vmem:[%s2228_s3 + $0x4] sm:$0xf] %vm1032_vm2, %v1023_v16  ;;  %v1011_v53 = vadd.f32 %v2121_v31, %v997_v26  ;;  %v948_v30 = vmax.f32 %v2104_v24, %v947_v34 }
 0x193   :  { %v1021_v46 = vmax.f32 %v1011_v53, 0.0  ;;  %v1004_v44 = vadd.f32 %v2121_v31, %v948_v30 }
 0x195   :  { %v1031_v45 = vpack.c.bf16 %v1021_v46, %v1021_v46  ;;  %v1014_v54 = vmax.f32 %v1004_v44, 0.0  ;;  %v909_v15 = vpop.f32.mrf.mxu2 }
 0x196   :  { %v910_v11 = vadd.f32 %v909_v15, %v801_v0 }
 0x197   :  { %1042 = vst.msk [vmem:[%s2228_s3 + $0x24] sm:$0xf] %vm1032_vm2, %v1031_v45  ;;  %v1024_v12 = vpack.c.bf16 %v1014_v54, %v1014_v54 }
 0x198   :  { %v954_v40 = vsel %vm927_vm1, %v910_v11, -inf }
 0x199   :  { %1035 = vst.msk [vmem:[%s2228_s3 + $0x8] sm:$0xf] %vm1032_vm2, %v1024_v12  ;;  %v955_v24 = vmax.f32 %v2110_v35, %v954_v40 }
 0x19b   :  { %v1005_v47 = vadd.f32 %v2121_v31, %v955_v24 }
 0x19d   :  { %v1015_v5 = vmax.f32 %v1005_v47, 0.0 }
 0x19f   :  { %v1025_v37 = vpack.c.bf16 %v1015_v5, %v1015_v5 }
 0x1a1   :  { %1036 = vst.msk [vmem:[%s2228_s3 + $0xc] sm:$0xf] %vm1032_vm2, %v1025_v37 }

// kernel: cnn_forward.7
= control target key start
LH: loop header
LB: loop body
LE: loop exit
PB: predicated region body
PF: predicated region fallthrough
CT: control target
= control target key end

     0   :  { %vm2532_vm0 = vcmask 56320   ;;  %s6277_s1 = inlined_call_operand.vmem [shape: bf16[2304,256], index: 1, kind: input, shape index: {}]   ;;  %s6278_s0 = inlined_call_operand.vmem [shape: bf16[16,2304], index: 0, kind: input, shape index: {}]   ;;  %s6279_s2 = inlined_call_operand.vmem [shape: f32[1,256], index: 2, kind: input, shape index: {}]   ;;  %s6280_s3 = inlined_call_operand.vmem [shape: bf16[256,7], index: 3, kind: input, shape index: {}]   ;;  %s6281_s4 = inlined_call_operand.vmem [shape: f32[1,7], index: 4, kind: input, shape index: {}]   ;;  %s6282_s5 = inlined_call_operand.vmem [shape: f32[16,7], index: 5, kind: output, shape index: {}]  }
   0x1   :  { %v2717_v0 = vld [vmem:[%s6277_s1 + $0x70] sm:$0xf]  ;;  %v3908_v1 = vld [vmem:[%s6277_s1 + $0x74] sm:$0xf0]  ;;  %v2709_v11 = vld [vmem:[%s6277_s1 + $0x60] sm:$0xf] }
   0x2   :  { %v2781_v2 = vld [vmem:[%s6277_s1 + $0xf0] sm:$0xf]  ;;  %v2718_v3 = vor.u32 %v3908_v1, %v2717_v0  ;;  %v3924_v4 = vld [vmem:[%s6277_s1 + $0xf4] sm:$0xf0]  ;;  %v3906_v13 = vld [vmem:[%s6277_s1 + $0x64] sm:$0xf0] }
   0x3   :  { %v2845_v5 = vld [vmem:[%s6277_s1 + $0x170] sm:$0xf]  ;;  %v3940_v6 = vld [vmem:[%s6277_s1 + $0x174] sm:$0xf0]  ;;  %v2782_v7 = vor.u32 %v3924_v4, %v2781_v2  ;;  %v2773_v14 = vld [vmem:[%s6277_s1 + $0xe0] sm:$0xf]  ;;  %v2710_v16 = vor.u32 %v3906_v13, %v2709_v11 }
   0x4   :  { %v2846_v8 = vor.u32 %v3940_v6, %v2845_v5  ;;  %v2909_v9 = vld [vmem:[%s6277_s1 + $0x1f0] sm:$0xf]  ;;  %v3956_v10 = vld [vmem:[%s6277_s1 + $0x1f4] sm:$0xf0]  ;;  %1862 = vmatpush.bf16.msra.mxu0 %v2718_v3  ;;  %v3922_v15 = vld [vmem:[%s6277_s1 + $0xe4] sm:$0xf0] }
   0x5   :  { %v2910_v12 = vor.u32 %v3956_v10, %v2909_v9  ;;  %1876 = vmatpush.bf16.msra.mxu1 %v2782_v7  ;;  %v2774_v17 = vor.u32 %v3922_v15, %v2773_v14  ;;  %v2837_v18 = vld [vmem:[%s6277_s1 + $0x160] sm:$0xf]  ;;  %v3938_v19 = vld [vmem:[%s6277_s1 + $0x164] sm:$0xf0]  ;;  %v2701_v23 = vld [vmem:[%s6277_s1 + $0x50] sm:$0xf] }
   0x6   :  { %1890 = vmatpush.bf16.msra.mxu2 %v2846_v8  ;;  %v2901_v20 = vld [vmem:[%s6277_s1 + $0x1e0] sm:$0xf]  ;;  %v2838_v21 = vor.u32 %v3938_v19, %v2837_v18  ;;  %v3954_v22 = vld [vmem:[%s6277_s1 + $0x1e4] sm:$0xf0]  ;;  %v3904_v24 = vld [vmem:[%s6277_s1 + $0x54] sm:$0xf0] }
   0x7   :  { %1904 = vmatpush.bf16.msra.mxu3 %v2910_v12  ;;  %v2902_v25 = vor.u32 %v3954_v22, %v2901_v20  ;;  %v2765_v26 = vld [vmem:[%s6277_s1 + $0xd0] sm:$0xf]  ;;  %v3920_v27 = vld [vmem:[%s6277_s1 + $0xd4] sm:$0xf0]  ;;  %v2702_v29 = vor.u32 %v3904_v24, %v2701_v23  ;;  %v2693_v35 = vld [vmem:[%s6277_s1 + $0x40] sm:$0xf] }
   0x8   :  { %v2829_v28 = vld [vmem:[%s6277_s1 + $0x150] sm:$0xf]  ;;  %1863 = vmatpush.bf16.msra.mxu0 %v2710_v16  ;;  %v3936_v30 = vld [vmem:[%s6277_s1 + $0x154] sm:$0xf0]  ;;  %v2766_v33 = vor.u32 %v3920_v27, %v2765_v26  ;;  %v3902_v36 = vld [vmem:[%s6277_s1 + $0x44] sm:$0xf0] }
   0x9   :  { %v2893_v31 = vld [vmem:[%s6277_s1 + $0x1d0] sm:$0xf]  ;;  %v3952_v32 = vld [vmem:[%s6277_s1 + $0x1d4] sm:$0xf0]  ;;  %1877 = vmatpush.bf16.msra.mxu1 %v2774_v17  ;;  %v2830_v34 = vor.u32 %v3936_v30, %v2829_v28  ;;  %v2757_v37 = vld [vmem:[%s6277_s1 + $0xc0] sm:$0xf]  ;;  %v2694_v44 = vor.u32 %v3902_v36, %v2693_v35 }
   0xa   :  { %1891 = vmatpush.bf16.msra.mxu2 %v2838_v21  ;;  %v2894_v38 = vor.u32 %v3952_v32, %v2893_v31  ;;  %v3918_v39 = vld [vmem:[%s6277_s1 + $0xc4] sm:$0xf0]  ;;  %v2821_v40 = vld [vmem:[%s6277_s1 + $0x140] sm:$0xf]  ;;  %v2685_v47 = vld [vmem:[%s6277_s1 + $0x30] sm:$0xf] }
   0xb   :  { %1905 = vmatpush.bf16.msra.mxu3 %v2902_v25  ;;  %v3934_v41 = vld [vmem:[%s6277_s1 + $0x144] sm:$0xf0]  ;;  %v2885_v42 = vld [vmem:[%s6277_s1 + $0x1c0] sm:$0xf]  ;;  %v2758_v45 = vor.u32 %v3918_v39, %v2757_v37  ;;  %v3900_v48 = vld [vmem:[%s6277_s1 + $0x34] sm:$0xf0] }
   0xc   :  { %v3950_v43 = vld [vmem:[%s6277_s1 + $0x1c4] sm:$0xf0]  ;;  %1864 = vmatpush.bf16.msra.mxu0 %v2702_v29  ;;  %v2822_v46 = vor.u32 %v3934_v41, %v2821_v40  ;;  %v2749_v49 = vld [vmem:[%s6277_s1 + $0xb0] sm:$0xf]  ;;  %v3916_v51 = vld [vmem:[%s6277_s1 + $0xb4] sm:$0xf0]  ;;  %v2686_v56 = vor.u32 %v3900_v48, %v2685_v47 }
   0xd   :  { %1878 = vmatpush.bf16.msra.mxu1 %v2766_v33  ;;  %v2886_v50 = vor.u32 %v3950_v43, %v2885_v42  ;;  %v2813_v52 = vld [vmem:[%s6277_s1 + $0x130] sm:$0xf]  ;;  %v3932_v53 = vld [vmem:[%s6277_s1 + $0x134] sm:$0xf0]  ;;  %v2750_v57 = vor.u32 %v3916_v51, %v2749_v49  ;;  %v2677_v59 = vld [vmem:[%s6277_s1 + $0x20] sm:$0xf] }
   0xe   :  { %1892 = vmatpush.bf16.msra.mxu2 %v2830_v34  ;;  %v2877_v54 = vld [vmem:[%s6277_s1 + $0x1b0] sm:$0xf]  ;;  %v3948_v55 = vld [vmem:[%s6277_s1 + $0x1b4] sm:$0xf0]  ;;  %v2814_v58 = vor.u32 %v3932_v53, %v2813_v52  ;;  %v3898_v60 = vld [vmem:[%s6277_s1 + $0x24] sm:$0xf0] }
   0xf   :  { %1906 = vmatpush.bf16.msra.mxu3 %v2894_v38  ;;  %v2741_v61 = vld [vmem:[%s6277_s1 + $0xa0] sm:$0xf]  ;;  %v2878_v62 = vor.u32 %v3948_v55, %v2877_v54  ;;  %v3914_v63 = vld [vmem:[%s6277_s1 + $0xa4] sm:$0xf0]  ;;  %v2678_v4 = vor.u32 %v3898_v60, %v2677_v59  ;;  %v2669_v7 = vld [vmem:[%s6277_s1 + $0x10] sm:$0xf] }
  0x10   :  { %1865 = vmatpush.bf16.msra.mxu0 %v2694_v44  ;;  %v2805_v0 = vld [vmem:[%s6277_s1 + $0x120] sm:$0xf]  ;;  %v3930_v1 = vld [vmem:[%s6277_s1 + $0x124] sm:$0xf0]  ;;  %v2742_v5 = vor.u32 %v3914_v63, %v2741_v61  ;;  %v3896_v8 = vld [vmem:[%s6277_s1 + $0x14] sm:$0xf0] }
  0x11   :  { %1879 = vmatpush.bf16.msra.mxu1 %v2758_v45  ;;  %v2869_v2 = vld [vmem:[%s6277_s1 + $0x1a0] sm:$0xf]  ;;  %v3946_v3 = vld [vmem:[%s6277_s1 + $0x1a4] sm:$0xf0]  ;;  %v2806_v6 = vor.u32 %v3930_v1, %v2805_v0  ;;  %v2733_v9 = vld [vmem:[%s6277_s1 + $0x90] sm:$0xf]  ;;  %v2670_v16 = vor.u32 %v3896_v8, %v2669_v7 }
  0x12   :  { %1893 = vmatpush.bf16.msra.mxu2 %v2822_v46  ;;  %v2870_v10 = vor.u32 %v3946_v3, %v2869_v2  ;;  %v3912_v11 = vld [vmem:[%s6277_s1 + $0x94] sm:$0xf0]  ;;  %v2797_v12 = vld [vmem:[%s6277_s1 + $0x110] sm:$0xf]  ;;  %v2661_v17 = vld [vmem:[%s6277_s1] sm:$0xf] }
  0x13   :  { %1907 = vmatpush.bf16.msra.mxu3 %v2886_v50  ;;  %v3928_v13 = vld [vmem:[%s6277_s1 + $0x114] sm:$0xf0]  ;;  %v2861_v14 = vld [vmem:[%s6277_s1 + $0x190] sm:$0xf]  ;;  %v3894_v18 = vld [vmem:[%s6277_s1 + $0x4] sm:$0xf0]  ;;  %v2734_v19 = vor.u32 %v3912_v11, %v2733_v9 }
  0x14   :  { %1866 = vmatpush.bf16.msra.mxu0 %v2686_v56  ;;  %v3944_v15 = vld [vmem:[%s6277_s1 + $0x194] sm:$0xf0]  ;;  %v2798_v20 = vor.u32 %v3928_v13, %v2797_v12  ;;  %v2725_v21 = vld [vmem:[%s6277_s1 + $0x80] sm:$0xf]  ;;  %v3910_v22 = vld [vmem:[%s6277_s1 + $0x84] sm:$0xf0]  ;;  %v2662_v31 = vor.u32 %v3894_v18, %v2661_v17 }
  0x15   :  { %1880 = vmatpush.bf16.msra.mxu1 %v2750_v57  ;;  %v2789_v23 = vld [vmem:[%s6277_s1 + $0x100] sm:$0xf]  ;;  %v2862_v24 = vor.u32 %v3944_v15, %v2861_v14  ;;  %v3926_v25 = vld [vmem:[%s6277_s1 + $0x104] sm:$0xf0]  ;;  %v2973_v28 = vld [vmem:[%s6277_s1 + $0x270] sm:$0xf]  ;;  %v2726_v35 = vor.u32 %v3910_v22, %v2725_v21 }
  0x16   :  { %1894 = vmatpush.bf16.msra.mxu2 %v2814_v58  ;;  %v2853_v26 = vld [vmem:[%s6277_s1 + $0x180] sm:$0xf]  ;;  %v3942_v27 = vld [vmem:[%s6277_s1 + $0x184] sm:$0xf0]  ;;  %v3972_v29 = vld [vmem:[%s6277_s1 + $0x274] sm:$0xf0]  ;;  %v2790_v36 = vor.u32 %v3926_v25, %v2789_v23 }
  0x17   :  { %1908 = vmatpush.bf16.msra.mxu3 %v2878_v62  ;;  %v3037_v30 = vld [vmem:[%s6277_s1 + $0x2f0] sm:$0xf]  ;;  %v3988_v32 = vld [vmem:[%s6277_s1 + $0x2f4] sm:$0xf0]  ;;  %v2854_v39 = vor.u32 %v3942_v27, %v2853_v26  ;;  %v2974_v40 = vor.u32 %v3972_v29, %v2973_v28  ;;  %v2965_v41 = vld [vmem:[%s6277_s1 + $0x260] sm:$0xf] }
  0x18   :  { %1867 = vmatpush.bf16.msra.mxu0 %v2678_v4  ;;  %v3101_v33 = vld [vmem:[%s6277_s1 + $0x370] sm:$0xf]  ;;  %v4004_v34 = vld [vmem:[%s6277_s1 + $0x374] sm:$0xf0]  ;;  %v3970_v42 = vld [vmem:[%s6277_s1 + $0x264] sm:$0xf0]  ;;  %v3038_v43 = vor.u32 %v3988_v32, %v3037_v30 }
  0x19   :  { %1881 = vmatpush.bf16.msra.mxu1 %v2742_v5  ;;  %v3165_v37 = vld [vmem:[%s6277_s1 + $0x3f0] sm:$0xf]  ;;  %v4020_v38 = vld [vmem:[%s6277_s1 + $0x3f4] sm:$0xf0]  ;;  %v3102_v44 = vor.u32 %v4004_v34, %v3101_v33  ;;  %v3029_v45 = vld [vmem:[%s6277_s1 + $0x2e0] sm:$0xf]  ;;  %v2966_v55 = vor.u32 %v3970_v42, %v2965_v41 }
  0x1a   :  { %1895 = vmatpush.bf16.msra.mxu2 %v2806_v6  ;;  %v3986_v46 = vld [vmem:[%s6277_s1 + $0x2e4] sm:$0xf0]  ;;  %v3093_v47 = vld [vmem:[%s6277_s1 + $0x360] sm:$0xf]  ;;  %v3166_v48 = vor.u32 %v4020_v38, %v3165_v37  ;;  %v2957_v56 = vld [vmem:[%s6277_s1 + $0x250] sm:$0xf] }
  0x1b   :  { %1909 = vmatpush.bf16.msra.mxu3 %v2870_v10  ;;  %v4002_v49 = vld [vmem:[%s6277_s1 + $0x364] sm:$0xf0]  ;;  %v3157_v50 = vld [vmem:[%s6277_s1 + $0x3e0] sm:$0xf]  ;;  %v3968_v57 = vld [vmem:[%s6277_s1 + $0x254] sm:$0xf0]  ;;  %v3030_v60 = vor.u32 %v3986_v46, %v3029_v45 }
  0x1c   :  { %1868 = vmatpush.bf16.msra.mxu0 %v2670_v16  ;;  %v4018_v51 = vld [vmem:[%s6277_s1 + $0x3e4] sm:$0xf0]  ;;  %v2589_v52 = vld [vmem:[%s6278_s0] sm:$0xf]  ;;  %v3885_v59 = vld [vmem:[%s6278_s0 + $0x4c] sm:$0xf0]  ;;  %v3094_v61 = vor.u32 %v4002_v49, %v3093_v47  ;;  %v2958_v9 = vor.u32 %v3968_v57, %v2957_v56 }
  0x1d   :  { %1882 = vmatpush.bf16.msra.mxu1 %v2734_v19  ;;  %v3884_v53 = vld [vmem:[%s6278_s0 + $0x44] sm:$0xf0]  ;;  %v3021_v62 = vld [vmem:[%s6277_s1 + $0x2d0] sm:$0xf]  ;;  %v3984_v63 = vld [vmem:[%s6277_s1 + $0x2d4] sm:$0xf0]  ;;  %v3158_v2 = vor.u32 %v4018_v51, %v3157_v50 }
  0x1e   :  { %1896 = vmatpush.bf16.msra.mxu2 %v2798_v20  ;;  %v2597_v54 = vld [vmem:[%s6278_s0 + $0x8] sm:$0xf]  ;;  %v4491_v58 = vor.u32 %v3884_v53, %v2589_v52  ;;  %v3085_v0 = vld [vmem:[%s6277_s1 + $0x350] sm:$0xf]  ;;  %v4000_v3 = vld [vmem:[%s6277_s1 + $0x354] sm:$0xf0]  ;;  %v3022_v12 = vor.u32 %v3984_v63, %v3021_v62 }
  0x1f   :  { %1910 = vmatpush.bf16.msra.mxu3 %v2862_v24  ;;  %v4505_v1 = vor.u32 %v3885_v59, %v2597_v54  ;;  %v3149_v4 = vld [vmem:[%s6277_s1 + $0x3d0] sm:$0xf]  ;;  %v4016_v5 = vld [vmem:[%s6277_s1 + $0x3d4] sm:$0xf0]  ;;  %v3875_v6 = vld [vmem:[%s6278_s0 + $0x4] sm:$0xf]  ;;  %v3086_v13 = vor.u32 %v4000_v3, %v3085_v0 }
  0x20   :  { %1869 = vmatpush.bf16.msra.mxu0 %v2662_v31  ;;  %v2591_v7 = vld [vmem:[%s6278_s0 + $0x48] sm:$0xf0]  ;;  %v2599_v11 = vld [vmem:[%s6278_s0 + $0x50] sm:$0xf0]  ;;  %v2949_v14 = vld [vmem:[%s6277_s1 + $0x240] sm:$0xf]  ;;  %v3150_v18 = vor.u32 %v4016_v5, %v3149_v4 }
  0x21   :  { %1883 = vmatpush.bf16.msra.mxu1 %v2726_v35  ;;  %v3876_v8 = vld [vmem:[%s6278_s0 + $0xc] sm:$0xf]  ;;  %v4527_v10 = vor.u32 %v3875_v6, %v2591_v7  ;;  %v3966_v15 = vld [vmem:[%s6277_s1 + $0x244] sm:$0xf0]  ;;  %v3013_v16 = vld [vmem:[%s6277_s1 + $0x2c0] sm:$0xf] }
  0x22   :  { %1897 = vmatpush.bf16.msra.mxu2 %v2790_v36  ;;  %v4541_v17 = vor.u32 %v3876_v8, %v2599_v11  ;;  %v3982_v19 = vld [vmem:[%s6277_s1 + $0x2c4] sm:$0xf0]  ;;  %v3077_v20 = vld [vmem:[%s6277_s1 + $0x340] sm:$0xf]  ;;  %v2950_v24 = vor.u32 %v3966_v15, %v2949_v14  ;;  %v2941_v27 = vld [vmem:[%s6277_s1 + $0x230] sm:$0xf] }
  0x23   :  { %1911 = vmatpush.bf16.msra.mxu3 %v2854_v39  ;;  %1870 = vmatmul.bf16.vlgmr.msra.gmra.mxu0 %v4491_v58  ;;  %v3998_v21 = vld [vmem:[%s6277_s1 + $0x344] sm:$0xf0]  ;;  %v3141_v22 = vld [vmem:[%s6277_s1 + $0x3c0] sm:$0xf]  ;;  %v3014_v25 = vor.u32 %v3982_v19, %v3013_v16  ;;  %v3964_v28 = vld [vmem:[%s6277_s1 + $0x234] sm:$0xf0] }
  0x24   :  { %1918 = vmatpush.bf16.msrb.mxu0 %v2974_v40  ;;  %1884 = vmatmul.bf16.vlgmr.msra.gmra.mxu1 %v4527_v10  ;;  %v4014_v23 = vld [vmem:[%s6277_s1 + $0x3c4] sm:$0xf0]  ;;  %v3078_v26 = vor.u32 %v3998_v21, %v3077_v20  ;;  %v3005_v29 = vld [vmem:[%s6277_s1 + $0x2b0] sm:$0xf]  ;;  %v3980_v31 = vld [vmem:[%s6277_s1 + $0x2b4] sm:$0xf0]  ;;  %v2942_v36 = vor.u32 %v3964_v28, %v2941_v27 }
  0x25   :  { %1932 = vmatpush.bf16.msrb.mxu1 %v3038_v43  ;;  %1898 = vmatmul.bf16.vlgmr.msra.gmra.mxu2 %v4505_v1  ;;  %v3142_v30 = vor.u32 %v4014_v23, %v3141_v22  ;;  %v3069_v32 = vld [vmem:[%s6277_s1 + $0x330] sm:$0xf]  ;;  %v3996_v33 = vld [vmem:[%s6277_s1 + $0x334] sm:$0xf0]  ;;  %v3006_v37 = vor.u32 %v3980_v31, %v3005_v29  ;;  %v2933_v39 = vld [vmem:[%s6277_s1 + $0x220] sm:$0xf] }
  0x26   :  { %1946 = vmatpush.bf16.msrb.mxu2 %v3102_v44  ;;  %1912 = vmatmul.bf16.vlgmr.msra.gmra.mxu3 %v4541_v17  ;;  %v3133_v34 = vld [vmem:[%s6277_s1 + $0x3b0] sm:$0xf]  ;;  %v4012_v35 = vld [vmem:[%s6277_s1 + $0x3b4] sm:$0xf0]  ;;  %v3070_v38 = vor.u32 %v3996_v33, %v3069_v32  ;;  %v3962_v40 = vld [vmem:[%s6277_s1 + $0x224] sm:$0xf0] }
  0x27   :  { %1960 = vmatpush.bf16.msrb.mxu3 %v3166_v48  ;;  %v2997_v41 = vld [vmem:[%s6277_s1 + $0x2a0] sm:$0xf]  ;;  %v3134_v42 = vor.u32 %v4012_v35, %v3133_v34  ;;  %v3978_v43 = vld [vmem:[%s6277_s1 + $0x2a4] sm:$0xf0]  ;;  %v2934_v48 = vor.u32 %v3962_v40, %v2933_v39  ;;  %v2925_v49 = vld [vmem:[%s6277_s1 + $0x210] sm:$0xf] }
  0x28   :  { %1919 = vmatpush.bf16.msrb.mxu0 %v2966_v55  ;;  %v3061_v44 = vld [vmem:[%s6277_s1 + $0x320] sm:$0xf]  ;;  %v3994_v45 = vld [vmem:[%s6277_s1 + $0x324] sm:$0xf0]  ;;  %v2998_v50 = vor.u32 %v3978_v43, %v2997_v41  ;;  %v3960_v52 = vld [vmem:[%s6277_s1 + $0x214] sm:$0xf0] }
  0x29   :  { %1933 = vmatpush.bf16.msrb.mxu1 %v3030_v60  ;;  %v3125_v46 = vld [vmem:[%s6277_s1 + $0x3a0] sm:$0xf]  ;;  %v4010_v47 = vld [vmem:[%s6277_s1 + $0x3a4] sm:$0xf0]  ;;  %v3062_v51 = vor.u32 %v3994_v45, %v3061_v44  ;;  %v2989_v53 = vld [vmem:[%s6277_s1 + $0x290] sm:$0xf]  ;;  %v2926_v63 = vor.u32 %v3960_v52, %v2925_v49 }
  0x2a   :  { %1947 = vmatpush.bf16.msrb.mxu2 %v3094_v61  ;;  %v3976_v54 = vld [vmem:[%s6277_s1 + $0x294] sm:$0xf0]  ;;  %v3126_v55 = vor.u32 %v4010_v47, %v3125_v46  ;;  %v3053_v56 = vld [vmem:[%s6277_s1 + $0x310] sm:$0xf]  ;;  %v2917_v61 = vld [vmem:[%s6277_s1 + $0x200] sm:$0xf] }
  0x2b   :  { %1961 = vmatpush.bf16.msrb.mxu3 %v3158_v2  ;;  %v3992_v57 = vld [vmem:[%s6277_s1 + $0x314] sm:$0xf0]  ;;  %v3117_v59 = vld [vmem:[%s6277_s1 + $0x390] sm:$0xf]  ;;  %v3958_v62 = vld [vmem:[%s6277_s1 + $0x204] sm:$0xf0]  ;;  %v2990_v5 = vor.u32 %v3976_v54, %v2989_v53 }
  0x2c   :  { %1920 = vmatpush.bf16.msrb.mxu0 %v2958_v9  ;;  %v4008_v60 = vld [vmem:[%s6277_s1 + $0x394] sm:$0xf0]  ;;  %v2981_v0 = vld [vmem:[%s6277_s1 + $0x280] sm:$0xf]  ;;  %v3974_v2 = vld [vmem:[%s6277_s1 + $0x284] sm:$0xf0]  ;;  %v3054_v6 = vor.u32 %v3992_v57, %v3053_v56  ;;  %v2918_v19 = vor.u32 %v3958_v62, %v2917_v61 }
  0x2d   :  { %1934 = vmatpush.bf16.msrb.mxu1 %v3022_v12  ;;  %v3045_v3 = vld [vmem:[%s6277_s1 + $0x300] sm:$0xf]  ;;  %v3990_v4 = vld [vmem:[%s6277_s1 + $0x304] sm:$0xf0]  ;;  %v3229_v9 = vld [vmem:[%s6277_s1 + $0x470] sm:$0xf]  ;;  %v3118_v11 = vor.u32 %v4008_v60, %v3117_v59  ;;  %v2982_v23 = vor.u32 %v3974_v2, %v2981_v0 }
  0x2e   :  { %1948 = vmatpush.bf16.msrb.mxu2 %v3086_v13  ;;  %v3109_v7 = vld [vmem:[%s6277_s1 + $0x380] sm:$0xf]  ;;  %v4006_v8 = vld [vmem:[%s6277_s1 + $0x384] sm:$0xf0]  ;;  %v4036_v12 = vld [vmem:[%s6277_s1 + $0x474] sm:$0xf0] }
  0x2f   :  { %1962 = vmatpush.bf16.msrb.mxu3 %v3150_v18  ;;  %v3293_v13 = vld [vmem:[%s6277_s1 + $0x4f0] sm:$0xf]  ;;  %v4052_v14 = vld [vmem:[%s6277_s1 + $0x4f4] sm:$0xf0]  ;;  %v3877_v27 = vld [vmem:[%s6278_s0 + $0x14] sm:$0xf]  ;;  %v3110_v28 = vor.u32 %v4006_v8, %v3109_v7  ;;  %v3230_v29 = vor.u32 %v4036_v12, %v3229_v9 }
  0x30   :  { %1921 = vmatpush.bf16.msrb.mxu0 %v2950_v24  ;;  %v3357_v15 = vld [vmem:[%s6277_s1 + $0x570] sm:$0xf]  ;;  %v4068_v16 = vld [vmem:[%s6277_s1 + $0x574] sm:$0xf0]  ;;  %v3046_v24 = vor.u32 %v3990_v4, %v3045_v3  ;;  %v3878_v31 = vld [vmem:[%s6278_s0 + $0x1c] sm:$0xf]  ;;  %v3294_v33 = vor.u32 %v4052_v14, %v3293_v13 }
  0x31   :  { %1935 = vmatpush.bf16.msrb.mxu1 %v3014_v25  ;;  %v3421_v18 = vld [vmem:[%s6277_s1 + $0x5f0] sm:$0xf]  ;;  %v4084_v20 = vld [vmem:[%s6277_s1 + $0x5f4] sm:$0xf0]  ;;  %v2615_v32 = vld [vmem:[%s6278_s0 + $0x60] sm:$0xf0]  ;;  %v3358_v34 = vor.u32 %v4068_v16, %v3357_v15 }
  0x32   :  { %1949 = vmatpush.bf16.msrb.mxu2 %v3078_v26  ;;  %v2605_v21 = vld [vmem:[%s6278_s0 + $0x10] sm:$0xf]  ;;  %v3886_v22 = vld [vmem:[%s6278_s0 + $0x54] sm:$0xf0]  ;;  %v3887_v26 = vld [vmem:[%s6278_s0 + $0x5c] sm:$0xf0]  ;;  %v4734_v47 = vor.u32 %v3878_v31, %v2615_v32 }
  0x33   :  { %1963 = vmatpush.bf16.msrb.mxu3 %v3142_v30  ;;  %v2613_v25 = vld [vmem:[%s6278_s0 + $0x18] sm:$0xf]  ;;  %v2607_v30 = vld [vmem:[%s6278_s0 + $0x58] sm:$0xf0]  ;;  %v3221_v35 = vld [vmem:[%s6277_s1 + $0x460] sm:$0xf]  ;;  %v4713_v39 = vor.u32 %v3886_v22, %v2605_v21 }
  0x34   :  { %1922 = vmatpush.bf16.msrb.mxu0 %v2942_v36  ;;  %v4034_v36 = vld [vmem:[%s6277_s1 + $0x464] sm:$0xf0]  ;;  %v3349_v41 = vld [vmem:[%s6277_s1 + $0x560] sm:$0xf]  ;;  %v4724_v43 = vor.u32 %v3887_v26, %v2613_v25  ;;  %v4726_v44 = vor.u32 %v3877_v27, %v2607_v30  ;;  %v4032_v52 = vld [vmem:[%s6277_s1 + $0x454] sm:$0xf0] }
  0x35   :  { %1936 = vmatpush.bf16.msrb.mxu1 %v3006_v37  ;;  %v3285_v37 = vld [vmem:[%s6277_s1 + $0x4e0] sm:$0xf]  ;;  %v4050_v40 = vld [vmem:[%s6277_s1 + $0x4e4] sm:$0xf0]  ;;  %v3277_v53 = vld [vmem:[%s6277_s1 + $0x4d0] sm:$0xf] }
  0x36   :  { %1950 = vmatpush.bf16.msrb.mxu2 %v3070_v38  ;;  %v3422_v38 = vor.u32 %v4084_v20, %v3421_v18  ;;  %v3413_v45 = vld [vmem:[%s6277_s1 + $0x5e0] sm:$0xf]  ;;  %v4082_v46 = vld [vmem:[%s6277_s1 + $0x5e4] sm:$0xf0]  ;;  %v3286_v49 = vor.u32 %v4050_v40, %v3285_v37  ;;  %v3341_v56 = vld [vmem:[%s6277_s1 + $0x550] sm:$0xf] }
  0x37   :  { %1964 = vmatpush.bf16.msrb.mxu3 %v3134_v42  ;;  %v4066_v42 = vld [vmem:[%s6277_s1 + $0x564] sm:$0xf0]  ;;  %v3414_v54 = vor.u32 %v4082_v46, %v3413_v45  ;;  %v4064_v57 = vld [vmem:[%s6277_s1 + $0x554] sm:$0xf0]  ;;  %v3405_v59 = vld [vmem:[%s6277_s1 + $0x5d0] sm:$0xf] }
  0x38   :  { %1923 = vmatpush.bf16.msrb.mxu0 %v2934_v48  ;;  %v3222_v48 = vor.u32 %v4034_v36, %v3221_v35  ;;  %v4080_v60 = vld [vmem:[%s6277_s1 + $0x5d4] sm:$0xf0]  ;;  %v3205_v0 = vld [vmem:[%s6277_s1 + $0x440] sm:$0xf]  ;;  %v4030_v2 = vld [vmem:[%s6277_s1 + $0x444] sm:$0xf0] }
  0x39   :  { %1937 = vmatpush.bf16.msrb.mxu1 %v2998_v50  ;;  %v3350_v50 = vor.u32 %v4066_v42, %v3349_v41  ;;  %v3269_v3 = vld [vmem:[%s6277_s1 + $0x4c0] sm:$0xf]  ;;  %v3406_v4 = vor.u32 %v4080_v60, %v3405_v59  ;;  %v4062_v7 = vld [vmem:[%s6277_s1 + $0x544] sm:$0xf0]  ;;  %v3197_v14 = vld [vmem:[%s6277_s1 + $0x430] sm:$0xf] }
  0x3a   :  { %1951 = vmatpush.bf16.msrb.mxu2 %v3062_v51  ;;  %v3213_v51 = vld [vmem:[%s6277_s1 + $0x450] sm:$0xf]  ;;  %v3397_v8 = vld [vmem:[%s6277_s1 + $0x5c0] sm:$0xf]  ;;  %v4078_v9 = vld [vmem:[%s6277_s1 + $0x5c4] sm:$0xf0] }
  0x3b   :  { %1965 = vmatpush.bf16.msrb.mxu3 %v3126_v55  ;;  %v4048_v55 = vld [vmem:[%s6277_s1 + $0x4d4] sm:$0xf0]  ;;  %v3214_v61 = vor.u32 %v4032_v52, %v3213_v51  ;;  %v3261_v16 = vld [vmem:[%s6277_s1 + $0x4b0] sm:$0xf]  ;;  %v3398_v18 = vor.u32 %v4078_v9, %v3397_v8  ;;  %v3189_v27 = vld [vmem:[%s6277_s1 + $0x420] sm:$0xf] }
  0x3c   :  { %1924 = vmatpush.bf16.msrb.mxu0 %v2926_v63  ;;  %v3278_v62 = vor.u32 %v4048_v55, %v3277_v53  ;;  %v3342_v63 = vor.u32 %v4064_v57, %v3341_v56  ;;  %v4028_v15 = vld [vmem:[%s6277_s1 + $0x434] sm:$0xf0]  ;;  %v3325_v20 = vld [vmem:[%s6277_s1 + $0x530] sm:$0xf]  ;;  %v4042_v31 = vld [vmem:[%s6277_s1 + $0x4a4] sm:$0xf0] }
  0x3d   :  { %1938 = vmatpush.bf16.msrb.mxu1 %v2990_v5  ;;  %v4046_v5 = vld [vmem:[%s6277_s1 + $0x4c4] sm:$0xf0]  ;;  %v4060_v21 = vld [vmem:[%s6277_s1 + $0x534] sm:$0xf0]  ;;  %v3389_v22 = vld [vmem:[%s6277_s1 + $0x5b0] sm:$0xf] }
  0x3e   :  { %1952 = vmatpush.bf16.msrb.mxu2 %v3054_v6  ;;  %v3333_v6 = vld [vmem:[%s6277_s1 + $0x540] sm:$0xf]  ;;  %v3270_v12 = vor.u32 %v4046_v5, %v3269_v3  ;;  %v3326_v26 = vor.u32 %v4060_v21, %v3325_v20  ;;  %v4074_v35 = vld [vmem:[%s6277_s1 + $0x5a4] sm:$0xf0]  ;;  %v3181_v37 = vld [vmem:[%s6277_s1 + $0x410] sm:$0xf] }
  0x3f   :  { %1966 = vmatpush.bf16.msrb.mxu3 %v3118_v11  ;;  %v3206_v11 = vor.u32 %v4030_v2, %v3205_v0  ;;  %v3334_v13 = vor.u32 %v4062_v7, %v3333_v6  ;;  %v3317_v32 = vld [vmem:[%s6277_s1 + $0x520] sm:$0xf]  ;;  %v4024_v41 = vld [vmem:[%s6277_s1 + $0x414] sm:$0xf0]  ;;  %v3245_v42 = vld [vmem:[%s6277_s1 + $0x490] sm:$0xf] }
  0x40   :  { %1925 = vmatpush.bf16.msrb.mxu0 %v2918_v19  ;;  %v4044_v19 = vld [vmem:[%s6277_s1 + $0x4b4] sm:$0xf0]  ;;  %v3173_v52 = vld [vmem:[%s6277_s1 + $0x400] sm:$0xf]  ;;  %v4022_v53 = vld [vmem:[%s6277_s1 + $0x404] sm:$0xf0] }
  0x41   :  { %1939 = vmatpush.bf16.msrb.mxu1 %v2982_v23  ;;  %v4076_v23 = vld [vmem:[%s6277_s1 + $0x5b4] sm:$0xf0]  ;;  %v3262_v25 = vor.u32 %v4044_v19, %v3261_v16  ;;  %v3237_v55 = vld [vmem:[%s6277_s1 + $0x480] sm:$0xf]  ;;  %v4038_v56 = vld [vmem:[%s6277_s1 + $0x484] sm:$0xf0]  ;;  %v3174_v9 = vor.u32 %v4022_v53, %v3173_v52 }
  0x42   :  { %1953 = vmatpush.bf16.msrb.mxu2 %v3046_v24  ;;  %v3198_v24 = vor.u32 %v4028_v15, %v3197_v14  ;;  %v3390_v30 = vor.u32 %v4076_v23, %v3389_v22  ;;  %v4040_v45 = vld [vmem:[%s6277_s1 + $0x494] sm:$0xf0]  ;;  %v3301_v57 = vld [vmem:[%s6277_s1 + $0x500] sm:$0xf]  ;;  %v4054_v59 = vld [vmem:[%s6277_s1 + $0x504] sm:$0xf0]  ;;  %v3238_v14 = vor.u32 %v4038_v56, %v3237_v55 }
  0x43   :  { %1967 = vmatpush.bf16.msrb.mxu3 %v3110_v28  ;;  %1926 = vmatmul.bf16.vlgmr.msrb.gmra.mxu0 %v4713_v39  ;;  %v4026_v28 = vld [vmem:[%s6277_s1 + $0x424] sm:$0xf0]  ;;  %v4072_v51 = vld [vmem:[%s6277_s1 + $0x594] sm:$0xf0]  ;;  %v3246_v60 = vor.u32 %v4040_v45, %v3245_v42  ;;  %v3485_v0 = vld [vmem:[%s6277_s1 + $0x670] sm:$0xf]  ;;  %v3302_v15 = vor.u32 %v4054_v59, %v3301_v57 }
  0x44   :  { %1974 = vmatpush.bf16.msra.mxu0 %v3230_v29  ;;  %1940 = vmatmul.bf16.vlgmr.msrb.gmra.mxu1 %v4726_v44  ;;  %v3253_v29 = vld [vmem:[%s6277_s1 + $0x4a0] sm:$0xf]  ;;  %v3190_v36 = vor.u32 %v4026_v28, %v3189_v27  ;;  %v4100_v3 = vld [vmem:[%s6277_s1 + $0x674] sm:$0xf0]  ;;  %v3613_v6 = vld [vmem:[%s6277_s1 + $0x770] sm:$0xf] }
  0x45   :  { %1988 = vmatpush.bf16.msra.mxu1 %v3294_v33  ;;  %1954 = vmatmul.bf16.vlgmr.msrb.gmra.mxu2 %v4724_v43  ;;  %v4058_v33 = vld [vmem:[%s6277_s1 + $0x524] sm:$0xf0]  ;;  %v4116_v5 = vld [vmem:[%s6277_s1 + $0x6f4] sm:$0xf0]  ;;  %v3677_v8 = vld [vmem:[%s6277_s1 + $0x7f0] sm:$0xf]  ;;  %v3486_v21 = vor.u32 %v4100_v3, %v3485_v0 }
  0x46   :  { %2002 = vmatpush.bf16.msra.mxu2 %v3358_v34  ;;  %1968 = vmatmul.bf16.vlgmr.msrb.gmra.mxu3 %v4734_v47  ;;  %v3381_v34 = vld [vmem:[%s6277_s1 + $0x5a0] sm:$0xf]  ;;  %v3318_v40 = vor.u32 %v4058_v33, %v3317_v32  ;;  %v4132_v7 = vld [vmem:[%s6277_s1 + $0x774] sm:$0xf0]  ;;  %v2629_v16 = vld [vmem:[%s6278_s0 + $0x28] sm:$0xf] }
  0x47   :  { %2016 = vmatpush.bf16.msra.mxu3 %v3422_v38  ;;  %v3254_v38 = vor.u32 %v4042_v31, %v3253_v29  ;;  %v3382_v46 = vor.u32 %v4074_v35, %v3381_v34  ;;  %v3879_v19 = vld [vmem:[%s6278_s0 + $0x24] sm:$0xf]  ;;  %v2623_v22 = vld [vmem:[%s6278_s0 + $0x68] sm:$0xf0]  ;;  %v3477_v27 = vld [vmem:[%s6277_s1 + $0x660] sm:$0xf] }
  0x48   :  { %1975 = vmatpush.bf16.msra.mxu0 %v3222_v48  ;;  %v3309_v48 = vld [vmem:[%s6277_s1 + $0x510] sm:$0xf]  ;;  %v3880_v23 = vld [vmem:[%s6278_s0 + $0x2c] sm:$0xf]  ;;  %v4098_v28 = vld [vmem:[%s6277_s1 + $0x664] sm:$0xf0] }
  0x49   :  { %1989 = vmatpush.bf16.msra.mxu1 %v3286_v49  ;;  %v4056_v49 = vld [vmem:[%s6277_s1 + $0x514] sm:$0xf0]  ;;  %v3541_v29 = vld [vmem:[%s6277_s1 + $0x6e0] sm:$0xf]  ;;  %v4114_v32 = vld [vmem:[%s6277_s1 + $0x6e4] sm:$0xf0] }
  0x4a   :  { %2003 = vmatpush.bf16.msra.mxu2 %v3350_v50  ;;  %v3373_v50 = vld [vmem:[%s6277_s1 + $0x590] sm:$0xf]  ;;  %v3605_v33 = vld [vmem:[%s6277_s1 + $0x760] sm:$0xf]  ;;  %v4130_v34 = vld [vmem:[%s6277_s1 + $0x764] sm:$0xf0]  ;;  %v3542_v42 = vor.u32 %v4114_v32, %v3541_v29 }
  0x4b   :  { %2017 = vmatpush.bf16.msra.mxu3 %v3414_v54  ;;  %v3182_v54 = vor.u32 %v4024_v41, %v3181_v37  ;;  %v3374_v2 = vor.u32 %v4072_v51, %v3373_v50  ;;  %v3669_v37 = vld [vmem:[%s6277_s1 + $0x7e0] sm:$0xf]  ;;  %v3478_v41 = vor.u32 %v4098_v28, %v3477_v27  ;;  %v3606_v45 = vor.u32 %v4130_v34, %v3605_v33  ;;  %v4112_v51 = vld [vmem:[%s6277_s1 + $0x6d4] sm:$0xf0]  ;;  %v3597_v52 = vld [vmem:[%s6277_s1 + $0x750] sm:$0xf] }
  0x4c   :  { %1976 = vmatpush.bf16.msra.mxu0 %v3214_v61  ;;  %v3310_v61 = vor.u32 %v4056_v49, %v3309_v48  ;;  %v4096_v48 = vld [vmem:[%s6277_s1 + $0x654] sm:$0xf0]  ;;  %v3533_v49 = vld [vmem:[%s6277_s1 + $0x6d0] sm:$0xf]  ;;  %v4110_v0 = vld [vmem:[%s6277_s1 + $0x6c4] sm:$0xf0] }
  0x4d   :  { %1990 = vmatpush.bf16.msra.mxu1 %v3278_v62  ;;  %v3365_v62 = vld [vmem:[%s6277_s1 + $0x580] sm:$0xf]  ;;  %v4128_v53 = vld [vmem:[%s6277_s1 + $0x754] sm:$0xf0]  ;;  %v3534_v57 = vor.u32 %v4112_v51, %v3533_v49  ;;  %v4126_v3 = vld [vmem:[%s6277_s1 + $0x744] sm:$0xf0] }
  0x4e   :  { %2004 = vmatpush.bf16.msra.mxu2 %v3342_v63  ;;  %v4070_v63 = vld [vmem:[%s6277_s1 + $0x584] sm:$0xf0]  ;;  %v4144_v55 = vld [vmem:[%s6277_s1 + $0x7d4] sm:$0xf0]  ;;  %v3598_v59 = vor.u32 %v4128_v53, %v3597_v52  ;;  %v3573_v28 = vld [vmem:[%s6277_s1 + $0x720] sm:$0xf] }
  0x4f   :  { %2018 = vmatpush.bf16.msra.mxu3 %v3406_v4  ;;  %v3549_v4 = vld [vmem:[%s6277_s1 + $0x6f0] sm:$0xf]  ;;  %v3366_v20 = vor.u32 %v4070_v63, %v3365_v62  ;;  %v3525_v62 = vld [vmem:[%s6277_s1 + $0x6c0] sm:$0xf]  ;;  %v4106_v27 = vld [vmem:[%s6277_s1 + $0x6a4] sm:$0xf0] }
  0x50   :  { %1977 = vmatpush.bf16.msra.mxu0 %v3206_v11  ;;  %v4148_v11 = vld [vmem:[%s6277_s1 + $0x7f4] sm:$0xf0]  ;;  %v4122_v29 = vld [vmem:[%s6277_s1 + $0x724] sm:$0xf0]  ;;  %v3437_v34 = vld [vmem:[%s6277_s1 + $0x610] sm:$0xf] }
  0x51   :  { %1991 = vmatpush.bf16.msra.mxu1 %v3270_v12  ;;  %v2621_v12 = vld [vmem:[%s6278_s0 + $0x20] sm:$0xf]  ;;  %v4138_v32 = vld [vmem:[%s6277_s1 + $0x7a4] sm:$0xf0]  ;;  %v4120_v49 = vld [vmem:[%s6277_s1 + $0x714] sm:$0xf0] }
  0x52   :  { %2005 = vmatpush.bf16.msra.mxu2 %v3334_v13  ;;  %v3888_v13 = vld [vmem:[%s6278_s0 + $0x64] sm:$0xf0]  ;;  %v4136_v51 = vld [vmem:[%s6277_s1 + $0x794] sm:$0xf0]  ;;  %v3429_v52 = vld [vmem:[%s6277_s1 + $0x600] sm:$0xf] }
  0x53   :  { %2019 = vmatpush.bf16.msra.mxu3 %v3398_v18  ;;  %v3889_v18 = vld [vmem:[%s6278_s0 + $0x6c] sm:$0xf0]  ;;  %v4941_v31 = vor.u32 %v3888_v13, %v2621_v12  ;;  %v4086_v53 = vld [vmem:[%s6277_s1 + $0x604] sm:$0xf0] }
  0x54   :  { %1978 = vmatpush.bf16.msra.mxu0 %v3198_v24  ;;  %v2631_v24 = vld [vmem:[%s6278_s0 + $0x70] sm:$0xf0]  ;;  %v4952_v35 = vor.u32 %v3889_v18, %v2629_v16  ;;  %v3517_v12 = vld [vmem:[%s6277_s1 + $0x6b0] sm:$0xf]  ;;  %v4124_v16 = vld [vmem:[%s6277_s1 + $0x734] sm:$0xf0] }
  0x55   :  { %1992 = vmatpush.bf16.msra.mxu1 %v3262_v25  ;;  %v3550_v25 = vor.u32 %v4116_v5, %v3549_v4  ;;  %v3653_v4 = vld [vmem:[%s6277_s1 + $0x7c0] sm:$0xf]  ;;  %v4142_v5 = vld [vmem:[%s6277_s1 + $0x7c4] sm:$0xf0]  ;;  %v3645_v18 = vld [vmem:[%s6277_s1 + $0x7b0] sm:$0xf] }
  0x56   :  { %2006 = vmatpush.bf16.msra.mxu2 %v3326_v26  ;;  %v3614_v26 = vor.u32 %v4132_v7, %v3613_v6  ;;  %v3526_v7 = vor.u32 %v4110_v0, %v3525_v62  ;;  %v3654_v13 = vor.u32 %v4142_v5, %v3653_v4  ;;  %v3621_v62 = vld [vmem:[%s6277_s1 + $0x780] sm:$0xf]  ;;  %v3741_v0 = vld [vmem:[%s6277_s1 + $0x870] sm:$0xf]  ;;  %v4180_v5 = vld [vmem:[%s6277_s1 + $0x8f4] sm:$0xf0] }
  0x57   :  { %2020 = vmatpush.bf16.msra.mxu3 %v3390_v30  ;;  %v3678_v30 = vor.u32 %v4148_v11, %v3677_v8  ;;  %v4092_v11 = vld [vmem:[%s6277_s1 + $0x634] sm:$0xf0]  ;;  %v3805_v4 = vld [vmem:[%s6277_s1 + $0x8f0] sm:$0xf] }
  0x58   :  { %1979 = vmatpush.bf16.msra.mxu0 %v3190_v36  ;;  %v4954_v36 = vor.u32 %v3879_v19, %v2623_v22  ;;  %v4140_v19 = vld [vmem:[%s6277_s1 + $0x7b4] sm:$0xf0] }
  0x59   :  { %1993 = vmatpush.bf16.msra.mxu1 %v3254_v38  ;;  %v4146_v38 = vld [vmem:[%s6277_s1 + $0x7e4] sm:$0xf0] }
  0x5a   :  { %2007 = vmatpush.bf16.msra.mxu2 %v3318_v40  ;;  %v4962_v40 = vor.u32 %v3880_v23, %v2631_v24  ;;  %v3670_v50 = vor.u32 %v4146_v38, %v3669_v37  ;;  %v3445_v23 = vld [vmem:[%s6277_s1 + $0x620] sm:$0xf]  ;;  %v4090_v24 = vld [vmem:[%s6277_s1 + $0x624] sm:$0xf0]  ;;  %v3574_v38 = vor.u32 %v4122_v29, %v3573_v28 }
  0x5b   :  { %2021 = vmatpush.bf16.msra.mxu3 %v3382_v46  ;;  %v3469_v46 = vld [vmem:[%s6277_s1 + $0x650] sm:$0xf]  ;;  %v3446_v33 = vor.u32 %v4090_v24, %v3445_v23  ;;  %v3882_v23 = vld [vmem:[%s6278_s0 + $0x3c] sm:$0xf]  ;;  %v2647_v24 = vld [vmem:[%s6278_s0 + $0x80] sm:$0xf0] }
  0x5c   :  { %1980 = vmatpush.bf16.msra.mxu0 %v3182_v54  ;;  %v3661_v54 = vld [vmem:[%s6277_s1 + $0x7d0] sm:$0xf]  ;;  %v3470_v56 = vor.u32 %v4096_v48, %v3469_v46  ;;  %v4162_v28 = vld [vmem:[%s6277_s1 + $0x864] sm:$0xf0]  ;;  %v3797_v29 = vld [vmem:[%s6277_s1 + $0x8e0] sm:$0xf] }
  0x5d   :  { %1994 = vmatpush.bf16.msra.mxu1 %v3246_v60  ;;  %v3461_v60 = vld [vmem:[%s6277_s1 + $0x640] sm:$0xf]  ;;  %v3662_v63 = vor.u32 %v4144_v55, %v3661_v54  ;;  %v3565_v48 = vld [vmem:[%s6277_s1 + $0x710] sm:$0xf] }
  0x5e   :  { %2008 = vmatpush.bf16.msra.mxu2 %v3310_v61  ;;  %v4094_v61 = vld [vmem:[%s6277_s1 + $0x644] sm:$0xf0]  ;;  %v3493_v55 = vld [vmem:[%s6277_s1 + $0x680] sm:$0xf] }
  0x5f   :  { %2022 = vmatpush.bf16.msra.mxu3 %v3374_v2  ;;  %v3589_v2 = vld [vmem:[%s6277_s1 + $0x740] sm:$0xf]  ;;  %v3462_v6 = vor.u32 %v4094_v61, %v3461_v60  ;;  %v3566_v61 = vor.u32 %v4120_v49, %v3565_v48 }
  0x60   :  { %1981 = vmatpush.bf16.msra.mxu0 %v3174_v9  ;;  %v3590_v8 = vor.u32 %v4126_v3, %v3589_v2  ;;  %v3453_v9 = vld [vmem:[%s6277_s1 + $0x630] sm:$0xf]  ;;  %v4164_v3 = vld [vmem:[%s6277_s1 + $0x874] sm:$0xf0] }
  0x61   :  { %1995 = vmatpush.bf16.msra.mxu1 %v3238_v14  ;;  %v4108_v14 = vld [vmem:[%s6277_s1 + $0x6b4] sm:$0xf0] }
  0x62   :  { %2009 = vmatpush.bf16.msra.mxu2 %v3302_v15  ;;  %v3581_v15 = vld [vmem:[%s6277_s1 + $0x730] sm:$0xf] }
  0x63   :  { %2023 = vmatpush.bf16.msra.mxu3 %v3366_v20  ;;  %1982 = vmatmul.bf16.vlgmr.msra.gmra.mxu0 %v4941_v31  ;;  %v3454_v20 = vor.u32 %v4092_v11, %v3453_v9  ;;  %v3582_v22 = vor.u32 %v4124_v16, %v3581_v15  ;;  %v3430_v9 = vor.u32 %v4086_v53, %v3429_v52  ;;  %v2783_v11 = vld [vmem:[%s6277_s1 + $0xf8] sm:$0xf0]  ;;  %v2645_v16 = vld [vmem:[%s6278_s0 + $0x38] sm:$0xf]  ;;  %v3789_v53 = vld [vmem:[%s6277_s1 + $0x8d0] sm:$0xf] }
  0x64   :  { %2030 = vmatpush.bf16.msrb.mxu0 %v3486_v21  ;;  %1996 = vmatmul.bf16.vlgmr.msra.gmra.mxu1 %v4954_v36  ;;  %v3518_v21 = vor.u32 %v4108_v14, %v3517_v12  ;;  %v2637_v12 = vld [vmem:[%s6278_s0 + $0x30] sm:$0xf]  ;;  %v4160_v52 = vld [vmem:[%s6277_s1 + $0x854] sm:$0xf0] }
  0x65   :  { %2044 = vmatpush.bf16.msrb.mxu1 %v3550_v25  ;;  %2010 = vmatmul.bf16.vlgmr.msra.gmra.mxu2 %v4952_v35  ;;  %v3509_v25 = vld [vmem:[%s6277_s1 + $0x6a0] sm:$0xf] }
  0x66   :  { %2058 = vmatpush.bf16.msrb.mxu2 %v3614_v26  ;;  %2024 = vmatmul.bf16.vlgmr.msra.gmra.mxu3 %v4962_v40  ;;  %v3646_v26 = vor.u32 %v4140_v19, %v3645_v18  ;;  %v3510_v37 = vor.u32 %v4106_v27, %v3509_v25  ;;  %v3891_v18 = vld [vmem:[%s6278_s0 + $0x7c] sm:$0xf0]  ;;  %v3881_v19 = vld [vmem:[%s6278_s0 + $0x34] sm:$0xf]  ;;  %v3806_v25 = vor.u32 %v4180_v5, %v3805_v4  ;;  %v4174_v5 = vld [vmem:[%s6277_s1 + $0x8c4] sm:$0xf0] }
  0x67   :  { %2072 = vmatpush.bf16.msrb.mxu3 %v3678_v30  ;;  %v3637_v30 = vld [vmem:[%s6277_s1 + $0x7a0] sm:$0xf] }
  0x68   :  { %2031 = vmatpush.bf16.msrb.mxu0 %v3478_v41  ;;  %v4088_v41 = vld [vmem:[%s6277_s1 + $0x614] sm:$0xf0]  ;;  %v3638_v46 = vor.u32 %v4138_v32, %v3637_v30  ;;  %v3733_v27 = vld [vmem:[%s6277_s1 + $0x860] sm:$0xf] }
  0x69   :  { %2045 = vmatpush.bf16.msrb.mxu1 %v3542_v42  ;;  %v3501_v42 = vld [vmem:[%s6277_s1 + $0x690] sm:$0xf]  ;;  %v3438_v54 = vor.u32 %v4088_v41, %v3437_v34  ;;  %v3905_v34 = vld [vmem:[%s6277_s1 + $0x64] sm:$0xf]  ;;  %v3734_v48 = vor.u32 %v4162_v28, %v3733_v27  ;;  %v3701_v27 = vld [vmem:[%s6277_s1 + $0x820] sm:$0xf] }
  0x6a   :  { %2059 = vmatpush.bf16.msrb.mxu2 %v3606_v45  ;;  %v4104_v45 = vld [vmem:[%s6277_s1 + $0x694] sm:$0xf0]  ;;  %v4154_v28 = vld [vmem:[%s6277_s1 + $0x824] sm:$0xf0] }
  0x6b   :  { %2073 = vmatpush.bf16.msrb.mxu3 %v3670_v50  ;;  %v3629_v50 = vld [vmem:[%s6277_s1 + $0x790] sm:$0xf]  ;;  %v3502_v60 = vor.u32 %v4104_v45, %v3501_v42  ;;  %v3921_v42 = vld [vmem:[%s6277_s1 + $0xe4] sm:$0xf]  ;;  %v2775_v45 = vld [vmem:[%s6277_s1 + $0xe8] sm:$0xf0] }
  0x6c   :  { %2032 = vmatpush.bf16.msrb.mxu0 %v3470_v56  ;;  %v4102_v56 = vld [vmem:[%s6277_s1 + $0x684] sm:$0xf0]  ;;  %v3630_v2 = vor.u32 %v4136_v51, %v3629_v50  ;;  %v3725_v51 = vld [vmem:[%s6277_s1 + $0x850] sm:$0xf] }
  0x6d   :  { %2046 = vmatpush.bf16.msrb.mxu1 %v3534_v57  ;;  %v3557_v57 = vld [vmem:[%s6277_s1 + $0x700] sm:$0xf]  ;;  %v3494_v14 = vor.u32 %v4102_v56, %v3493_v55  ;;  %v4176_v55 = vld [vmem:[%s6277_s1 + $0x8d4] sm:$0xf0]  ;;  %v3903_v56 = vld [vmem:[%s6277_s1 + $0x54] sm:$0xf] }
  0x6e   :  { %2060 = vmatpush.bf16.msrb.mxu2 %v3598_v59  ;;  %v4118_v59 = vld [vmem:[%s6277_s1 + $0x704] sm:$0xf0] }
  0x6f   :  { %2074 = vmatpush.bf16.msrb.mxu3 %v3662_v63  ;;  %v4134_v63 = vld [vmem:[%s6277_s1 + $0x784] sm:$0xf0]  ;;  %v3558_v15 = vor.u32 %v4118_v59, %v3557_v57  ;;  %v2703_v57 = vld [vmem:[%s6277_s1 + $0x58] sm:$0xf0]  ;;  %v3919_v59 = vld [vmem:[%s6277_s1 + $0xd4] sm:$0xf] }
  0x70   :  { %2033 = vmatpush.bf16.msrb.mxu0 %v3462_v6  ;;  %v3907_v6 = vld [vmem:[%s6277_s1 + $0x74] sm:$0xf] }
  0x71   :  { %2047 = vmatpush.bf16.msrb.mxu1 %v3526_v7  ;;  %v2719_v7 = vld [vmem:[%s6277_s1 + $0x78] sm:$0xf0] }
  0x72   :  { %2061 = vmatpush.bf16.msrb.mxu2 %v3590_v8  ;;  %v3923_v8 = vld [vmem:[%s6277_s1 + $0xf4] sm:$0xf] }
  0x73   :  { %2075 = vmatpush.bf16.msrb.mxu3 %v3654_v13  ;;  %v3890_v13 = vld [vmem:[%s6278_s0 + $0x74] sm:$0xf0]  ;;  %v2786_v30 = vor.u32 %v3923_v8, %v2783_v11  ;;  %v3917_v8 = vld [vmem:[%s6277_s1 + $0xc4] sm:$0xf] }
  0x74   :  { %2034 = vmatpush.bf16.msrb.mxu0 %v3454_v20  ;;  %v3622_v20 = vor.u32 %v4134_v63, %v3621_v62  ;;  %v5169_v32 = vor.u32 %v3890_v13, %v2637_v12  ;;  %v3790_v62 = vor.u32 %v4176_v55, %v3789_v53  ;;  %v2706_v63 = vor.u32 %v3903_v56, %v2703_v57  ;;  %v3757_v53 = vld [vmem:[%s6277_s1 + $0x890] sm:$0xf]  ;;  %v4168_v55 = vld [vmem:[%s6277_s1 + $0x894] sm:$0xf0]  ;;  %v3895_v56 = vld [vmem:[%s6277_s1 + $0x14] sm:$0xf] }
  0x75   :  { %2048 = vmatpush.bf16.msrb.mxu1 %v3518_v21  ;;  %v3742_v21 = vor.u32 %v4164_v3, %v3741_v0  ;;  %v3717_v0 = vld [vmem:[%s6277_s1 + $0x840] sm:$0xf]  ;;  %v2671_v57 = vld [vmem:[%s6277_s1 + $0x18] sm:$0xf0] }
  0x76   :  { %2062 = vmatpush.bf16.msrb.mxu2 %v3582_v22  ;;  %v2639_v22 = vld [vmem:[%s6278_s0 + $0x78] sm:$0xf0]  ;;  %v3781_v3 = vld [vmem:[%s6277_s1 + $0x8c0] sm:$0xf] }
  0x77   :  { %2076 = vmatpush.bf16.msrb.mxu3 %v3646_v26  ;;  %v2722_v26 = vor.u32 %v3907_v6, %v2719_v7  ;;  %v5182_v41 = vor.u32 %v3881_v19, %v2639_v22  ;;  %v3901_v6 = vld [vmem:[%s6277_s1 + $0x44] sm:$0xf]  ;;  %v2695_v7 = vld [vmem:[%s6277_s1 + $0x48] sm:$0xf0]  ;;  %v3782_v12 = vor.u32 %v4174_v5, %v3781_v3  ;;  %v4172_v19 = vld [vmem:[%s6277_s1 + $0x8b4] sm:$0xf0]  ;;  %v2674_v3 = vor.u32 %v3895_v56, %v2671_v57 }
  0x78   :  { %2035 = vmatpush.bf16.msrb.mxu0 %v3446_v33  ;;  %v4178_v33 = vld [vmem:[%s6277_s1 + $0x8e4] sm:$0xf0]  ;;  %v2698_v13 = vor.u32 %v3901_v6, %v2695_v7  ;;  %v3915_v22 = vld [vmem:[%s6277_s1 + $0xb4] sm:$0xf]  ;;  %v3893_v5 = vld [vmem:[%s6277_s1 + $0x4] sm:$0xf] }
  0x79   :  { %2049 = vmatpush.bf16.msrb.mxu1 %v3510_v37  ;;  %v2711_v37 = vld [vmem:[%s6277_s1 + $0x68] sm:$0xf0]  ;;  %v3798_v49 = vor.u32 %v4178_v33, %v3797_v29  ;;  %v3765_v29 = vld [vmem:[%s6277_s1 + $0x8a0] sm:$0xf]  ;;  %v4170_v33 = vld [vmem:[%s6277_s1 + $0x8a4] sm:$0xf0] }
  0x7a   :  { %2063 = vmatpush.bf16.msrb.mxu2 %v3574_v38  ;;  %v5180_v38 = vor.u32 %v3891_v18, %v2645_v16  ;;  %v2714_v50 = vor.u32 %v3905_v34, %v2711_v37  ;;  %v3773_v16 = vld [vmem:[%s6277_s1 + $0x8b0] sm:$0xf]  ;;  %v3897_v34 = vld [vmem:[%s6277_s1 + $0x24] sm:$0xf]  ;;  %v2679_v37 = vld [vmem:[%s6277_s1 + $0x28] sm:$0xf0] }
  0x7b   :  { %2077 = vmatpush.bf16.msrb.mxu3 %v3638_v46  ;;  %v5190_v46 = vor.u32 %v3882_v23, %v2647_v24  ;;  %v2751_v23 = vld [vmem:[%s6277_s1 + $0xb8] sm:$0xf0]  ;;  %v2663_v6 = vld [vmem:[%s6277_s1 + $0x8] sm:$0xf0]  ;;  %v3935_v57 = vld [vmem:[%s6277_s1 + $0x154] sm:$0xf] }
  0x7c   :  { %2036 = vmatpush.bf16.msrb.mxu0 %v3438_v54  ;;  %v2778_v54 = vor.u32 %v3921_v42, %v2775_v45  ;;  %v3913_v42 = vld [vmem:[%s6277_s1 + $0xa4] sm:$0xf]  ;;  %v2743_v45 = vld [vmem:[%s6277_s1 + $0xa8] sm:$0xf0] }
  0x7d   :  { %2050 = vmatpush.bf16.msrb.mxu1 %v3502_v60  ;;  %v2767_v60 = vld [vmem:[%s6277_s1 + $0xd8] sm:$0xf0] }
  0x7e   :  { %2064 = vmatpush.bf16.msrb.mxu2 %v3566_v61  ;;  %v3726_v61 = vor.u32 %v4160_v52, %v3725_v51  ;;  %v2770_v4 = vor.u32 %v3919_v59, %v2767_v60  ;;  %v3693_v51 = vld [vmem:[%s6277_s1 + $0x810] sm:$0xf]  ;;  %v4152_v52 = vld [vmem:[%s6277_s1 + $0x814] sm:$0xf0]  ;;  %v3911_v59 = vld [vmem:[%s6277_s1 + $0x94] sm:$0xf] }
  0x7f   :  { %2078 = vmatpush.bf16.msrb.mxu3 %v3630_v2  ;;  %v4158_v2 = vld [vmem:[%s6277_s1 + $0x844] sm:$0xf0]  ;;  %v2735_v60 = vld [vmem:[%s6277_s1 + $0x98] sm:$0xf0] }
  0x80   :  { %2037 = vmatpush.bf16.msrb.mxu0 %v3430_v9  ;;  %v2759_v9 = vld [vmem:[%s6277_s1 + $0xc8] sm:$0xf0]  ;;  %v3718_v11 = vor.u32 %v4158_v2, %v3717_v0  ;;  %v3749_v0 = vld [vmem:[%s6277_s1 + $0x880] sm:$0xf]  ;;  %v3758_v2 = vor.u32 %v4168_v55, %v3757_v53  ;;  %v2738_v7 = vor.u32 %v3911_v59, %v2735_v60  ;;  %v2831_v59 = vld [vmem:[%s6277_s1 + $0x158] sm:$0xf0] }
  0x81   :  { %2051 = vmatpush.bf16.msrb.mxu1 %v3494_v14  ;;  %v3709_v14 = vld [vmem:[%s6277_s1 + $0x830] sm:$0xf]  ;;  %v2762_v18 = vor.u32 %v3917_v8, %v2759_v9  ;;  %v3909_v8 = vld [vmem:[%s6277_s1 + $0x84] sm:$0xf]  ;;  %v2727_v9 = vld [vmem:[%s6277_s1 + $0x88] sm:$0xf0] }
  0x82   :  { %2065 = vmatpush.bf16.msrb.mxu2 %v3558_v15  ;;  %v4156_v15 = vld [vmem:[%s6277_s1 + $0x834] sm:$0xf0]  ;;  %v3031_v53 = vld [vmem:[%s6277_s1 + $0x2e8] sm:$0xf0]  ;;  %v3951_v60 = vld [vmem:[%s6277_s1 + $0x1d4] sm:$0xf] }
  0x83   :  { %2079 = vmatpush.bf16.msrb.mxu3 %v3622_v20  ;;  %2038 = vmatmul.bf16.vlgmr.msrb.gmra.mxu0 %v5169_v32  ;;  %v3899_v20 = vld [vmem:[%s6277_s1 + $0x34] sm:$0xf]  ;;  %v3710_v24 = vor.u32 %v4156_v15, %v3709_v14  ;;  %v2911_v14 = vld [vmem:[%s6277_s1 + $0x1f8] sm:$0xf0] }
  0x84   :  { %2086 = vmatpush.bf16.msra.mxu0 %v3742_v21  ;;  %2052 = vmatmul.bf16.vlgmr.msrb.gmra.mxu1 %v5182_v41  ;;  %v2687_v21 = vld [vmem:[%s6277_s1 + $0x38] sm:$0xf0] }
  0x85   :  { %2100 = vmatpush.bf16.msra.mxu1 %v3806_v25  ;;  %2066 = vmatmul.bf16.vlgmr.msrb.gmra.mxu2 %v5180_v38  ;;  %v3774_v25 = vor.u32 %v4172_v19, %v3773_v16  ;;  %v3971_v16 = vld [vmem:[%s6277_s1 + $0x274] sm:$0xf] }
  0x86   :  { %2114 = vmatpush.bf16.msra.mxu2 %v2722_v26  ;;  %2080 = vmatmul.bf16.vlgmr.msrb.gmra.mxu3 %v5190_v46  ;;  %v2690_v26 = vor.u32 %v3899_v20, %v2687_v21  ;;  %v3987_v19 = vld [vmem:[%s6277_s1 + $0x2f4] sm:$0xf]  ;;  %v2666_v21 = vor.u32 %v3893_v5, %v2663_v6 }
  0x87   :  { %2128 = vmatpush.bf16.msra.mxu3 %v2786_v30  ;;  %v2754_v30 = vor.u32 %v3915_v22, %v2751_v23  ;;  %v3039_v22 = vld [vmem:[%s6277_s1 + $0x2f8] sm:$0xf0]  ;;  %v2653_v23 = vld [vmem:[%s6278_s0 + $0x40] sm:$0xf] }
  0x88   :  { %2087 = vmatpush.bf16.msra.mxu0 %v3734_v48  ;;  %v3702_v48 = vor.u32 %v4154_v28, %v3701_v27  ;;  %v3883_v27 = vld [vmem:[%s6278_s0 + $0x44] sm:$0xf]  ;;  %v2655_v28 = vld [vmem:[%s6278_s0 + $0x88] sm:$0xf0] }
  0x89   :  { %2101 = vmatpush.bf16.msra.mxu1 %v3798_v49  ;;  %v3766_v49 = vor.u32 %v4170_v33, %v3765_v29  ;;  %v3937_v33 = vld [vmem:[%s6277_s1 + $0x164] sm:$0xf] }
  0x8a   :  { %2115 = vmatpush.bf16.msra.mxu2 %v2714_v50  ;;  %v2682_v50 = vor.u32 %v3897_v34, %v2679_v37  ;;  %v2839_v34 = vld [vmem:[%s6277_s1 + $0x168] sm:$0xf0]  ;;  %v3953_v37 = vld [vmem:[%s6277_s1 + $0x1e4] sm:$0xf] }
  0x8b   :  { %2129 = vmatpush.bf16.msra.mxu3 %v2778_v54  ;;  %v2746_v54 = vor.u32 %v3913_v42, %v2743_v45  ;;  %v3042_v42 = vor.u32 %v3987_v19, %v3039_v22  ;;  %v3931_v19 = vld [vmem:[%s6277_s1 + $0x134] sm:$0xf] }
  0x8c   :  { %2088 = vmatpush.bf16.msra.mxu0 %v3726_v61  ;;  %v3694_v61 = vor.u32 %v4152_v52, %v3693_v51  ;;  %v5396_v51 = vor.u32 %v3883_v27, %v2655_v28  ;;  %v3985_v52 = vld [vmem:[%s6277_s1 + $0x2e4] sm:$0xf]  ;;  %v3007_v27 = vld [vmem:[%s6277_s1 + $0x2b8] sm:$0xf0] }
  0x8d   :  { %2102 = vmatpush.bf16.msra.mxu1 %v3790_v62  ;;  %v3685_v62 = vld [vmem:[%s6277_s1 + $0x800] sm:$0xf] }
  0x8e   :  { %2116 = vmatpush.bf16.msra.mxu2 %v2706_v63  ;;  %v4150_v63 = vld [vmem:[%s6277_s1 + $0x804] sm:$0xf0] }
  0x8f   :  { %2130 = vmatpush.bf16.msra.mxu3 %v2770_v4  ;;  %v4166_v4 = vld [vmem:[%s6277_s1 + $0x884] sm:$0xf0]  ;;  %v3686_v15 = vor.u32 %v4150_v63, %v3685_v62  ;;  %v2895_v62 = vld [vmem:[%s6277_s1 + $0x1d8] sm:$0xf0]  ;;  %v3967_v63 = vld [vmem:[%s6277_s1 + $0x254] sm:$0xf] }
  0x90   :  { %2089 = vmatpush.bf16.msra.mxu0 %v3718_v11  ;;  %v3939_v11 = vld [vmem:[%s6277_s1 + $0x174] sm:$0xf]  ;;  %v3750_v20 = vor.u32 %v4166_v4, %v3749_v0  ;;  %v2959_v0 = vld [vmem:[%s6277_s1 + $0x258] sm:$0xf0]  ;;  %v2834_v4 = vor.u32 %v3935_v57, %v2831_v59  ;;  %v2898_v5 = vor.u32 %v3951_v60, %v2895_v62 }
  0x91   :  { %2103 = vmatpush.bf16.msra.mxu1 %v3782_v12  ;;  %v2847_v12 = vld [vmem:[%s6277_s1 + $0x178] sm:$0xf0]  ;;  %v2962_v6 = vor.u32 %v3967_v63, %v2959_v0  ;;  %v3927_v57 = vld [vmem:[%s6277_s1 + $0x114] sm:$0xf] }
  0x92   :  { %2117 = vmatpush.bf16.msra.mxu2 %v2698_v13  ;;  %v3955_v13 = vld [vmem:[%s6277_s1 + $0x1f4] sm:$0xf]  ;;  %v2799_v59 = vld [vmem:[%s6277_s1 + $0x118] sm:$0xf0] }
  0x93   :  { %2131 = vmatpush.bf16.msra.mxu3 %v2762_v18  ;;  %v2975_v18 = vld [vmem:[%s6277_s1 + $0x278] sm:$0xf0]  ;;  %v2914_v29 = vor.u32 %v3955_v13, %v2911_v14  ;;  %v3981_v13 = vld [vmem:[%s6277_s1 + $0x2c4] sm:$0xf]  ;;  %v3015_v14 = vld [vmem:[%s6277_s1 + $0x2c8] sm:$0xf0] }
  0x94   :  { %2090 = vmatpush.bf16.msra.mxu0 %v3710_v24  ;;  %v3892_v24 = vld [vmem:[%s6278_s0 + $0x84] sm:$0xf0]  ;;  %v3018_v22 = vor.u32 %v3981_v13, %v3015_v14  ;;  %v3943_v60 = vld [vmem:[%s6277_s1 + $0x194] sm:$0xf]  ;;  %v2863_v62 = vld [vmem:[%s6277_s1 + $0x198] sm:$0xf0] }
  0x95   :  { %2104 = vmatpush.bf16.msra.mxu1 %v3774_v25  ;;  %v2730_v25 = vor.u32 %v3909_v8, %v2727_v9  ;;  %v5385_v45 = vor.u32 %v3892_v24, %v2653_v23  ;;  %v2823_v8 = vld [vmem:[%s6277_s1 + $0x148] sm:$0xf0]  ;;  %v2879_v23 = vld [vmem:[%s6277_s1 + $0x1b8] sm:$0xf0]  ;;  %v3963_v24 = vld [vmem:[%s6277_s1 + $0x234] sm:$0xf] }
  0x96   :  { %2118 = vmatpush.bf16.msra.mxu2 %v2690_v26  ;;  %v2850_v26 = vor.u32 %v3939_v11, %v2847_v12  ;;  %v3965_v11 = vld [vmem:[%s6277_s1 + $0x244] sm:$0xf]  ;;  %v2951_v12 = vld [vmem:[%s6277_s1 + $0x248] sm:$0xf0]  ;;  %v3959_v63 = vld [vmem:[%s6277_s1 + $0x214] sm:$0xf] }
  0x97   :  { %2132 = vmatpush.bf16.msra.mxu3 %v2754_v30  ;;  %v2978_v30 = vor.u32 %v3971_v16, %v2975_v18  ;;  %v2954_v18 = vor.u32 %v3965_v11, %v2951_v12  ;;  %v2927_v0 = vld [vmem:[%s6277_s1 + $0x218] sm:$0xf0]  ;;  %v2919_v12 = vld [vmem:[%s6277_s1 + $0x208] sm:$0xf0]  ;;  %v3973_v13 = vld [vmem:[%s6277_s1 + $0x284] sm:$0xf] }
  0x98   :  { %2091 = vmatpush.bf16.msra.mxu0 %v3702_v48  ;;  %v2903_v48 = vld [vmem:[%s6277_s1 + $0x1e8] sm:$0xf0] }
  0x99   :  { %2105 = vmatpush.bf16.msra.mxu1 %v3766_v49  ;;  %v3969_v49 = vld [vmem:[%s6277_s1 + $0x264] sm:$0xf]  ;;  %v2906_v55 = vor.u32 %v3953_v37, %v2903_v48  ;;  %v2871_v48 = vld [vmem:[%s6277_s1 + $0x1a8] sm:$0xf0] }
  0x9a   :  { %2119 = vmatpush.bf16.msra.mxu2 %v2682_v50  ;;  %v2967_v50 = vld [vmem:[%s6277_s1 + $0x268] sm:$0xf0]  ;;  %v3945_v37 = vld [vmem:[%s6277_s1 + $0x1a4] sm:$0xf] }
  0x9b   :  { %2133 = vmatpush.bf16.msra.mxu3 %v2746_v54  ;;  %v2842_v54 = vor.u32 %v3937_v33, %v2839_v34  ;;  %v2970_v56 = vor.u32 %v3969_v49, %v2967_v50  ;;  %v3929_v33 = vld [vmem:[%s6277_s1 + $0x124] sm:$0xf]  ;;  %v2807_v34 = vld [vmem:[%s6277_s1 + $0x128] sm:$0xf0] }
  0x9c   :  { %2092 = vmatpush.bf16.msra.mxu0 %v3694_v61  ;;  %v3034_v61 = vor.u32 %v3985_v52, %v3031_v53  ;;  %v3961_v49 = vld [vmem:[%s6277_s1 + $0x224] sm:$0xf]  ;;  %v2935_v50 = vld [vmem:[%s6277_s1 + $0x228] sm:$0xf0] }
  0x9d   :  { %2106 = vmatpush.bf16.msra.mxu1 %v3758_v2  ;;  %v3983_v2 = vld [vmem:[%s6277_s1 + $0x2d4] sm:$0xf]  ;;  %v3977_v52 = vld [vmem:[%s6277_s1 + $0x2a4] sm:$0xf]  ;;  %v2999_v53 = vld [vmem:[%s6277_s1 + $0x2a8] sm:$0xf0] }
  0x9e   :  { %2120 = vmatpush.bf16.msra.mxu2 %v2674_v3  ;;  %v3023_v3 = vld [vmem:[%s6277_s1 + $0x2d8] sm:$0xf0]  ;;  %v2983_v14 = vld [vmem:[%s6277_s1 + $0x288] sm:$0xf0] }
  0x9f   :  { %2134 = vmatpush.bf16.msra.mxu3 %v2738_v7  ;;  %v3933_v7 = vld [vmem:[%s6277_s1 + $0x144] sm:$0xf]  ;;  %v3026_v9 = vor.u32 %v3983_v2, %v3023_v3  ;;  %v3975_v2 = vld [vmem:[%s6277_s1 + $0x294] sm:$0xf]  ;;  %v2991_v3 = vld [vmem:[%s6277_s1 + $0x298] sm:$0xf0] }
  0xa0   :  { %2093 = vmatpush.bf16.msra.mxu0 %v3686_v15  ;;  %v2826_v15 = vor.u32 %v3933_v7, %v2823_v8  ;;  %v2866_v7 = vor.u32 %v3943_v60, %v2863_v62  ;;  %v2930_v8 = vor.u32 %v3959_v63, %v2927_v0  ;;  %v2994_v11 = vor.u32 %v3975_v2, %v2991_v3  ;;  %v4015_v60 = vld [vmem:[%s6277_s1 + $0x3d4] sm:$0xf]  ;;  %v3151_v62 = vld [vmem:[%s6277_s1 + $0x3d8] sm:$0xf0] }
  0xa1   :  { %2107 = vmatpush.bf16.msra.mxu1 %v3750_v20  ;;  %v2815_v20 = vld [vmem:[%s6277_s1 + $0x138] sm:$0xf0]  ;;  %v4031_v63 = vld [vmem:[%s6277_s1 + $0x454] sm:$0xf] }
  0xa2   :  { %2121 = vmatpush.bf16.msra.mxu2 %v2666_v21  ;;  %v3947_v21 = vld [vmem:[%s6277_s1 + $0x1b4] sm:$0xf]  ;;  %v2818_v28 = vor.u32 %v3931_v19, %v2815_v20  ;;  %v3167_v20 = vld [vmem:[%s6277_s1 + $0x3f8] sm:$0xf0] }
  0xa3   :  { %2135 = vmatpush.bf16.msra.mxu3 %v2730_v25  ;;  %2094 = vmatmul.bf16.vlgmr.msra.gmra.mxu0 %v5385_v45  ;;  %v2943_v25 = vld [vmem:[%s6277_s1 + $0x238] sm:$0xf0] }
  0xa4   :  { %2142 = vmatpush.bf16.msrb.mxu0 %v2850_v26  ;;  %2108 = vmatmul.bf16.vlgmr.msra.gmra.mxu1 %v5396_v51  ;;  %v3979_v26 = vld [vmem:[%s6277_s1 + $0x2b4] sm:$0xf]  ;;  %v3215_v0 = vld [vmem:[%s6277_s1 + $0x458] sm:$0xf0] }
  0xa5   :  { %2156 = vmatpush.bf16.msrb.mxu1 %v2914_v29  ;;  %2122 = vmatmul.bf16.vlgmr.msra.gmra.mxu2 %v4491_v58  ;;  %v3949_v58 = vld [vmem:[%s6277_s1 + $0x1c4] sm:$0xf]  ;;  %v2882_v29 = vor.u32 %v3947_v21, %v2879_v23  ;;  %v4035_v21 = vld [vmem:[%s6277_s1 + $0x474] sm:$0xf]  ;;  %v3279_v2 = vld [vmem:[%s6277_s1 + $0x4d8] sm:$0xf0] }
  0xa6   :  { %2170 = vmatpush.bf16.msrb.mxu2 %v2978_v30  ;;  %2136 = vmatmul.bf16.vlgmr.msra.gmra.mxu3 %v4527_v10  ;;  %v2887_v10 = vld [vmem:[%s6277_s1 + $0x1c8] sm:$0xf0]  ;;  %v2946_v30 = vor.u32 %v3963_v24, %v2943_v25  ;;  %v4051_v25 = vld [vmem:[%s6277_s1 + $0x4f4] sm:$0xf] }
  0xa7   :  { %2184 = vmatpush.bf16.msrb.mxu3 %v3042_v42  ;;  %v2890_v16 = vor.u32 %v3949_v58, %v2887_v10  ;;  %v3010_v42 = vor.u32 %v3979_v26, %v3007_v27  ;;  %v3941_v58 = vld [vmem:[%s6277_s1 + $0x184] sm:$0xf]  ;;  %v3295_v26 = vld [vmem:[%s6277_s1 + $0x4f8] sm:$0xf0]  ;;  %v2986_v27 = vor.u32 %v3973_v13, %v2983_v14  ;;  %v3995_v14 = vld [vmem:[%s6277_s1 + $0x334] sm:$0xf] }
  0xa8   :  { %2143 = vmatpush.bf16.msrb.mxu0 %v2842_v54  ;;  %v2810_v54 = vor.u32 %v3929_v33, %v2807_v34  ;;  %v3957_v10 = vld [vmem:[%s6277_s1 + $0x204] sm:$0xf]  ;;  %v3095_v34 = vld [vmem:[%s6277_s1 + $0x368] sm:$0xf0] }
  0xa9   :  { %2157 = vmatpush.bf16.msrb.mxu1 %v2906_v55  ;;  %v2874_v55 = vor.u32 %v3945_v37, %v2871_v48  ;;  %v2922_v24 = vor.u32 %v3957_v10, %v2919_v12  ;;  %v4001_v33 = vld [vmem:[%s6277_s1 + $0x364] sm:$0xf]  ;;  %v3159_v48 = vld [vmem:[%s6277_s1 + $0x3e8] sm:$0xf0] }
  0xaa   :  { %2171 = vmatpush.bf16.msrb.mxu2 %v2970_v56  ;;  %v2938_v56 = vor.u32 %v3961_v49, %v2935_v50  ;;  %v4017_v37 = vld [vmem:[%s6277_s1 + $0x3e4] sm:$0xf]  ;;  %v3223_v50 = vld [vmem:[%s6277_s1 + $0x468] sm:$0xf0] }
  0xab   :  { %2185 = vmatpush.bf16.msrb.mxu3 %v3034_v61  ;;  %v3002_v61 = vor.u32 %v3977_v52, %v2999_v53  ;;  %v4033_v49 = vld [vmem:[%s6277_s1 + $0x464] sm:$0xf]  ;;  %v3287_v53 = vld [vmem:[%s6277_s1 + $0x4e8] sm:$0xf0] }
  0xac   :  { %2144 = vmatpush.bf16.msrb.mxu0 %v2834_v4  ;;  %v2802_v4 = vor.u32 %v3927_v57, %v2799_v59  ;;  %v4049_v52 = vld [vmem:[%s6277_s1 + $0x4e4] sm:$0xf]  ;;  %v3999_v57 = vld [vmem:[%s6277_s1 + $0x354] sm:$0xf]  ;;  %v3087_v59 = vld [vmem:[%s6277_s1 + $0x358] sm:$0xf0] }
  0xad   :  { %2158 = vmatpush.bf16.msrb.mxu1 %v2898_v5  ;;  %v3925_v5 = vld [vmem:[%s6277_s1 + $0x104] sm:$0xf]  ;;  %v3090_v3 = vor.u32 %v3999_v57, %v3087_v59  ;;  %v3271_v10 = vld [vmem:[%s6277_s1 + $0x4c8] sm:$0xf0]  ;;  %v3119_v57 = vld [vmem:[%s6277_s1 + $0x398] sm:$0xf0] }
  0xae   :  { %2172 = vmatpush.bf16.msrb.mxu2 %v2962_v6  ;;  %v2791_v6 = vld [vmem:[%s6277_s1 + $0x108] sm:$0xf0]  ;;  %v4023_v59 = vld [vmem:[%s6277_s1 + $0x414] sm:$0xf] }
  0xaf   :  { %2186 = vmatpush.bf16.msrb.mxu3 %v3026_v9  ;;  %v2855_v9 = vld [vmem:[%s6277_s1 + $0x188] sm:$0xf0]  ;;  %v2794_v19 = vor.u32 %v3925_v5, %v2791_v6  ;;  %v3218_v5 = vor.u32 %v4031_v63, %v3215_v0  ;;  %v4013_v6 = vld [vmem:[%s6277_s1 + $0x3c4] sm:$0xf] }
  0xb0   :  { %2145 = vmatpush.bf16.msrb.mxu0 %v2826_v15  ;;  %v4003_v15 = vld [vmem:[%s6277_s1 + $0x374] sm:$0xf]  ;;  %v2858_v23 = vor.u32 %v3941_v58, %v2855_v9  ;;  %v3207_v58 = vld [vmem:[%s6277_s1 + $0x448] sm:$0xf0]  ;;  %v4045_v9 = vld [vmem:[%s6277_s1 + $0x4c4] sm:$0xf] }
  0xb1   :  { %2159 = vmatpush.bf16.msrb.mxu1 %v2890_v16  ;;  %v3103_v16 = vld [vmem:[%s6277_s1 + $0x378] sm:$0xf0]  ;;  %v3989_v0 = vld [vmem:[%s6277_s1 + $0x304] sm:$0xf] }
  0xb2   :  { %2173 = vmatpush.bf16.msrb.mxu2 %v2954_v18  ;;  %v4019_v18 = vld [vmem:[%s6277_s1 + $0x3f4] sm:$0xf] }
  0xb3   :  { %2187 = vmatpush.bf16.msrb.mxu3 %v3018_v22  ;;  %v3231_v22 = vld [vmem:[%s6277_s1 + $0x478] sm:$0xf0] }
  0xb4   :  { %2146 = vmatpush.bf16.msrb.mxu0 %v2818_v28  ;;  %v3106_v28 = vor.u32 %v4003_v15, %v3103_v16  ;;  %v3071_v15 = vld [vmem:[%s6277_s1 + $0x338] sm:$0xf0]  ;;  %v4011_v16 = vld [vmem:[%s6277_s1 + $0x3b4] sm:$0xf] }
  0xb5   :  { %2160 = vmatpush.bf16.msrb.mxu1 %v2882_v29  ;;  %v3170_v29 = vor.u32 %v4019_v18, %v3167_v20  ;;  %v3274_v18 = vor.u32 %v4045_v9, %v3271_v10  ;;  %v4027_v20 = vld [vmem:[%s6277_s1 + $0x434] sm:$0xf]  ;;  %v3359_v9 = vld [vmem:[%s6277_s1 + $0x578] sm:$0xf0] }
  0xb6   :  { %2174 = vmatpush.bf16.msrb.mxu2 %v2946_v30  ;;  %v3234_v30 = vor.u32 %v4035_v21, %v3231_v22  ;;  %v3199_v21 = vld [vmem:[%s6277_s1 + $0x438] sm:$0xf0]  ;;  %v4043_v22 = vld [vmem:[%s6277_s1 + $0x4b4] sm:$0xf] }
  0xb7   :  { %2188 = vmatpush.bf16.msrb.mxu3 %v3010_v42  ;;  %v3298_v42 = vor.u32 %v4051_v25, %v3295_v26  ;;  %v3202_v26 = vor.u32 %v4027_v20, %v3199_v21  ;;  %v4083_v10 = vld [vmem:[%s6277_s1 + $0x5f4] sm:$0xf]  ;;  %v3551_v20 = vld [vmem:[%s6277_s1 + $0x6f8] sm:$0xf0] }
  0xb8   :  { %2147 = vmatpush.bf16.msrb.mxu0 %v2810_v54  ;;  %v3098_v54 = vor.u32 %v4001_v33, %v3095_v34  ;;  %v3127_v33 = vld [vmem:[%s6277_s1 + $0x3a8] sm:$0xf0]  ;;  %v4025_v34 = vld [vmem:[%s6277_s1 + $0x424] sm:$0xf] }
  0xb9   :  { %2161 = vmatpush.bf16.msrb.mxu1 %v2874_v55  ;;  %v3162_v55 = vor.u32 %v4017_v37, %v3159_v48  ;;  %v3191_v37 = vld [vmem:[%s6277_s1 + $0x428] sm:$0xf0] }
  0xba   :  { %2175 = vmatpush.bf16.msrb.mxu2 %v2938_v56  ;;  %v3226_v56 = vor.u32 %v4033_v49, %v3223_v50  ;;  %v3255_v48 = vld [vmem:[%s6277_s1 + $0x4a8] sm:$0xf0] }
  0xbb   :  { %2189 = vmatpush.bf16.msrb.mxu3 %v3002_v61  ;;  %v3290_v61 = vor.u32 %v4049_v52, %v3287_v53  ;;  %v3194_v52 = vor.u32 %v4025_v34, %v3191_v37  ;;  %v3991_v53 = vld [vmem:[%s6277_s1 + $0x314] sm:$0xf]  ;;  %v4113_v34 = vld [vmem:[%s6277_s1 + $0x6e4] sm:$0xf]  ;;  %v3543_v37 = vld [vmem:[%s6277_s1 + $0x6e8] sm:$0xf0] }
  0xbc   :  { %2148 = vmatpush.bf16.msrb.mxu0 %v2802_v4  ;;  %v3154_v4 = vor.u32 %v4015_v60, %v3151_v62  ;;  %v3183_v60 = vld [vmem:[%s6277_s1 + $0x418] sm:$0xf0] }
  0xbd   :  { %2162 = vmatpush.bf16.msrb.mxu1 %v2866_v7  ;;  %v3143_v7 = vld [vmem:[%s6277_s1 + $0x3c8] sm:$0xf0]  ;;  %v3247_v62 = vld [vmem:[%s6277_s1 + $0x498] sm:$0xf0] }
  0xbe   :  { %2176 = vmatpush.bf16.msrb.mxu2 %v2930_v8  ;;  %v4029_v8 = vld [vmem:[%s6277_s1 + $0x444] sm:$0xf]  ;;  %v3146_v12 = vor.u32 %v4013_v6, %v3143_v7  ;;  %v3175_v6 = vld [vmem:[%s6277_s1 + $0x408] sm:$0xf0] }
  0xbf   :  { %2190 = vmatpush.bf16.msrb.mxu3 %v2994_v11  ;;  %v3210_v13 = vor.u32 %v4029_v8, %v3207_v58  ;;  %v3239_v7 = vld [vmem:[%s6277_s1 + $0x488] sm:$0xf0]  ;;  %v5748_v8 = vpop.f32.mrf.mxu0  ;;  %v4067_v58 = vld [vmem:[%s6277_s1 + $0x574] sm:$0xf] }
  0xc0   :  { %2149 = vmatpush.bf16.msrb.mxu0 %v2794_v19  ;;  %v3135_v19 = vld [vmem:[%s6277_s1 + $0x3b8] sm:$0xf0] }
  0xc1   :  { %2163 = vmatpush.bf16.msrb.mxu1 %v2858_v23  ;;  %v3263_v23 = vld [vmem:[%s6277_s1 + $0x4b8] sm:$0xf0]  ;;  %v3138_v25 = vor.u32 %v4011_v16, %v3135_v19  ;;  %v4115_v19 = vld [vmem:[%s6277_s1 + $0x6f4] sm:$0xf] }
  0xc2   :  { %2177 = vmatpush.bf16.msrb.mxu2 %v2922_v24  ;;  %v3074_v24 = vor.u32 %v3995_v14, %v3071_v15  ;;  %v4099_v14 = vld [vmem:[%s6277_s1 + $0x674] sm:$0xf]  ;;  %v3487_v15 = vld [vmem:[%s6277_s1 + $0x678] sm:$0xf0] }
  0xc3   :  { %2191 = vmatpush.bf16.msrb.mxu3 %v2986_v27  ;;  %2150 = vmatmul.bf16.vlgmr.msrb.gmra.mxu0 %v4505_v1  ;;  %v4047_v1 = vld [vmem:[%s6277_s1 + $0x4d4] sm:$0xf]  ;;  %v3993_v27 = vld [vmem:[%s6277_s1 + $0x324] sm:$0xf] }
  0xc4   :  { %2198 = vmatpush.bf16.msra.mxu0 %v3106_v28  ;;  %2164 = vmatmul.bf16.vlgmr.msrb.gmra.mxu1 %v4541_v17  ;;  %v3997_v17 = vld [vmem:[%s6277_s1 + $0x344] sm:$0xf]  ;;  %v3063_v28 = vld [vmem:[%s6277_s1 + $0x328] sm:$0xf0] }
  0xc5   :  { %2212 = vmatpush.bf16.msra.mxu1 %v3170_v29  ;;  %2178 = vmatmul.bf16.vlgmr.msrb.gmra.mxu2 %v4713_v39  ;;  %v3079_v39 = vld [vmem:[%s6277_s1 + $0x348] sm:$0xf0]  ;;  %v4009_v29 = vld [vmem:[%s6277_s1 + $0x3a4] sm:$0xf]  ;;  %v3066_v49 = vor.u32 %v3993_v27, %v3063_v28  ;;  %v3554_v28 = vor.u32 %v4115_v19, %v3551_v20  ;;  %v3519_v19 = vld [vmem:[%s6277_s1 + $0x6b8] sm:$0xf0] }
  0xc6   :  { %2226 = vmatpush.bf16.msra.mxu2 %v3234_v30  ;;  %2192 = vmatmul.bf16.vlgmr.msrb.gmra.mxu3 %v4726_v44  ;;  %v3282_v44 = vor.u32 %v4047_v1, %v3279_v2  ;;  %v3082_v11 = vor.u32 %v3997_v17, %v3079_v39  ;;  %v3266_v30 = vor.u32 %v4043_v22, %v3263_v23  ;;  %v3047_v1 = vld [vmem:[%s6277_s1 + $0x308] sm:$0xf0]  ;;  %v4021_v17 = vld [vmem:[%s6277_s1 + $0x404] sm:$0xf] }
  0xc7   :  { %2240 = vmatpush.bf16.msra.mxu3 %v3298_v42  ;;  %v4041_v42 = vld [vmem:[%s6277_s1 + $0x4a4] sm:$0xf]  ;;  %v3130_v50 = vor.u32 %v4009_v29, %v3127_v33  ;;  %v3362_v22 = vor.u32 %v4067_v58, %v3359_v9  ;;  %v3415_v29 = vld [vmem:[%s6277_s1 + $0x5e8] sm:$0xf0]  ;;  %v4059_v9 = vld [vmem:[%s6277_s1 + $0x534] sm:$0xf] }
  0xc8   :  { %2199 = vmatpush.bf16.msra.mxu0 %v3098_v54  ;;  %v3055_v54 = vld [vmem:[%s6277_s1 + $0x318] sm:$0xf0]  ;;  %v4081_v27 = vld [vmem:[%s6277_s1 + $0x5e4] sm:$0xf]  ;;  %v3479_v33 = vld [vmem:[%s6277_s1 + $0x668] sm:$0xf0] }
  0xc9   :  { %2213 = vmatpush.bf16.msra.mxu1 %v3162_v55  ;;  %v4007_v55 = vld [vmem:[%s6277_s1 + $0x394] sm:$0xf]  ;;  %v3058_v63 = vor.u32 %v3991_v53, %v3055_v54  ;;  %v5809_v54 = vpop.f32.mrf.mxu2 }
  0xca   :  { %2227 = vmatpush.bf16.msra.mxu2 %v3226_v56  ;;  %v3258_v56 = vor.u32 %v4041_v42, %v3255_v48  ;;  %v3122_v2 = vor.u32 %v4007_v55, %v3119_v57  ;;  %v3418_v48 = vor.u32 %v4081_v27, %v3415_v29  ;;  %v4079_v53 = vld [vmem:[%s6277_s1 + $0x5d4] sm:$0xf]  ;;  %v3546_v55 = vor.u32 %v4113_v34, %v3543_v37  ;;  %v4073_v27 = vld [vmem:[%s6277_s1 + $0x5a4] sm:$0xf]  ;;  %v3447_v34 = vld [vmem:[%s6277_s1 + $0x628] sm:$0xf0] }
  0xcb   :  { %2241 = vmatpush.bf16.msra.mxu3 %v3290_v61  ;;  %v4039_v61 = vld [vmem:[%s6277_s1 + $0x494] sm:$0xf]  ;;  %v4105_v37 = vld [vmem:[%s6277_s1 + $0x6a4] sm:$0xf] }
  0xcc   :  { %2200 = vmatpush.bf16.msra.mxu0 %v3090_v3  ;;  %v3186_v3 = vor.u32 %v4023_v59, %v3183_v60  ;;  %v3250_v39 = vor.u32 %v4039_v61, %v3247_v62  ;;  %v4095_v57 = vld [vmem:[%s6277_s1 + $0x654] sm:$0xf]  ;;  %v3471_v59 = vld [vmem:[%s6277_s1 + $0x658] sm:$0xf0]  ;;  %v5821_v60 = vpop.f32.mrf.mxu0 }
  0xcd   :  { %2214 = vmatpush.bf16.msra.mxu1 %v3154_v4  ;;  %v4005_v4 = vld [vmem:[%s6277_s1 + $0x384] sm:$0xf]  ;;  %v3535_v61 = vld [vmem:[%s6277_s1 + $0x6d8] sm:$0xf0] }
  0xce   :  { %2228 = vmatpush.bf16.msra.mxu2 %v3218_v5  ;;  %v3111_v5 = vld [vmem:[%s6277_s1 + $0x388] sm:$0xf0] }
  0xcf   :  { %2242 = vmatpush.bf16.msra.mxu3 %v3282_v44  ;;  %v4037_v44 = vld [vmem:[%s6277_s1 + $0x484] sm:$0xf]  ;;  %v3114_v16 = vor.u32 %v4005_v4, %v3111_v5  ;;  %v3399_v4 = vld [vmem:[%s6277_s1 + $0x5c8] sm:$0xf0] }
  0xd0   :  { %2201 = vmatpush.bf16.msra.mxu0 %v3082_v11  ;;  %v5759_v11 = vpop.f32.mrf.mxu1  ;;  %v3242_v21 = vor.u32 %v4037_v44, %v3239_v7  ;;  %v4093_v5 = vld [vmem:[%s6277_s1 + $0x644] sm:$0xf] }
  0xd1   :  { %2215 = vmatpush.bf16.msra.mxu1 %v3146_v12  ;;  %v3050_v12 = vor.u32 %v3989_v0, %v3047_v1  ;;  %v3335_v1 = vld [vmem:[%s6277_s1 + $0x548] sm:$0xf0]  ;;  %v5884_v20 = vpop.f32.mrf.mxu2 }
  0xd2   :  { %2229 = vmatpush.bf16.msra.mxu2 %v3210_v13  ;;  %v3423_v13 = vld [vmem:[%s6277_s1 + $0x5f8] sm:$0xf0] }
  0xd3   :  { %2243 = vmatpush.bf16.msra.mxu3 %v3274_v18  ;;  %v3178_v18 = vor.u32 %v4021_v17, %v3175_v6  ;;  %v3426_v23 = vor.u32 %v4083_v10, %v3423_v13  ;;  %v3463_v17 = vld [vmem:[%s6277_s1 + $0x648] sm:$0xf0]  ;;  %v3327_v10 = vld [vmem:[%s6277_s1 + $0x538] sm:$0xf0] }
  0xd4   :  { %2202 = vmatpush.bf16.msra.mxu0 %v3074_v24  ;;  %v3490_v24 = vor.u32 %v4099_v14, %v3487_v15  ;;  %v3527_v6 = vld [vmem:[%s6277_s1 + $0x6c8] sm:$0xf0]  ;;  %v3466_v58 = vor.u32 %v4093_v5, %v3463_v17  ;;  %v3391_v14 = vld [vmem:[%s6277_s1 + $0x5b8] sm:$0xf0]  ;;  %v4091_v15 = vld [vmem:[%s6277_s1 + $0x634] sm:$0xf] }
  0xd5   :  { %2216 = vmatpush.bf16.msra.mxu1 %v3138_v25  ;;  %v4065_v25 = vld [vmem:[%s6277_s1 + $0x564] sm:$0xf] }
  0xd6   :  { %2230 = vmatpush.bf16.msra.mxu2 %v3202_v26  ;;  %v3351_v26 = vld [vmem:[%s6277_s1 + $0x568] sm:$0xf0]  ;;  %v4069_v17 = vld [vmem:[%s6277_s1 + $0x584] sm:$0xf] }
  0xd7   :  { %2244 = vmatpush.bf16.msra.mxu3 %v3266_v30  ;;  %v4097_v30 = vld [vmem:[%s6277_s1 + $0x664] sm:$0xf]  ;;  %v3354_v42 = vor.u32 %v4065_v25, %v3351_v26  ;;  %v3319_v26 = vld [vmem:[%s6277_s1 + $0x528] sm:$0xf0] }
  0xd8   :  { %2203 = vmatpush.bf16.msra.mxu0 %v3066_v49  ;;  %v3482_v49 = vor.u32 %v4097_v30, %v3479_v33  ;;  %v5831_v62 = vpop.f32.mrf.mxu1  ;;  %v4057_v25 = vld [vmem:[%s6277_s1 + $0x524] sm:$0xf]  ;;  %v3383_v30 = vld [vmem:[%s6277_s1 + $0x5a8] sm:$0xf0] }
  0xd9   :  { %2217 = vmatpush.bf16.msra.mxu1 %v3130_v50  ;;  %v4063_v50 = vld [vmem:[%s6277_s1 + $0x554] sm:$0xf]  ;;  %v4089_v33 = vld [vmem:[%s6277_s1 + $0x624] sm:$0xf] }
  0xda   :  { %2231 = vmatpush.bf16.msra.mxu2 %v3194_v52  ;;  %v3343_v52 = vld [vmem:[%s6277_s1 + $0x558] sm:$0xf0] }
  0xdb   :  { %2245 = vmatpush.bf16.msra.mxu3 %v3258_v56  ;;  %v3407_v56 = vld [vmem:[%s6277_s1 + $0x5d8] sm:$0xf0] }
  0xdc   :  { %2204 = vmatpush.bf16.msra.mxu0 %v3058_v63  ;;  %v3346_v63 = vor.u32 %v4063_v50, %v3343_v52  ;;  %v3410_v0 = vor.u32 %v4079_v53, %v3407_v56  ;;  %v3322_v50 = vor.u32 %v4057_v25, %v3319_v26  ;;  %v3386_v52 = vor.u32 %v4073_v27, %v3383_v30  ;;  %v3311_v56 = vld [vmem:[%s6277_s1 + $0x518] sm:$0xf0]  ;;  %v4179_v27 = vld [vmem:[%s6277_s1 + $0x8f4] sm:$0xf] }
  0xdd   :  { %2218 = vmatpush.bf16.msra.mxu1 %v3122_v2  ;;  %v4077_v2 = vld [vmem:[%s6277_s1 + $0x5c4] sm:$0xf]  ;;  %v3450_v53 = vor.u32 %v4089_v33, %v3447_v34 }
  0xde   :  { %2232 = vmatpush.bf16.msra.mxu2 %v3186_v3  ;;  %v5843_v3 = vpop.f32.mrf.mxu3  ;;  %v3402_v7 = vor.u32 %v4077_v2, %v3399_v4  ;;  %v4053_v2 = vld [vmem:[%s6277_s1 + $0x504] sm:$0xf] }
  0xdf   :  { %2246 = vmatpush.bf16.msra.mxu3 %v3250_v39  ;;  %v4109_v39 = vld [vmem:[%s6277_s1 + $0x6c4] sm:$0xf] }
  0xe0   :  { %2205 = vmatpush.bf16.msra.mxu0 %v3050_v12  ;;  %v4075_v12 = vld [vmem:[%s6277_s1 + $0x5b4] sm:$0xf]  ;;  %v3530_v13 = vor.u32 %v4109_v39, %v3527_v6  ;;  %v3367_v39 = vld [vmem:[%s6277_s1 + $0x588] sm:$0xf0]  ;;  %v4085_v6 = vld [vmem:[%s6277_s1 + $0x604] sm:$0xf] }
  0xe1   :  { %2219 = vmatpush.bf16.msra.mxu1 %v3114_v16  ;;  %v3455_v16 = vld [vmem:[%s6277_s1 + $0x638] sm:$0xf0] }
  0xe2   :  { %2233 = vmatpush.bf16.msra.mxu2 %v3178_v18  ;;  %v4107_v18 = vld [vmem:[%s6277_s1 + $0x6b4] sm:$0xf] }
  0xe3   :  { %2247 = vmatpush.bf16.msra.mxu3 %v3242_v21  ;;  %2206 = vmatmul.bf16.vlgmr.msra.gmra.mxu0 %v4724_v43  ;;  %v4111_v43 = vld [vmem:[%s6277_s1 + $0x6d4] sm:$0xf]  ;;  %v3330_v21 = vor.u32 %v4059_v9, %v3327_v10  ;;  %v3522_v29 = vor.u32 %v4107_v18, %v3519_v19  ;;  %v4101_v9 = vld [vmem:[%s6277_s1 + $0x684] sm:$0xf]  ;;  %v3495_v10 = vld [vmem:[%s6277_s1 + $0x688] sm:$0xf0] }
  0xe4   :  { %2254 = vmatpush.bf16.msrb.mxu0 %v3362_v22  ;;  %2220 = vmatmul.bf16.vlgmr.msra.gmra.mxu1 %v4734_v47  ;;  %v4061_v47 = vld [vmem:[%s6277_s1 + $0x544] sm:$0xf]  ;;  %v5886_v22 = vpop.f32.mrf.mxu0  ;;  %v3498_v33 = vor.u32 %v4101_v9, %v3495_v10  ;;  %v3791_v9 = vld [vmem:[%s6277_s1 + $0x8d8] sm:$0xf0] }
  0xe5   :  { %2268 = vmatpush.bf16.msrb.mxu1 %v3426_v23  ;;  %2234 = vmatmul.bf16.vlgmr.msra.gmra.mxu2 %v4941_v31  ;;  %v3474_v31 = vor.u32 %v4095_v57, %v3471_v59  ;;  %v3338_v44 = vor.u32 %v4061_v47, %v3335_v1  ;;  %v3394_v23 = vor.u32 %v4075_v12, %v3391_v14  ;;  %v4071_v57 = vld [vmem:[%s6277_s1 + $0x594] sm:$0xf]  ;;  %v3615_v14 = vld [vmem:[%s6277_s1 + $0x778] sm:$0xf0] }
  0xe6   :  { %2282 = vmatpush.bf16.msrb.mxu2 %v3490_v24  ;;  %2248 = vmatmul.bf16.vlgmr.msra.gmra.mxu3 %v4954_v36  ;;  %v3538_v36 = vor.u32 %v4111_v43, %v3535_v61  ;;  %v3458_v24 = vor.u32 %v4091_v15, %v3455_v16  ;;  %v3375_v43 = vld [vmem:[%s6277_s1 + $0x598] sm:$0xf0]  ;;  %v4087_v61 = vld [vmem:[%s6277_s1 + $0x614] sm:$0xf] }
  0xe7   :  { %2296 = vmatpush.bf16.msrb.mxu3 %v3554_v28  ;;  %v5897_v28 = vpop.f32.mrf.mxu1  ;;  %v3378_v4 = vor.u32 %v4071_v57, %v3375_v43  ;;  %v4147_v15 = vld [vmem:[%s6277_s1 + $0x7f4] sm:$0xf]  ;;  %v3735_v57 = vld [vmem:[%s6277_s1 + $0x868] sm:$0xf0] }
  0xe8   :  { %2255 = vmatpush.bf16.msrb.mxu0 %v3354_v42  ;;  %v3511_v42 = vld [vmem:[%s6277_s1 + $0x6a8] sm:$0xf0] }
  0xe9   :  { %2269 = vmatpush.bf16.msrb.mxu1 %v3418_v48  ;;  %v5917_v48 = vld [vmem:[%s6279_s2] sm:$0x3]  ;;  %v3514_v59 = vor.u32 %v4105_v37, %v3511_v42 }
  0xea   :  { %2283 = vmatpush.bf16.msrb.mxu2 %v3482_v49  ;;  %v5919_v49 = vpop.f32.mrf.mxu3  ;;  %v328_v47 = vperm.slane %v5917_v48, 0 }
  0xeb   :  { %2297 = vmatpush.bf16.msrb.mxu3 %v3546_v55  ;;  %v4055_v55 = vld [vmem:[%s6277_s1 + $0x514] sm:$0xf] }
  0xec   :  { %2256 = vmatpush.bf16.msrb.mxu0 %v3346_v63  ;;  %v3439_v63 = vld [vmem:[%s6277_s1 + $0x618] sm:$0xf0]  ;;  %v3314_v1 = vor.u32 %v4055_v55, %v3311_v56  ;;  %v5972_v12 = vpop.f32.mrf.mxu0  ;;  %v1872_v16 = vadd.f32 %v5748_v8, %v328_v47  ;;  %v1874_v25 = vadd.f32 %v5821_v60, %v328_v47  ;;  %v3370_v8 = vor.u32 %v4069_v17, %v3367_v39  ;;  %v4129_v60 = vld [vmem:[%s6277_s1 + $0x764] sm:$0xf]  ;;  %v3671_v55 = vld [vmem:[%s6277_s1 + $0x7e8] sm:$0xf0] }
  0xed   :  { %2270 = vmatpush.bf16.msrb.mxu1 %v3410_v0  ;;  %v4103_v0 = vld [vmem:[%s6277_s1 + $0x694] sm:$0xf]  ;;  %v3442_v5 = vor.u32 %v4087_v61, %v3439_v63  ;;  %v4161_v56 = vld [vmem:[%s6277_s1 + $0x864] sm:$0xf]  ;;  %v3799_v63 = vld [vmem:[%s6277_s1 + $0x8e8] sm:$0xf0] }
  0xee   :  { %2284 = vmatpush.bf16.msrb.mxu2 %v3474_v31  ;;  %v3503_v31 = vld [vmem:[%s6277_s1 + $0x698] sm:$0xf0]  ;;  %v1888_v43 = vadd.f32 %v5831_v62, %v1874_v25  ;;  %v4177_v61 = vld [vmem:[%s6277_s1 + $0x8e4] sm:$0xf]  ;;  %v3738_v47 = vor.u32 %v4161_v56, %v3735_v57  ;;  %v4127_v62 = vld [vmem:[%s6277_s1 + $0x754] sm:$0xf] }
  0xef   :  { %2298 = vmatpush.bf16.msrb.mxu3 %v3538_v36  ;;  %v3303_v36 = vld [vmem:[%s6277_s1 + $0x508] sm:$0xf0]  ;;  %v5984_v18 = vpop.f32.mrf.mxu1  ;;  %v3663_v17 = vld [vmem:[%s6277_s1 + $0x7d8] sm:$0xf0]  ;;  %v4159_v39 = vld [vmem:[%s6277_s1 + $0x854] sm:$0xf] }
  0xf0   :  { %2257 = vmatpush.bf16.msrb.mxu0 %v3338_v44  ;;  %v5961_v44 = vpop.f32.mrf.mxu2  ;;  %v3306_v19 = vor.u32 %v4053_v2, %v3303_v36  ;;  %v4143_v2 = vld [vmem:[%s6277_s1 + $0x7d4] sm:$0xf]  ;;  %v3783_v25 = vld [vmem:[%s6277_s1 + $0x8c8] sm:$0xf0]  ;;  %v3775_v56 = vld [vmem:[%s6277_s1 + $0x8b8] sm:$0xf0] }
  0xf1   :  { %2271 = vmatpush.bf16.msrb.mxu1 %v3402_v7  ;;  %v3506_v7 = vor.u32 %v4103_v0, %v3503_v31 }
  0xf2   :  { %2285 = vmatpush.bf16.msrb.mxu2 %v3466_v58  ;;  %v3431_v58 = vld [vmem:[%s6277_s1 + $0x608] sm:$0xf0]  ;;  %v6002_v30 = vpop.f32.mrf.mxu3 }
  0xf3   :  { %2299 = vmatpush.bf16.msrb.mxu3 %v3530_v13  ;;  %v4131_v13 = vld [vmem:[%s6277_s1 + $0x774] sm:$0xf]  ;;  %v3434_v26 = vor.u32 %v4085_v6, %v3431_v58  ;;  %v3727_v6 = vld [vmem:[%s6277_s1 + $0x858] sm:$0xf0]  ;;  %v1902_v58 = vadd.f32 %v5884_v20, %v1888_v43 }
  0xf4   :  { %2258 = vmatpush.bf16.msrb.mxu0 %v3330_v21  ;;  %v3679_v21 = vld [vmem:[%s6277_s1 + $0x7f8] sm:$0xf0]  ;;  %v3618_v34 = vor.u32 %v4131_v13, %v3615_v14  ;;  %v6030_v31 = vpop.f32.mrf.mxu0  ;;  %v3730_v20 = vor.u32 %v4159_v39, %v3727_v6  ;;  %v4141_v13 = vld [vmem:[%s6277_s1 + $0x7c4] sm:$0xf]  ;;  %v3767_v39 = vld [vmem:[%s6277_s1 + $0x8a8] sm:$0xf0] }
  0xf5   :  { %2272 = vmatpush.bf16.msrb.mxu1 %v3394_v23  ;;  %v4163_v23 = vld [vmem:[%s6277_s1 + $0x874] sm:$0xf]  ;;  %v3682_v37 = vor.u32 %v4147_v15, %v3679_v21  ;;  %v3655_v15 = vld [vmem:[%s6277_s1 + $0x7c8] sm:$0xf0] }
  0xf6   :  { %2286 = vmatpush.bf16.msrb.mxu2 %v3458_v24  ;;  %v3743_v24 = vld [vmem:[%s6277_s1 + $0x878] sm:$0xf0] }
  0xf7   :  { %2300 = vmatpush.bf16.msrb.mxu3 %v3522_v29  ;;  %v3807_v29 = vld [vmem:[%s6277_s1 + $0x8f8] sm:$0xf0]  ;;  %v3746_v42 = vor.u32 %v4163_v23, %v3743_v24  ;;  %v1916_v23 = vadd.f32 %v5919_v49, %v1902_v58  ;;  %v4173_v24 = vld [vmem:[%s6277_s1 + $0x8c4] sm:$0xf] }
  0xf8   :  { %2259 = vmatpush.bf16.msrb.mxu0 %v3322_v50  ;;  %v3607_v50 = vld [vmem:[%s6277_s1 + $0x768] sm:$0xf0]  ;;  %v6041_v36 = vpop.f32.mrf.mxu2  ;;  %v3583_v49 = vld [vmem:[%s6277_s1 + $0x738] sm:$0xf0] }
  0xf9   :  { %2273 = vmatpush.bf16.msrb.mxu1 %v3386_v52  ;;  %v4145_v52 = vld [vmem:[%s6277_s1 + $0x7e4] sm:$0xf]  ;;  %v3610_v0 = vor.u32 %v4129_v60, %v3607_v50  ;;  %v3711_v60 = vld [vmem:[%s6277_s1 + $0x838] sm:$0xf0] }
  0xfa   :  { %2287 = vmatpush.bf16.msrb.mxu2 %v3450_v53  ;;  %v3810_v53 = vor.u32 %v4179_v27, %v3807_v29  ;;  %v6075_v14 = vpop.f32.mrf.mxu3  ;;  %v4139_v29 = vld [vmem:[%s6277_s1 + $0x7b4] sm:$0xf] }
  0xfb   :  { %2301 = vmatpush.bf16.msrb.mxu3 %v3514_v59  ;;  %v1886_v59 = vadd.f32 %v5759_v11, %v1872_v16  ;;  %v3674_v11 = vor.u32 %v4145_v52, %v3671_v55  ;;  %v4157_v16 = vld [vmem:[%s6277_s1 + $0x844] sm:$0xf]  ;;  %v1930_v52 = vadd.f32 %v5972_v12, %v1916_v23  ;;  %v4171_v55 = vld [vmem:[%s6277_s1 + $0x8b4] sm:$0xf]  ;;  %v3575_v12 = vld [vmem:[%s6277_s1 + $0x728] sm:$0xf0] }
  0xfc   :  { %2260 = vmatpush.bf16.msrb.mxu0 %v3314_v1  ;;  %v3599_v1 = vld [vmem:[%s6277_s1 + $0x758] sm:$0xf0] }
  0xfd   :  { %2274 = vmatpush.bf16.msrb.mxu1 %v3378_v4  ;;  %v6043_v4 = vpop.f32.mrf.mxu1  ;;  %v3602_v10 = vor.u32 %v4127_v62, %v3599_v1  ;;  %v4153_v62 = vld [vmem:[%s6277_s1 + $0x824] sm:$0xf]  ;;  %v3703_v1 = vld [vmem:[%s6277_s1 + $0x828] sm:$0xf0] }
  0xfe   :  { %2288 = vmatpush.bf16.msrb.mxu2 %v3442_v5  ;;  %v3802_v5 = vor.u32 %v4177_v61, %v3799_v63  ;;  %v4137_v63 = vld [vmem:[%s6277_s1 + $0x7a4] sm:$0xf] }
  0xff   :  { %2302 = vmatpush.bf16.msrb.mxu3 %v3506_v7  ;;  %v1900_v7 = vadd.f32 %v5809_v54, %v1886_v59  ;;  %v3666_v54 = vor.u32 %v4143_v2, %v3663_v17  ;;  %v4169_v17 = vld [vmem:[%s6277_s1 + $0x8a4] sm:$0xf] }
 0x100   :  { %2261 = vmatpush.bf16.msrb.mxu0 %v3306_v19  ;;  %v3719_v19 = vld [vmem:[%s6277_s1 + $0x848] sm:$0xf0] }
 0x101   :  { %2275 = vmatpush.bf16.msrb.mxu1 %v3370_v8  ;;  %v1914_v21 = vadd.f32 %v5843_v3, %v1900_v7  ;;  %v3722_v27 = vor.u32 %v4157_v16, %v3719_v19  ;;  %v4123_v3 = vld [vmem:[%s6277_s1 + $0x734] sm:$0xf] }
 0x102   :  { %2289 = vmatpush.bf16.msrb.mxu2 %v3434_v26  ;;  %v3658_v26 = vor.u32 %v4141_v13, %v3655_v15  ;;  %v3586_v59 = vor.u32 %v4123_v3, %v3583_v49  ;;  %v4167_v13 = vld [vmem:[%s6277_s1 + $0x894] sm:$0xf]  ;;  %v3687_v3 = vld [vmem:[%s6277_s1 + $0x808] sm:$0xf0] }
 0x103   :  { %2303 = vmatpush.bf16.msrb.mxu3 %v3498_v33  ;;  %2262 = vmatmul.bf16.vlgmr.msrb.gmra.mxu0 %v4952_v35  ;;  %v4175_v35 = vld [vmem:[%s6277_s1 + $0x8d4] sm:$0xf]  ;;  %v6103_v33 = vpop.f32.mrf.mxu2  ;;  %v1928_v50 = vadd.f32 %v5886_v22, %v1914_v21  ;;  %v4121_v22 = vld [vmem:[%s6277_s1 + $0x724] sm:$0xf] }
 0x104   :  { %2310 = vmatpush.bf16.msra.mxu0 %v3618_v34  ;;  %2276 = vmatmul.bf16.vlgmr.msrb.gmra.mxu1 %v4962_v40  ;;  %v4125_v40 = vld [vmem:[%s6277_s1 + $0x744] sm:$0xf]  ;;  %v3786_v34 = vor.u32 %v4173_v24, %v3783_v25  ;;  %v3578_v6 = vor.u32 %v4121_v22, %v3575_v12  ;;  %v3559_v25 = vld [vmem:[%s6277_s1 + $0x708] sm:$0xf0]  ;;  %v4187_v12 = vld [vmem:[%s6280_s3 + $0x30] sm:$0xff] }
 0x105   :  { %2324 = vmatpush.bf16.msra.mxu1 %v3682_v37  ;;  %2290 = vmatmul.bf16.vlgmr.msrb.gmra.mxu2 %v5169_v32  ;;  %v3591_v32 = vld [vmem:[%s6277_s1 + $0x748] sm:$0xf0]  ;;  %v3647_v37 = vld [vmem:[%s6277_s1 + $0x7b8] sm:$0xf0]  ;;  %v6122_v57 = vpop.f32.mrf.mxu1  ;;  %v1942_v2 = vadd.f32 %v5897_v28, %v1928_v50  ;;  %v4119_v28 = vld [vmem:[%s6277_s1 + $0x714] sm:$0xf] }
 0x106   :  { %2338 = vmatpush.bf16.msra.mxu2 %v3746_v42  ;;  %2304 = vmatmul.bf16.vlgmr.msrb.gmra.mxu3 %v5182_v41  ;;  %v3794_v41 = vor.u32 %v4175_v35, %v3791_v9  ;;  %v3594_v8 = vor.u32 %v4125_v40, %v3591_v32  ;;  %v4155_v42 = vld [vmem:[%s6277_s1 + $0x834] sm:$0xf]  ;;  %v3650_v43 = vor.u32 %v4139_v29, %v3647_v37  ;;  %v3751_v37 = vld [vmem:[%s6277_s1 + $0x888] sm:$0xf0] }
 0x107   :  { %2352 = vmatpush.bf16.msra.mxu3 %v3810_v53  ;;  %v1985_v53 = vpop.f32.mrf.mxu0  ;;  %v3714_v61 = vor.u32 %v4155_v42, %v3711_v60  ;;  %v3706_v35 = vor.u32 %v4153_v62, %v3703_v1  ;;  %v4135_v9 = vld [vmem:[%s6277_s1 + $0x794] sm:$0xf]  ;;  %v1956_v40 = vadd.f32 %v5961_v44, %v1942_v2  ;;  %v4117_v44 = vld [vmem:[%s6277_s1 + $0x704] sm:$0xf] }
 0x108   :  { %2311 = vmatpush.bf16.msra.mxu0 %v3610_v0  ;;  %v6133_v0 = vpop.f32.mrf.mxu3  ;;  %v3562_v60 = vor.u32 %v4117_v44, %v3559_v25  ;;  %v329_v25 = vperm.slane %v5917_v48, 1 }
 0x109   :  { %2325 = vmatpush.bf16.msra.mxu1 %v3674_v11  ;;  %v3778_v11 = vor.u32 %v4171_v55, %v3775_v56  ;;  %v1970_v49 = vadd.f32 %v6002_v30, %v1956_v40 }
 0x10a   :  { %2339 = vmatpush.bf16.msra.mxu2 %v3738_v47  ;;  %v3639_v47 = vld [vmem:[%s6277_s1 + $0x7a8] sm:$0xf0] }
 0x10b   :  { %2353 = vmatpush.bf16.msra.mxu3 %v3802_v5  ;;  %v1944_v5 = vadd.f32 %v5984_v18, %v1930_v52  ;;  %v3642_v58 = vor.u32 %v4137_v63, %v3639_v47  ;;  %v3567_v18 = vld [vmem:[%s6277_s1 + $0x718] sm:$0xf0]  ;;  %v2013_v15 = vpop.f32.mrf.mxu2  ;;  %v1984_v50 = vadd.f32 %v6030_v31, %v1970_v49 }
 0x10c   :  { %2312 = vmatpush.bf16.msra.mxu0 %v3602_v10  ;;  %v3770_v10 = vor.u32 %v4169_v17, %v3767_v39  ;;  %v3570_v19 = vor.u32 %v4119_v28, %v3567_v18  ;;  %v4184_v39 = vld [vmem:[%s6280_s3 + $0x18] sm:$0xff] }
 0x10d   :  { %2326 = vmatpush.bf16.msra.mxu1 %v3666_v54  ;;  %v1958_v7 = vadd.f32 %v6041_v36, %v1944_v5  ;;  %v3631_v36 = vld [vmem:[%s6277_s1 + $0x798] sm:$0xf0]  ;;  %v4151_v54 = vld [vmem:[%s6277_s1 + $0x814] sm:$0xf]  ;;  %v2053_v16 = vpop.f32.mrf.mxu1 }
 0x10e   :  { %2340 = vmatpush.bf16.msra.mxu2 %v3730_v20  ;;  %v3695_v20 = vld [vmem:[%s6277_s1 + $0x818] sm:$0xf0]  ;;  %v3634_v23 = vor.u32 %v4135_v9, %v3631_v36 }
 0x10f   :  { %2354 = vmatpush.bf16.msra.mxu3 %v3794_v41  ;;  %v2039_v32 = vpop.f32.mrf.mxu0  ;;  %v3759_v41 = vld [vmem:[%s6277_s1 + $0x898] sm:$0xf0]  ;;  %v1972_v21 = vadd.f32 %v6075_v14, %v1958_v7  ;;  %v3698_v24 = vor.u32 %v4151_v54, %v3695_v20  ;;  %v3623_v14 = vld [vmem:[%s6277_s1 + $0x788] sm:$0xf0]  ;;  %v4181_v20 = vld [vmem:[%s6280_s3] sm:$0xff] }
 0x110   :  { %2313 = vmatpush.bf16.msra.mxu0 %v3594_v8  ;;  %v4133_v8 = vld [vmem:[%s6277_s1 + $0x784] sm:$0xf]  ;;  %v2027_v42 = vpop.f32.mrf.mxu3 }
 0x111   :  { %2327 = vmatpush.bf16.msra.mxu1 %v3658_v26  ;;  %v3762_v26 = vor.u32 %v4167_v13, %v3759_v41  ;;  %v1986_v29 = vadd.f32 %v1985_v53, %v1972_v21  ;;  %v3626_v52 = vor.u32 %v4133_v8, %v3623_v14  ;;  %v4188_v53 = vld [vmem:[%s6280_s3 + $0x38] sm:$0xff] }
 0x112   :  { %2341 = vmatpush.bf16.msra.mxu2 %v3722_v27  ;;  %v4149_v27 = vld [vmem:[%s6277_s1 + $0x804] sm:$0xf] }
 0x113   :  { %2355 = vmatpush.bf16.msra.mxu3 %v3786_v34  ;;  %v4165_v34 = vld [vmem:[%s6277_s1 + $0x884] sm:$0xf]  ;;  %v3690_v55 = vor.u32 %v4149_v27, %v3687_v3  ;;  %v2000_v56 = vadd.f32 %v6122_v57, %v1986_v29  ;;  %v4195_v27 = vld [vmem:[%s6280_s3 + $0x70] sm:$0xff] }
 0x114   :  { %2314 = vmatpush.bf16.msra.mxu0 %v3586_v59  ;;  %v3754_v30 = vor.u32 %v4165_v34, %v3751_v37  ;;  %v2067_v59 = vpop.f32.mrf.mxu2 }
 0x115   :  { %2328 = vmatpush.bf16.msra.mxu1 %v3650_v43  ;;  %v1998_v43 = vadd.f32 %v6043_v4, %v1984_v50  ;;  %v2055_v31 = vpop.f32.mrf.mxu1  ;;  %v4194_v50 = vld [vmem:[%s6280_s3 + $0x68] sm:$0xff] }
 0x116   :  { %2342 = vmatpush.bf16.msra.mxu2 %v3714_v61  ;;  %v2014_v61 = vadd.f32 %v2013_v15, %v2000_v56 }
 0x117   :  { %2356 = vmatpush.bf16.msra.mxu3 %v3778_v11  ;;  %v2041_v22 = vpop.f32.mrf.mxu0  ;;  %v2012_v63 = vadd.f32 %v6103_v33, %v1998_v43  ;;  %v4186_v11 = vld [vmem:[%s6280_s3 + $0x28] sm:$0xff] }
 0x118   :  { %2315 = vmatpush.bf16.msra.mxu0 %v3578_v6  ;;  %v2081_v57 = vpop.f32.mrf.mxu3  ;;  %v2028_v4 = vadd.f32 %v2027_v42, %v2014_v61 }
 0x119   :  { %2329 = vmatpush.bf16.msra.mxu1 %v3642_v58  ;;  %v2026_v47 = vadd.f32 %v6133_v0, %v2012_v63  ;;  %v4183_v58 = vld [vmem:[%s6280_s3 + $0x10] sm:$0xff] }
 0x11a   :  { %2343 = vmatpush.bf16.msra.mxu2 %v3706_v35  ;;  %v2042_v62 = vadd.f32 %v2041_v22, %v2028_v4  ;;  %v4192_v22 = vld [vmem:[%s6280_s3 + $0x58] sm:$0xff]  ;;  %v4191_v4 = vld [vmem:[%s6280_s3 + $0x50] sm:$0xff] }
 0x11b   :  { %2357 = vmatpush.bf16.msra.mxu3 %v3770_v10  ;;  %v2040_v1 = vadd.f32 %v2039_v32, %v2026_v47  ;;  %v4182_v10 = vld [vmem:[%s6280_s3 + $0x8] sm:$0xff] }
 0x11c   :  { %2316 = vmatpush.bf16.msra.mxu0 %v3570_v19  ;;  %v2069_v2 = vpop.f32.mrf.mxu2 }
 0x11d   :  { %2330 = vmatpush.bf16.msra.mxu1 %v3634_v23  ;;  %v2054_v5 = vadd.f32 %v2053_v16, %v2040_v1 }
 0x11e   :  { %2344 = vmatpush.bf16.msra.mxu2 %v3698_v24 }
 0x11f   :  { %2358 = vmatpush.bf16.msra.mxu3 %v3762_v26  ;;  %v2068_v0 = vadd.f32 %v2067_v59, %v2054_v5  ;;  %v4196_v26 = vld [vmem:[%s6280_s3 + $0x78] sm:$0xff] }
 0x120   :  { %2317 = vmatpush.bf16.msra.mxu0 %v3562_v60  ;;  %v2095_v33 = vpop.f32.mrf.mxu0  ;;  %v2083_v17 = vpop.f32.mrf.mxu3 }
 0x121   :  { %2331 = vmatpush.bf16.msra.mxu1 %v3626_v52  ;;  %v2082_v35 = vadd.f32 %v2081_v57, %v2068_v0 }
 0x122   :  { %2345 = vmatpush.bf16.msra.mxu2 %v3690_v55 }
 0x123   :  { %2359 = vmatpush.bf16.msra.mxu3 %v3754_v30  ;;  %2318 = vmatmul.bf16.vlgmr.msra.gmra.mxu0 %v5180_v38  ;;  %v4185_v38 = vld [vmem:[%s6280_s3 + $0x20] sm:$0xff]  ;;  %v2096_v9 = vadd.f32 %v2095_v33, %v2082_v35 }
 0x124   :  { %2504 = vmatpush.bf16.msrb.mxu0 %v4188_v53  ;;  %2332 = vmatmul.bf16.vlgmr.msra.gmra.mxu1 %v5190_v46  ;;  %v2109_v46 = vpop.f32.mrf.mxu1  ;;  %v4193_v30 = vld [vmem:[%s6280_s3 + $0x60] sm:$0xff] }
 0x125   :  { %2346 = vmatmul.bf16.vlgmr.msra.gmra.mxu2 %v5385_v45  ;;  %v2056_v45 = vadd.f32 %v2055_v31, %v2042_v62  ;;  %v2110_v54 = vadd.f32 %v2109_v46, %v2096_v9  ;;  %2518 = vmatpush.bf16.msrb.mxu1 %v4196_v26 }
 0x126   :  { %2360 = vmatmul.bf16.vlgmr.msra.gmra.mxu3 %v5396_v51 }
 0x127   :  { %v2070_v51 = vadd.f32 %v2069_v2, %v2056_v45  ;;  %v2366_v32 = vmax.f32 %v2110_v54, 0.0  ;;  %v4190_v2 = vld [vmem:[%s6280_s3 + $0x48] sm:$0xff] }
 0x128   :  { %2505 = vmatpush.bf16.msrb.mxu0 %v4187_v12  ;;  %v2097_v7 = vpop.f32.mrf.mxu0  ;;  %v2123_v41 = vpop.f32.mrf.mxu2 }
 0x129   :  { %v2084_v6 = vadd.f32 %v2083_v17, %v2070_v51  ;;  %v2137_v15 = vpop.f32.mrf.mxu3  ;;  %v2124_v3 = vadd.f32 %v2123_v41, %v329_v25  ;;  %2519 = vmatpush.bf16.msrb.mxu1 %v4195_v27  ;;  %v4189_v51 = vld [vmem:[%s6280_s3 + $0x40] sm:$0xff] }
 0x12b   :  { %v2098_v28 = vadd.f32 %v2097_v7, %v2084_v6  ;;  %v2138_v29 = vadd.f32 %v2137_v15, %v2124_v3 }
 0x12c   :  { %2506 = vmatpush.bf16.msrb.mxu0 %v4186_v11  ;;  %v2111_v18 = vpop.f32.mrf.mxu1 }
 0x12d   :  { %v2112_v36 = vadd.f32 %v2111_v18, %v2098_v28  ;;  %2520 = vmatpush.bf16.msrb.mxu1 %v4194_v50  ;;  %v4197_v50 = vld [vmem:[%s6281_s4] ss:$0 sm:$0xff] }
 0x12f   :  { %v2368_v40 = vmax.f32 %v2112_v36, 0.0 }
 0x130   :  { %2507 = vmatpush.bf16.msrb.mxu0 %v4185_v38  ;;  %v2125_v16 = vpop.f32.mrf.mxu2 }
 0x131   :  { %v2370_v13 = vpack.c.bf16 %v2368_v40, %v2366_v32  ;;  %v2139_v19 = vpop.f32.mrf.mxu3  ;;  %v2126_v42 = vadd.f32 %v2125_v16, %v329_v25  ;;  %2521 = vmatpush.bf16.msrb.mxu1 %v4193_v30 }
 0x133   :  { %v2140_v52 = vadd.f32 %v2139_v19, %v2126_v42 }
 0x134   :  { %2508 = vmatpush.bf16.msrb.mxu0 %v4184_v39 }
 0x135   :  { %2522 = vmatpush.bf16.msrb.mxu1 %v4192_v22 }
 0x138   :  { %2509 = vmatpush.bf16.msrb.mxu0 %v4183_v58 }
 0x139   :  { %2523 = vmatpush.bf16.msrb.mxu1 %v4191_v4 }
 0x13c   :  { %2510 = vmatpush.bf16.msrb.mxu0 %v4182_v10 }
 0x13d   :  { %2524 = vmatpush.bf16.msrb.mxu1 %v4190_v2 }
 0x140   :  { %2511 = vmatpush.bf16.msrb.mxu0 %v4181_v20  ;;  %v2151_v21 = vpop.f32.mrf.mxu0 }
 0x141   :  { %v2165_v23 = vpop.f32.mrf.mxu1  ;;  %v2152_v48 = vadd.f32 %v2151_v21, %v2138_v29  ;;  %2525 = vmatpush.bf16.msrb.mxu1 %v4189_v51 }
 0x143   :  { %2512 = vmatmul.bf16.vlgmr.msrb.gmra.mxu0 %v2370_v13  ;;  %v2166_v53 = vadd.f32 %v2165_v23, %v2152_v48 }
 0x148   :  { %v2179_v24 = vpop.f32.mrf.mxu2  ;;  %v2153_v8 = vpop.f32.mrf.mxu0 }
 0x149   :  { %v2193_v44 = vpop.f32.mrf.mxu3  ;;  %v2167_v14 = vpop.f32.mrf.mxu1  ;;  %v2154_v59 = vadd.f32 %v2153_v8, %v2140_v52  ;;  %v2180_v61 = vadd.f32 %v2179_v24, %v2166_v53 }
 0x14b   :  { %v2168_v12 = vadd.f32 %v2167_v14, %v2154_v59  ;;  %v2194_v63 = vadd.f32 %v2193_v44, %v2180_v61 }
 0x150   :  { %v2181_v49 = vpop.f32.mrf.mxu2 }
 0x151   :  { %v2195_v34 = vpop.f32.mrf.mxu3  ;;  %v2182_v57 = vadd.f32 %v2181_v49, %v2168_v12 }
 0x153   :  { %v2196_v33 = vadd.f32 %v2195_v34, %v2182_v57 }
 0x160   :  { %v2207_v37 = vpop.f32.mrf.mxu0 }
 0x161   :  { %v2221_v60 = vpop.f32.mrf.mxu1  ;;  %v2208_v47 = vadd.f32 %v2207_v37, %v2194_v63 }
 0x163   :  { %v2222_v46 = vadd.f32 %v2221_v60, %v2208_v47 }
 0x168   :  { %v2235_v55 = vpop.f32.mrf.mxu2  ;;  %v2209_v43 = vpop.f32.mrf.mxu0 }
 0x169   :  { %v2249_v56 = vpop.f32.mrf.mxu3  ;;  %v2223_v31 = vpop.f32.mrf.mxu1  ;;  %v2210_v45 = vadd.f32 %v2209_v43, %v2196_v33  ;;  %v2236_v5 = vadd.f32 %v2235_v55, %v2222_v46 }
 0x16b   :  { %v2224_v39 = vadd.f32 %v2223_v31, %v2210_v45  ;;  %v2250_v6 = vadd.f32 %v2249_v56, %v2236_v5 }
 0x170   :  { %v2237_v11 = vpop.f32.mrf.mxu2 }
 0x171   :  { %v2251_v62 = vpop.f32.mrf.mxu3  ;;  %v2238_v7 = vadd.f32 %v2237_v11, %v2224_v39 }
 0x173   :  { %v2252_v18 = vadd.f32 %v2251_v62, %v2238_v7 }
 0x180   :  { %v2263_v1 = vpop.f32.mrf.mxu0 }
 0x181   :  { %v2277_v38 = vpop.f32.mrf.mxu1  ;;  %v2264_v35 = vadd.f32 %v2263_v1, %v2250_v6 }
 0x183   :  { %v2278_v9 = vadd.f32 %v2277_v38, %v2264_v35 }
 0x188   :  { %v2291_v17 = vpop.f32.mrf.mxu2  ;;  %v2265_v58 = vpop.f32.mrf.mxu0 }
 0x189   :  { %v2305_v0 = vpop.f32.mrf.mxu3  ;;  %v2279_v28 = vpop.f32.mrf.mxu1  ;;  %v2266_v10 = vadd.f32 %v2265_v58, %v2252_v18  ;;  %v2292_v54 = vadd.f32 %v2291_v17, %v2278_v9 }
 0x18b   :  { %v2280_v32 = vadd.f32 %v2279_v28, %v2266_v10  ;;  %v2306_v41 = vadd.f32 %v2305_v0, %v2292_v54 }
 0x190   :  { %v2293_v36 = vpop.f32.mrf.mxu2 }
 0x191   :  { %v2307_v20 = vpop.f32.mrf.mxu3  ;;  %v2294_v15 = vadd.f32 %v2293_v36, %v2280_v32 }
 0x193   :  { %v2308_v21 = vadd.f32 %v2307_v20, %v2294_v15 }
 0x1a0   :  { %v2319_v40 = vpop.f32.mrf.mxu0 }
 0x1a1   :  { %v2333_v13 = vpop.f32.mrf.mxu1  ;;  %v2320_v16 = vadd.f32 %v2319_v40, %v2306_v41 }
 0x1a3   :  { %v2334_v44 = vadd.f32 %v2333_v13, %v2320_v16 }
 0x1a8   :  { %v2347_v19 = vpop.f32.mrf.mxu2  ;;  %v2321_v24 = vpop.f32.mrf.mxu0 }
 0x1a9   :  { %v2361_v23 = vpop.f32.mrf.mxu3  ;;  %v2322_v25 = vadd.f32 %v2321_v24, %v2308_v21  ;;  %v2348_v8 = vadd.f32 %v2347_v19, %v2334_v44  ;;  %v2335_v26 = vpop.f32.mrf.mxu1 }
 0x1ab   :  { %v2336_v14 = vadd.f32 %v2335_v26, %v2322_v25  ;;  %v2362_v3 = vadd.f32 %v2361_v23, %v2348_v8 }
 0x1ad   :  { %v2367_v37 = vmax.f32 %v2362_v3, 0.0 }
 0x1b0   :  { %v2349_v27 = vpop.f32.mrf.mxu2 }
 0x1b1   :  { %v2350_v49 = vadd.f32 %v2349_v27, %v2336_v14  ;;  %v2363_v29 = vpop.f32.mrf.mxu3 }
 0x1b3   :  { %v2364_v34 = vadd.f32 %v2363_v29, %v2350_v49 }
 0x1b5   :  { %v2369_v42 = vmax.f32 %v2364_v34, 0.0 }
 0x1b7   :  { %v2371_v60 = vpack.c.bf16 %v2369_v42, %v2367_v37 }
 0x1b9   :  { %2526 = vmatmul.bf16.vlgmr.msrb.gmra.mxu1 %v2371_v60 }
 0x1c0   :  { %v2513_v48 = vpop.f32.mrf.mxu0 }
 0x1c1   :  { %v2514_v52 = vadd.f32 %v4197_v50, %v2513_v48 }
 0x1c8   :  { %v2515_v56 = vpop.f32.mrf.mxu0 }
 0x1c9   :  { %v2516_v59 = vadd.f32 %v4197_v50, %v2515_v56 }
 0x236   :  { %v2527_v55 = vpop.f32.mrf.mxu1 }
 0x237   :  { %v2528_v30 = vadd.f32 %v2527_v55, %v2514_v52 }
 0x239   :  { %v2533_v53 = vsel %vm2532_vm0, %v2528_v30, -inf }
 0x23a   :  { %2534 = vmax.xlane.f32.xlu0 %v2533_v53 }
 0x23e   :  { %v2529_v43 = vpop.f32.mrf.mxu1 }
 0x23f   :  { %v2530_v61 = vadd.f32 %v2529_v43, %v2516_v59 }
 0x241   :  { %v2536_v22 = vsel %vm2532_vm0, %v2530_v61, -inf }
 0x242   :  { %2537 = vmax.xlane.f32.xlu0 %v2536_v22 }
 0x2ad   :  { %v2535_v31 = vpop.xlane.xlu0 %2534 }
 0x2ae   :  { %v2539_v12 = vsub.f32 %v2528_v30, %v2535_v31 }
 0x2b0   :  { %v2541_v63 = vmul.f32 1.442695, %v2539_v12 }
 0x2b2   :  { %4198 = vpow2.f32 %v2541_v63 }
 0x2b5   :  { %v2538_v57 = vpop.xlane.xlu0 %2537 }
 0x2b6   :  { %v2540_v4 = vsub.f32 %v2530_v61, %v2538_v57 }
 0x2b8   :  { %v4199_v11 = vpop.eup %4198  ;;  %v2543_v47 = vmul.f32 1.442695, %v2540_v4 }
 0x2b9   :  { %v2545_v62 = vsel %vm2532_vm0, %v4199_v11, 0.0 }
 0x2ba   :  { %4200 = vpow2.f32 %v2543_v47  ;;  %2546 = vadd.xlane.f32.xlu1 %v2545_v62 }
 0x2c0   :  { %v4201_v1 = vpop.eup %4200 }
 0x2c1   :  { %v2548_v33 = vsel %vm2532_vm0, %v4201_v1, 0.0 }
 0x2c2   :  { %2549 = vadd.xlane.f32.xlu1 %v2548_v33 }
 0x32d   :  { %v2547_v2 = vpop.xlane.xlu1 %2546 }
 0x32e   :  { %4202 = vrcp.f32 %v2547_v2  ;;  %v2562_v51 = vand.u32 2147483648, %v2547_v2  ;;  %v2560_v39 = vand.u32 2147483647, %v2547_v2  ;;  %vm2556_vm2 = vweird.f32 %v2547_v2 }
 0x330   :  { %v2563_v7 = vor.u32 1.1754944e-38, %v2562_v51  ;;  %vm2561_vm4 = vcmp.eq.f32.partialorder %v2560_v39, 8.507059e+37 }
 0x334   :  { %v4203_v38 = vpop.eup %4202 }
 0x335   :  { %v2552_v46 = vmul.f32 %v4203_v38, %v2547_v2  ;;  %v2550_v45 = vpop.xlane.xlu1 %2549  ;;  %vm2557_vm1 = vweird.f32 %v4203_v38 }
 0x336   :  { %4204 = vrcp.f32 %v2550_v45  ;;  %vm2558_vm3 = vmor %vm2556_vm2, %vm2557_vm1  ;;  %v2577_v10 = vand.u32 2147483648, %v2550_v45  ;;  %v2575_v54 = vand.u32 2147483647, %v2550_v45  ;;  %vm2571_vm6 = vweird.f32 %v2550_v45 }
 0x337   :  { %v2553_v5 = vsub.f32 1.0, %v2552_v46 }
 0x338   :  { %v2578_v40 = vor.u32 1.1754944e-38, %v2577_v10  ;;  %vm2576_vm8 = vcmp.eq.f32.partialorder %v2575_v54, 8.507059e+37 }
 0x339   :  { %v2554_v17 = vmul.f32 %v4203_v38, %v2553_v5 }
 0x33b   :  { %v2555_v0 = vadd.f32 %v4203_v38, %v2554_v17 }
 0x33c   :  { %v4205_v6 = vpop.eup %4204 }
 0x33d   :  { %v2559_v58 = vsel %vm2558_vm3, %v4203_v38, %v2555_v0  ;;  %v2567_v35 = vmul.f32 %v4205_v6, %v2550_v45  ;;  %vm2572_vm5 = vweird.f32 %v4205_v6 }
 0x33e   :  { %v2564_v28 = vsel %vm2561_vm4, %v2563_v7, %v2559_v58  ;;  %vm2573_vm7 = vmor %vm2571_vm6, %vm2572_vm5 }
 0x33f   :  { %v2565_v18 = vmul.f32 %v4199_v11, %v2564_v28  ;;  %v2568_v9 = vsub.f32 1.0, %v2567_v35 }
 0x341   :  { %2581 = vst.msk [vmem:[%s6282_s5] sm:$0xff] %vm2532_vm0, %v2565_v18  ;;  %v2569_v36 = vmul.f32 %v4205_v6, %v2568_v9 }
 0x343   :  { %v2570_v20 = vadd.f32 %v4205_v6, %v2569_v36 }
 0x345   :  { %v2574_v32 = vsel %vm2573_vm7, %v4205_v6, %v2570_v20 }
 0x346   :  { %v2579_v13 = vsel %vm2576_vm8, %v2578_v40, %v2574_v32 }
 0x347   :  { %v2580_v41 = vmul.f32 %v4201_v1, %v2579_v13 }
 0x349   :  { %2582 = vst.msk [vmem:[%s6282_s5 + $0x8] sm:$0xff] %vm2532_vm0, %v2580_v41 }

</bundles_post_ra>
